<compile_context>
chip_gen: v7x
topology: tpu7x:2x2x1
jax: 0.10.0
libtpu: 0.0.40
codegen_flags: <defaults>
</compile_context>

<pallas_src>
from types import SimpleNamespace

import jax
import jax.numpy as jnp
from jax import lax
from jax.experimental import pallas as pl
from jax.experimental.pallas import tpu as pltpu

MATMUL_DTYPE = jnp.bfloat16   # MXU input dtype; accumulation stays float32.
_PACKED_CIN = 16              # conv1 input lanes: 3*C horizontally packed, zero-padded.


def _round_up(x, m):
    return (x + m - 1) // m * m


def _geom(H, W, Bt):
    """Layout constants of the flat, zero-padded, 8-aligned activation layout."""
    wp1 = _round_up(W + 2, 8)          # stage-1 padded row width (review: 18 -> 24)
    S1 = (H + 2) * wp1                 # per-image flat rows, stage-1 padded layout
    n2 = H * wp1                       # conv2 output rows per image (dense staging)
    Hh, Wh = H // 2, W // 2
    wp3 = _round_up(Wh + 2, 8)         # stage-2 padded row width (review: 10 -> 16)
    S3 = (Hh + 2) * wp3
    n3 = Hh * wp3
    Hq, Wq = H // 4, W // 4
    return SimpleNamespace(
        wp1=wp1, S1=S1, n2=n2, q1=wp1 // 2, nw1=n2 // 2,
        Hh=Hh, Wh=Wh, wp3=wp3, S3=S3, n3=n3, q3=wp3 // 2, nw3=n3 // 2,
        Hq=Hq, Wq=Wq,
        R2=_round_up(S1 + 2, 8),                  # per-image p2 rows (+ tap over-read)
        R3=_round_up(S3 + 2, 8),                  # per-image p3 rows (+ tap over-read)
        r_x=_round_up(Bt * S1 + 3 * wp1 + 1, 8),  # packed-input rows per batch tile
        lead_x=wp1 + 1,                           # leading zero rows in the input slab
    )


def _build_kernel(H, W, Bt, c3):
    g = _geom(H, W, Bt)
    wp1, S1, n2, q1, nw1 = g.wp1, g.S1, g.n2, g.q1, g.nw1
    Hh, Wh, wp3, n3, q3, nw3 = g.Hh, g.Wh, g.wp3, g.n3, g.q3, g.nw3
    Hq, Wq = g.Hq, g.Wq

    offs1 = tuple(k * wp1 for k in range(3))                       # K-folded conv1 taps
    offs2 = tuple(k * wp1 + j for k in range(3) for j in range(3))
    offs3 = tuple(k * wp3 + j for k in range(3) for j in range(3))
    MC1, MC2, MC3 = 72, 96, 64                                     # conv M-chunk sizes

    def kernel(x_ref, m_ref, w1_ref, b1_ref, w2_ref, b2_ref, w3_ref, b3_ref,
               f1w_ref, f1b_ref, f2w_ref, f2b_ref, out_ref,
               p2_ref, s2_ref, wm1_ref, p3_ref, s3_ref, wm2_ref, slab_ref):

        # Only the small pooled-input buffer is cleared: its zero padding is the one
        # region not rewritten below.  p2's padding is written by conv1's masked
        # store, so the old full-buffer zero fills are gone.
        p3_ref[...] = jnp.zeros(p3_ref.shape, jnp.float32)

        def conv3x3(src_ref, src_base, offs, w_ref, b_ref, n_rows, mc,
                    dst_ref, masked=False):
            """3x3 'same' conv on the flat layout: one accumulated bf16 MXU matmul
            per tap per M-chunk; each chunk is stored as soon as it is finished."""
            for m0 in range(0, n_rows, mc):
                ms = min(mc, n_rows - m0)
                acc = None
                for t, off in enumerate(offs):
                    a = src_ref[pl.ds(src_base + m0 + off, ms), :].astype(MATMUL_DTYPE)
                    part = jnp.dot(a, w_ref[t], preferred_element_type=jnp.float32)
                    acc = part if acc is None else acc + part
                acc = jnp.maximum(acc + b_ref[...], 0.0)
                if masked:
                    acc = jnp.where(m_ref[pl.ds(m0, ms), :] > 0.5, acc, 0.0)
                dst_ref[pl.ds(m0, ms), :] = acc

        def img_body(b, carry):
            # Per-image base row inside the stacked packed-input slab (8-aligned).
            xbase = pl.multiple_of(b * S1, 8)

            # conv1 + ReLU -> p2 (padded layout).  The validity mask writes the zero
            # padding in the same full-width store as the interior values.
            conv3x3(x_ref, xbase, offs1, w1_ref, b1_ref, S1, MC1, p2_ref, masked=True)

            # conv2 + ReLU -> s2 (dense rows; garbage columns are never pooled).
            conv3x3(p2_ref, 0, offs2, w2_ref, b2_ref, n2, MC2, s2_ref)

            # 2x2 max-pool #1 -> p3 interior (W-pool via stride-2 loads, H-pool as
            # 8-row strip stores straight into the zero-padded conv3 input).
            wm1_ref[...] = jnp.maximum(s2_ref[pl.ds(0, nw1, 2), :],
                                       s2_ref[pl.ds(1, nw1, 2), :])
            for i in range(Hh):
                strip = jnp.maximum(wm1_ref[pl.ds(2 * i * q1, Wh), :],
                                    wm1_ref[pl.ds((2 * i + 1) * q1, Wh), :])
                p3_ref[pl.ds((i + 1) * wp3 + 1, Wh), :] = strip

            # conv3 + ReLU -> s3 (dense rows).
            conv3x3(p3_ref, 0, offs3, w3_ref, b3_ref, n3, MC3, s3_ref)

            # 2x2 max-pool #2, W direction; kept for every image for the fc1 gather.
            wbase = pl.multiple_of(b * nw3, 8)
            wm2_ref[pl.ds(wbase, nw3), :] = jnp.maximum(s3_ref[pl.ds(0, nw3, 2), :],
                                                        s3_ref[pl.ds(1, nw3, 2), :])
            return carry

        lax.fori_loop(0, Bt, img_body, 0)

        # 2x2 max-pool #2, H direction, gathered straight into the (Bt, Hq*Wq*c3)
        # fc1 input slab (PyTorch's (C, H, W) flatten order is baked into fc1's
        # weights, so no activation relayout is needed).
        for p in range(Hq * Wq):
            i, j = p // Wq, p % Wq
            r0 = 2 * i * q3 + j
            v = jnp.maximum(wm2_ref[pl.ds(r0, Bt, nw3), :],
                            wm2_ref[pl.ds(r0 + q3, Bt, nw3), :])      # (Bt, c3)
            slab_ref[:, p * c3:(p + 1) * c3] = v

        # fc1 (+ReLU) and fc2 as two dense whole-batch-tile MXU matmuls.
        slab = slab_ref[...].astype(MATMUL_DTYPE)
        h1 = jnp.dot(slab, f1w_ref[...], preferred_element_type=jnp.float32) + f1b_ref[...]
        h1 = jnp.maximum(h1, 0.0)
        # TODO(synk): nn.Dropout(0.5) is identity at inference; training-mode RNG
        # masking (pltpu.prng_*) is not implemented.
        logits = jnp.dot(h1.astype(MATMUL_DTYPE), f2w_ref[...],
                         preferred_element_type=jnp.float32) + f2b_ref[...]
        out_ref[...] = logits.astype(out_ref.dtype)

    return kernel


# ----------------------------------------------------------------------------
# Wrapper
# ----------------------------------------------------------------------------
def cnn_small_forward(x_nchw, kparams, *, num_classes, batch_tile=8):
    """Forward pass of CNN_Small.  x_nchw: (B, C, H, W) -> logits (B, num_classes)."""
    B, C, H, W = x_nchw.shape
    assert H % 4 == 0 and W % 4 == 0, "spatial dims must be divisible by 4"
    assert 3 * C <= _PACKED_CIN, "wrapper packs 3*C horizontal taps into 16 lanes"
    assert batch_tile % 8 == 0, "batch_tile must be a multiple of 8"

    Bt = batch_tile
    G = -(-B // Bt)
    Bp = G * Bt
    g = _geom(H, W, Bt)

    c1 = kparams["w1"].shape[2]
    c2 = kparams["w2"].shape[2]
    c3 = kparams["w3"].shape[2]
    ncp = kparams["f2w"].shape[1]

    # Input prep (tiny XLA glue on the raw input only): NCHW -> NHWC, pad the
    # spatial border, pack the 3 horizontal taps into lanes (3*C -> 16), lay every
    # image out as (H+2)*wp1 flat rows and stack Bt images per grid step with the
    # leading/trailing zero rows that the in-kernel tap offsets rely on.  The
    # per-step block is one contiguous HBM slab.
    x = jnp.transpose(x_nchw, (0, 2, 3, 1)).astype(jnp.float32)
    if Bp > B:
        x = jnp.pad(x, ((0, Bp - B), (0, 0), (0, 0), (0, 0)))
    xp = jnp.pad(x, ((0, 0), (1, 1), (1, 1), (0, 0)))
    packed = jnp.concatenate(
        [xp[:, :, 0:W], xp[:, :, 1:W + 1], xp[:, :, 2:W + 2]], axis=-1)  # (Bp,H+2,W,3C)
    packed = jnp.pad(packed, ((0, 0), (0, 0), (0, g.wp1 - W), (0, _PACKED_CIN - 3 * C)))
    packed = packed.reshape(Bp, g.S1, _PACKED_CIN).reshape(G, Bt * g.S1, _PACKED_CIN)
    packed = jnp.pad(packed,
                     ((0, 0), (g.lead_x, g.r_x - g.lead_x - Bt * g.S1), (0, 0)))

    # Validity mask for conv1's padded-layout store (interior of the padded image),
    # pre-broadcast over conv1's output channels.
    d = jnp.arange(g.S1)
    y, xcol = d // g.wp1, d % g.wp1
    mask = ((y >= 1) & (y <= H) & (xcol >= 1) & (xcol <= W)).astype(jnp.float32)
    mask = jnp.broadcast_to(mask[:, None], (g.S1, c1))

    kernel = _build_kernel(H, W, Bt, c3)

    def _full(a):
        return pl.BlockSpec(a.shape, lambda i: (0,) * a.ndim)

    # NOTE: weight blocks are constant across the grid so Pallas skips their
    # re-DMA between steps; with more VMEM pressure they could additionally be
    # single-buffered via pipeline_mode=pl.Buffered(1).
    out = pl.pallas_call(
        kernel,
        out_shape=jax.ShapeDtypeStruct((Bp, ncp), jnp.float32),
        grid=(G,),
        in_specs=[
            pl.BlockSpec((None, g.r_x, _PACKED_CIN), lambda i: (i, 0, 0)),
            _full(mask),
            _full(kparams["w1"]), _full(kparams["b1"]),
            _full(kparams["w2"]), _full(kparams["b2"]),
            _full(kparams["w3"]), _full(kparams["b3"]),
            _full(kparams["f1w"]), _full(kparams["f1b"]),
            _full(kparams["f2w"]), _full(kparams["f2b"]),
        ],
        out_specs=pl.BlockSpec((Bt, ncp), lambda i: (i, 0)),
        scratch_shapes=[
            pltpu.VMEM((g.R2, c1), jnp.float32),              # p2: padded conv2 input
            pltpu.VMEM((g.n2, c2), jnp.float32),              # s2: conv2 output staging
            pltpu.VMEM((g.nw1, c2), jnp.float32),             # wm1: W-pooled staging
            pltpu.VMEM((g.R3, c2), jnp.float32),              # p3: padded conv3 input
            pltpu.VMEM((g.n3, c3), jnp.float32),              # s3: conv3 output staging
            pltpu.VMEM((Bt * g.nw3, c3), jnp.float32),        # wm2: W-pooled, all images
            pltpu.VMEM((Bt, g.Hq * g.Wq * c3), jnp.float32),  # fc1 input slab
        ],
        compiler_params=pltpu.CompilerParams(dimension_semantics=("parallel",)),
    )(packed, mask, kparams["w1"], kparams["b1"], kparams["w2"], kparams["b2"],
      kparams["w3"], kparams["b3"], kparams["f1w"], kparams["f1b"],
      kparams["f2w"], kparams["f2b"])
    return out[:B, :num_classes]


# ----------------------------------------------------------------------------
# Parameter init (torch-layout shapes) and one-time kernel-layout prep
# ----------------------------------------------------------------------------
def init_params(key, input_shape=(3, 16, 16), num_classes=10):
    C, H, W = input_shape
    ks = jax.random.split(key, 10)

    def conv_w(k, cout, cin):
        return jax.random.normal(k, (cout, cin, 3, 3), jnp.float32) / jnp.sqrt(cin * 9.0)

    def lin_w(k, out, inn):
        return jax.random.normal(k, (out, inn), jnp.float32) / jnp.sqrt(float(inn))

    conv_out = (W // 4) * (H // 4) * 64
    return {
        "conv1_w": conv_w(ks[0], 32, C),
        "conv1_b": 0.01 * jax.random.normal(ks[1], (32,), jnp.float32),
        "conv2_w": conv_w(ks[2], 64, 32),
        "conv2_b": 0.01 * jax.random.normal(ks[3], (64,), jnp.float32),
        "conv3_w": conv_w(ks[4], 64, 64),
        "conv3_b": 0.01 * jax.random.normal(ks[5], (64,), jnp.float32),
        "fc1_w": lin_w(ks[6], 512, conv_out),
        "fc1_b": 0.01 * jax.random.normal(ks[7], (512,), jnp.float32),
        "fc2_w": lin_w(ks[8], num_classes, 512),
        "fc2_b": 0.01 * jax.random.normal(ks[9], (num_classes,), jnp.float32),
    }


def prepare_params(params, input_shape=(3, 16, 16)):
    """One-time reformat of torch-layout parameters into the kernel layout.

    * conv2/conv3 weights (Cout, Cin, 3, 3) -> (9, Cin, Cout), tap (ky*3+kx) major,
      bfloat16 (halves weight VMEM/DMA; MXU runs bf16 with f32 accumulation).
    * conv1's three horizontal taps are folded into the contraction dim
      (matching the horizontally packed input built by the wrapper): (3, 16, 32).
    * fc1 weight rows are permuted from PyTorch's (C, H, W) flatten order into
      (Hq*Wq*64, 512) spatial-major order so no activation relayout is needed.
    * fc2 weight is transposed and zero-padded to 128 output lanes for a dense
      logits store; biases stay float32 (1, N) rows.
    """
    C, H, W = input_shape
    Hq, Wq = H // 4, W // 4
    wdt = MATMUL_DTYPE

    def conv_taps(w):
        return jnp.transpose(w, (2, 3, 1, 0)).reshape(9, w.shape[1], w.shape[0]).astype(wdt)

    w1 = params["conv1_w"]
    c1 = w1.shape[0]
    w1p = jnp.transpose(w1, (2, 3, 1, 0)).reshape(3, 3 * C, c1)
    w1p = jnp.pad(w1p, ((0, 0), (0, _PACKED_CIN - 3 * C), (0, 0))).astype(wdt)

    c3 = params["conv3_w"].shape[0]
    nf = params["fc1_w"].shape[0]
    f1 = params["fc1_w"].reshape(nf, c3, Hq, Wq)
    f1 = jnp.transpose(f1, (2, 3, 1, 0)).reshape(Hq * Wq * c3, nf).astype(wdt)

    nc = params["fc2_w"].shape[0]
    ncp = _round_up(max(nc, 128), 128)
    f2 = jnp.pad(params["fc2_w"].T, ((0, 0), (0, ncp - nc))).astype(wdt)
    f2b = jnp.pad(params["fc2_b"], ((0, ncp - nc),)).reshape(1, -1)

    return {
        "w1": w1p, "b1": params["conv1_b"].reshape(1, -1),
        "w2": conv_taps(params["conv2_w"]), "b2": params["conv2_b"].reshape(1, -1),
        "w3": conv_taps(params["conv3_w"]), "b3": params["conv3_b"].reshape(1, -1),
        "f1w": f1, "f1b": params["fc1_b"].reshape(1, -1),
        "f2w": f2, "f2b": f2b,
    }


# ----------------------------------------------------------------------------
# Pure-JAX reference (mirrors the torch forward exactly) for validation
# ----------------------------------------------------------------------------
def reference_forward(x_nchw, params):
    hi = lax.Precision.HIGHEST

    def conv(x, w, b):
        y = lax.conv_general_dilated(
            x, w, (1, 1), ((1, 1), (1, 1)),
            dimension_numbers=("NCHW", "OIHW", "NCHW"), precision=hi)
        return jax.nn.relu(y + b[None, :, None, None])

    def pool(x):
        return lax.reduce_window(x, -jnp.inf, lax.max, (1, 1, 2, 2), (1, 1, 2, 2), "VALID")

    x = conv(x_nchw, params["conv1_w"], params["conv1_b"])
    x = pool(conv(x, params["conv2_w"], params["conv2_b"]))
    x = pool(conv(x, params["conv3_w"], params["conv3_b"]))
    x = x.reshape(x.shape[0], -1)
    x = jax.nn.relu(jnp.dot(x, params["fc1_w"].T, precision=hi) + params["fc1_b"])
    x = jnp.dot(x, params["fc2_w"].T, precision=hi) + params["fc2_b"]
    return x


if __name__ == "__main__":
    key = jax.random.PRNGKey(0)
    k_params, k_x = jax.random.split(key)

    input_shape = (3, 16, 16)     # small CIFAR-like shape consistent with the module
    num_classes = 10
    batch = 16
    batch_tile = 8                # -> grid=(2,): even grid for v7x's two TensorCores

    params = init_params(k_params, input_shape=input_shape, num_classes=num_classes)
    kparams = prepare_params(params, input_shape=input_shape)
    x = jax.random.normal(k_x, (batch,) + input_shape, jnp.float32)

    fwd = jax.jit(lambda inp: cnn_small_forward(
        inp, kparams, num_classes=num_classes, batch_tile=batch_tile))
    out = jax.block_until_ready(fwd(x))

    assert out.shape == (batch, num_classes), out.shape
    assert bool(jnp.all(jnp.isfinite(out)))

    ref = reference_forward(x, params)
    max_err = float(jnp.max(jnp.abs(out - ref)))
    # Tolerance accounts for bfloat16 MXU inputs (float32 accumulation) vs. the
    # float32 reference; observed error is typically ~1e-2 on these magnitudes.
    if not bool(jnp.allclose(out, ref, atol=5e-2, rtol=5e-2)):
        raise AssertionError(f"Pallas output mismatch vs reference, max |err|={max_err}")

    print("KERNEL_OK")
</pallas_src>

<mosaic_0001>
module attributes {stable_mosaic.version = 11 : i64} {
  func.func @kernel(%arg0: i32, %arg1: memref<1x3536x16xf32, #tpu.memory_space<vmem>>, %arg2: memref<432x32xf32, #tpu.memory_space<vmem>>, %arg3: memref<3x16x32xbf16, #tpu.memory_space<vmem>>, %arg4: memref<1x32xf32, #tpu.memory_space<vmem>>, %arg5: memref<9x32x64xbf16, #tpu.memory_space<vmem>>, %arg6: memref<1x64xf32, #tpu.memory_space<vmem>>, %arg7: memref<9x64x64xbf16, #tpu.memory_space<vmem>>, %arg8: memref<1x64xf32, #tpu.memory_space<vmem>>, %arg9: memref<1024x512xbf16, #tpu.memory_space<vmem>>, %arg10: memref<1x512xf32, #tpu.memory_space<vmem>>, %arg11: memref<512x128xbf16, #tpu.memory_space<vmem>>, %arg12: memref<1x128xf32, #tpu.memory_space<vmem>>, %arg13: memref<8x128xf32, #tpu.memory_space<vmem>>, %arg14: memref<440x32xf32, #tpu.memory_space<vmem>>, %arg15: memref<384x64xf32, #tpu.memory_space<vmem>>, %arg16: memref<192x64xf32, #tpu.memory_space<vmem>>, %arg17: memref<168x64xf32, #tpu.memory_space<vmem>>, %arg18: memref<128x64xf32, #tpu.memory_space<vmem>>, %arg19: memref<512x64xf32, #tpu.memory_space<vmem>>, %arg20: memref<8x1024xf32, #tpu.memory_space<vmem>>) attributes {dimension_semantics = [#tpu.dimension_semantics<parallel>], iteration_bounds = array<i64: 2>, scalar_prefetch = 0 : i64, scratch_operands = 7 : i64, tpu.core_type = #tpu.core_type<tc>, window_params = [{transform_indices = @transform_0, window_bounds = array<i64: 1, 3536, 16>}, {pipeline_mode = #tpu.pipeline_mode<synchronous>, transform_indices = @transform_1, window_bounds = array<i64: 432, 32>}, {pipeline_mode = #tpu.pipeline_mode<synchronous>, transform_indices = @transform_2, window_bounds = array<i64: 3, 16, 32>}, {pipeline_mode = #tpu.pipeline_mode<synchronous>, transform_indices = @transform_3, window_bounds = array<i64: 1, 32>}, {pipeline_mode = #tpu.pipeline_mode<synchronous>, transform_indices = @transform_4, window_bounds = array<i64: 9, 32, 64>}, {pipeline_mode = #tpu.pipeline_mode<synchronous>, transform_indices = @transform_5, window_bounds = array<i64: 1, 64>}, {pipeline_mode = #tpu.pipeline_mode<synchronous>, transform_indices = @transform_6, window_bounds = array<i64: 9, 64, 64>}, {pipeline_mode = #tpu.pipeline_mode<synchronous>, transform_indices = @transform_7, window_bounds = array<i64: 1, 64>}, {pipeline_mode = #tpu.pipeline_mode<synchronous>, transform_indices = @transform_8, window_bounds = array<i64: 1024, 512>}, {pipeline_mode = #tpu.pipeline_mode<synchronous>, transform_indices = @transform_9, window_bounds = array<i64: 1, 512>}, {pipeline_mode = #tpu.pipeline_mode<synchronous>, transform_indices = @transform_10, window_bounds = array<i64: 512, 128>}, {pipeline_mode = #tpu.pipeline_mode<synchronous>, transform_indices = @transform_11, window_bounds = array<i64: 1, 128>}, {transform_indices = @transform_12, window_bounds = array<i64: 8, 128>}]} {
    %cst = arith.constant 0.000000e+00 : f32
    %0 = vector.broadcast %cst : f32 to vector<168x64xf32>
    %c0 = arith.constant 0 : index
    %c0_0 = arith.constant 0 : index
    %1 = vector.load %arg17[%c0, %c0_0] : memref<168x64xf32, #tpu.memory_space<vmem>>, vector<168x64xf32>
    tpu.vector_store %arg17[%c0, %c0_0], %0 {strides = array<i32>} : memref<168x64xf32, #tpu.memory_space<vmem>>, vector<168x64xf32>,
    %c0_i32 = arith.constant 0 : i32
    %c8_i32 = arith.constant 8 : i32
    %2 = arith.addi %c0_i32, %c8_i32 : i32
    %c1_i32 = arith.constant 1 : i32
    scf.for %arg21 = %c0_i32 to %2 step %c1_i32  : i32 {
      %c432_i32 = arith.constant 432 : i32
      %83 = arith.muli %arg21, %c432_i32 : i32
      %84 = tpu.assume_multiple %83, 8 : i32
      %c0_i32_67 = arith.constant 0 : i32
      %85 = arith.addi %84, %c0_i32_67 : i32
      %c0_i32_68 = arith.constant 0 : i32
      %86 = arith.addi %85, %c0_i32_68 : i32
      %c0_69 = arith.constant 0 : index
      %87 = arith.index_cast %86 : i32 to index
      %c0_70 = arith.constant 0 : index
      %88 = vector.load %arg1[%c0_69, %87, %c0_70] : memref<1x3536x16xf32, #tpu.memory_space<vmem>>, vector<1x72x16xf32>
      %89 = vector.shape_cast %88 : vector<1x72x16xf32> to vector<72x16xf32>
      %90 = arith.truncf %89 : vector<72x16xf32> to vector<72x16xbf16>
      %c0_71 = arith.constant 0 : index
      %c0_72 = arith.constant 0 : index
      %c0_73 = arith.constant 0 : index
      %91 = vector.load %arg3[%c0_71, %c0_72, %c0_73] : memref<3x16x32xbf16, #tpu.memory_space<vmem>>, vector<1x16x32xbf16>
      %92 = vector.shape_cast %91 : vector<1x16x32xbf16> to vector<16x32xbf16>
      %cst_74 = arith.constant dense<0.000000e+00> : vector<72x32xf32>
      %93 = tpu.matmul %90, %92, %cst_74 {dimension_numbers = #tpu.dot_dimension_numbers<[1], [0], [0], [1], [0, 0, 1, 1], [], []>} : vector<72x16xbf16>, vector<16x32xbf16>, vector<72x32xf32> -> vector<72x32xf32>
      %c0_i32_75 = arith.constant 0 : i32
      %94 = arith.addi %84, %c0_i32_75 : i32
      %c24_i32 = arith.constant 24 : i32
      %95 = arith.addi %94, %c24_i32 : i32
      %c0_76 = arith.constant 0 : index
      %96 = arith.index_cast %95 : i32 to index
      %c0_77 = arith.constant 0 : index
      %97 = vector.load %arg1[%c0_76, %96, %c0_77] : memref<1x3536x16xf32, #tpu.memory_space<vmem>>, vector<1x72x16xf32>
      %98 = vector.shape_cast %97 : vector<1x72x16xf32> to vector<72x16xf32>
      %99 = arith.truncf %98 : vector<72x16xf32> to vector<72x16xbf16>
      %c1_78 = arith.constant 1 : index
      %c0_79 = arith.constant 0 : index
      %c0_80 = arith.constant 0 : index
      %100 = vector.load %arg3[%c1_78, %c0_79, %c0_80] : memref<3x16x32xbf16, #tpu.memory_space<vmem>>, vector<1x16x32xbf16>
      %101 = vector.shape_cast %100 : vector<1x16x32xbf16> to vector<16x32xbf16>
      %cst_81 = arith.constant dense<0.000000e+00> : vector<72x32xf32>
      %102 = tpu.matmul %99, %101, %cst_81 {dimension_numbers = #tpu.dot_dimension_numbers<[1], [0], [0], [1], [0, 0, 1, 1], [], []>} : vector<72x16xbf16>, vector<16x32xbf16>, vector<72x32xf32> -> vector<72x32xf32>
      %103 = arith.addf %93, %102 : vector<72x32xf32>
      %c0_i32_82 = arith.constant 0 : i32
      %104 = arith.addi %84, %c0_i32_82 : i32
      %c48_i32 = arith.constant 48 : i32
      %105 = arith.addi %104, %c48_i32 : i32
      %c0_83 = arith.constant 0 : index
      %106 = arith.index_cast %105 : i32 to index
      %c0_84 = arith.constant 0 : index
      %107 = vector.load %arg1[%c0_83, %106, %c0_84] : memref<1x3536x16xf32, #tpu.memory_space<vmem>>, vector<1x72x16xf32>
      %108 = vector.shape_cast %107 : vector<1x72x16xf32> to vector<72x16xf32>
      %109 = arith.truncf %108 : vector<72x16xf32> to vector<72x16xbf16>
      %c2_85 = arith.constant 2 : index
      %c0_86 = arith.constant 0 : index
      %c0_87 = arith.constant 0 : index
      %110 = vector.load %arg3[%c2_85, %c0_86, %c0_87] : memref<3x16x32xbf16, #tpu.memory_space<vmem>>, vector<1x16x32xbf16>
      %111 = vector.shape_cast %110 : vector<1x16x32xbf16> to vector<16x32xbf16>
      %cst_88 = arith.constant dense<0.000000e+00> : vector<72x32xf32>
      %112 = tpu.matmul %109, %111, %cst_88 {dimension_numbers = #tpu.dot_dimension_numbers<[1], [0], [0], [1], [0, 0, 1, 1], [], []>} : vector<72x16xbf16>, vector<16x32xbf16>, vector<72x32xf32> -> vector<72x32xf32>
      %113 = arith.addf %103, %112 : vector<72x32xf32>
      %c0_89 = arith.constant 0 : index
      %c0_90 = arith.constant 0 : index
      %114 = vector.load %arg4[%c0_89, %c0_90] : memref<1x32xf32, #tpu.memory_space<vmem>>, vector<1x32xf32>
      %115 = vector.broadcast %114 : vector<1x32xf32> to vector<72x32xf32>
      %116 = arith.addf %113, %115 : vector<72x32xf32>
      %cst_91 = arith.constant 0.000000e+00 : f32
      %117 = vector.broadcast %cst_91 : f32 to vector<72x32xf32>
      %118 = arith.maximumf %116, %117 : vector<72x32xf32>
      %c0_92 = arith.constant 0 : index
      %c0_93 = arith.constant 0 : index
      %119 = vector.load %arg2[%c0_92, %c0_93] : memref<432x32xf32, #tpu.memory_space<vmem>>, vector<72x32xf32>
      %cst_94 = arith.constant 5.000000e-01 : f32
      %120 = vector.broadcast %cst_94 : f32 to vector<72x32xf32>
      %121 = arith.cmpf ogt, %119, %120 : vector<72x32xf32>
      %cst_95 = arith.constant 0.000000e+00 : f32
      %122 = vector.broadcast %cst_95 : f32 to vector<72x32xf32>
      %123 = arith.select %121, %118, %122 : vector<72x32xi1>, vector<72x32xf32>
      %c0_96 = arith.constant 0 : index
      %c0_97 = arith.constant 0 : index
      %124 = vector.load %arg14[%c0_96, %c0_97] : memref<440x32xf32, #tpu.memory_space<vmem>>, vector<72x32xf32>
      tpu.vector_store %arg14[%c0_96, %c0_97], %123 {strides = array<i32>} : memref<440x32xf32, #tpu.memory_space<vmem>>, vector<72x32xf32>,
      %c72_i32 = arith.constant 72 : i32
      %125 = arith.addi %84, %c72_i32 : i32
      %c0_i32_98 = arith.constant 0 : i32
      %126 = arith.addi %125, %c0_i32_98 : i32
      %c0_99 = arith.constant 0 : index
      %127 = arith.index_cast %126 : i32 to index
      %c0_100 = arith.constant 0 : index
      %128 = vector.load %arg1[%c0_99, %127, %c0_100] : memref<1x3536x16xf32, #tpu.memory_space<vmem>>, vector<1x72x16xf32>
      %129 = vector.shape_cast %128 : vector<1x72x16xf32> to vector<72x16xf32>
      %130 = arith.truncf %129 : vector<72x16xf32> to vector<72x16xbf16>
      %c0_101 = arith.constant 0 : index
      %c0_102 = arith.constant 0 : index
      %c0_103 = arith.constant 0 : index
      %131 = vector.load %arg3[%c0_101, %c0_102, %c0_103] : memref<3x16x32xbf16, #tpu.memory_space<vmem>>, vector<1x16x32xbf16>
      %132 = vector.shape_cast %131 : vector<1x16x32xbf16> to vector<16x32xbf16>
      %cst_104 = arith.constant dense<0.000000e+00> : vector<72x32xf32>
      %133 = tpu.matmul %130, %132, %cst_104 {dimension_numbers = #tpu.dot_dimension_numbers<[1], [0], [0], [1], [0, 0, 1, 1], [], []>} : vector<72x16xbf16>, vector<16x32xbf16>, vector<72x32xf32> -> vector<72x32xf32>
      %c72_i32_105 = arith.constant 72 : i32
      %134 = arith.addi %84, %c72_i32_105 : i32
      %c24_i32_106 = arith.constant 24 : i32
      %135 = arith.addi %134, %c24_i32_106 : i32
      %c0_107 = arith.constant 0 : index
      %136 = arith.index_cast %135 : i32 to index
      %c0_108 = arith.constant 0 : index
      %137 = vector.load %arg1[%c0_107, %136, %c0_108] : memref<1x3536x16xf32, #tpu.memory_space<vmem>>, vector<1x72x16xf32>
      %138 = vector.shape_cast %137 : vector<1x72x16xf32> to vector<72x16xf32>
      %139 = arith.truncf %138 : vector<72x16xf32> to vector<72x16xbf16>
      %c1_109 = arith.constant 1 : index
      %c0_110 = arith.constant 0 : index
      %c0_111 = arith.constant 0 : index
      %140 = vector.load %arg3[%c1_109, %c0_110, %c0_111] : memref<3x16x32xbf16, #tpu.memory_space<vmem>>, vector<1x16x32xbf16>
      %141 = vector.shape_cast %140 : vector<1x16x32xbf16> to vector<16x32xbf16>
      %cst_112 = arith.constant dense<0.000000e+00> : vector<72x32xf32>
      %142 = tpu.matmul %139, %141, %cst_112 {dimension_numbers = #tpu.dot_dimension_numbers<[1], [0], [0], [1], [0, 0, 1, 1], [], []>} : vector<72x16xbf16>, vector<16x32xbf16>, vector<72x32xf32> -> vector<72x32xf32>
      %143 = arith.addf %133, %142 : vector<72x32xf32>
      %c72_i32_113 = arith.constant 72 : i32
      %144 = arith.addi %84, %c72_i32_113 : i32
      %c48_i32_114 = arith.constant 48 : i32
      %145 = arith.addi %144, %c48_i32_114 : i32
      %c0_115 = arith.constant 0 : index
      %146 = arith.index_cast %145 : i32 to index
      %c0_116 = arith.constant 0 : index
      %147 = vector.load %arg1[%c0_115, %146, %c0_116] : memref<1x3536x16xf32, #tpu.memory_space<vmem>>, vector<1x72x16xf32>
      %148 = vector.shape_cast %147 : vector<1x72x16xf32> to vector<72x16xf32>
      %149 = arith.truncf %148 : vector<72x16xf32> to vector<72x16xbf16>
      %c2_117 = arith.constant 2 : index
      %c0_118 = arith.constant 0 : index
      %c0_119 = arith.constant 0 : index
      %150 = vector.load %arg3[%c2_117, %c0_118, %c0_119] : memref<3x16x32xbf16, #tpu.memory_space<vmem>>, vector<1x16x32xbf16>
      %151 = vector.shape_cast %150 : vector<1x16x32xbf16> to vector<16x32xbf16>
      %cst_120 = arith.constant dense<0.000000e+00> : vector<72x32xf32>
      %152 = tpu.matmul %149, %151, %cst_120 {dimension_numbers = #tpu.dot_dimension_numbers<[1], [0], [0], [1], [0, 0, 1, 1], [], []>} : vector<72x16xbf16>, vector<16x32xbf16>, vector<72x32xf32> -> vector<72x32xf32>
      %153 = arith.addf %143, %152 : vector<72x32xf32>
      %c0_121 = arith.constant 0 : index
      %c0_122 = arith.constant 0 : index
      %154 = vector.load %arg4[%c0_121, %c0_122] : memref<1x32xf32, #tpu.memory_space<vmem>>, vector<1x32xf32>
      %155 = vector.broadcast %154 : vector<1x32xf32> to vector<72x32xf32>
      %156 = arith.addf %153, %155 : vector<72x32xf32>
      %cst_123 = arith.constant 0.000000e+00 : f32
      %157 = vector.broadcast %cst_123 : f32 to vector<72x32xf32>
      %158 = arith.maximumf %156, %157 : vector<72x32xf32>
      %c72 = arith.constant 72 : index
      %c0_124 = arith.constant 0 : index
      %159 = vector.load %arg2[%c72, %c0_124] : memref<432x32xf32, #tpu.memory_space<vmem>>, vector<72x32xf32>
      %cst_125 = arith.constant 5.000000e-01 : f32
      %160 = vector.broadcast %cst_125 : f32 to vector<72x32xf32>
      %161 = arith.cmpf ogt, %159, %160 : vector<72x32xf32>
      %cst_126 = arith.constant 0.000000e+00 : f32
      %162 = vector.broadcast %cst_126 : f32 to vector<72x32xf32>
      %163 = arith.select %161, %158, %162 : vector<72x32xi1>, vector<72x32xf32>
      %c72_127 = arith.constant 72 : index
      %c0_128 = arith.constant 0 : index
      %164 = vector.load %arg14[%c72_127, %c0_128] : memref<440x32xf32, #tpu.memory_space<vmem>>, vector<72x32xf32>
      tpu.vector_store %arg14[%c72_127, %c0_128], %163 {strides = array<i32>} : memref<440x32xf32, #tpu.memory_space<vmem>>, vector<72x32xf32>,
      %c144_i32 = arith.constant 144 : i32
      %165 = arith.addi %84, %c144_i32 : i32
      %c0_i32_129 = arith.constant 0 : i32
      %166 = arith.addi %165, %c0_i32_129 : i32
      %c0_130 = arith.constant 0 : index
      %167 = arith.index_cast %166 : i32 to index
      %c0_131 = arith.constant 0 : index
      %168 = vector.load %arg1[%c0_130, %167, %c0_131] : memref<1x3536x16xf32, #tpu.memory_space<vmem>>, vector<1x72x16xf32>
      %169 = vector.shape_cast %168 : vector<1x72x16xf32> to vector<72x16xf32>
      %170 = arith.truncf %169 : vector<72x16xf32> to vector<72x16xbf16>
      %c0_132 = arith.constant 0 : index
      %c0_133 = arith.constant 0 : index
      %c0_134 = arith.constant 0 : index
      %171 = vector.load %arg3[%c0_132, %c0_133, %c0_134] : memref<3x16x32xbf16, #tpu.memory_space<vmem>>, vector<1x16x32xbf16>
      %172 = vector.shape_cast %171 : vector<1x16x32xbf16> to vector<16x32xbf16>
      %cst_135 = arith.constant dense<0.000000e+00> : vector<72x32xf32>
      %173 = tpu.matmul %170, %172, %cst_135 {dimension_numbers = #tpu.dot_dimension_numbers<[1], [0], [0], [1], [0, 0, 1, 1], [], []>} : vector<72x16xbf16>, vector<16x32xbf16>, vector<72x32xf32> -> vector<72x32xf32>
      %c144_i32_136 = arith.constant 144 : i32
      %174 = arith.addi %84, %c144_i32_136 : i32
      %c24_i32_137 = arith.constant 24 : i32
      %175 = arith.addi %174, %c24_i32_137 : i32
      %c0_138 = arith.constant 0 : index
      %176 = arith.index_cast %175 : i32 to index
      %c0_139 = arith.constant 0 : index
      %177 = vector.load %arg1[%c0_138, %176, %c0_139] : memref<1x3536x16xf32, #tpu.memory_space<vmem>>, vector<1x72x16xf32>
      %178 = vector.shape_cast %177 : vector<1x72x16xf32> to vector<72x16xf32>
      %179 = arith.truncf %178 : vector<72x16xf32> to vector<72x16xbf16>
      %c1_140 = arith.constant 1 : index
      %c0_141 = arith.constant 0 : index
      %c0_142 = arith.constant 0 : index
      %180 = vector.load %arg3[%c1_140, %c0_141, %c0_142] : memref<3x16x32xbf16, #tpu.memory_space<vmem>>, vector<1x16x32xbf16>
      %181 = vector.shape_cast %180 : vector<1x16x32xbf16> to vector<16x32xbf16>
      %cst_143 = arith.constant dense<0.000000e+00> : vector<72x32xf32>
      %182 = tpu.matmul %179, %181, %cst_143 {dimension_numbers = #tpu.dot_dimension_numbers<[1], [0], [0], [1], [0, 0, 1, 1], [], []>} : vector<72x16xbf16>, vector<16x32xbf16>, vector<72x32xf32> -> vector<72x32xf32>
      %183 = arith.addf %173, %182 : vector<72x32xf32>
      %c144_i32_144 = arith.constant 144 : i32
      %184 = arith.addi %84, %c144_i32_144 : i32
      %c48_i32_145 = arith.constant 48 : i32
      %185 = arith.addi %184, %c48_i32_145 : i32
      %c0_146 = arith.constant 0 : index
      %186 = arith.index_cast %185 : i32 to index
      %c0_147 = arith.constant 0 : index
      %187 = vector.load %arg1[%c0_146, %186, %c0_147] : memref<1x3536x16xf32, #tpu.memory_space<vmem>>, vector<1x72x16xf32>
      %188 = vector.shape_cast %187 : vector<1x72x16xf32> to vector<72x16xf32>
      %189 = arith.truncf %188 : vector<72x16xf32> to vector<72x16xbf16>
      %c2_148 = arith.constant 2 : index
      %c0_149 = arith.constant 0 : index
      %c0_150 = arith.constant 0 : index
      %190 = vector.load %arg3[%c2_148, %c0_149, %c0_150] : memref<3x16x32xbf16, #tpu.memory_space<vmem>>, vector<1x16x32xbf16>
      %191 = vector.shape_cast %190 : vector<1x16x32xbf16> to vector<16x32xbf16>
      %cst_151 = arith.constant dense<0.000000e+00> : vector<72x32xf32>
      %192 = tpu.matmul %189, %191, %cst_151 {dimension_numbers = #tpu.dot_dimension_numbers<[1], [0], [0], [1], [0, 0, 1, 1], [], []>} : vector<72x16xbf16>, vector<16x32xbf16>, vector<72x32xf32> -> vector<72x32xf32>
      %193 = arith.addf %183, %192 : vector<72x32xf32>
      %c0_152 = arith.constant 0 : index
      %c0_153 = arith.constant 0 : index
      %194 = vector.load %arg4[%c0_152, %c0_153] : memref<1x32xf32, #tpu.memory_space<vmem>>, vector<1x32xf32>
      %195 = vector.broadcast %194 : vector<1x32xf32> to vector<72x32xf32>
      %196 = arith.addf %193, %195 : vector<72x32xf32>
      %cst_154 = arith.constant 0.000000e+00 : f32
      %197 = vector.broadcast %cst_154 : f32 to vector<72x32xf32>
      %198 = arith.maximumf %196, %197 : vector<72x32xf32>
      %c144 = arith.constant 144 : index
      %c0_155 = arith.constant 0 : index
      %199 = vector.load %arg2[%c144, %c0_155] : memref<432x32xf32, #tpu.memory_space<vmem>>, vector<72x32xf32>
      %cst_156 = arith.constant 5.000000e-01 : f32
      %200 = vector.broadcast %cst_156 : f32 to vector<72x32xf32>
      %201 = arith.cmpf ogt, %199, %200 : vector<72x32xf32>
      %cst_157 = arith.constant 0.000000e+00 : f32
      %202 = vector.broadcast %cst_157 : f32 to vector<72x32xf32>
      %203 = arith.select %201, %198, %202 : vector<72x32xi1>, vector<72x32xf32>
      %c144_158 = arith.constant 144 : index
      %c0_159 = arith.constant 0 : index
      %204 = vector.load %arg14[%c144_158, %c0_159] : memref<440x32xf32, #tpu.memory_space<vmem>>, vector<72x32xf32>
      tpu.vector_store %arg14[%c144_158, %c0_159], %203 {strides = array<i32>} : memref<440x32xf32, #tpu.memory_space<vmem>>, vector<72x32xf32>,
      %c216_i32 = arith.constant 216 : i32
      %205 = arith.addi %84, %c216_i32 : i32
      %c0_i32_160 = arith.constant 0 : i32
      %206 = arith.addi %205, %c0_i32_160 : i32
      %c0_161 = arith.constant 0 : index
      %207 = arith.index_cast %206 : i32 to index
      %c0_162 = arith.constant 0 : index
      %208 = vector.load %arg1[%c0_161, %207, %c0_162] : memref<1x3536x16xf32, #tpu.memory_space<vmem>>, vector<1x72x16xf32>
      %209 = vector.shape_cast %208 : vector<1x72x16xf32> to vector<72x16xf32>
      %210 = arith.truncf %209 : vector<72x16xf32> to vector<72x16xbf16>
      %c0_163 = arith.constant 0 : index
      %c0_164 = arith.constant 0 : index
      %c0_165 = arith.constant 0 : index
      %211 = vector.load %arg3[%c0_163, %c0_164, %c0_165] : memref<3x16x32xbf16, #tpu.memory_space<vmem>>, vector<1x16x32xbf16>
      %212 = vector.shape_cast %211 : vector<1x16x32xbf16> to vector<16x32xbf16>
      %cst_166 = arith.constant dense<0.000000e+00> : vector<72x32xf32>
      %213 = tpu.matmul %210, %212, %cst_166 {dimension_numbers = #tpu.dot_dimension_numbers<[1], [0], [0], [1], [0, 0, 1, 1], [], []>} : vector<72x16xbf16>, vector<16x32xbf16>, vector<72x32xf32> -> vector<72x32xf32>
      %c216_i32_167 = arith.constant 216 : i32
      %214 = arith.addi %84, %c216_i32_167 : i32
      %c24_i32_168 = arith.constant 24 : i32
      %215 = arith.addi %214, %c24_i32_168 : i32
      %c0_169 = arith.constant 0 : index
      %216 = arith.index_cast %215 : i32 to index
      %c0_170 = arith.constant 0 : index
      %217 = vector.load %arg1[%c0_169, %216, %c0_170] : memref<1x3536x16xf32, #tpu.memory_space<vmem>>, vector<1x72x16xf32>
      %218 = vector.shape_cast %217 : vector<1x72x16xf32> to vector<72x16xf32>
      %219 = arith.truncf %218 : vector<72x16xf32> to vector<72x16xbf16>
      %c1_171 = arith.constant 1 : index
      %c0_172 = arith.constant 0 : index
      %c0_173 = arith.constant 0 : index
      %220 = vector.load %arg3[%c1_171, %c0_172, %c0_173] : memref<3x16x32xbf16, #tpu.memory_space<vmem>>, vector<1x16x32xbf16>
      %221 = vector.shape_cast %220 : vector<1x16x32xbf16> to vector<16x32xbf16>
      %cst_174 = arith.constant dense<0.000000e+00> : vector<72x32xf32>
      %222 = tpu.matmul %219, %221, %cst_174 {dimension_numbers = #tpu.dot_dimension_numbers<[1], [0], [0], [1], [0, 0, 1, 1], [], []>} : vector<72x16xbf16>, vector<16x32xbf16>, vector<72x32xf32> -> vector<72x32xf32>
      %223 = arith.addf %213, %222 : vector<72x32xf32>
      %c216_i32_175 = arith.constant 216 : i32
      %224 = arith.addi %84, %c216_i32_175 : i32
      %c48_i32_176 = arith.constant 48 : i32
      %225 = arith.addi %224, %c48_i32_176 : i32
      %c0_177 = arith.constant 0 : index
      %226 = arith.index_cast %225 : i32 to index
      %c0_178 = arith.constant 0 : index
      %227 = vector.load %arg1[%c0_177, %226, %c0_178] : memref<1x3536x16xf32, #tpu.memory_space<vmem>>, vector<1x72x16xf32>
      %228 = vector.shape_cast %227 : vector<1x72x16xf32> to vector<72x16xf32>
      %229 = arith.truncf %228 : vector<72x16xf32> to vector<72x16xbf16>
      %c2_179 = arith.constant 2 : index
      %c0_180 = arith.constant 0 : index
      %c0_181 = arith.constant 0 : index
      %230 = vector.load %arg3[%c2_179, %c0_180, %c0_181] : memref<3x16x32xbf16, #tpu.memory_space<vmem>>, vector<1x16x32xbf16>
      %231 = vector.shape_cast %230 : vector<1x16x32xbf16> to vector<16x32xbf16>
      %cst_182 = arith.constant dense<0.000000e+00> : vector<72x32xf32>
      %232 = tpu.matmul %229, %231, %cst_182 {dimension_numbers = #tpu.dot_dimension_numbers<[1], [0], [0], [1], [0, 0, 1, 1], [], []>} : vector<72x16xbf16>, vector<16x32xbf16>, vector<72x32xf32> -> vector<72x32xf32>
      %233 = arith.addf %223, %232 : vector<72x32xf32>
      %c0_183 = arith.constant 0 : index
      %c0_184 = arith.constant 0 : index
      %234 = vector.load %arg4[%c0_183, %c0_184] : memref<1x32xf32, #tpu.memory_space<vmem>>, vector<1x32xf32>
      %235 = vector.broadcast %234 : vector<1x32xf32> to vector<72x32xf32>
      %236 = arith.addf %233, %235 : vector<72x32xf32>
      %cst_185 = arith.constant 0.000000e+00 : f32
      %237 = vector.broadcast %cst_185 : f32 to vector<72x32xf32>
      %238 = arith.maximumf %236, %237 : vector<72x32xf32>
      %c216 = arith.constant 216 : index
      %c0_186 = arith.constant 0 : index
      %239 = vector.load %arg2[%c216, %c0_186] : memref<432x32xf32, #tpu.memory_space<vmem>>, vector<72x32xf32>
      %cst_187 = arith.constant 5.000000e-01 : f32
      %240 = vector.broadcast %cst_187 : f32 to vector<72x32xf32>
      %241 = arith.cmpf ogt, %239, %240 : vector<72x32xf32>
      %cst_188 = arith.constant 0.000000e+00 : f32
      %242 = vector.broadcast %cst_188 : f32 to vector<72x32xf32>
      %243 = arith.select %241, %238, %242 : vector<72x32xi1>, vector<72x32xf32>
      %c216_189 = arith.constant 216 : index
      %c0_190 = arith.constant 0 : index
      %244 = vector.load %arg14[%c216_189, %c0_190] : memref<440x32xf32, #tpu.memory_space<vmem>>, vector<72x32xf32>
      tpu.vector_store %arg14[%c216_189, %c0_190], %243 {strides = array<i32>} : memref<440x32xf32, #tpu.memory_space<vmem>>, vector<72x32xf32>,
      %c288_i32 = arith.constant 288 : i32
      %245 = arith.addi %84, %c288_i32 : i32
      %c0_i32_191 = arith.constant 0 : i32
      %246 = arith.addi %245, %c0_i32_191 : i32
      %c0_192 = arith.constant 0 : index
      %247 = arith.index_cast %246 : i32 to index
      %c0_193 = arith.constant 0 : index
      %248 = vector.load %arg1[%c0_192, %247, %c0_193] : memref<1x3536x16xf32, #tpu.memory_space<vmem>>, vector<1x72x16xf32>
      %249 = vector.shape_cast %248 : vector<1x72x16xf32> to vector<72x16xf32>
      %250 = arith.truncf %249 : vector<72x16xf32> to vector<72x16xbf16>
      %c0_194 = arith.constant 0 : index
      %c0_195 = arith.constant 0 : index
      %c0_196 = arith.constant 0 : index
      %251 = vector.load %arg3[%c0_194, %c0_195, %c0_196] : memref<3x16x32xbf16, #tpu.memory_space<vmem>>, vector<1x16x32xbf16>
      %252 = vector.shape_cast %251 : vector<1x16x32xbf16> to vector<16x32xbf16>
      %cst_197 = arith.constant dense<0.000000e+00> : vector<72x32xf32>
      %253 = tpu.matmul %250, %252, %cst_197 {dimension_numbers = #tpu.dot_dimension_numbers<[1], [0], [0], [1], [0, 0, 1, 1], [], []>} : vector<72x16xbf16>, vector<16x32xbf16>, vector<72x32xf32> -> vector<72x32xf32>
      %c288_i32_198 = arith.constant 288 : i32
      %254 = arith.addi %84, %c288_i32_198 : i32
      %c24_i32_199 = arith.constant 24 : i32
      %255 = arith.addi %254, %c24_i32_199 : i32
      %c0_200 = arith.constant 0 : index
      %256 = arith.index_cast %255 : i32 to index
      %c0_201 = arith.constant 0 : index
      %257 = vector.load %arg1[%c0_200, %256, %c0_201] : memref<1x3536x16xf32, #tpu.memory_space<vmem>>, vector<1x72x16xf32>
      %258 = vector.shape_cast %257 : vector<1x72x16xf32> to vector<72x16xf32>
      %259 = arith.truncf %258 : vector<72x16xf32> to vector<72x16xbf16>
      %c1_202 = arith.constant 1 : index
      %c0_203 = arith.constant 0 : index
      %c0_204 = arith.constant 0 : index
      %260 = vector.load %arg3[%c1_202, %c0_203, %c0_204] : memref<3x16x32xbf16, #tpu.memory_space<vmem>>, vector<1x16x32xbf16>
      %261 = vector.shape_cast %260 : vector<1x16x32xbf16> to vector<16x32xbf16>
      %cst_205 = arith.constant dense<0.000000e+00> : vector<72x32xf32>
      %262 = tpu.matmul %259, %261, %cst_205 {dimension_numbers = #tpu.dot_dimension_numbers<[1], [0], [0], [1], [0, 0, 1, 1], [], []>} : vector<72x16xbf16>, vector<16x32xbf16>, vector<72x32xf32> -> vector<72x32xf32>
      %263 = arith.addf %253, %262 : vector<72x32xf32>
      %c288_i32_206 = arith.constant 288 : i32
      %264 = arith.addi %84, %c288_i32_206 : i32
      %c48_i32_207 = arith.constant 48 : i32
      %265 = arith.addi %264, %c48_i32_207 : i32
      %c0_208 = arith.constant 0 : index
      %266 = arith.index_cast %265 : i32 to index
      %c0_209 = arith.constant 0 : index
      %267 = vector.load %arg1[%c0_208, %266, %c0_209] : memref<1x3536x16xf32, #tpu.memory_space<vmem>>, vector<1x72x16xf32>
      %268 = vector.shape_cast %267 : vector<1x72x16xf32> to vector<72x16xf32>
      %269 = arith.truncf %268 : vector<72x16xf32> to vector<72x16xbf16>
      %c2_210 = arith.constant 2 : index
      %c0_211 = arith.constant 0 : index
      %c0_212 = arith.constant 0 : index
      %270 = vector.load %arg3[%c2_210, %c0_211, %c0_212] : memref<3x16x32xbf16, #tpu.memory_space<vmem>>, vector<1x16x32xbf16>
      %271 = vector.shape_cast %270 : vector<1x16x32xbf16> to vector<16x32xbf16>
      %cst_213 = arith.constant dense<0.000000e+00> : vector<72x32xf32>
      %272 = tpu.matmul %269, %271, %cst_213 {dimension_numbers = #tpu.dot_dimension_numbers<[1], [0], [0], [1], [0, 0, 1, 1], [], []>} : vector<72x16xbf16>, vector<16x32xbf16>, vector<72x32xf32> -> vector<72x32xf32>
      %273 = arith.addf %263, %272 : vector<72x32xf32>
      %c0_214 = arith.constant 0 : index
      %c0_215 = arith.constant 0 : index
      %274 = vector.load %arg4[%c0_214, %c0_215] : memref<1x32xf32, #tpu.memory_space<vmem>>, vector<1x32xf32>
      %275 = vector.broadcast %274 : vector<1x32xf32> to vector<72x32xf32>
      %276 = arith.addf %273, %275 : vector<72x32xf32>
      %cst_216 = arith.constant 0.000000e+00 : f32
      %277 = vector.broadcast %cst_216 : f32 to vector<72x32xf32>
      %278 = arith.maximumf %276, %277 : vector<72x32xf32>
      %c288 = arith.constant 288 : index
      %c0_217 = arith.constant 0 : index
      %279 = vector.load %arg2[%c288, %c0_217] : memref<432x32xf32, #tpu.memory_space<vmem>>, vector<72x32xf32>
      %cst_218 = arith.constant 5.000000e-01 : f32
      %280 = vector.broadcast %cst_218 : f32 to vector<72x32xf32>
      %281 = arith.cmpf ogt, %279, %280 : vector<72x32xf32>
      %cst_219 = arith.constant 0.000000e+00 : f32
      %282 = vector.broadcast %cst_219 : f32 to vector<72x32xf32>
      %283 = arith.select %281, %278, %282 : vector<72x32xi1>, vector<72x32xf32>
      %c288_220 = arith.constant 288 : index
      %c0_221 = arith.constant 0 : index
      %284 = vector.load %arg14[%c288_220, %c0_221] : memref<440x32xf32, #tpu.memory_space<vmem>>, vector<72x32xf32>
      tpu.vector_store %arg14[%c288_220, %c0_221], %283 {strides = array<i32>} : memref<440x32xf32, #tpu.memory_space<vmem>>, vector<72x32xf32>,
      %c360_i32 = arith.constant 360 : i32
      %285 = arith.addi %84, %c360_i32 : i32
      %c0_i32_222 = arith.constant 0 : i32
      %286 = arith.addi %285, %c0_i32_222 : i32
      %c0_223 = arith.constant 0 : index
      %287 = arith.index_cast %286 : i32 to index
      %c0_224 = arith.constant 0 : index
      %288 = vector.load %arg1[%c0_223, %287, %c0_224] : memref<1x3536x16xf32, #tpu.memory_space<vmem>>, vector<1x72x16xf32>
      %289 = vector.shape_cast %288 : vector<1x72x16xf32> to vector<72x16xf32>
      %290 = arith.truncf %289 : vector<72x16xf32> to vector<72x16xbf16>
      %c0_225 = arith.constant 0 : index
      %c0_226 = arith.constant 0 : index
      %c0_227 = arith.constant 0 : index
      %291 = vector.load %arg3[%c0_225, %c0_226, %c0_227] : memref<3x16x32xbf16, #tpu.memory_space<vmem>>, vector<1x16x32xbf16>
      %292 = vector.shape_cast %291 : vector<1x16x32xbf16> to vector<16x32xbf16>
      %cst_228 = arith.constant dense<0.000000e+00> : vector<72x32xf32>
      %293 = tpu.matmul %290, %292, %cst_228 {dimension_numbers = #tpu.dot_dimension_numbers<[1], [0], [0], [1], [0, 0, 1, 1], [], []>} : vector<72x16xbf16>, vector<16x32xbf16>, vector<72x32xf32> -> vector<72x32xf32>
      %c360_i32_229 = arith.constant 360 : i32
      %294 = arith.addi %84, %c360_i32_229 : i32
      %c24_i32_230 = arith.constant 24 : i32
      %295 = arith.addi %294, %c24_i32_230 : i32
      %c0_231 = arith.constant 0 : index
      %296 = arith.index_cast %295 : i32 to index
      %c0_232 = arith.constant 0 : index
      %297 = vector.load %arg1[%c0_231, %296, %c0_232] : memref<1x3536x16xf32, #tpu.memory_space<vmem>>, vector<1x72x16xf32>
      %298 = vector.shape_cast %297 : vector<1x72x16xf32> to vector<72x16xf32>
      %299 = arith.truncf %298 : vector<72x16xf32> to vector<72x16xbf16>
      %c1_233 = arith.constant 1 : index
      %c0_234 = arith.constant 0 : index
      %c0_235 = arith.constant 0 : index
      %300 = vector.load %arg3[%c1_233, %c0_234, %c0_235] : memref<3x16x32xbf16, #tpu.memory_space<vmem>>, vector<1x16x32xbf16>
      %301 = vector.shape_cast %300 : vector<1x16x32xbf16> to vector<16x32xbf16>
      %cst_236 = arith.constant dense<0.000000e+00> : vector<72x32xf32>
      %302 = tpu.matmul %299, %301, %cst_236 {dimension_numbers = #tpu.dot_dimension_numbers<[1], [0], [0], [1], [0, 0, 1, 1], [], []>} : vector<72x16xbf16>, vector<16x32xbf16>, vector<72x32xf32> -> vector<72x32xf32>
      %303 = arith.addf %293, %302 : vector<72x32xf32>
      %c360_i32_237 = arith.constant 360 : i32
      %304 = arith.addi %84, %c360_i32_237 : i32
      %c48_i32_238 = arith.constant 48 : i32
      %305 = arith.addi %304, %c48_i32_238 : i32
      %c0_239 = arith.constant 0 : index
      %306 = arith.index_cast %305 : i32 to index
      %c0_240 = arith.constant 0 : index
      %307 = vector.load %arg1[%c0_239, %306, %c0_240] : memref<1x3536x16xf32, #tpu.memory_space<vmem>>, vector<1x72x16xf32>
      %308 = vector.shape_cast %307 : vector<1x72x16xf32> to vector<72x16xf32>
      %309 = arith.truncf %308 : vector<72x16xf32> to vector<72x16xbf16>
      %c2_241 = arith.constant 2 : index
      %c0_242 = arith.constant 0 : index
      %c0_243 = arith.constant 0 : index
      %310 = vector.load %arg3[%c2_241, %c0_242, %c0_243] : memref<3x16x32xbf16, #tpu.memory_space<vmem>>, vector<1x16x32xbf16>
      %311 = vector.shape_cast %310 : vector<1x16x32xbf16> to vector<16x32xbf16>
      %cst_244 = arith.constant dense<0.000000e+00> : vector<72x32xf32>
      %312 = tpu.matmul %309, %311, %cst_244 {dimension_numbers = #tpu.dot_dimension_numbers<[1], [0], [0], [1], [0, 0, 1, 1], [], []>} : vector<72x16xbf16>, vector<16x32xbf16>, vector<72x32xf32> -> vector<72x32xf32>
      %313 = arith.addf %303, %312 : vector<72x32xf32>
      %c0_245 = arith.constant 0 : index
      %c0_246 = arith.constant 0 : index
      %314 = vector.load %arg4[%c0_245, %c0_246] : memref<1x32xf32, #tpu.memory_space<vmem>>, vector<1x32xf32>
      %315 = vector.broadcast %314 : vector<1x32xf32> to vector<72x32xf32>
      %316 = arith.addf %313, %315 : vector<72x32xf32>
      %cst_247 = arith.constant 0.000000e+00 : f32
      %317 = vector.broadcast %cst_247 : f32 to vector<72x32xf32>
      %318 = arith.maximumf %316, %317 : vector<72x32xf32>
      %c360 = arith.constant 360 : index
      %c0_248 = arith.constant 0 : index
      %319 = vector.load %arg2[%c360, %c0_248] : memref<432x32xf32, #tpu.memory_space<vmem>>, vector<72x32xf32>
      %cst_249 = arith.constant 5.000000e-01 : f32
      %320 = vector.broadcast %cst_249 : f32 to vector<72x32xf32>
      %321 = arith.cmpf ogt, %319, %320 : vector<72x32xf32>
      %cst_250 = arith.constant 0.000000e+00 : f32
      %322 = vector.broadcast %cst_250 : f32 to vector<72x32xf32>
      %323 = arith.select %321, %318, %322 : vector<72x32xi1>, vector<72x32xf32>
      %c360_251 = arith.constant 360 : index
      %c0_252 = arith.constant 0 : index
      %324 = vector.load %arg14[%c360_251, %c0_252] : memref<440x32xf32, #tpu.memory_space<vmem>>, vector<72x32xf32>
      tpu.vector_store %arg14[%c360_251, %c0_252], %323 {strides = array<i32>} : memref<440x32xf32, #tpu.memory_space<vmem>>, vector<72x32xf32>,
      %c0_253 = arith.constant 0 : index
      %c0_254 = arith.constant 0 : index
      %325 = vector.load %arg14[%c0_253, %c0_254] : memref<440x32xf32, #tpu.memory_space<vmem>>, vector<96x32xf32>
      %326 = arith.truncf %325 : vector<96x32xf32> to vector<96x32xbf16>
      %c0_255 = arith.constant 0 : index
      %c0_256 = arith.constant 0 : index
      %c0_257 = arith.constant 0 : index
      %327 = vector.load %arg5[%c0_255, %c0_256, %c0_257] : memref<9x32x64xbf16, #tpu.memory_space<vmem>>, vector<1x32x64xbf16>
      %328 = vector.shape_cast %327 : vector<1x32x64xbf16> to vector<32x64xbf16>
      %cst_258 = arith.constant dense<0.000000e+00> : vector<96x64xf32>
      %329 = tpu.matmul %326, %328, %cst_258 {dimension_numbers = #tpu.dot_dimension_numbers<[1], [0], [0], [1], [0, 0, 1, 1], [], []>} : vector<96x32xbf16>, vector<32x64xbf16>, vector<96x64xf32> -> vector<96x64xf32>
      %c1_259 = arith.constant 1 : index
      %c0_260 = arith.constant 0 : index
      %330 = vector.load %arg14[%c1_259, %c0_260] : memref<440x32xf32, #tpu.memory_space<vmem>>, vector<96x32xf32>
      %331 = arith.truncf %330 : vector<96x32xf32> to vector<96x32xbf16>
      %c1_261 = arith.constant 1 : index
      %c0_262 = arith.constant 0 : index
      %c0_263 = arith.constant 0 : index
      %332 = vector.load %arg5[%c1_261, %c0_262, %c0_263] : memref<9x32x64xbf16, #tpu.memory_space<vmem>>, vector<1x32x64xbf16>
      %333 = vector.shape_cast %332 : vector<1x32x64xbf16> to vector<32x64xbf16>
      %cst_264 = arith.constant dense<0.000000e+00> : vector<96x64xf32>
      %334 = tpu.matmul %331, %333, %cst_264 {dimension_numbers = #tpu.dot_dimension_numbers<[1], [0], [0], [1], [0, 0, 1, 1], [], []>} : vector<96x32xbf16>, vector<32x64xbf16>, vector<96x64xf32> -> vector<96x64xf32>
      %335 = arith.addf %329, %334 : vector<96x64xf32>
      %c2_265 = arith.constant 2 : index
      %c0_266 = arith.constant 0 : index
      %336 = vector.load %arg14[%c2_265, %c0_266] : memref<440x32xf32, #tpu.memory_space<vmem>>, vector<96x32xf32>
      %337 = arith.truncf %336 : vector<96x32xf32> to vector<96x32xbf16>
      %c2_267 = arith.constant 2 : index
      %c0_268 = arith.constant 0 : index
      %c0_269 = arith.constant 0 : index
      %338 = vector.load %arg5[%c2_267, %c0_268, %c0_269] : memref<9x32x64xbf16, #tpu.memory_space<vmem>>, vector<1x32x64xbf16>
      %339 = vector.shape_cast %338 : vector<1x32x64xbf16> to vector<32x64xbf16>
      %cst_270 = arith.constant dense<0.000000e+00> : vector<96x64xf32>
      %340 = tpu.matmul %337, %339, %cst_270 {dimension_numbers = #tpu.dot_dimension_numbers<[1], [0], [0], [1], [0, 0, 1, 1], [], []>} : vector<96x32xbf16>, vector<32x64xbf16>, vector<96x64xf32> -> vector<96x64xf32>
      %341 = arith.addf %335, %340 : vector<96x64xf32>
      %c24_271 = arith.constant 24 : index
      %c0_272 = arith.constant 0 : index
      %342 = vector.load %arg14[%c24_271, %c0_272] : memref<440x32xf32, #tpu.memory_space<vmem>>, vector<96x32xf32>
      %343 = arith.truncf %342 : vector<96x32xf32> to vector<96x32xbf16>
      %c3_273 = arith.constant 3 : index
      %c0_274 = arith.constant 0 : index
      %c0_275 = arith.constant 0 : index
      %344 = vector.load %arg5[%c3_273, %c0_274, %c0_275] : memref<9x32x64xbf16, #tpu.memory_space<vmem>>, vector<1x32x64xbf16>
      %345 = vector.shape_cast %344 : vector<1x32x64xbf16> to vector<32x64xbf16>
      %cst_276 = arith.constant dense<0.000000e+00> : vector<96x64xf32>
      %346 = tpu.matmul %343, %345, %cst_276 {dimension_numbers = #tpu.dot_dimension_numbers<[1], [0], [0], [1], [0, 0, 1, 1], [], []>} : vector<96x32xbf16>, vector<32x64xbf16>, vector<96x64xf32> -> vector<96x64xf32>
      %347 = arith.addf %341, %346 : vector<96x64xf32>
      %c25_277 = arith.constant 25 : index
      %c0_278 = arith.constant 0 : index
      %348 = vector.load %arg14[%c25_277, %c0_278] : memref<440x32xf32, #tpu.memory_space<vmem>>, vector<96x32xf32>
      %349 = arith.truncf %348 : vector<96x32xf32> to vector<96x32xbf16>
      %c4 = arith.constant 4 : index
      %c0_279 = arith.constant 0 : index
      %c0_280 = arith.constant 0 : index
      %350 = vector.load %arg5[%c4, %c0_279, %c0_280] : memref<9x32x64xbf16, #tpu.memory_space<vmem>>, vector<1x32x64xbf16>
      %351 = vector.shape_cast %350 : vector<1x32x64xbf16> to vector<32x64xbf16>
      %cst_281 = arith.constant dense<0.000000e+00> : vector<96x64xf32>
      %352 = tpu.matmul %349, %351, %cst_281 {dimension_numbers = #tpu.dot_dimension_numbers<[1], [0], [0], [1], [0, 0, 1, 1], [], []>} : vector<96x32xbf16>, vector<32x64xbf16>, vector<96x64xf32> -> vector<96x64xf32>
      %353 = arith.addf %347, %352 : vector<96x64xf32>
      %c26_282 = arith.constant 26 : index
      %c0_283 = arith.constant 0 : index
      %354 = vector.load %arg14[%c26_282, %c0_283] : memref<440x32xf32, #tpu.memory_space<vmem>>, vector<96x32xf32>
      %355 = arith.truncf %354 : vector<96x32xf32> to vector<96x32xbf16>
      %c5 = arith.constant 5 : index
      %c0_284 = arith.constant 0 : index
      %c0_285 = arith.constant 0 : index
      %356 = vector.load %arg5[%c5, %c0_284, %c0_285] : memref<9x32x64xbf16, #tpu.memory_space<vmem>>, vector<1x32x64xbf16>
      %357 = vector.shape_cast %356 : vector<1x32x64xbf16> to vector<32x64xbf16>
      %cst_286 = arith.constant dense<0.000000e+00> : vector<96x64xf32>
      %358 = tpu.matmul %355, %357, %cst_286 {dimension_numbers = #tpu.dot_dimension_numbers<[1], [0], [0], [1], [0, 0, 1, 1], [], []>} : vector<96x32xbf16>, vector<32x64xbf16>, vector<96x64xf32> -> vector<96x64xf32>
      %359 = arith.addf %353, %358 : vector<96x64xf32>
      %c48_287 = arith.constant 48 : index
      %c0_288 = arith.constant 0 : index
      %360 = vector.load %arg14[%c48_287, %c0_288] : memref<440x32xf32, #tpu.memory_space<vmem>>, vector<96x32xf32>
      %361 = arith.truncf %360 : vector<96x32xf32> to vector<96x32xbf16>
      %c6 = arith.constant 6 : index
      %c0_289 = arith.constant 0 : index
      %c0_290 = arith.constant 0 : index
      %362 = vector.load %arg5[%c6, %c0_289, %c0_290] : memref<9x32x64xbf16, #tpu.memory_space<vmem>>, vector<1x32x64xbf16>
      %363 = vector.shape_cast %362 : vector<1x32x64xbf16> to vector<32x64xbf16>
      %cst_291 = arith.constant dense<0.000000e+00> : vector<96x64xf32>
      %364 = tpu.matmul %361, %363, %cst_291 {dimension_numbers = #tpu.dot_dimension_numbers<[1], [0], [0], [1], [0, 0, 1, 1], [], []>} : vector<96x32xbf16>, vector<32x64xbf16>, vector<96x64xf32> -> vector<96x64xf32>
      %365 = arith.addf %359, %364 : vector<96x64xf32>
      %c49_292 = arith.constant 49 : index
      %c0_293 = arith.constant 0 : index
      %366 = vector.load %arg14[%c49_292, %c0_293] : memref<440x32xf32, #tpu.memory_space<vmem>>, vector<96x32xf32>
      %367 = arith.truncf %366 : vector<96x32xf32> to vector<96x32xbf16>
      %c7 = arith.constant 7 : index
      %c0_294 = arith.constant 0 : index
      %c0_295 = arith.constant 0 : index
      %368 = vector.load %arg5[%c7, %c0_294, %c0_295] : memref<9x32x64xbf16, #tpu.memory_space<vmem>>, vector<1x32x64xbf16>
      %369 = vector.shape_cast %368 : vector<1x32x64xbf16> to vector<32x64xbf16>
      %cst_296 = arith.constant dense<0.000000e+00> : vector<96x64xf32>
      %370 = tpu.matmul %367, %369, %cst_296 {dimension_numbers = #tpu.dot_dimension_numbers<[1], [0], [0], [1], [0, 0, 1, 1], [], []>} : vector<96x32xbf16>, vector<32x64xbf16>, vector<96x64xf32> -> vector<96x64xf32>
      %371 = arith.addf %365, %370 : vector<96x64xf32>
      %c50_297 = arith.constant 50 : index
      %c0_298 = arith.constant 0 : index
      %372 = vector.load %arg14[%c50_297, %c0_298] : memref<440x32xf32, #tpu.memory_space<vmem>>, vector<96x32xf32>
      %373 = arith.truncf %372 : vector<96x32xf32> to vector<96x32xbf16>
      %c8_299 = arith.constant 8 : index
      %c0_300 = arith.constant 0 : index
      %c0_301 = arith.constant 0 : index
      %374 = vector.load %arg5[%c8_299, %c0_300, %c0_301] : memref<9x32x64xbf16, #tpu.memory_space<vmem>>, vector<1x32x64xbf16>
      %375 = vector.shape_cast %374 : vector<1x32x64xbf16> to vector<32x64xbf16>
      %cst_302 = arith.constant dense<0.000000e+00> : vector<96x64xf32>
      %376 = tpu.matmul %373, %375, %cst_302 {dimension_numbers = #tpu.dot_dimension_numbers<[1], [0], [0], [1], [0, 0, 1, 1], [], []>} : vector<96x32xbf16>, vector<32x64xbf16>, vector<96x64xf32> -> vector<96x64xf32>
      %377 = arith.addf %371, %376 : vector<96x64xf32>
      %c0_303 = arith.constant 0 : index
      %c0_304 = arith.constant 0 : index
      %378 = vector.load %arg6[%c0_303, %c0_304] : memref<1x64xf32, #tpu.memory_space<vmem>>, vector<1x64xf32>
      %379 = vector.broadcast %378 : vector<1x64xf32> to vector<96x64xf32>
      %380 = arith.addf %377, %379 : vector<96x64xf32>
      %cst_305 = arith.constant 0.000000e+00 : f32
      %381 = vector.broadcast %cst_305 : f32 to vector<96x64xf32>
      %382 = arith.maximumf %380, %381 : vector<96x64xf32>
      %c0_306 = arith.constant 0 : index
      %c0_307 = arith.constant 0 : index
      %383 = vector.load %arg15[%c0_306, %c0_307] : memref<384x64xf32, #tpu.memory_space<vmem>>, vector<96x64xf32>
      tpu.vector_store %arg15[%c0_306, %c0_307], %382 {strides = array<i32>} : memref<384x64xf32, #tpu.memory_space<vmem>>, vector<96x64xf32>,
      %c96 = arith.constant 96 : index
      %c0_308 = arith.constant 0 : index
      %384 = vector.load %arg14[%c96, %c0_308] : memref<440x32xf32, #tpu.memory_space<vmem>>, vector<96x32xf32>
      %385 = arith.truncf %384 : vector<96x32xf32> to vector<96x32xbf16>
      %c0_309 = arith.constant 0 : index
      %c0_310 = arith.constant 0 : index
      %c0_311 = arith.constant 0 : index
      %386 = vector.load %arg5[%c0_309, %c0_310, %c0_311] : memref<9x32x64xbf16, #tpu.memory_space<vmem>>, vector<1x32x64xbf16>
      %387 = vector.shape_cast %386 : vector<1x32x64xbf16> to vector<32x64xbf16>
      %cst_312 = arith.constant dense<0.000000e+00> : vector<96x64xf32>
      %388 = tpu.matmul %385, %387, %cst_312 {dimension_numbers = #tpu.dot_dimension_numbers<[1], [0], [0], [1], [0, 0, 1, 1], [], []>} : vector<96x32xbf16>, vector<32x64xbf16>, vector<96x64xf32> -> vector<96x64xf32>
      %c97 = arith.constant 97 : index
      %c0_313 = arith.constant 0 : index
      %389 = vector.load %arg14[%c97, %c0_313] : memref<440x32xf32, #tpu.memory_space<vmem>>, vector<96x32xf32>
      %390 = arith.truncf %389 : vector<96x32xf32> to vector<96x32xbf16>
      %c1_314 = arith.constant 1 : index
      %c0_315 = arith.constant 0 : index
      %c0_316 = arith.constant 0 : index
      %391 = vector.load %arg5[%c1_314, %c0_315, %c0_316] : memref<9x32x64xbf16, #tpu.memory_space<vmem>>, vector<1x32x64xbf16>
      %392 = vector.shape_cast %391 : vector<1x32x64xbf16> to vector<32x64xbf16>
      %cst_317 = arith.constant dense<0.000000e+00> : vector<96x64xf32>
      %393 = tpu.matmul %390, %392, %cst_317 {dimension_numbers = #tpu.dot_dimension_numbers<[1], [0], [0], [1], [0, 0, 1, 1], [], []>} : vector<96x32xbf16>, vector<32x64xbf16>, vector<96x64xf32> -> vector<96x64xf32>
      %394 = arith.addf %388, %393 : vector<96x64xf32>
      %c98 = arith.constant 98 : index
      %c0_318 = arith.constant 0 : index
      %395 = vector.load %arg14[%c98, %c0_318] : memref<440x32xf32, #tpu.memory_space<vmem>>, vector<96x32xf32>
      %396 = arith.truncf %395 : vector<96x32xf32> to vector<96x32xbf16>
      %c2_319 = arith.constant 2 : index
      %c0_320 = arith.constant 0 : index
      %c0_321 = arith.constant 0 : index
      %397 = vector.load %arg5[%c2_319, %c0_320, %c0_321] : memref<9x32x64xbf16, #tpu.memory_space<vmem>>, vector<1x32x64xbf16>
      %398 = vector.shape_cast %397 : vector<1x32x64xbf16> to vector<32x64xbf16>
      %cst_322 = arith.constant dense<0.000000e+00> : vector<96x64xf32>
      %399 = tpu.matmul %396, %398, %cst_322 {dimension_numbers = #tpu.dot_dimension_numbers<[1], [0], [0], [1], [0, 0, 1, 1], [], []>} : vector<96x32xbf16>, vector<32x64xbf16>, vector<96x64xf32> -> vector<96x64xf32>
      %400 = arith.addf %394, %399 : vector<96x64xf32>
      %c120 = arith.constant 120 : index
      %c0_323 = arith.constant 0 : index
      %401 = vector.load %arg14[%c120, %c0_323] : memref<440x32xf32, #tpu.memory_space<vmem>>, vector<96x32xf32>
      %402 = arith.truncf %401 : vector<96x32xf32> to vector<96x32xbf16>
      %c3_324 = arith.constant 3 : index
      %c0_325 = arith.constant 0 : index
      %c0_326 = arith.constant 0 : index
      %403 = vector.load %arg5[%c3_324, %c0_325, %c0_326] : memref<9x32x64xbf16, #tpu.memory_space<vmem>>, vector<1x32x64xbf16>
      %404 = vector.shape_cast %403 : vector<1x32x64xbf16> to vector<32x64xbf16>
      %cst_327 = arith.constant dense<0.000000e+00> : vector<96x64xf32>
      %405 = tpu.matmul %402, %404, %cst_327 {dimension_numbers = #tpu.dot_dimension_numbers<[1], [0], [0], [1], [0, 0, 1, 1], [], []>} : vector<96x32xbf16>, vector<32x64xbf16>, vector<96x64xf32> -> vector<96x64xf32>
      %406 = arith.addf %400, %405 : vector<96x64xf32>
      %c121 = arith.constant 121 : index
      %c0_328 = arith.constant 0 : index
      %407 = vector.load %arg14[%c121, %c0_328] : memref<440x32xf32, #tpu.memory_space<vmem>>, vector<96x32xf32>
      %408 = arith.truncf %407 : vector<96x32xf32> to vector<96x32xbf16>
      %c4_329 = arith.constant 4 : index
      %c0_330 = arith.constant 0 : index
      %c0_331 = arith.constant 0 : index
      %409 = vector.load %arg5[%c4_329, %c0_330, %c0_331] : memref<9x32x64xbf16, #tpu.memory_space<vmem>>, vector<1x32x64xbf16>
      %410 = vector.shape_cast %409 : vector<1x32x64xbf16> to vector<32x64xbf16>
      %cst_332 = arith.constant dense<0.000000e+00> : vector<96x64xf32>
      %411 = tpu.matmul %408, %410, %cst_332 {dimension_numbers = #tpu.dot_dimension_numbers<[1], [0], [0], [1], [0, 0, 1, 1], [], []>} : vector<96x32xbf16>, vector<32x64xbf16>, vector<96x64xf32> -> vector<96x64xf32>
      %412 = arith.addf %406, %411 : vector<96x64xf32>
      %c122 = arith.constant 122 : index
      %c0_333 = arith.constant 0 : index
      %413 = vector.load %arg14[%c122, %c0_333] : memref<440x32xf32, #tpu.memory_space<vmem>>, vector<96x32xf32>
      %414 = arith.truncf %413 : vector<96x32xf32> to vector<96x32xbf16>
      %c5_334 = arith.constant 5 : index
      %c0_335 = arith.constant 0 : index
      %c0_336 = arith.constant 0 : index
      %415 = vector.load %arg5[%c5_334, %c0_335, %c0_336] : memref<9x32x64xbf16, #tpu.memory_space<vmem>>, vector<1x32x64xbf16>
      %416 = vector.shape_cast %415 : vector<1x32x64xbf16> to vector<32x64xbf16>
      %cst_337 = arith.constant dense<0.000000e+00> : vector<96x64xf32>
      %417 = tpu.matmul %414, %416, %cst_337 {dimension_numbers = #tpu.dot_dimension_numbers<[1], [0], [0], [1], [0, 0, 1, 1], [], []>} : vector<96x32xbf16>, vector<32x64xbf16>, vector<96x64xf32> -> vector<96x64xf32>
      %418 = arith.addf %412, %417 : vector<96x64xf32>
      %c144_338 = arith.constant 144 : index
      %c0_339 = arith.constant 0 : index
      %419 = vector.load %arg14[%c144_338, %c0_339] : memref<440x32xf32, #tpu.memory_space<vmem>>, vector<96x32xf32>
      %420 = arith.truncf %419 : vector<96x32xf32> to vector<96x32xbf16>
      %c6_340 = arith.constant 6 : index
      %c0_341 = arith.constant 0 : index
      %c0_342 = arith.constant 0 : index
      %421 = vector.load %arg5[%c6_340, %c0_341, %c0_342] : memref<9x32x64xbf16, #tpu.memory_space<vmem>>, vector<1x32x64xbf16>
      %422 = vector.shape_cast %421 : vector<1x32x64xbf16> to vector<32x64xbf16>
      %cst_343 = arith.constant dense<0.000000e+00> : vector<96x64xf32>
      %423 = tpu.matmul %420, %422, %cst_343 {dimension_numbers = #tpu.dot_dimension_numbers<[1], [0], [0], [1], [0, 0, 1, 1], [], []>} : vector<96x32xbf16>, vector<32x64xbf16>, vector<96x64xf32> -> vector<96x64xf32>
      %424 = arith.addf %418, %423 : vector<96x64xf32>
      %c145 = arith.constant 145 : index
      %c0_344 = arith.constant 0 : index
      %425 = vector.load %arg14[%c145, %c0_344] : memref<440x32xf32, #tpu.memory_space<vmem>>, vector<96x32xf32>
      %426 = arith.truncf %425 : vector<96x32xf32> to vector<96x32xbf16>
      %c7_345 = arith.constant 7 : index
      %c0_346 = arith.constant 0 : index
      %c0_347 = arith.constant 0 : index
      %427 = vector.load %arg5[%c7_345, %c0_346, %c0_347] : memref<9x32x64xbf16, #tpu.memory_space<vmem>>, vector<1x32x64xbf16>
      %428 = vector.shape_cast %427 : vector<1x32x64xbf16> to vector<32x64xbf16>
      %cst_348 = arith.constant dense<0.000000e+00> : vector<96x64xf32>
      %429 = tpu.matmul %426, %428, %cst_348 {dimension_numbers = #tpu.dot_dimension_numbers<[1], [0], [0], [1], [0, 0, 1, 1], [], []>} : vector<96x32xbf16>, vector<32x64xbf16>, vector<96x64xf32> -> vector<96x64xf32>
      %430 = arith.addf %424, %429 : vector<96x64xf32>
      %c146 = arith.constant 146 : index
      %c0_349 = arith.constant 0 : index
      %431 = vector.load %arg14[%c146, %c0_349] : memref<440x32xf32, #tpu.memory_space<vmem>>, vector<96x32xf32>
      %432 = arith.truncf %431 : vector<96x32xf32> to vector<96x32xbf16>
      %c8_350 = arith.constant 8 : index
      %c0_351 = arith.constant 0 : index
      %c0_352 = arith.constant 0 : index
      %433 = vector.load %arg5[%c8_350, %c0_351, %c0_352] : memref<9x32x64xbf16, #tpu.memory_space<vmem>>, vector<1x32x64xbf16>
      %434 = vector.shape_cast %433 : vector<1x32x64xbf16> to vector<32x64xbf16>
      %cst_353 = arith.constant dense<0.000000e+00> : vector<96x64xf32>
      %435 = tpu.matmul %432, %434, %cst_353 {dimension_numbers = #tpu.dot_dimension_numbers<[1], [0], [0], [1], [0, 0, 1, 1], [], []>} : vector<96x32xbf16>, vector<32x64xbf16>, vector<96x64xf32> -> vector<96x64xf32>
      %436 = arith.addf %430, %435 : vector<96x64xf32>
      %c0_354 = arith.constant 0 : index
      %c0_355 = arith.constant 0 : index
      %437 = vector.load %arg6[%c0_354, %c0_355] : memref<1x64xf32, #tpu.memory_space<vmem>>, vector<1x64xf32>
      %438 = vector.broadcast %437 : vector<1x64xf32> to vector<96x64xf32>
      %439 = arith.addf %436, %438 : vector<96x64xf32>
      %cst_356 = arith.constant 0.000000e+00 : f32
      %440 = vector.broadcast %cst_356 : f32 to vector<96x64xf32>
      %441 = arith.maximumf %439, %440 : vector<96x64xf32>
      %c96_357 = arith.constant 96 : index
      %c0_358 = arith.constant 0 : index
      %442 = vector.load %arg15[%c96_357, %c0_358] : memref<384x64xf32, #tpu.memory_space<vmem>>, vector<96x64xf32>
      tpu.vector_store %arg15[%c96_357, %c0_358], %441 {strides = array<i32>} : memref<384x64xf32, #tpu.memory_space<vmem>>, vector<96x64xf32>,
      %c192_359 = arith.constant 192 : index
      %c0_360 = arith.constant 0 : index
      %443 = vector.load %arg14[%c192_359, %c0_360] : memref<440x32xf32, #tpu.memory_space<vmem>>, vector<96x32xf32>
      %444 = arith.truncf %443 : vector<96x32xf32> to vector<96x32xbf16>
      %c0_361 = arith.constant 0 : index
      %c0_362 = arith.constant 0 : index
      %c0_363 = arith.constant 0 : index
      %445 = vector.load %arg5[%c0_361, %c0_362, %c0_363] : memref<9x32x64xbf16, #tpu.memory_space<vmem>>, vector<1x32x64xbf16>
      %446 = vector.shape_cast %445 : vector<1x32x64xbf16> to vector<32x64xbf16>
      %cst_364 = arith.constant dense<0.000000e+00> : vector<96x64xf32>
      %447 = tpu.matmul %444, %446, %cst_364 {dimension_numbers = #tpu.dot_dimension_numbers<[1], [0], [0], [1], [0, 0, 1, 1], [], []>} : vector<96x32xbf16>, vector<32x64xbf16>, vector<96x64xf32> -> vector<96x64xf32>
      %c193 = arith.constant 193 : index
      %c0_365 = arith.constant 0 : index
      %448 = vector.load %arg14[%c193, %c0_365] : memref<440x32xf32, #tpu.memory_space<vmem>>, vector<96x32xf32>
      %449 = arith.truncf %448 : vector<96x32xf32> to vector<96x32xbf16>
      %c1_366 = arith.constant 1 : index
      %c0_367 = arith.constant 0 : index
      %c0_368 = arith.constant 0 : index
      %450 = vector.load %arg5[%c1_366, %c0_367, %c0_368] : memref<9x32x64xbf16, #tpu.memory_space<vmem>>, vector<1x32x64xbf16>
      %451 = vector.shape_cast %450 : vector<1x32x64xbf16> to vector<32x64xbf16>
      %cst_369 = arith.constant dense<0.000000e+00> : vector<96x64xf32>
      %452 = tpu.matmul %449, %451, %cst_369 {dimension_numbers = #tpu.dot_dimension_numbers<[1], [0], [0], [1], [0, 0, 1, 1], [], []>} : vector<96x32xbf16>, vector<32x64xbf16>, vector<96x64xf32> -> vector<96x64xf32>
      %453 = arith.addf %447, %452 : vector<96x64xf32>
      %c194 = arith.constant 194 : index
      %c0_370 = arith.constant 0 : index
      %454 = vector.load %arg14[%c194, %c0_370] : memref<440x32xf32, #tpu.memory_space<vmem>>, vector<96x32xf32>
      %455 = arith.truncf %454 : vector<96x32xf32> to vector<96x32xbf16>
      %c2_371 = arith.constant 2 : index
      %c0_372 = arith.constant 0 : index
      %c0_373 = arith.constant 0 : index
      %456 = vector.load %arg5[%c2_371, %c0_372, %c0_373] : memref<9x32x64xbf16, #tpu.memory_space<vmem>>, vector<1x32x64xbf16>
      %457 = vector.shape_cast %456 : vector<1x32x64xbf16> to vector<32x64xbf16>
      %cst_374 = arith.constant dense<0.000000e+00> : vector<96x64xf32>
      %458 = tpu.matmul %455, %457, %cst_374 {dimension_numbers = #tpu.dot_dimension_numbers<[1], [0], [0], [1], [0, 0, 1, 1], [], []>} : vector<96x32xbf16>, vector<32x64xbf16>, vector<96x64xf32> -> vector<96x64xf32>
      %459 = arith.addf %453, %458 : vector<96x64xf32>
      %c216_375 = arith.constant 216 : index
      %c0_376 = arith.constant 0 : index
      %460 = vector.load %arg14[%c216_375, %c0_376] : memref<440x32xf32, #tpu.memory_space<vmem>>, vector<96x32xf32>
      %461 = arith.truncf %460 : vector<96x32xf32> to vector<96x32xbf16>
      %c3_377 = arith.constant 3 : index
      %c0_378 = arith.constant 0 : index
      %c0_379 = arith.constant 0 : index
      %462 = vector.load %arg5[%c3_377, %c0_378, %c0_379] : memref<9x32x64xbf16, #tpu.memory_space<vmem>>, vector<1x32x64xbf16>
      %463 = vector.shape_cast %462 : vector<1x32x64xbf16> to vector<32x64xbf16>
      %cst_380 = arith.constant dense<0.000000e+00> : vector<96x64xf32>
      %464 = tpu.matmul %461, %463, %cst_380 {dimension_numbers = #tpu.dot_dimension_numbers<[1], [0], [0], [1], [0, 0, 1, 1], [], []>} : vector<96x32xbf16>, vector<32x64xbf16>, vector<96x64xf32> -> vector<96x64xf32>
      %465 = arith.addf %459, %464 : vector<96x64xf32>
      %c217 = arith.constant 217 : index
      %c0_381 = arith.constant 0 : index
      %466 = vector.load %arg14[%c217, %c0_381] : memref<440x32xf32, #tpu.memory_space<vmem>>, vector<96x32xf32>
      %467 = arith.truncf %466 : vector<96x32xf32> to vector<96x32xbf16>
      %c4_382 = arith.constant 4 : index
      %c0_383 = arith.constant 0 : index
      %c0_384 = arith.constant 0 : index
      %468 = vector.load %arg5[%c4_382, %c0_383, %c0_384] : memref<9x32x64xbf16, #tpu.memory_space<vmem>>, vector<1x32x64xbf16>
      %469 = vector.shape_cast %468 : vector<1x32x64xbf16> to vector<32x64xbf16>
      %cst_385 = arith.constant dense<0.000000e+00> : vector<96x64xf32>
      %470 = tpu.matmul %467, %469, %cst_385 {dimension_numbers = #tpu.dot_dimension_numbers<[1], [0], [0], [1], [0, 0, 1, 1], [], []>} : vector<96x32xbf16>, vector<32x64xbf16>, vector<96x64xf32> -> vector<96x64xf32>
      %471 = arith.addf %465, %470 : vector<96x64xf32>
      %c218 = arith.constant 218 : index
      %c0_386 = arith.constant 0 : index
      %472 = vector.load %arg14[%c218, %c0_386] : memref<440x32xf32, #tpu.memory_space<vmem>>, vector<96x32xf32>
      %473 = arith.truncf %472 : vector<96x32xf32> to vector<96x32xbf16>
      %c5_387 = arith.constant 5 : index
      %c0_388 = arith.constant 0 : index
      %c0_389 = arith.constant 0 : index
      %474 = vector.load %arg5[%c5_387, %c0_388, %c0_389] : memref<9x32x64xbf16, #tpu.memory_space<vmem>>, vector<1x32x64xbf16>
      %475 = vector.shape_cast %474 : vector<1x32x64xbf16> to vector<32x64xbf16>
      %cst_390 = arith.constant dense<0.000000e+00> : vector<96x64xf32>
      %476 = tpu.matmul %473, %475, %cst_390 {dimension_numbers = #tpu.dot_dimension_numbers<[1], [0], [0], [1], [0, 0, 1, 1], [], []>} : vector<96x32xbf16>, vector<32x64xbf16>, vector<96x64xf32> -> vector<96x64xf32>
      %477 = arith.addf %471, %476 : vector<96x64xf32>
      %c240 = arith.constant 240 : index
      %c0_391 = arith.constant 0 : index
      %478 = vector.load %arg14[%c240, %c0_391] : memref<440x32xf32, #tpu.memory_space<vmem>>, vector<96x32xf32>
      %479 = arith.truncf %478 : vector<96x32xf32> to vector<96x32xbf16>
      %c6_392 = arith.constant 6 : index
      %c0_393 = arith.constant 0 : index
      %c0_394 = arith.constant 0 : index
      %480 = vector.load %arg5[%c6_392, %c0_393, %c0_394] : memref<9x32x64xbf16, #tpu.memory_space<vmem>>, vector<1x32x64xbf16>
      %481 = vector.shape_cast %480 : vector<1x32x64xbf16> to vector<32x64xbf16>
      %cst_395 = arith.constant dense<0.000000e+00> : vector<96x64xf32>
      %482 = tpu.matmul %479, %481, %cst_395 {dimension_numbers = #tpu.dot_dimension_numbers<[1], [0], [0], [1], [0, 0, 1, 1], [], []>} : vector<96x32xbf16>, vector<32x64xbf16>, vector<96x64xf32> -> vector<96x64xf32>
      %483 = arith.addf %477, %482 : vector<96x64xf32>
      %c241 = arith.constant 241 : index
      %c0_396 = arith.constant 0 : index
      %484 = vector.load %arg14[%c241, %c0_396] : memref<440x32xf32, #tpu.memory_space<vmem>>, vector<96x32xf32>
      %485 = arith.truncf %484 : vector<96x32xf32> to vector<96x32xbf16>
      %c7_397 = arith.constant 7 : index
      %c0_398 = arith.constant 0 : index
      %c0_399 = arith.constant 0 : index
      %486 = vector.load %arg5[%c7_397, %c0_398, %c0_399] : memref<9x32x64xbf16, #tpu.memory_space<vmem>>, vector<1x32x64xbf16>
      %487 = vector.shape_cast %486 : vector<1x32x64xbf16> to vector<32x64xbf16>
      %cst_400 = arith.constant dense<0.000000e+00> : vector<96x64xf32>
      %488 = tpu.matmul %485, %487, %cst_400 {dimension_numbers = #tpu.dot_dimension_numbers<[1], [0], [0], [1], [0, 0, 1, 1], [], []>} : vector<96x32xbf16>, vector<32x64xbf16>, vector<96x64xf32> -> vector<96x64xf32>
      %489 = arith.addf %483, %488 : vector<96x64xf32>
      %c242 = arith.constant 242 : index
      %c0_401 = arith.constant 0 : index
      %490 = vector.load %arg14[%c242, %c0_401] : memref<440x32xf32, #tpu.memory_space<vmem>>, vector<96x32xf32>
      %491 = arith.truncf %490 : vector<96x32xf32> to vector<96x32xbf16>
      %c8_402 = arith.constant 8 : index
      %c0_403 = arith.constant 0 : index
      %c0_404 = arith.constant 0 : index
      %492 = vector.load %arg5[%c8_402, %c0_403, %c0_404] : memref<9x32x64xbf16, #tpu.memory_space<vmem>>, vector<1x32x64xbf16>
      %493 = vector.shape_cast %492 : vector<1x32x64xbf16> to vector<32x64xbf16>
      %cst_405 = arith.constant dense<0.000000e+00> : vector<96x64xf32>
      %494 = tpu.matmul %491, %493, %cst_405 {dimension_numbers = #tpu.dot_dimension_numbers<[1], [0], [0], [1], [0, 0, 1, 1], [], []>} : vector<96x32xbf16>, vector<32x64xbf16>, vector<96x64xf32> -> vector<96x64xf32>
      %495 = arith.addf %489, %494 : vector<96x64xf32>
      %c0_406 = arith.constant 0 : index
      %c0_407 = arith.constant 0 : index
      %496 = vector.load %arg6[%c0_406, %c0_407] : memref<1x64xf32, #tpu.memory_space<vmem>>, vector<1x64xf32>
      %497 = vector.broadcast %496 : vector<1x64xf32> to vector<96x64xf32>
      %498 = arith.addf %495, %497 : vector<96x64xf32>
      %cst_408 = arith.constant 0.000000e+00 : f32
      %499 = vector.broadcast %cst_408 : f32 to vector<96x64xf32>
      %500 = arith.maximumf %498, %499 : vector<96x64xf32>
      %c192_409 = arith.constant 192 : index
      %c0_410 = arith.constant 0 : index
      %501 = vector.load %arg15[%c192_409, %c0_410] : memref<384x64xf32, #tpu.memory_space<vmem>>, vector<96x64xf32>
      tpu.vector_store %arg15[%c192_409, %c0_410], %500 {strides = array<i32>} : memref<384x64xf32, #tpu.memory_space<vmem>>, vector<96x64xf32>,
      %c288_411 = arith.constant 288 : index
      %c0_412 = arith.constant 0 : index
      %502 = vector.load %arg14[%c288_411, %c0_412] : memref<440x32xf32, #tpu.memory_space<vmem>>, vector<96x32xf32>
      %503 = arith.truncf %502 : vector<96x32xf32> to vector<96x32xbf16>
      %c0_413 = arith.constant 0 : index
      %c0_414 = arith.constant 0 : index
      %c0_415 = arith.constant 0 : index
      %504 = vector.load %arg5[%c0_413, %c0_414, %c0_415] : memref<9x32x64xbf16, #tpu.memory_space<vmem>>, vector<1x32x64xbf16>
      %505 = vector.shape_cast %504 : vector<1x32x64xbf16> to vector<32x64xbf16>
      %cst_416 = arith.constant dense<0.000000e+00> : vector<96x64xf32>
      %506 = tpu.matmul %503, %505, %cst_416 {dimension_numbers = #tpu.dot_dimension_numbers<[1], [0], [0], [1], [0, 0, 1, 1], [], []>} : vector<96x32xbf16>, vector<32x64xbf16>, vector<96x64xf32> -> vector<96x64xf32>
      %c289 = arith.constant 289 : index
      %c0_417 = arith.constant 0 : index
      %507 = vector.load %arg14[%c289, %c0_417] : memref<440x32xf32, #tpu.memory_space<vmem>>, vector<96x32xf32>
      %508 = arith.truncf %507 : vector<96x32xf32> to vector<96x32xbf16>
      %c1_418 = arith.constant 1 : index
      %c0_419 = arith.constant 0 : index
      %c0_420 = arith.constant 0 : index
      %509 = vector.load %arg5[%c1_418, %c0_419, %c0_420] : memref<9x32x64xbf16, #tpu.memory_space<vmem>>, vector<1x32x64xbf16>
      %510 = vector.shape_cast %509 : vector<1x32x64xbf16> to vector<32x64xbf16>
      %cst_421 = arith.constant dense<0.000000e+00> : vector<96x64xf32>
      %511 = tpu.matmul %508, %510, %cst_421 {dimension_numbers = #tpu.dot_dimension_numbers<[1], [0], [0], [1], [0, 0, 1, 1], [], []>} : vector<96x32xbf16>, vector<32x64xbf16>, vector<96x64xf32> -> vector<96x64xf32>
      %512 = arith.addf %506, %511 : vector<96x64xf32>
      %c290 = arith.constant 290 : index
      %c0_422 = arith.constant 0 : index
      %513 = vector.load %arg14[%c290, %c0_422] : memref<440x32xf32, #tpu.memory_space<vmem>>, vector<96x32xf32>
      %514 = arith.truncf %513 : vector<96x32xf32> to vector<96x32xbf16>
      %c2_423 = arith.constant 2 : index
      %c0_424 = arith.constant 0 : index
      %c0_425 = arith.constant 0 : index
      %515 = vector.load %arg5[%c2_423, %c0_424, %c0_425] : memref<9x32x64xbf16, #tpu.memory_space<vmem>>, vector<1x32x64xbf16>
      %516 = vector.shape_cast %515 : vector<1x32x64xbf16> to vector<32x64xbf16>
      %cst_426 = arith.constant dense<0.000000e+00> : vector<96x64xf32>
      %517 = tpu.matmul %514, %516, %cst_426 {dimension_numbers = #tpu.dot_dimension_numbers<[1], [0], [0], [1], [0, 0, 1, 1], [], []>} : vector<96x32xbf16>, vector<32x64xbf16>, vector<96x64xf32> -> vector<96x64xf32>
      %518 = arith.addf %512, %517 : vector<96x64xf32>
      %c312 = arith.constant 312 : index
      %c0_427 = arith.constant 0 : index
      %519 = vector.load %arg14[%c312, %c0_427] : memref<440x32xf32, #tpu.memory_space<vmem>>, vector<96x32xf32>
      %520 = arith.truncf %519 : vector<96x32xf32> to vector<96x32xbf16>
      %c3_428 = arith.constant 3 : index
      %c0_429 = arith.constant 0 : index
      %c0_430 = arith.constant 0 : index
      %521 = vector.load %arg5[%c3_428, %c0_429, %c0_430] : memref<9x32x64xbf16, #tpu.memory_space<vmem>>, vector<1x32x64xbf16>
      %522 = vector.shape_cast %521 : vector<1x32x64xbf16> to vector<32x64xbf16>
      %cst_431 = arith.constant dense<0.000000e+00> : vector<96x64xf32>
      %523 = tpu.matmul %520, %522, %cst_431 {dimension_numbers = #tpu.dot_dimension_numbers<[1], [0], [0], [1], [0, 0, 1, 1], [], []>} : vector<96x32xbf16>, vector<32x64xbf16>, vector<96x64xf32> -> vector<96x64xf32>
      %524 = arith.addf %518, %523 : vector<96x64xf32>
      %c313 = arith.constant 313 : index
      %c0_432 = arith.constant 0 : index
      %525 = vector.load %arg14[%c313, %c0_432] : memref<440x32xf32, #tpu.memory_space<vmem>>, vector<96x32xf32>
      %526 = arith.truncf %525 : vector<96x32xf32> to vector<96x32xbf16>
      %c4_433 = arith.constant 4 : index
      %c0_434 = arith.constant 0 : index
      %c0_435 = arith.constant 0 : index
      %527 = vector.load %arg5[%c4_433, %c0_434, %c0_435] : memref<9x32x64xbf16, #tpu.memory_space<vmem>>, vector<1x32x64xbf16>
      %528 = vector.shape_cast %527 : vector<1x32x64xbf16> to vector<32x64xbf16>
      %cst_436 = arith.constant dense<0.000000e+00> : vector<96x64xf32>
      %529 = tpu.matmul %526, %528, %cst_436 {dimension_numbers = #tpu.dot_dimension_numbers<[1], [0], [0], [1], [0, 0, 1, 1], [], []>} : vector<96x32xbf16>, vector<32x64xbf16>, vector<96x64xf32> -> vector<96x64xf32>
      %530 = arith.addf %524, %529 : vector<96x64xf32>
      %c314 = arith.constant 314 : index
      %c0_437 = arith.constant 0 : index
      %531 = vector.load %arg14[%c314, %c0_437] : memref<440x32xf32, #tpu.memory_space<vmem>>, vector<96x32xf32>
      %532 = arith.truncf %531 : vector<96x32xf32> to vector<96x32xbf16>
      %c5_438 = arith.constant 5 : index
      %c0_439 = arith.constant 0 : index
      %c0_440 = arith.constant 0 : index
      %533 = vector.load %arg5[%c5_438, %c0_439, %c0_440] : memref<9x32x64xbf16, #tpu.memory_space<vmem>>, vector<1x32x64xbf16>
      %534 = vector.shape_cast %533 : vector<1x32x64xbf16> to vector<32x64xbf16>
      %cst_441 = arith.constant dense<0.000000e+00> : vector<96x64xf32>
      %535 = tpu.matmul %532, %534, %cst_441 {dimension_numbers = #tpu.dot_dimension_numbers<[1], [0], [0], [1], [0, 0, 1, 1], [], []>} : vector<96x32xbf16>, vector<32x64xbf16>, vector<96x64xf32> -> vector<96x64xf32>
      %536 = arith.addf %530, %535 : vector<96x64xf32>
      %c336 = arith.constant 336 : index
      %c0_442 = arith.constant 0 : index
      %537 = vector.load %arg14[%c336, %c0_442] : memref<440x32xf32, #tpu.memory_space<vmem>>, vector<96x32xf32>
      %538 = arith.truncf %537 : vector<96x32xf32> to vector<96x32xbf16>
      %c6_443 = arith.constant 6 : index
      %c0_444 = arith.constant 0 : index
      %c0_445 = arith.constant 0 : index
      %539 = vector.load %arg5[%c6_443, %c0_444, %c0_445] : memref<9x32x64xbf16, #tpu.memory_space<vmem>>, vector<1x32x64xbf16>
      %540 = vector.shape_cast %539 : vector<1x32x64xbf16> to vector<32x64xbf16>
      %cst_446 = arith.constant dense<0.000000e+00> : vector<96x64xf32>
      %541 = tpu.matmul %538, %540, %cst_446 {dimension_numbers = #tpu.dot_dimension_numbers<[1], [0], [0], [1], [0, 0, 1, 1], [], []>} : vector<96x32xbf16>, vector<32x64xbf16>, vector<96x64xf32> -> vector<96x64xf32>
      %542 = arith.addf %536, %541 : vector<96x64xf32>
      %c337 = arith.constant 337 : index
      %c0_447 = arith.constant 0 : index
      %543 = vector.load %arg14[%c337, %c0_447] : memref<440x32xf32, #tpu.memory_space<vmem>>, vector<96x32xf32>
      %544 = arith.truncf %543 : vector<96x32xf32> to vector<96x32xbf16>
      %c7_448 = arith.constant 7 : index
      %c0_449 = arith.constant 0 : index
      %c0_450 = arith.constant 0 : index
      %545 = vector.load %arg5[%c7_448, %c0_449, %c0_450] : memref<9x32x64xbf16, #tpu.memory_space<vmem>>, vector<1x32x64xbf16>
      %546 = vector.shape_cast %545 : vector<1x32x64xbf16> to vector<32x64xbf16>
      %cst_451 = arith.constant dense<0.000000e+00> : vector<96x64xf32>
      %547 = tpu.matmul %544, %546, %cst_451 {dimension_numbers = #tpu.dot_dimension_numbers<[1], [0], [0], [1], [0, 0, 1, 1], [], []>} : vector<96x32xbf16>, vector<32x64xbf16>, vector<96x64xf32> -> vector<96x64xf32>
      %548 = arith.addf %542, %547 : vector<96x64xf32>
      %c338 = arith.constant 338 : index
      %c0_452 = arith.constant 0 : index
      %549 = vector.load %arg14[%c338, %c0_452] : memref<440x32xf32, #tpu.memory_space<vmem>>, vector<96x32xf32>
      %550 = arith.truncf %549 : vector<96x32xf32> to vector<96x32xbf16>
      %c8_453 = arith.constant 8 : index
      %c0_454 = arith.constant 0 : index
      %c0_455 = arith.constant 0 : index
      %551 = vector.load %arg5[%c8_453, %c0_454, %c0_455] : memref<9x32x64xbf16, #tpu.memory_space<vmem>>, vector<1x32x64xbf16>
      %552 = vector.shape_cast %551 : vector<1x32x64xbf16> to vector<32x64xbf16>
      %cst_456 = arith.constant dense<0.000000e+00> : vector<96x64xf32>
      %553 = tpu.matmul %550, %552, %cst_456 {dimension_numbers = #tpu.dot_dimension_numbers<[1], [0], [0], [1], [0, 0, 1, 1], [], []>} : vector<96x32xbf16>, vector<32x64xbf16>, vector<96x64xf32> -> vector<96x64xf32>
      %554 = arith.addf %548, %553 : vector<96x64xf32>
      %c0_457 = arith.constant 0 : index
      %c0_458 = arith.constant 0 : index
      %555 = vector.load %arg6[%c0_457, %c0_458] : memref<1x64xf32, #tpu.memory_space<vmem>>, vector<1x64xf32>
      %556 = vector.broadcast %555 : vector<1x64xf32> to vector<96x64xf32>
      %557 = arith.addf %554, %556 : vector<96x64xf32>
      %cst_459 = arith.constant 0.000000e+00 : f32
      %558 = vector.broadcast %cst_459 : f32 to vector<96x64xf32>
      %559 = arith.maximumf %557, %558 : vector<96x64xf32>
      %c288_460 = arith.constant 288 : index
      %c0_461 = arith.constant 0 : index
      %560 = vector.load %arg15[%c288_460, %c0_461] : memref<384x64xf32, #tpu.memory_space<vmem>>, vector<96x64xf32>
      tpu.vector_store %arg15[%c288_460, %c0_461], %559 {strides = array<i32>} : memref<384x64xf32, #tpu.memory_space<vmem>>, vector<96x64xf32>,
      %c0_462 = arith.constant 0 : index
      %c0_463 = arith.constant 0 : index
      %561 = tpu.strided_load %arg15[%c0_462, %c0_463] {strides = array<i32: 2, 1>} : memref<384x64xf32, #tpu.memory_space<vmem>>, vector<192x64xf32>
      %c1_464 = arith.constant 1 : index
      %c0_465 = arith.constant 0 : index
      %562 = tpu.strided_load %arg15[%c1_464, %c0_465] {strides = array<i32: 2, 1>} : memref<384x64xf32, #tpu.memory_space<vmem>>, vector<192x64xf32>
      %563 = arith.maximumf %561, %562 : vector<192x64xf32>
      %c0_466 = arith.constant 0 : index
      %c0_467 = arith.constant 0 : index
      %564 = vector.load %arg16[%c0_466, %c0_467] : memref<192x64xf32, #tpu.memory_space<vmem>>, vector<192x64xf32>
      tpu.vector_store %arg16[%c0_466, %c0_467], %563 {strides = array<i32>} : memref<192x64xf32, #tpu.memory_space<vmem>>, vector<192x64xf32>,
      %c0_468 = arith.constant 0 : index
      %c0_469 = arith.constant 0 : index
      %565 = vector.load %arg16[%c0_468, %c0_469] : memref<192x64xf32, #tpu.memory_space<vmem>>, vector<8x64xf32>
      %c12 = arith.constant 12 : index
      %c0_470 = arith.constant 0 : index
      %566 = vector.load %arg16[%c12, %c0_470] : memref<192x64xf32, #tpu.memory_space<vmem>>, vector<8x64xf32>
      %567 = arith.maximumf %565, %566 : vector<8x64xf32>
      %c17_471 = arith.constant 17 : index
      %c0_472 = arith.constant 0 : index
      %568 = vector.load %arg17[%c17_471, %c0_472] : memref<168x64xf32, #tpu.memory_space<vmem>>, vector<8x64xf32>
      tpu.vector_store %arg17[%c17_471, %c0_472], %567 {strides = array<i32>} : memref<168x64xf32, #tpu.memory_space<vmem>>, vector<8x64xf32>,
      %c24_473 = arith.constant 24 : index
      %c0_474 = arith.constant 0 : index
      %569 = vector.load %arg16[%c24_473, %c0_474] : memref<192x64xf32, #tpu.memory_space<vmem>>, vector<8x64xf32>
      %c36 = arith.constant 36 : index
      %c0_475 = arith.constant 0 : index
      %570 = vector.load %arg16[%c36, %c0_475] : memref<192x64xf32, #tpu.memory_space<vmem>>, vector<8x64xf32>
      %571 = arith.maximumf %569, %570 : vector<8x64xf32>
      %c33_476 = arith.constant 33 : index
      %c0_477 = arith.constant 0 : index
      %572 = vector.load %arg17[%c33_476, %c0_477] : memref<168x64xf32, #tpu.memory_space<vmem>>, vector<8x64xf32>
      tpu.vector_store %arg17[%c33_476, %c0_477], %571 {strides = array<i32>} : memref<168x64xf32, #tpu.memory_space<vmem>>, vector<8x64xf32>,
      %c48_478 = arith.constant 48 : index
      %c0_479 = arith.constant 0 : index
      %573 = vector.load %arg16[%c48_478, %c0_479] : memref<192x64xf32, #tpu.memory_space<vmem>>, vector<8x64xf32>
      %c60 = arith.constant 60 : index
      %c0_480 = arith.constant 0 : index
      %574 = vector.load %arg16[%c60, %c0_480] : memref<192x64xf32, #tpu.memory_space<vmem>>, vector<8x64xf32>
      %575 = arith.maximumf %573, %574 : vector<8x64xf32>
      %c49_481 = arith.constant 49 : index
      %c0_482 = arith.constant 0 : index
      %576 = vector.load %arg17[%c49_481, %c0_482] : memref<168x64xf32, #tpu.memory_space<vmem>>, vector<8x64xf32>
      tpu.vector_store %arg17[%c49_481, %c0_482], %575 {strides = array<i32>} : memref<168x64xf32, #tpu.memory_space<vmem>>, vector<8x64xf32>,
      %c72_483 = arith.constant 72 : index
      %c0_484 = arith.constant 0 : index
      %577 = vector.load %arg16[%c72_483, %c0_484] : memref<192x64xf32, #tpu.memory_space<vmem>>, vector<8x64xf32>
      %c84 = arith.constant 84 : index
      %c0_485 = arith.constant 0 : index
      %578 = vector.load %arg16[%c84, %c0_485] : memref<192x64xf32, #tpu.memory_space<vmem>>, vector<8x64xf32>
      %579 = arith.maximumf %577, %578 : vector<8x64xf32>
      %c65 = arith.constant 65 : index
      %c0_486 = arith.constant 0 : index
      %580 = vector.load %arg17[%c65, %c0_486] : memref<168x64xf32, #tpu.memory_space<vmem>>, vector<8x64xf32>
      tpu.vector_store %arg17[%c65, %c0_486], %579 {strides = array<i32>} : memref<168x64xf32, #tpu.memory_space<vmem>>, vector<8x64xf32>,
      %c96_487 = arith.constant 96 : index
      %c0_488 = arith.constant 0 : index
      %581 = vector.load %arg16[%c96_487, %c0_488] : memref<192x64xf32, #tpu.memory_space<vmem>>, vector<8x64xf32>
      %c108 = arith.constant 108 : index
      %c0_489 = arith.constant 0 : index
      %582 = vector.load %arg16[%c108, %c0_489] : memref<192x64xf32, #tpu.memory_space<vmem>>, vector<8x64xf32>
      %583 = arith.maximumf %581, %582 : vector<8x64xf32>
      %c81 = arith.constant 81 : index
      %c0_490 = arith.constant 0 : index
      %584 = vector.load %arg17[%c81, %c0_490] : memref<168x64xf32, #tpu.memory_space<vmem>>, vector<8x64xf32>
      tpu.vector_store %arg17[%c81, %c0_490], %583 {strides = array<i32>} : memref<168x64xf32, #tpu.memory_space<vmem>>, vector<8x64xf32>,
      %c120_491 = arith.constant 120 : index
      %c0_492 = arith.constant 0 : index
      %585 = vector.load %arg16[%c120_491, %c0_492] : memref<192x64xf32, #tpu.memory_space<vmem>>, vector<8x64xf32>
      %c132 = arith.constant 132 : index
      %c0_493 = arith.constant 0 : index
      %586 = vector.load %arg16[%c132, %c0_493] : memref<192x64xf32, #tpu.memory_space<vmem>>, vector<8x64xf32>
      %587 = arith.maximumf %585, %586 : vector<8x64xf32>
      %c97_494 = arith.constant 97 : index
      %c0_495 = arith.constant 0 : index
      %588 = vector.load %arg17[%c97_494, %c0_495] : memref<168x64xf32, #tpu.memory_space<vmem>>, vector<8x64xf32>
      tpu.vector_store %arg17[%c97_494, %c0_495], %587 {strides = array<i32>} : memref<168x64xf32, #tpu.memory_space<vmem>>, vector<8x64xf32>,
      %c144_496 = arith.constant 144 : index
      %c0_497 = arith.constant 0 : index
      %589 = vector.load %arg16[%c144_496, %c0_497] : memref<192x64xf32, #tpu.memory_space<vmem>>, vector<8x64xf32>
      %c156 = arith.constant 156 : index
      %c0_498 = arith.constant 0 : index
      %590 = vector.load %arg16[%c156, %c0_498] : memref<192x64xf32, #tpu.memory_space<vmem>>, vector<8x64xf32>
      %591 = arith.maximumf %589, %590 : vector<8x64xf32>
      %c113 = arith.constant 113 : index
      %c0_499 = arith.constant 0 : index
      %592 = vector.load %arg17[%c113, %c0_499] : memref<168x64xf32, #tpu.memory_space<vmem>>, vector<8x64xf32>
      tpu.vector_store %arg17[%c113, %c0_499], %591 {strides = array<i32>} : memref<168x64xf32, #tpu.memory_space<vmem>>, vector<8x64xf32>,
      %c168 = arith.constant 168 : index
      %c0_500 = arith.constant 0 : index
      %593 = vector.load %arg16[%c168, %c0_500] : memref<192x64xf32, #tpu.memory_space<vmem>>, vector<8x64xf32>
      %c180 = arith.constant 180 : index
      %c0_501 = arith.constant 0 : index
      %594 = vector.load %arg16[%c180, %c0_501] : memref<192x64xf32, #tpu.memory_space<vmem>>, vector<8x64xf32>
      %595 = arith.maximumf %593, %594 : vector<8x64xf32>
      %c129 = arith.constant 129 : index
      %c0_502 = arith.constant 0 : index
      %596 = vector.load %arg17[%c129, %c0_502] : memref<168x64xf32, #tpu.memory_space<vmem>>, vector<8x64xf32>
      tpu.vector_store %arg17[%c129, %c0_502], %595 {strides = array<i32>} : memref<168x64xf32, #tpu.memory_space<vmem>>, vector<8x64xf32>,
      %c0_503 = arith.constant 0 : index
      %c0_504 = arith.constant 0 : index
      %597 = vector.load %arg17[%c0_503, %c0_504] : memref<168x64xf32, #tpu.memory_space<vmem>>, vector<64x64xf32>
      %598 = arith.truncf %597 : vector<64x64xf32> to vector<64x64xbf16>
      %c0_505 = arith.constant 0 : index
      %c0_506 = arith.constant 0 : index
      %c0_507 = arith.constant 0 : index
      %599 = vector.load %arg7[%c0_505, %c0_506, %c0_507] : memref<9x64x64xbf16, #tpu.memory_space<vmem>>, vector<1x64x64xbf16>
      %600 = vector.shape_cast %599 : vector<1x64x64xbf16> to vector<64x64xbf16>
      %cst_508 = arith.constant dense<0.000000e+00> : vector<64x64xf32>
      %601 = tpu.matmul %598, %600, %cst_508 {dimension_numbers = #tpu.dot_dimension_numbers<[1], [0], [0], [1], [0, 0, 1, 1], [], []>} : vector<64x64xbf16>, vector<64x64xbf16>, vector<64x64xf32> -> vector<64x64xf32>
      %c1_509 = arith.constant 1 : index
      %c0_510 = arith.constant 0 : index
      %602 = vector.load %arg17[%c1_509, %c0_510] : memref<168x64xf32, #tpu.memory_space<vmem>>, vector<64x64xf32>
      %603 = arith.truncf %602 : vector<64x64xf32> to vector<64x64xbf16>
      %c1_511 = arith.constant 1 : index
      %c0_512 = arith.constant 0 : index
      %c0_513 = arith.constant 0 : index
      %604 = vector.load %arg7[%c1_511, %c0_512, %c0_513] : memref<9x64x64xbf16, #tpu.memory_space<vmem>>, vector<1x64x64xbf16>
      %605 = vector.shape_cast %604 : vector<1x64x64xbf16> to vector<64x64xbf16>
      %cst_514 = arith.constant dense<0.000000e+00> : vector<64x64xf32>
      %606 = tpu.matmul %603, %605, %cst_514 {dimension_numbers = #tpu.dot_dimension_numbers<[1], [0], [0], [1], [0, 0, 1, 1], [], []>} : vector<64x64xbf16>, vector<64x64xbf16>, vector<64x64xf32> -> vector<64x64xf32>
      %607 = arith.addf %601, %606 : vector<64x64xf32>
      %c2_515 = arith.constant 2 : index
      %c0_516 = arith.constant 0 : index
      %608 = vector.load %arg17[%c2_515, %c0_516] : memref<168x64xf32, #tpu.memory_space<vmem>>, vector<64x64xf32>
      %609 = arith.truncf %608 : vector<64x64xf32> to vector<64x64xbf16>
      %c2_517 = arith.constant 2 : index
      %c0_518 = arith.constant 0 : index
      %c0_519 = arith.constant 0 : index
      %610 = vector.load %arg7[%c2_517, %c0_518, %c0_519] : memref<9x64x64xbf16, #tpu.memory_space<vmem>>, vector<1x64x64xbf16>
      %611 = vector.shape_cast %610 : vector<1x64x64xbf16> to vector<64x64xbf16>
      %cst_520 = arith.constant dense<0.000000e+00> : vector<64x64xf32>
      %612 = tpu.matmul %609, %611, %cst_520 {dimension_numbers = #tpu.dot_dimension_numbers<[1], [0], [0], [1], [0, 0, 1, 1], [], []>} : vector<64x64xbf16>, vector<64x64xbf16>, vector<64x64xf32> -> vector<64x64xf32>
      %613 = arith.addf %607, %612 : vector<64x64xf32>
      %c16_521 = arith.constant 16 : index
      %c0_522 = arith.constant 0 : index
      %614 = vector.load %arg17[%c16_521, %c0_522] : memref<168x64xf32, #tpu.memory_space<vmem>>, vector<64x64xf32>
      %615 = arith.truncf %614 : vector<64x64xf32> to vector<64x64xbf16>
      %c3_523 = arith.constant 3 : index
      %c0_524 = arith.constant 0 : index
      %c0_525 = arith.constant 0 : index
      %616 = vector.load %arg7[%c3_523, %c0_524, %c0_525] : memref<9x64x64xbf16, #tpu.memory_space<vmem>>, vector<1x64x64xbf16>
      %617 = vector.shape_cast %616 : vector<1x64x64xbf16> to vector<64x64xbf16>
      %cst_526 = arith.constant dense<0.000000e+00> : vector<64x64xf32>
      %618 = tpu.matmul %615, %617, %cst_526 {dimension_numbers = #tpu.dot_dimension_numbers<[1], [0], [0], [1], [0, 0, 1, 1], [], []>} : vector<64x64xbf16>, vector<64x64xbf16>, vector<64x64xf32> -> vector<64x64xf32>
      %619 = arith.addf %613, %618 : vector<64x64xf32>
      %c17_527 = arith.constant 17 : index
      %c0_528 = arith.constant 0 : index
      %620 = vector.load %arg17[%c17_527, %c0_528] : memref<168x64xf32, #tpu.memory_space<vmem>>, vector<64x64xf32>
      %621 = arith.truncf %620 : vector<64x64xf32> to vector<64x64xbf16>
      %c4_529 = arith.constant 4 : index
      %c0_530 = arith.constant 0 : index
      %c0_531 = arith.constant 0 : index
      %622 = vector.load %arg7[%c4_529, %c0_530, %c0_531] : memref<9x64x64xbf16, #tpu.memory_space<vmem>>, vector<1x64x64xbf16>
      %623 = vector.shape_cast %622 : vector<1x64x64xbf16> to vector<64x64xbf16>
      %cst_532 = arith.constant dense<0.000000e+00> : vector<64x64xf32>
      %624 = tpu.matmul %621, %623, %cst_532 {dimension_numbers = #tpu.dot_dimension_numbers<[1], [0], [0], [1], [0, 0, 1, 1], [], []>} : vector<64x64xbf16>, vector<64x64xbf16>, vector<64x64xf32> -> vector<64x64xf32>
      %625 = arith.addf %619, %624 : vector<64x64xf32>
      %c18_533 = arith.constant 18 : index
      %c0_534 = arith.constant 0 : index
      %626 = vector.load %arg17[%c18_533, %c0_534] : memref<168x64xf32, #tpu.memory_space<vmem>>, vector<64x64xf32>
      %627 = arith.truncf %626 : vector<64x64xf32> to vector<64x64xbf16>
      %c5_535 = arith.constant 5 : index
      %c0_536 = arith.constant 0 : index
      %c0_537 = arith.constant 0 : index
      %628 = vector.load %arg7[%c5_535, %c0_536, %c0_537] : memref<9x64x64xbf16, #tpu.memory_space<vmem>>, vector<1x64x64xbf16>
      %629 = vector.shape_cast %628 : vector<1x64x64xbf16> to vector<64x64xbf16>
      %cst_538 = arith.constant dense<0.000000e+00> : vector<64x64xf32>
      %630 = tpu.matmul %627, %629, %cst_538 {dimension_numbers = #tpu.dot_dimension_numbers<[1], [0], [0], [1], [0, 0, 1, 1], [], []>} : vector<64x64xbf16>, vector<64x64xbf16>, vector<64x64xf32> -> vector<64x64xf32>
      %631 = arith.addf %625, %630 : vector<64x64xf32>
      %c32_539 = arith.constant 32 : index
      %c0_540 = arith.constant 0 : index
      %632 = vector.load %arg17[%c32_539, %c0_540] : memref<168x64xf32, #tpu.memory_space<vmem>>, vector<64x64xf32>
      %633 = arith.truncf %632 : vector<64x64xf32> to vector<64x64xbf16>
      %c6_541 = arith.constant 6 : index
      %c0_542 = arith.constant 0 : index
      %c0_543 = arith.constant 0 : index
      %634 = vector.load %arg7[%c6_541, %c0_542, %c0_543] : memref<9x64x64xbf16, #tpu.memory_space<vmem>>, vector<1x64x64xbf16>
      %635 = vector.shape_cast %634 : vector<1x64x64xbf16> to vector<64x64xbf16>
      %cst_544 = arith.constant dense<0.000000e+00> : vector<64x64xf32>
      %636 = tpu.matmul %633, %635, %cst_544 {dimension_numbers = #tpu.dot_dimension_numbers<[1], [0], [0], [1], [0, 0, 1, 1], [], []>} : vector<64x64xbf16>, vector<64x64xbf16>, vector<64x64xf32> -> vector<64x64xf32>
      %637 = arith.addf %631, %636 : vector<64x64xf32>
      %c33_545 = arith.constant 33 : index
      %c0_546 = arith.constant 0 : index
      %638 = vector.load %arg17[%c33_545, %c0_546] : memref<168x64xf32, #tpu.memory_space<vmem>>, vector<64x64xf32>
      %639 = arith.truncf %638 : vector<64x64xf32> to vector<64x64xbf16>
      %c7_547 = arith.constant 7 : index
      %c0_548 = arith.constant 0 : index
      %c0_549 = arith.constant 0 : index
      %640 = vector.load %arg7[%c7_547, %c0_548, %c0_549] : memref<9x64x64xbf16, #tpu.memory_space<vmem>>, vector<1x64x64xbf16>
      %641 = vector.shape_cast %640 : vector<1x64x64xbf16> to vector<64x64xbf16>
      %cst_550 = arith.constant dense<0.000000e+00> : vector<64x64xf32>
      %642 = tpu.matmul %639, %641, %cst_550 {dimension_numbers = #tpu.dot_dimension_numbers<[1], [0], [0], [1], [0, 0, 1, 1], [], []>} : vector<64x64xbf16>, vector<64x64xbf16>, vector<64x64xf32> -> vector<64x64xf32>
      %643 = arith.addf %637, %642 : vector<64x64xf32>
      %c34_551 = arith.constant 34 : index
      %c0_552 = arith.constant 0 : index
      %644 = vector.load %arg17[%c34_551, %c0_552] : memref<168x64xf32, #tpu.memory_space<vmem>>, vector<64x64xf32>
      %645 = arith.truncf %644 : vector<64x64xf32> to vector<64x64xbf16>
      %c8_553 = arith.constant 8 : index
      %c0_554 = arith.constant 0 : index
      %c0_555 = arith.constant 0 : index
      %646 = vector.load %arg7[%c8_553, %c0_554, %c0_555] : memref<9x64x64xbf16, #tpu.memory_space<vmem>>, vector<1x64x64xbf16>
      %647 = vector.shape_cast %646 : vector<1x64x64xbf16> to vector<64x64xbf16>
      %cst_556 = arith.constant dense<0.000000e+00> : vector<64x64xf32>
      %648 = tpu.matmul %645, %647, %cst_556 {dimension_numbers = #tpu.dot_dimension_numbers<[1], [0], [0], [1], [0, 0, 1, 1], [], []>} : vector<64x64xbf16>, vector<64x64xbf16>, vector<64x64xf32> -> vector<64x64xf32>
      %649 = arith.addf %643, %648 : vector<64x64xf32>
      %c0_557 = arith.constant 0 : index
      %c0_558 = arith.constant 0 : index
      %650 = vector.load %arg8[%c0_557, %c0_558] : memref<1x64xf32, #tpu.memory_space<vmem>>, vector<1x64xf32>
      %651 = vector.broadcast %650 : vector<1x64xf32> to vector<64x64xf32>
      %652 = arith.addf %649, %651 : vector<64x64xf32>
      %cst_559 = arith.constant 0.000000e+00 : f32
      %653 = vector.broadcast %cst_559 : f32 to vector<64x64xf32>
      %654 = arith.maximumf %652, %653 : vector<64x64xf32>
      %c0_560 = arith.constant 0 : index
      %c0_561 = arith.constant 0 : index
      %655 = vector.load %arg18[%c0_560, %c0_561] : memref<128x64xf32, #tpu.memory_space<vmem>>, vector<64x64xf32>
      tpu.vector_store %arg18[%c0_560, %c0_561], %654 {strides = array<i32>} : memref<128x64xf32, #tpu.memory_space<vmem>>, vector<64x64xf32>,
      %c64_562 = arith.constant 64 : index
      %c0_563 = arith.constant 0 : index
      %656 = vector.load %arg17[%c64_562, %c0_563] : memref<168x64xf32, #tpu.memory_space<vmem>>, vector<64x64xf32>
      %657 = arith.truncf %656 : vector<64x64xf32> to vector<64x64xbf16>
      %c0_564 = arith.constant 0 : index
      %c0_565 = arith.constant 0 : index
      %c0_566 = arith.constant 0 : index
      %658 = vector.load %arg7[%c0_564, %c0_565, %c0_566] : memref<9x64x64xbf16, #tpu.memory_space<vmem>>, vector<1x64x64xbf16>
      %659 = vector.shape_cast %658 : vector<1x64x64xbf16> to vector<64x64xbf16>
      %cst_567 = arith.constant dense<0.000000e+00> : vector<64x64xf32>
      %660 = tpu.matmul %657, %659, %cst_567 {dimension_numbers = #tpu.dot_dimension_numbers<[1], [0], [0], [1], [0, 0, 1, 1], [], []>} : vector<64x64xbf16>, vector<64x64xbf16>, vector<64x64xf32> -> vector<64x64xf32>
      %c65_568 = arith.constant 65 : index
      %c0_569 = arith.constant 0 : index
      %661 = vector.load %arg17[%c65_568, %c0_569] : memref<168x64xf32, #tpu.memory_space<vmem>>, vector<64x64xf32>
      %662 = arith.truncf %661 : vector<64x64xf32> to vector<64x64xbf16>
      %c1_570 = arith.constant 1 : index
      %c0_571 = arith.constant 0 : index
      %c0_572 = arith.constant 0 : index
      %663 = vector.load %arg7[%c1_570, %c0_571, %c0_572] : memref<9x64x64xbf16, #tpu.memory_space<vmem>>, vector<1x64x64xbf16>
      %664 = vector.shape_cast %663 : vector<1x64x64xbf16> to vector<64x64xbf16>
      %cst_573 = arith.constant dense<0.000000e+00> : vector<64x64xf32>
      %665 = tpu.matmul %662, %664, %cst_573 {dimension_numbers = #tpu.dot_dimension_numbers<[1], [0], [0], [1], [0, 0, 1, 1], [], []>} : vector<64x64xbf16>, vector<64x64xbf16>, vector<64x64xf32> -> vector<64x64xf32>
      %666 = arith.addf %660, %665 : vector<64x64xf32>
      %c66 = arith.constant 66 : index
      %c0_574 = arith.constant 0 : index
      %667 = vector.load %arg17[%c66, %c0_574] : memref<168x64xf32, #tpu.memory_space<vmem>>, vector<64x64xf32>
      %668 = arith.truncf %667 : vector<64x64xf32> to vector<64x64xbf16>
      %c2_575 = arith.constant 2 : index
      %c0_576 = arith.constant 0 : index
      %c0_577 = arith.constant 0 : index
      %669 = vector.load %arg7[%c2_575, %c0_576, %c0_577] : memref<9x64x64xbf16, #tpu.memory_space<vmem>>, vector<1x64x64xbf16>
      %670 = vector.shape_cast %669 : vector<1x64x64xbf16> to vector<64x64xbf16>
      %cst_578 = arith.constant dense<0.000000e+00> : vector<64x64xf32>
      %671 = tpu.matmul %668, %670, %cst_578 {dimension_numbers = #tpu.dot_dimension_numbers<[1], [0], [0], [1], [0, 0, 1, 1], [], []>} : vector<64x64xbf16>, vector<64x64xbf16>, vector<64x64xf32> -> vector<64x64xf32>
      %672 = arith.addf %666, %671 : vector<64x64xf32>
      %c80 = arith.constant 80 : index
      %c0_579 = arith.constant 0 : index
      %673 = vector.load %arg17[%c80, %c0_579] : memref<168x64xf32, #tpu.memory_space<vmem>>, vector<64x64xf32>
      %674 = arith.truncf %673 : vector<64x64xf32> to vector<64x64xbf16>
      %c3_580 = arith.constant 3 : index
      %c0_581 = arith.constant 0 : index
      %c0_582 = arith.constant 0 : index
      %675 = vector.load %arg7[%c3_580, %c0_581, %c0_582] : memref<9x64x64xbf16, #tpu.memory_space<vmem>>, vector<1x64x64xbf16>
      %676 = vector.shape_cast %675 : vector<1x64x64xbf16> to vector<64x64xbf16>
      %cst_583 = arith.constant dense<0.000000e+00> : vector<64x64xf32>
      %677 = tpu.matmul %674, %676, %cst_583 {dimension_numbers = #tpu.dot_dimension_numbers<[1], [0], [0], [1], [0, 0, 1, 1], [], []>} : vector<64x64xbf16>, vector<64x64xbf16>, vector<64x64xf32> -> vector<64x64xf32>
      %678 = arith.addf %672, %677 : vector<64x64xf32>
      %c81_584 = arith.constant 81 : index
      %c0_585 = arith.constant 0 : index
      %679 = vector.load %arg17[%c81_584, %c0_585] : memref<168x64xf32, #tpu.memory_space<vmem>>, vector<64x64xf32>
      %680 = arith.truncf %679 : vector<64x64xf32> to vector<64x64xbf16>
      %c4_586 = arith.constant 4 : index
      %c0_587 = arith.constant 0 : index
      %c0_588 = arith.constant 0 : index
      %681 = vector.load %arg7[%c4_586, %c0_587, %c0_588] : memref<9x64x64xbf16, #tpu.memory_space<vmem>>, vector<1x64x64xbf16>
      %682 = vector.shape_cast %681 : vector<1x64x64xbf16> to vector<64x64xbf16>
      %cst_589 = arith.constant dense<0.000000e+00> : vector<64x64xf32>
      %683 = tpu.matmul %680, %682, %cst_589 {dimension_numbers = #tpu.dot_dimension_numbers<[1], [0], [0], [1], [0, 0, 1, 1], [], []>} : vector<64x64xbf16>, vector<64x64xbf16>, vector<64x64xf32> -> vector<64x64xf32>
      %684 = arith.addf %678, %683 : vector<64x64xf32>
      %c82 = arith.constant 82 : index
      %c0_590 = arith.constant 0 : index
      %685 = vector.load %arg17[%c82, %c0_590] : memref<168x64xf32, #tpu.memory_space<vmem>>, vector<64x64xf32>
      %686 = arith.truncf %685 : vector<64x64xf32> to vector<64x64xbf16>
      %c5_591 = arith.constant 5 : index
      %c0_592 = arith.constant 0 : index
      %c0_593 = arith.constant 0 : index
      %687 = vector.load %arg7[%c5_591, %c0_592, %c0_593] : memref<9x64x64xbf16, #tpu.memory_space<vmem>>, vector<1x64x64xbf16>
      %688 = vector.shape_cast %687 : vector<1x64x64xbf16> to vector<64x64xbf16>
      %cst_594 = arith.constant dense<0.000000e+00> : vector<64x64xf32>
      %689 = tpu.matmul %686, %688, %cst_594 {dimension_numbers = #tpu.dot_dimension_numbers<[1], [0], [0], [1], [0, 0, 1, 1], [], []>} : vector<64x64xbf16>, vector<64x64xbf16>, vector<64x64xf32> -> vector<64x64xf32>
      %690 = arith.addf %684, %689 : vector<64x64xf32>
      %c96_595 = arith.constant 96 : index
      %c0_596 = arith.constant 0 : index
      %691 = vector.load %arg17[%c96_595, %c0_596] : memref<168x64xf32, #tpu.memory_space<vmem>>, vector<64x64xf32>
      %692 = arith.truncf %691 : vector<64x64xf32> to vector<64x64xbf16>
      %c6_597 = arith.constant 6 : index
      %c0_598 = arith.constant 0 : index
      %c0_599 = arith.constant 0 : index
      %693 = vector.load %arg7[%c6_597, %c0_598, %c0_599] : memref<9x64x64xbf16, #tpu.memory_space<vmem>>, vector<1x64x64xbf16>
      %694 = vector.shape_cast %693 : vector<1x64x64xbf16> to vector<64x64xbf16>
      %cst_600 = arith.constant dense<0.000000e+00> : vector<64x64xf32>
      %695 = tpu.matmul %692, %694, %cst_600 {dimension_numbers = #tpu.dot_dimension_numbers<[1], [0], [0], [1], [0, 0, 1, 1], [], []>} : vector<64x64xbf16>, vector<64x64xbf16>, vector<64x64xf32> -> vector<64x64xf32>
      %696 = arith.addf %690, %695 : vector<64x64xf32>
      %c97_601 = arith.constant 97 : index
      %c0_602 = arith.constant 0 : index
      %697 = vector.load %arg17[%c97_601, %c0_602] : memref<168x64xf32, #tpu.memory_space<vmem>>, vector<64x64xf32>
      %698 = arith.truncf %697 : vector<64x64xf32> to vector<64x64xbf16>
      %c7_603 = arith.constant 7 : index
      %c0_604 = arith.constant 0 : index
      %c0_605 = arith.constant 0 : index
      %699 = vector.load %arg7[%c7_603, %c0_604, %c0_605] : memref<9x64x64xbf16, #tpu.memory_space<vmem>>, vector<1x64x64xbf16>
      %700 = vector.shape_cast %699 : vector<1x64x64xbf16> to vector<64x64xbf16>
      %cst_606 = arith.constant dense<0.000000e+00> : vector<64x64xf32>
      %701 = tpu.matmul %698, %700, %cst_606 {dimension_numbers = #tpu.dot_dimension_numbers<[1], [0], [0], [1], [0, 0, 1, 1], [], []>} : vector<64x64xbf16>, vector<64x64xbf16>, vector<64x64xf32> -> vector<64x64xf32>
      %702 = arith.addf %696, %701 : vector<64x64xf32>
      %c98_607 = arith.constant 98 : index
      %c0_608 = arith.constant 0 : index
      %703 = vector.load %arg17[%c98_607, %c0_608] : memref<168x64xf32, #tpu.memory_space<vmem>>, vector<64x64xf32>
      %704 = arith.truncf %703 : vector<64x64xf32> to vector<64x64xbf16>
      %c8_609 = arith.constant 8 : index
      %c0_610 = arith.constant 0 : index
      %c0_611 = arith.constant 0 : index
      %705 = vector.load %arg7[%c8_609, %c0_610, %c0_611] : memref<9x64x64xbf16, #tpu.memory_space<vmem>>, vector<1x64x64xbf16>
      %706 = vector.shape_cast %705 : vector<1x64x64xbf16> to vector<64x64xbf16>
      %cst_612 = arith.constant dense<0.000000e+00> : vector<64x64xf32>
      %707 = tpu.matmul %704, %706, %cst_612 {dimension_numbers = #tpu.dot_dimension_numbers<[1], [0], [0], [1], [0, 0, 1, 1], [], []>} : vector<64x64xbf16>, vector<64x64xbf16>, vector<64x64xf32> -> vector<64x64xf32>
      %708 = arith.addf %702, %707 : vector<64x64xf32>
      %c0_613 = arith.constant 0 : index
      %c0_614 = arith.constant 0 : index
      %709 = vector.load %arg8[%c0_613, %c0_614] : memref<1x64xf32, #tpu.memory_space<vmem>>, vector<1x64xf32>
      %710 = vector.broadcast %709 : vector<1x64xf32> to vector<64x64xf32>
      %711 = arith.addf %708, %710 : vector<64x64xf32>
      %cst_615 = arith.constant 0.000000e+00 : f32
      %712 = vector.broadcast %cst_615 : f32 to vector<64x64xf32>
      %713 = arith.maximumf %711, %712 : vector<64x64xf32>
      %c64_616 = arith.constant 64 : index
      %c0_617 = arith.constant 0 : index
      %714 = vector.load %arg18[%c64_616, %c0_617] : memref<128x64xf32, #tpu.memory_space<vmem>>, vector<64x64xf32>
      tpu.vector_store %arg18[%c64_616, %c0_617], %713 {strides = array<i32>} : memref<128x64xf32, #tpu.memory_space<vmem>>, vector<64x64xf32>,
      %c64_i32 = arith.constant 64 : i32
      %715 = arith.muli %arg21, %c64_i32 : i32
      %716 = tpu.assume_multiple %715, 8 : i32
      %c0_618 = arith.constant 0 : index
      %c0_619 = arith.constant 0 : index
      %717 = tpu.strided_load %arg18[%c0_618, %c0_619] {strides = array<i32: 2, 1>} : memref<128x64xf32, #tpu.memory_space<vmem>>, vector<64x64xf32>
      %c1_620 = arith.constant 1 : index
      %c0_621 = arith.constant 0 : index
      %718 = tpu.strided_load %arg18[%c1_620, %c0_621] {strides = array<i32: 2, 1>} : memref<128x64xf32, #tpu.memory_space<vmem>>, vector<64x64xf32>
      %719 = arith.maximumf %717, %718 : vector<64x64xf32>
      %720 = arith.index_cast %716 : i32 to index
      %c0_622 = arith.constant 0 : index
      %721 = vector.load %arg19[%720, %c0_622] : memref<512x64xf32, #tpu.memory_space<vmem>>, vector<64x64xf32>
      tpu.vector_store %arg19[%720, %c0_622], %719 {strides = array<i32>} : memref<512x64xf32, #tpu.memory_space<vmem>>, vector<64x64xf32>,
    }
    %c8_i32_1 = arith.constant 8 : i32
    %c0_2 = arith.constant 0 : index
    %c0_3 = arith.constant 0 : index
    %3 = tpu.strided_load %arg19[%c0_2, %c0_3] {strides = array<i32: 64, 1>} : memref<512x64xf32, #tpu.memory_space<vmem>>, vector<8x64xf32>
    %c8 = arith.constant 8 : index
    %c0_4 = arith.constant 0 : index
    %4 = tpu.strided_load %arg19[%c8, %c0_4] {strides = array<i32: 64, 1>} : memref<512x64xf32, #tpu.memory_space<vmem>>, vector<8x64xf32>
    %5 = arith.maximumf %3, %4 : vector<8x64xf32>
    %c0_5 = arith.constant 0 : index
    %c0_6 = arith.constant 0 : index
    %6 = vector.load %arg20[%c0_5, %c0_6] : memref<8x1024xf32, #tpu.memory_space<vmem>>, vector<8x64xf32>
    tpu.vector_store %arg20[%c0_5, %c0_6], %5 {strides = array<i32>} : memref<8x1024xf32, #tpu.memory_space<vmem>>, vector<8x64xf32>,
    %c1 = arith.constant 1 : index
    %c0_7 = arith.constant 0 : index
    %7 = tpu.strided_load %arg19[%c1, %c0_7] {strides = array<i32: 64, 1>} : memref<512x64xf32, #tpu.memory_space<vmem>>, vector<8x64xf32>
    %c9 = arith.constant 9 : index
    %c0_8 = arith.constant 0 : index
    %8 = tpu.strided_load %arg19[%c9, %c0_8] {strides = array<i32: 64, 1>} : memref<512x64xf32, #tpu.memory_space<vmem>>, vector<8x64xf32>
    %9 = arith.maximumf %7, %8 : vector<8x64xf32>
    %c0_9 = arith.constant 0 : index
    %c64 = arith.constant 64 : index
    %10 = vector.load %arg20[%c0_9, %c64] : memref<8x1024xf32, #tpu.memory_space<vmem>>, vector<8x64xf32>
    tpu.vector_store %arg20[%c0_9, %c64], %9 {strides = array<i32>} : memref<8x1024xf32, #tpu.memory_space<vmem>>, vector<8x64xf32>,
    %c2 = arith.constant 2 : index
    %c0_10 = arith.constant 0 : index
    %11 = tpu.strided_load %arg19[%c2, %c0_10] {strides = array<i32: 64, 1>} : memref<512x64xf32, #tpu.memory_space<vmem>>, vector<8x64xf32>
    %c10 = arith.constant 10 : index
    %c0_11 = arith.constant 0 : index
    %12 = tpu.strided_load %arg19[%c10, %c0_11] {strides = array<i32: 64, 1>} : memref<512x64xf32, #tpu.memory_space<vmem>>, vector<8x64xf32>
    %13 = arith.maximumf %11, %12 : vector<8x64xf32>
    %c0_12 = arith.constant 0 : index
    %c128 = arith.constant 128 : index
    %14 = vector.load %arg20[%c0_12, %c128] : memref<8x1024xf32, #tpu.memory_space<vmem>>, vector<8x64xf32>
    tpu.vector_store %arg20[%c0_12, %c128], %13 {strides = array<i32>} : memref<8x1024xf32, #tpu.memory_space<vmem>>, vector<8x64xf32>,
    %c3 = arith.constant 3 : index
    %c0_13 = arith.constant 0 : index
    %15 = tpu.strided_load %arg19[%c3, %c0_13] {strides = array<i32: 64, 1>} : memref<512x64xf32, #tpu.memory_space<vmem>>, vector<8x64xf32>
    %c11 = arith.constant 11 : index
    %c0_14 = arith.constant 0 : index
    %16 = tpu.strided_load %arg19[%c11, %c0_14] {strides = array<i32: 64, 1>} : memref<512x64xf32, #tpu.memory_space<vmem>>, vector<8x64xf32>
    %17 = arith.maximumf %15, %16 : vector<8x64xf32>
    %c0_15 = arith.constant 0 : index
    %c192 = arith.constant 192 : index
    %18 = vector.load %arg20[%c0_15, %c192] : memref<8x1024xf32, #tpu.memory_space<vmem>>, vector<8x64xf32>
    tpu.vector_store %arg20[%c0_15, %c192], %17 {strides = array<i32>} : memref<8x1024xf32, #tpu.memory_space<vmem>>, vector<8x64xf32>,
    %c16 = arith.constant 16 : index
    %c0_16 = arith.constant 0 : index
    %19 = tpu.strided_load %arg19[%c16, %c0_16] {strides = array<i32: 64, 1>} : memref<512x64xf32, #tpu.memory_space<vmem>>, vector<8x64xf32>
    %c24 = arith.constant 24 : index
    %c0_17 = arith.constant 0 : index
    %20 = tpu.strided_load %arg19[%c24, %c0_17] {strides = array<i32: 64, 1>} : memref<512x64xf32, #tpu.memory_space<vmem>>, vector<8x64xf32>
    %21 = arith.maximumf %19, %20 : vector<8x64xf32>
    %c0_18 = arith.constant 0 : index
    %c256 = arith.constant 256 : index
    %22 = vector.load %arg20[%c0_18, %c256] : memref<8x1024xf32, #tpu.memory_space<vmem>>, vector<8x64xf32>
    tpu.vector_store %arg20[%c0_18, %c256], %21 {strides = array<i32>} : memref<8x1024xf32, #tpu.memory_space<vmem>>, vector<8x64xf32>,
    %c17 = arith.constant 17 : index
    %c0_19 = arith.constant 0 : index
    %23 = tpu.strided_load %arg19[%c17, %c0_19] {strides = array<i32: 64, 1>} : memref<512x64xf32, #tpu.memory_space<vmem>>, vector<8x64xf32>
    %c25 = arith.constant 25 : index
    %c0_20 = arith.constant 0 : index
    %24 = tpu.strided_load %arg19[%c25, %c0_20] {strides = array<i32: 64, 1>} : memref<512x64xf32, #tpu.memory_space<vmem>>, vector<8x64xf32>
    %25 = arith.maximumf %23, %24 : vector<8x64xf32>
    %c0_21 = arith.constant 0 : index
    %c320 = arith.constant 320 : index
    %26 = vector.load %arg20[%c0_21, %c320] : memref<8x1024xf32, #tpu.memory_space<vmem>>, vector<8x64xf32>
    tpu.vector_store %arg20[%c0_21, %c320], %25 {strides = array<i32>} : memref<8x1024xf32, #tpu.memory_space<vmem>>, vector<8x64xf32>,
    %c18 = arith.constant 18 : index
    %c0_22 = arith.constant 0 : index
    %27 = tpu.strided_load %arg19[%c18, %c0_22] {strides = array<i32: 64, 1>} : memref<512x64xf32, #tpu.memory_space<vmem>>, vector<8x64xf32>
    %c26 = arith.constant 26 : index
    %c0_23 = arith.constant 0 : index
    %28 = tpu.strided_load %arg19[%c26, %c0_23] {strides = array<i32: 64, 1>} : memref<512x64xf32, #tpu.memory_space<vmem>>, vector<8x64xf32>
    %29 = arith.maximumf %27, %28 : vector<8x64xf32>
    %c0_24 = arith.constant 0 : index
    %c384 = arith.constant 384 : index
    %30 = vector.load %arg20[%c0_24, %c384] : memref<8x1024xf32, #tpu.memory_space<vmem>>, vector<8x64xf32>
    tpu.vector_store %arg20[%c0_24, %c384], %29 {strides = array<i32>} : memref<8x1024xf32, #tpu.memory_space<vmem>>, vector<8x64xf32>,
    %c19 = arith.constant 19 : index
    %c0_25 = arith.constant 0 : index
    %31 = tpu.strided_load %arg19[%c19, %c0_25] {strides = array<i32: 64, 1>} : memref<512x64xf32, #tpu.memory_space<vmem>>, vector<8x64xf32>
    %c27 = arith.constant 27 : index
    %c0_26 = arith.constant 0 : index
    %32 = tpu.strided_load %arg19[%c27, %c0_26] {strides = array<i32: 64, 1>} : memref<512x64xf32, #tpu.memory_space<vmem>>, vector<8x64xf32>
    %33 = arith.maximumf %31, %32 : vector<8x64xf32>
    %c0_27 = arith.constant 0 : index
    %c448 = arith.constant 448 : index
    %34 = vector.load %arg20[%c0_27, %c448] : memref<8x1024xf32, #tpu.memory_space<vmem>>, vector<8x64xf32>
    tpu.vector_store %arg20[%c0_27, %c448], %33 {strides = array<i32>} : memref<8x1024xf32, #tpu.memory_space<vmem>>, vector<8x64xf32>,
    %c32 = arith.constant 32 : index
    %c0_28 = arith.constant 0 : index
    %35 = tpu.strided_load %arg19[%c32, %c0_28] {strides = array<i32: 64, 1>} : memref<512x64xf32, #tpu.memory_space<vmem>>, vector<8x64xf32>
    %c40 = arith.constant 40 : index
    %c0_29 = arith.constant 0 : index
    %36 = tpu.strided_load %arg19[%c40, %c0_29] {strides = array<i32: 64, 1>} : memref<512x64xf32, #tpu.memory_space<vmem>>, vector<8x64xf32>
    %37 = arith.maximumf %35, %36 : vector<8x64xf32>
    %c0_30 = arith.constant 0 : index
    %c512 = arith.constant 512 : index
    %38 = vector.load %arg20[%c0_30, %c512] : memref<8x1024xf32, #tpu.memory_space<vmem>>, vector<8x64xf32>
    tpu.vector_store %arg20[%c0_30, %c512], %37 {strides = array<i32>} : memref<8x1024xf32, #tpu.memory_space<vmem>>, vector<8x64xf32>,
    %c33 = arith.constant 33 : index
    %c0_31 = arith.constant 0 : index
    %39 = tpu.strided_load %arg19[%c33, %c0_31] {strides = array<i32: 64, 1>} : memref<512x64xf32, #tpu.memory_space<vmem>>, vector<8x64xf32>
    %c41 = arith.constant 41 : index
    %c0_32 = arith.constant 0 : index
    %40 = tpu.strided_load %arg19[%c41, %c0_32] {strides = array<i32: 64, 1>} : memref<512x64xf32, #tpu.memory_space<vmem>>, vector<8x64xf32>
    %41 = arith.maximumf %39, %40 : vector<8x64xf32>
    %c0_33 = arith.constant 0 : index
    %c576 = arith.constant 576 : index
    %42 = vector.load %arg20[%c0_33, %c576] : memref<8x1024xf32, #tpu.memory_space<vmem>>, vector<8x64xf32>
    tpu.vector_store %arg20[%c0_33, %c576], %41 {strides = array<i32>} : memref<8x1024xf32, #tpu.memory_space<vmem>>, vector<8x64xf32>,
    %c34 = arith.constant 34 : index
    %c0_34 = arith.constant 0 : index
    %43 = tpu.strided_load %arg19[%c34, %c0_34] {strides = array<i32: 64, 1>} : memref<512x64xf32, #tpu.memory_space<vmem>>, vector<8x64xf32>
    %c42 = arith.constant 42 : index
    %c0_35 = arith.constant 0 : index
    %44 = tpu.strided_load %arg19[%c42, %c0_35] {strides = array<i32: 64, 1>} : memref<512x64xf32, #tpu.memory_space<vmem>>, vector<8x64xf32>
    %45 = arith.maximumf %43, %44 : vector<8x64xf32>
    %c0_36 = arith.constant 0 : index
    %c640 = arith.constant 640 : index
    %46 = vector.load %arg20[%c0_36, %c640] : memref<8x1024xf32, #tpu.memory_space<vmem>>, vector<8x64xf32>
    tpu.vector_store %arg20[%c0_36, %c640], %45 {strides = array<i32>} : memref<8x1024xf32, #tpu.memory_space<vmem>>, vector<8x64xf32>,
    %c35 = arith.constant 35 : index
    %c0_37 = arith.constant 0 : index
    %47 = tpu.strided_load %arg19[%c35, %c0_37] {strides = array<i32: 64, 1>} : memref<512x64xf32, #tpu.memory_space<vmem>>, vector<8x64xf32>
    %c43 = arith.constant 43 : index
    %c0_38 = arith.constant 0 : index
    %48 = tpu.strided_load %arg19[%c43, %c0_38] {strides = array<i32: 64, 1>} : memref<512x64xf32, #tpu.memory_space<vmem>>, vector<8x64xf32>
    %49 = arith.maximumf %47, %48 : vector<8x64xf32>
    %c0_39 = arith.constant 0 : index
    %c704 = arith.constant 704 : index
    %50 = vector.load %arg20[%c0_39, %c704] : memref<8x1024xf32, #tpu.memory_space<vmem>>, vector<8x64xf32>
    tpu.vector_store %arg20[%c0_39, %c704], %49 {strides = array<i32>} : memref<8x1024xf32, #tpu.memory_space<vmem>>, vector<8x64xf32>,
    %c48 = arith.constant 48 : index
    %c0_40 = arith.constant 0 : index
    %51 = tpu.strided_load %arg19[%c48, %c0_40] {strides = array<i32: 64, 1>} : memref<512x64xf32, #tpu.memory_space<vmem>>, vector<8x64xf32>
    %c56 = arith.constant 56 : index
    %c0_41 = arith.constant 0 : index
    %52 = tpu.strided_load %arg19[%c56, %c0_41] {strides = array<i32: 64, 1>} : memref<512x64xf32, #tpu.memory_space<vmem>>, vector<8x64xf32>
    %53 = arith.maximumf %51, %52 : vector<8x64xf32>
    %c0_42 = arith.constant 0 : index
    %c768 = arith.constant 768 : index
    %54 = vector.load %arg20[%c0_42, %c768] : memref<8x1024xf32, #tpu.memory_space<vmem>>, vector<8x64xf32>
    tpu.vector_store %arg20[%c0_42, %c768], %53 {strides = array<i32>} : memref<8x1024xf32, #tpu.memory_space<vmem>>, vector<8x64xf32>,
    %c49 = arith.constant 49 : index
    %c0_43 = arith.constant 0 : index
    %55 = tpu.strided_load %arg19[%c49, %c0_43] {strides = array<i32: 64, 1>} : memref<512x64xf32, #tpu.memory_space<vmem>>, vector<8x64xf32>
    %c57 = arith.constant 57 : index
    %c0_44 = arith.constant 0 : index
    %56 = tpu.strided_load %arg19[%c57, %c0_44] {strides = array<i32: 64, 1>} : memref<512x64xf32, #tpu.memory_space<vmem>>, vector<8x64xf32>
    %57 = arith.maximumf %55, %56 : vector<8x64xf32>
    %c0_45 = arith.constant 0 : index
    %c832 = arith.constant 832 : index
    %58 = vector.load %arg20[%c0_45, %c832] : memref<8x1024xf32, #tpu.memory_space<vmem>>, vector<8x64xf32>
    tpu.vector_store %arg20[%c0_45, %c832], %57 {strides = array<i32>} : memref<8x1024xf32, #tpu.memory_space<vmem>>, vector<8x64xf32>,
    %c50 = arith.constant 50 : index
    %c0_46 = arith.constant 0 : index
    %59 = tpu.strided_load %arg19[%c50, %c0_46] {strides = array<i32: 64, 1>} : memref<512x64xf32, #tpu.memory_space<vmem>>, vector<8x64xf32>
    %c58 = arith.constant 58 : index
    %c0_47 = arith.constant 0 : index
    %60 = tpu.strided_load %arg19[%c58, %c0_47] {strides = array<i32: 64, 1>} : memref<512x64xf32, #tpu.memory_space<vmem>>, vector<8x64xf32>
    %61 = arith.maximumf %59, %60 : vector<8x64xf32>
    %c0_48 = arith.constant 0 : index
    %c896 = arith.constant 896 : index
    %62 = vector.load %arg20[%c0_48, %c896] : memref<8x1024xf32, #tpu.memory_space<vmem>>, vector<8x64xf32>
    tpu.vector_store %arg20[%c0_48, %c896], %61 {strides = array<i32>} : memref<8x1024xf32, #tpu.memory_space<vmem>>, vector<8x64xf32>,
    %c51 = arith.constant 51 : index
    %c0_49 = arith.constant 0 : index
    %63 = tpu.strided_load %arg19[%c51, %c0_49] {strides = array<i32: 64, 1>} : memref<512x64xf32, #tpu.memory_space<vmem>>, vector<8x64xf32>
    %c59 = arith.constant 59 : index
    %c0_50 = arith.constant 0 : index
    %64 = tpu.strided_load %arg19[%c59, %c0_50] {strides = array<i32: 64, 1>} : memref<512x64xf32, #tpu.memory_space<vmem>>, vector<8x64xf32>
    %65 = arith.maximumf %63, %64 : vector<8x64xf32>
    %c0_51 = arith.constant 0 : index
    %c960 = arith.constant 960 : index
    %66 = vector.load %arg20[%c0_51, %c960] : memref<8x1024xf32, #tpu.memory_space<vmem>>, vector<8x64xf32>
    tpu.vector_store %arg20[%c0_51, %c960], %65 {strides = array<i32>} : memref<8x1024xf32, #tpu.memory_space<vmem>>, vector<8x64xf32>,
    %c0_52 = arith.constant 0 : index
    %c0_53 = arith.constant 0 : index
    %67 = vector.load %arg20[%c0_52, %c0_53] : memref<8x1024xf32, #tpu.memory_space<vmem>>, vector<8x1024xf32>
    %68 = arith.truncf %67 : vector<8x1024xf32> to vector<8x1024xbf16>
    %c0_54 = arith.constant 0 : index
    %c0_55 = arith.constant 0 : index
    %69 = vector.load %arg9[%c0_54, %c0_55] : memref<1024x512xbf16, #tpu.memory_space<vmem>>, vector<1024x512xbf16>
    %cst_56 = arith.constant dense<0.000000e+00> : vector<8x512xf32>
    %70 = tpu.matmul %68, %69, %cst_56 {dimension_numbers = #tpu.dot_dimension_numbers<[1], [0], [0], [1], [0, 0, 1, 1], [], []>} : vector<8x1024xbf16>, vector<1024x512xbf16>, vector<8x512xf32> -> vector<8x512xf32>
    %c0_57 = arith.constant 0 : index
    %c0_58 = arith.constant 0 : index
    %71 = vector.load %arg10[%c0_57, %c0_58] : memref<1x512xf32, #tpu.memory_space<vmem>>, vector<1x512xf32>
    %72 = vector.broadcast %71 : vector<1x512xf32> to vector<8x512xf32>
    %73 = arith.addf %70, %72 : vector<8x512xf32>
    %cst_59 = arith.constant 0.000000e+00 : f32
    %74 = vector.broadcast %cst_59 : f32 to vector<8x512xf32>
    %75 = arith.maximumf %73, %74 : vector<8x512xf32>
    %76 = arith.truncf %75 : vector<8x512xf32> to vector<8x512xbf16>
    %c0_60 = arith.constant 0 : index
    %c0_61 = arith.constant 0 : index
    %77 = vector.load %arg11[%c0_60, %c0_61] : memref<512x128xbf16, #tpu.memory_space<vmem>>, vector<512x128xbf16>
    %cst_62 = arith.constant dense<0.000000e+00> : vector<8x128xf32>
    %78 = tpu.matmul %76, %77, %cst_62 {dimension_numbers = #tpu.dot_dimension_numbers<[1], [0], [0], [1], [0, 0, 1, 1], [], []>} : vector<8x512xbf16>, vector<512x128xbf16>, vector<8x128xf32> -> vector<8x128xf32>
    %c0_63 = arith.constant 0 : index
    %c0_64 = arith.constant 0 : index
    %79 = vector.load %arg12[%c0_63, %c0_64] : memref<1x128xf32, #tpu.memory_space<vmem>>, vector<1x128xf32>
    %80 = vector.broadcast %79 : vector<1x128xf32> to vector<8x128xf32>
    %81 = arith.addf %78, %80 : vector<8x128xf32>
    %c0_65 = arith.constant 0 : index
    %c0_66 = arith.constant 0 : index
    %82 = vector.load %arg13[%c0_65, %c0_66] : memref<8x128xf32, #tpu.memory_space<vmem>>, vector<8x128xf32>
    tpu.vector_store %arg13[%c0_65, %c0_66], %81 {strides = array<i32>} : memref<8x128xf32, #tpu.memory_space<vmem>>, vector<8x128xf32>,
    return
  }
  func.func @transform_0(%arg0: i32) -> (i32, i32, i32) {
    %c0_i32 = arith.constant 0 : i32
    %c0_i32_0 = arith.constant 0 : i32
    %c0_i32_1 = arith.constant 0 : i32
    return %arg0, %c0_i32, %c0_i32_0 : i32, i32, i32
  }
  func.func @transform_1(%arg0: i32) -> (i32, i32) {
    %c0_i32 = arith.constant 0 : i32
    %c0_i32_0 = arith.constant 0 : i32
    %c0_i32_1 = arith.constant 0 : i32
    return %c0_i32, %c0_i32_0 : i32, i32
  }
  func.func @transform_2(%arg0: i32) -> (i32, i32, i32) {
    %c0_i32 = arith.constant 0 : i32
    %c0_i32_0 = arith.constant 0 : i32
    %c0_i32_1 = arith.constant 0 : i32
    %c0_i32_2 = arith.constant 0 : i32
    return %c0_i32, %c0_i32_0, %c0_i32_1 : i32, i32, i32
  }
  func.func @transform_3(%arg0: i32) -> (i32, i32) {
    %c0_i32 = arith.constant 0 : i32
    %c0_i32_0 = arith.constant 0 : i32
    %c0_i32_1 = arith.constant 0 : i32
    return %c0_i32, %c0_i32_0 : i32, i32
  }
  func.func @transform_4(%arg0: i32) -> (i32, i32, i32) {
    %c0_i32 = arith.constant 0 : i32
    %c0_i32_0 = arith.constant 0 : i32
    %c0_i32_1 = arith.constant 0 : i32
    %c0_i32_2 = arith.constant 0 : i32
    return %c0_i32, %c0_i32_0, %c0_i32_1 : i32, i32, i32
  }
  func.func @transform_5(%arg0: i32) -> (i32, i32) {
    %c0_i32 = arith.constant 0 : i32
    %c0_i32_0 = arith.constant 0 : i32
    %c0_i32_1 = arith.constant 0 : i32
    return %c0_i32, %c0_i32_0 : i32, i32
  }
  func.func @transform_6(%arg0: i32) -> (i32, i32, i32) {
    %c0_i32 = arith.constant 0 : i32
    %c0_i32_0 = arith.constant 0 : i32
    %c0_i32_1 = arith.constant 0 : i32
    %c0_i32_2 = arith.constant 0 : i32
    return %c0_i32, %c0_i32_0, %c0_i32_1 : i32, i32, i32
  }
  func.func @transform_7(%arg0: i32) -> (i32, i32) {
    %c0_i32 = arith.constant 0 : i32
    %c0_i32_0 = arith.constant 0 : i32
    %c0_i32_1 = arith.constant 0 : i32
    return %c0_i32, %c0_i32_0 : i32, i32
  }
  func.func @transform_8(%arg0: i32) -> (i32, i32) {
    %c0_i32 = arith.constant 0 : i32
    %c0_i32_0 = arith.constant 0 : i32
    %c0_i32_1 = arith.constant 0 : i32
    return %c0_i32, %c0_i32_0 : i32, i32
  }
  func.func @transform_9(%arg0: i32) -> (i32, i32) {
    %c0_i32 = arith.constant 0 : i32
    %c0_i32_0 = arith.constant 0 : i32
    %c0_i32_1 = arith.constant 0 : i32
    return %c0_i32, %c0_i32_0 : i32, i32
  }
  func.func @transform_10(%arg0: i32) -> (i32, i32) {
    %c0_i32 = arith.constant 0 : i32
    %c0_i32_0 = arith.constant 0 : i32
    %c0_i32_1 = arith.constant 0 : i32
    return %c0_i32, %c0_i32_0 : i32, i32
  }
  func.func @transform_11(%arg0: i32) -> (i32, i32) {
    %c0_i32 = arith.constant 0 : i32
    %c0_i32_0 = arith.constant 0 : i32
    %c0_i32_1 = arith.constant 0 : i32
    return %c0_i32, %c0_i32_0 : i32, i32
  }
  func.func @transform_12(%arg0: i32) -> (i32, i32) {
    %c0_i32 = arith.constant 0 : i32
    %c0_i32_0 = arith.constant 0 : i32
    return %arg0, %c0_i32 : i32, i32
  }
}

</mosaic_0001>

<bundles_post_ra>
// kernel: _lambda_.1
= control target key start
LH: loop header
LB: loop body
LE: loop exit
PB: predicated region body
PF: predicated region fallthrough
CT: control target
= control target key end

     0   :  { %s22122_s0 = inlined_call_operand.vmem [shape: f32[2,3536,16], index: 0, kind: input, shape index: {}]   ;;  %s22123_s1 = inlined_call_operand.vmem [shape: f32[432,32], index: 1, kind: input, shape index: {}]   ;;  %s22124_s2 = inlined_call_operand.vmem [shape: bf16[3,16,32], index: 2, kind: input, shape index: {}]   ;;  %s22125_s3 = inlined_call_operand.vmem [shape: f32[1,32], index: 3, kind: input, shape index: {}]   ;;  %s22126_s4 = inlined_call_operand.vmem [shape: bf16[9,32,64], index: 4, kind: input, shape index: {}]   ;;  %s22127_s5 = inlined_call_operand.vmem [shape: f32[1,64], index: 5, kind: input, shape index: {}]   ;;  %s22128_s6 = inlined_call_operand.vmem [shape: bf16[9,64,64], index: 6, kind: input, shape index: {}]   ;;  %s22129_s7 = inlined_call_operand.vmem [shape: f32[1,64], index: 7, kind: input, shape index: {}]   ;;  %s22130_s8 = inlined_call_operand.vmem [shape: bf16[1024,512], index: 8, kind: input, shape index: {}]   ;;  %s22131_s9 = inlined_call_operand.vmem [shape: f32[1,512], index: 9, kind: input, shape index: {}]   ;;  %s22132_s10 = inlined_call_operand.vmem [shape: bf16[512,128], index: 10, kind: input, shape index: {}]   ;;  %s22133_s11 = inlined_call_operand.vmem [shape: f32[1,128], index: 11, kind: input, shape index: {}]   ;;  %s22134_s12 = inlined_call_operand.hbm [shape: f32[16,128], index: 12, kind: output, shape index: {}]  }
   0x1   :  { %22193 = sst [smem:[#allocation41_spill]] %s22122_s0 }
   0x2   :  { %22194 = sst [smem:[#allocation42_spill]] %s22123_s1 }
   0x3   :  { %17 = vsyncpa [#allocation10], 0 }
   0x4   :  { %19 = vsyncpa [#allocation10 + $0x1], 0  ;;  %s18173_s21 = smov 0   ;;  %s18175_s22 = smov 0  }
   0x5   :  { %s18177_s23 = smov 0   ;;  %s18179_s24 = smov 0  }
   0x6 LB: > { %s18194_s25 = sadd.s32 4294967295, %s18097_s24   ;;  %s13714_s26 = sadd.s32 4294967294, %s18097_s24   ;;  %s18097_s24 = sphi %s18179_s24, %s22347_s24   ;;  %s18093_s23 = sphi %s18177_s23, %s22346_s23   ;;  %s18089_s22 = sphi %s18175_s22, %s22345_s22   ;;  %s18085_s21 = sphi %s18173_s21, %s22344_s21  }
   0x7   : > { %s18198_s27 = sadd.s32 1, %s18097_s24   ;;  %s289_s28 = sadd.s32 1, %s18093_s23 }
   0x8   : > { %s286_s29 = ssub.s32 %s18097_s24, %s18198_s27  ;;  %p299_p0 = scmp.ne.s32.totalorder %s18093_s23, %s18089_s22 }
   0x9   : > { %p287_p1 = scmp.eq.s32.totalorder %s286_s29, 0  ;;  %p300_p2 = scmp.eq.s32.totalorder %s18194_s25, 1 }
   0xa   : > { %p305_p3 = scmp.ne.s32.totalorder %s18089_s22, %s18085_s21  ;;  %p306_p4 = scmp.eq.s32.totalorder %s13714_s26, 1 }
   0xb   : > { %s18209_s30 = scalar_select %p287_p1, %s18093_s23, %s289_s28  }
   0xc   : > { %p18211_p5 = por %p300_p2, %p299_p0  ;;  %p18215_p6 = por %p306_p4, %p305_p3 }
   0xd   : > { %22195 = sst [smem:[#allocation12_spill]] %s18209_s30  ;;  %p13717_p7 = scmp.ge.s32.totalorder %s18097_s24, 1 }
   0xe   : > { %p365_p8 = scmp.lt.s32.totalorder %s18097_s24, 3 }
  0x10   : > { %p366_p9 = pnand %p13717_p7, %p365_p8 }
  0x12   : > { %369 = sbr.rel (%p366_p9) target bundleno = 2270 (0x8de), region = 68 }
  0x19   : > { %s22135_s15 = sand.u32 1, %s18089_s22   ;;  %p407_p10 = scmp.lt.s32.totalorder %s18194_s25, 1  ;;  %vm413_vm0 = vcmask 523264   ;;  %v18103_v0 = vmov 0.0  }
  0x1a   : > { %s18225_s16 = sshll.u32 %s22135_s15, 3  ;;  %414 = vst.msk [vmem:[#allocation5] sm:$0xff] %vm413_vm0, %v18103_v0  ;;  %415 = vst.msk [vmem:[#allocation5 + $0x8] sm:$0xff] %vm413_vm0, %v18103_v0  ;;  %s22198_s0 = sld [smem:[#allocation41_spill]] }
  0x1b   : > { %416 = vst.msk [vmem:[#allocation5 + $0x10] sm:$0xff] %vm413_vm0, %v18103_v0  ;;  %417 = vst.msk [vmem:[#allocation5 + $0x18] sm:$0xff] %vm413_vm0, %v18103_v0  ;;  %s408_s17 = scalar_select %p407_p10, %s18194_s25, 1 }
  0x1c   : > { %418 = vst.msk [vmem:[#allocation5 + $0x20] sm:$0xff] %vm413_vm0, %v18103_v0  ;;  %419 = vst.msk [vmem:[#allocation5 + $0x28] sm:$0xff] %vm413_vm0, %v18103_v0  ;;  %s18257_s29 = smov 0  }
  0x1d   : > { %420 = vst.msk [vmem:[#allocation5 + $0x30] sm:$0xff] %vm413_vm0, %v18103_v0  ;;  %421 = vst.msk [vmem:[#allocation5 + $0x38] sm:$0xff] %vm413_vm0, %v18103_v0  ;;  %s17383_s18 = smul.u32 3536, %s408_s17 }
  0x1e   : > { %422 = vst.msk [vmem:[#allocation5 + $0x40] sm:$0xff] %vm413_vm0, %v18103_v0  ;;  %423 = vst.msk [vmem:[#allocation5 + $0x48] sm:$0xff] %vm413_vm0, %v18103_v0 }
  0x1f   : > { %424 = vst.msk [vmem:[#allocation5 + $0x50] sm:$0xff] %vm413_vm0, %v18103_v0  ;;  %425 = vst.msk [vmem:[#allocation5 + $0x58] sm:$0xff] %vm413_vm0, %v18103_v0 }
  0x20   : > { %426 = vst.msk [vmem:[#allocation5 + $0x60] sm:$0xff] %vm413_vm0, %v18103_v0  ;;  %427 = vst.msk [vmem:[#allocation5 + $0x68] sm:$0xff] %vm413_vm0, %v18103_v0  ;;  %s18254_s26 = scalar_lea.vmem %s22198_s0, %s17383_s18 }
  0x21   : > { %428 = vst.msk [vmem:[#allocation5 + $0x70] sm:$0xff] %vm413_vm0, %v18103_v0  ;;  %429 = vst.msk [vmem:[#allocation5 + $0x78] sm:$0xff] %vm413_vm0, %v18103_v0  ;;  %22199 = sst [smem:[#allocation13_spill]] %s18254_s26 }
  0x22   : > { %430 = vst.msk [vmem:[#allocation5 + $0x80] sm:$0xff] %vm413_vm0, %v18103_v0  ;;  %431 = vst.msk [vmem:[#allocation5 + $0x88] sm:$0xff] %vm413_vm0, %v18103_v0 }
  0x23   : > { %432 = vst.msk [vmem:[#allocation5 + $0x90] sm:$0xff] %vm413_vm0, %v18103_v0  ;;  %433 = vst.msk [vmem:[#allocation5 + $0x98] sm:$0xff] %vm413_vm0, %v18103_v0 }
  0x24   : > { %434 = vst.msk [vmem:[#allocation5 + $0xa0] sm:$0xff] %vm413_vm0, %v18103_v0 }
  0x25 LB: >> { %s22200_s26 = sld [smem:[#allocation13_spill]]  ;;  %v17435_v1 = vld [vmem:[%s22124_s2 + $0x8] sm:$0xff]   ;;  %v18104_v2 = vmov 0.0   ;;  %v17436_v3 = vld [vmem:[%s22124_s2] sm:$0xff]   ;;  %vm18105_vm1 = vmmov 0   ;;  %s441_s19 = smul.u32 432, %s18101_s29  ;;  %s18101_s29 = sphi %s18257_s29, %s440_s29  }
  0x26   : >> { %15583 = vmatprep.subr.bf16.mxu0 %v18104_v2  ;;  %15605 = vmatprep.subr.bf16.mxu1 %v18104_v2  ;;  %v17437_v4 = vld [vmem:[%s22124_s2 + $0x10] sm:$0xff]   ;;  %vm484_vm2 = vcmask 130048   ;;  %v17438_v11 = vld [vmem:[%s22124_s2 + $0x8] sm:$0xff]   ;;  %v17439_v30 = vld [vmem:[%s22124_s2] sm:$0xff]   ;;  %s22201_s1 = sld [smem:[#allocation42_spill]]  ;;  %vm838_vm4 = vcmask 261120  }
  0x27   : >> { %15584 = vmatpush3.bf16.msra.mxu0 %v17435_v1  ;;  %15585 = vmatprep.mubr.msk.bf16.mxu0 %vm18105_vm1, %v18104_v2  ;;  %v17440_v32 = vld [vmem:[%s22124_s2 + $0x10] sm:$0xff]   ;;  %v17441_v47 = vld [vmem:[%s22124_s2 + $0x8] sm:$0xff]   ;;  %v17442_v49 = vld [vmem:[%s22124_s2] sm:$0xff]  }
  0x28   : >> { %15606 = vmatpush3.bf16.msra.mxu1 %v17436_v3  ;;  %15607 = vmatprep.mubr.msk.bf16.mxu1 %vm18105_vm1, %v18104_v2  ;;  %v17443_v60 = vld [vmem:[%s22124_s2 + $0x10] sm:$0xff]   ;;  %v17444_v61 = vld [vmem:[%s22124_s2 + $0x8] sm:$0xff]  }
  0x29   : >> { %15627 = vmatprep.subr.bf16.mxu0 %v18104_v2  ;;  %15649 = vmatprep.subr.bf16.mxu1 %v18104_v2 }
  0x2b   : >> { %s18277_s30 = scalar_lea.vmem %s22200_s26, %s441_s19 }
  0x2c   : >> { %v13720_v5 = vld [vmem:[%s18277_s30 + $0x18] sm:$0xff]  ;;  %v13721_v6 = vld [vmem:[%s18277_s30 + $0x20] sm:$0xff]  ;;  %v444_v9 = vld [vmem:[%s18277_s30 + $0x8] sm:$0xff] }
  0x2d   : >> { %v443_v7 = vld [vmem:[%s18277_s30] sm:$0xff]  ;;  %v470_v8 = vpack.c.bf16 %v13721_v6, %v13720_v5  ;;  %v13722_v12 = vld [vmem:[%s18277_s30 + $0x28] sm:$0xff]  ;;  %v13723_v13 = vld [vmem:[%s18277_s30 + $0x30] sm:$0xff] }
  0x2e   : >> { %v452_v10 = vpack.c.bf16 %v444_v9, %v443_v7  ;;  %v445_v14 = vld [vmem:[%s18277_s30 + $0x10] sm:$0xff]  ;;  %v471_v15 = vpack.c.bf16 %v13723_v13, %v13722_v12  ;;  %v13724_v17 = vld [vmem:[%s18277_s30 + $0x38] sm:$0xff]  ;;  %v13725_v18 = vld [vmem:[%s18277_s30 + $0x40] sm:$0xff]  ;;  %v454_v20 = vpack.c.bf16 %v13722_v12, %v13721_v6 }
  0x2f   : >> { %15586 = vmatmul.mubr.msk.bf16.vlgmr.msra.gmra.mrb[0].mxu0 %vm484_vm2, %v470_v8  ;;  %v453_v16 = vpack.c.bf16 %v13720_v5, %v445_v14  ;;  %v472_v19 = vpack.c.bf16 %v13725_v18, %v13724_v17  ;;  %v13726_v21 = vld [vmem:[%s18277_s30 + $0x48] sm:$0xff]  ;;  %v13727_v22 = vld [vmem:[%s18277_s30 + $0x50] sm:$0xff]  ;;  %v455_v24 = vpack.c.bf16 %v13724_v17, %v13723_v13  ;;  %v18322_v25 = vld [vmem:[%s18277_s30 + $0x58] sm:$0xff]  ;;  %v456_v27 = vpack.c.bf16 %v13725_v18, %v13725_v18 }
  0x30   : >> { %15608 = vmatmul.mubr.msk.bf16.vlgmr.msra.gmra.mrb[0].mxu1 %vm484_vm2, %v452_v10  ;;  %15628 = vmatpush3.bf16.msra.mxu0 %v17437_v4  ;;  %v473_v23 = vpack.c.bf16 %v13727_v22, %v13726_v21  ;;  %v474_v26 = vpack.c.bf16 %v18322_v25, %v18322_v25  ;;  %v13770_v28 = vld [vmem:[%s18277_s30 + $0x60] sm:$0xff]  ;;  %v18331_v29 = vld [vmem:[%s18277_s30 + $0x68] sm:$0xff]  ;;  %v13772_v33 = vld [vmem:[%s18277_s30 + $0x70] sm:$0xff]  ;;  %v677_v35 = vpack.c.bf16 %v13726_v21, %v13725_v18 }
  0x31   : >> { %15589 = vmatprep.mubr.msk.bf16.mxu0 %vm18105_vm1, %v18104_v2  ;;  %15611 = vmatprep.mubr.msk.bf16.mxu1 %vm18105_vm1, %v18104_v2  ;;  %v877_v31 = vpack.c.bf16 %v18331_v29, %v13770_v28  ;;  %v13773_v34 = vld [vmem:[%s18277_s30 + $0x78] sm:$0xff]  ;;  %v13774_v37 = vld [vmem:[%s18277_s30 + $0x80] sm:$0xff]  ;;  %v13775_v38 = vld [vmem:[%s18277_s30 + $0x88] sm:$0xff]  ;;  %v678_v39 = vpack.c.bf16 %v18322_v25, %v13727_v22  ;;  %v680_v45 = vpack.c.bf16 %v13772_v33, %v13772_v33 }
  0x32   : >> { %15650 = vmatpush3.bf16.msra.mxu1 %v17438_v11  ;;  %15671 = vmatprep.subr.bf16.mxu0 %v18104_v2  ;;  %v878_v36 = vpack.c.bf16 %v13773_v34, %v13772_v33  ;;  %v879_v40 = vpack.c.bf16 %v13775_v38, %v13774_v37  ;;  %v13776_v41 = vld [vmem:[%s18277_s30 + $0x90] sm:$0xff]  ;;  %v13777_v42 = vld [vmem:[%s18277_s30 + $0x98] sm:$0xff]  ;;  %v13778_v44 = vld [vmem:[%s18277_s30 + $0xa0] sm:$0xff]  ;;  %v1081_v48 = vpack.c.bf16 %v13774_v37, %v13773_v34 }
  0x33   : >> { %15693 = vmatprep.subr.bf16.mxu1 %v18104_v2  ;;  %v880_v43 = vpack.c.bf16 %v13777_v42, %v13776_v41  ;;  %v881_v46 = vpack.c.bf16 %v13778_v44, %v13778_v44  ;;  %v860_v50 = vpack.c.bf16 %v13770_v28, %v18322_v25  ;;  %v1082_v51 = vpack.c.bf16 %v13776_v41, %v13775_v38  ;;  %v13799_v54 = vld [vmem:[%s18277_s30 + $0xa8] sm:$0xff]  ;;  %v13800_v55 = vld [vmem:[%s18277_s30 + $0xb0] sm:$0xff]  ;;  %v13801_v57 = vld [vmem:[%s18277_s30 + $0xb8] sm:$0xff] }
  0x34   : >> { %v861_v52 = vpack.c.bf16 %v13772_v33, %v18331_v29  ;;  %v1083_v53 = vpack.c.bf16 %v13778_v44, %v13777_v42  ;;  %v1084_v56 = vpack.c.bf16 %v13800_v55, %v13799_v54  ;;  %v863_v58 = vpack.c.bf16 %v13775_v38, %v13775_v38  ;;  %v13823_v62 = vld [vmem:[%s18277_s30 + $0xc0] sm:$0xff]  ;;  %v13824_v1 = vld [vmem:[%s18277_s30 + $0xc8] sm:$0xff]  ;;  %v13825_v3 = vld [vmem:[%s18277_s30 + $0xd0] sm:$0xff] }
  0x35   : >> { %v1085_v59 = vpack.c.bf16 %v13801_v57, %v13801_v57  ;;  %v1281_v63 = vpack.c.bf16 %v13823_v62, %v13801_v57  ;;  %v1263_v0 = vpack.c.bf16 %v13799_v54, %v13778_v44  ;;  %v1282_v4 = vpack.c.bf16 %v13825_v3, %v13824_v1  ;;  %v13826_v6 = vld [vmem:[%s18277_s30 + $0xd8] sm:$0xff]  ;;  %v13827_v7 = vld [vmem:[%s18277_s30 + $0xe0] sm:$0xff]  ;;  %v18464_v10 = vld [vmem:[%s18277_s30 + $0xe8] sm:$0xff] }
  0x36   : >> { %v1264_v5 = vpack.c.bf16 %v13801_v57, %v13800_v55  ;;  %v1283_v8 = vpack.c.bf16 %v13827_v7, %v13826_v6  ;;  %v1265_v9 = vpack.c.bf16 %v13824_v1, %v13823_v62  ;;  %v1284_v11 = vpack.c.bf16 %v18464_v10, %v18464_v10  ;;  %v13870_v13 = vld [vmem:[%s18277_s30 + $0xf0] sm:$0xff]  ;;  %v18478_v14 = vld [vmem:[%s18277_s30 + $0xf8] sm:$0xff]  ;;  %v18494_v18 = vld [vmem:[%s18277_s30 + $0x100] sm:$0xff] }
  0x37   : >> { %15590 = vmatmul.mubr.msk.bf16.gmra.mrb[4].mxu0 %vm484_vm2, %v471_v15  ;;  %v1266_v12 = vpack.c.bf16 %v13825_v3, %v13825_v3  ;;  %v1683_v15 = vpack.c.bf16 %v18478_v14, %v13870_v13  ;;  %v17446_v17 = vld [vmem:[%s22124_s2 + $0x10] sm:$0xff]   ;;  %v17447_v33 = vld [vmem:[%s22124_s2 + $0x8] sm:$0xff]   ;;  %v17448_v34 = vld [vmem:[%s22124_s2] sm:$0xff]  }
  0x38   : >> { %15612 = vmatmul.mubr.msk.bf16.gmra.mrb[4].mxu1 %vm484_vm2, %v453_v16  ;;  %15593 = vmatprep.mubr.msk.bf16.mxu0 %vm18105_vm1, %v18104_v2  ;;  %v17445_v16 = vld [vmem:[%s22124_s2] sm:$0xff]   ;;  %v13874_v22 = vld [vmem:[%s18277_s30 + $0x110] sm:$0xff]  ;;  %v18596_v62 = vld [vmem:[%s18277_s30 + $0x148] sm:$0xff] }
  0x39   : >> { %15615 = vmatprep.mubr.msk.bf16.mxu1 %vm18105_vm1, %v18104_v2  ;;  %v18530_v29 = vld [vmem:[%s18277_s30 + $0x130] sm:$0xff] }
  0x3f   : >> { %15594 = vmatmul.mubr.msk.bf16.gmra.mrb[8].mxu0 %vm484_vm2, %v472_v19  ;;  %v13873_v19 = vld [vmem:[%s18277_s30 + $0x108] sm:$0xff] }
  0x40   : >> { %15616 = vmatmul.mubr.msk.bf16.gmra.mrb[8].mxu1 %vm484_vm2, %v454_v20  ;;  %15597 = vmatprep.mubr.msk.bf16.mxu0 %vm18105_vm1, %v18104_v2  ;;  %v1485_v20 = vpack.c.bf16 %v13826_v6, %v13825_v3  ;;  %v1684_v21 = vpack.c.bf16 %v13873_v19, %v18494_v18 }
  0x41   : >> { %15619 = vmatprep.mubr.msk.bf16.mxu1 %vm18105_vm1, %v18104_v2 }
  0x47   : >> { %15598 = vmatmul.mubr.msk.bf16.gmra.mrb[12].mxu0 %vm484_vm2, %v473_v23 }
  0x48   : >> { %15620 = vmatmul.mubr.msk.bf16.gmra.mrb[12].mxu1 %vm484_vm2, %v455_v24  ;;  %15601 = vmatprep.mubr.msk.bf16.mxu0 %vm18105_vm1, %v18104_v2 }
  0x49   : >> { %15623 = vmatprep.mubr.msk.bf16.mxu1 %vm18105_vm1, %v18104_v2 }
  0x4f   : >> { %15602 = vmatmul.mubr.msk.bf16.gmra.mrb[16].mxu0 %vm484_vm2, %v474_v26  ;;  %v13876_v26 = vld [vmem:[%s18277_s30 + $0x120] sm:$0xff] }
  0x50   : >> { %15624 = vmatmul.mubr.msk.bf16.gmra.mrb[16].mxu1 %vm484_vm2, %v456_v27  ;;  %15629 = vmatprep.mubr.msk.bf16.mxu0 %vm18105_vm1, %v18104_v2  ;;  %v13877_v27 = vld [vmem:[%s18277_s30 + $0x128] sm:$0xff] }
  0x51   : >> { %15651 = vmatprep.mubr.msk.bf16.mxu1 %vm18105_vm1, %v18104_v2  ;;  %v18520_v28 = vpack.c.bf16 %v13877_v27, %v13876_v26  ;;  %v1889_v44 = vpack.c.bf16 %v18530_v29, %v13877_v27 }
  0x57   : >> { %15630 = vmatmul.mubr.msk.bf16.vlgmr.msra.gmra.mrb[20].mxu0 %vm484_vm2, %v455_v24  ;;  %v1486_v24 = vpack.c.bf16 %v18464_v10, %v13827_v7  ;;  %v1891_v7 = vpack.c.bf16 %v18596_v62, %v18596_v62 }
  0x58   : >> { %15652 = vmatmul.mubr.msk.bf16.vlgmr.msra.gmra.mrb[20].mxu1 %vm484_vm2, %v877_v31  ;;  %15672 = vmatpush3.bf16.msra.mxu0 %v17439_v30  ;;  %v1488_v30 = vpack.c.bf16 %v18494_v18, %v18494_v18 }
  0x59   : >> { %15633 = vmatprep.mubr.msk.bf16.mxu0 %vm18105_vm1, %v18104_v2  ;;  %15655 = vmatprep.mubr.msk.bf16.mxu1 %vm18105_vm1, %v18104_v2 }
  0x5a   : >> { %15694 = vmatpush3.bf16.msra.mxu1 %v17440_v32  ;;  %15715 = vmatprep.subr.bf16.mxu0 %v18104_v2  ;;  %v1887_v32 = vpack.c.bf16 %v13874_v22, %v13873_v19 }
  0x5b   : >> { %15737 = vmatprep.subr.bf16.mxu1 %v18104_v2 }
  0x5f   : >> { %15634 = vmatmul.mubr.msk.bf16.gmra.mrb[24].mxu0 %vm484_vm2, %v677_v35  ;;  %v1666_v35 = vpack.c.bf16 %v13870_v13, %v18464_v10 }
  0x60   : >> { %15656 = vmatmul.mubr.msk.bf16.gmra.mrb[24].mxu1 %vm484_vm2, %v878_v36  ;;  %15637 = vmatprep.mubr.msk.bf16.mxu0 %vm18105_vm1, %v18104_v2 }
  0x61   : >> { %15659 = vmatprep.mubr.msk.bf16.mxu1 %vm18105_vm1, %v18104_v2 }
  0x67   : >> { %15638 = vmatmul.mubr.msk.bf16.gmra.mrb[28].mxu0 %vm484_vm2, %v678_v39 }
  0x68   : >> { %15660 = vmatmul.mubr.msk.bf16.gmra.mrb[28].mxu1 %vm484_vm2, %v879_v40  ;;  %15641 = vmatprep.mubr.msk.bf16.mxu0 %vm18105_vm1, %v18104_v2  ;;  %v1667_v40 = vpack.c.bf16 %v18494_v18, %v18478_v14 }
  0x69   : >> { %15663 = vmatprep.mubr.msk.bf16.mxu1 %vm18105_vm1, %v18104_v2 }
  0x6f   : >> { %15642 = vmatmul.mubr.msk.bf16.gmra.mrb[32].mxu0 %vm484_vm2, %v877_v31  ;;  %v1687_v31 = vpack.c.bf16 %v18530_v29, %v18530_v29 }
  0x70   : >> { %15664 = vmatmul.mubr.msk.bf16.gmra.mrb[32].mxu1 %vm484_vm2, %v880_v43  ;;  %15645 = vmatprep.mubr.msk.bf16.mxu0 %vm18105_vm1, %v18104_v2 }
  0x71   : >> { %15667 = vmatprep.mubr.msk.bf16.mxu1 %vm18105_vm1, %v18104_v2 }
  0x77   : >> { %15646 = vmatmul.mubr.msk.bf16.gmra.mrb[36].mxu0 %vm484_vm2, %v680_v45 }
  0x78   : >> { %15668 = vmatmul.mubr.msk.bf16.gmra.mrb[36].mxu1 %vm484_vm2, %v881_v46  ;;  %15673 = vmatprep.mubr.msk.bf16.mxu0 %vm18105_vm1, %v18104_v2 }
  0x79   : >> { %15695 = vmatprep.mubr.msk.bf16.mxu1 %vm18105_vm1, %v18104_v2 }
  0x7f   : >> { %15674 = vmatmul.mubr.msk.bf16.vlgmr.msra.gmra.mrb[40].mxu0 %vm484_vm2, %v473_v23  ;;  %v18508_v23 = vld [vmem:[%s18277_s30 + $0x118] sm:$0xff] }
  0x80   : >> { %15696 = vmatmul.mubr.msk.bf16.vlgmr.msra.gmra.mrb[40].mxu1 %vm484_vm2, %v1081_v48  ;;  %15716 = vmatpush3.bf16.msra.mxu0 %v17441_v47  ;;  %v1685_v25 = vpack.c.bf16 %v18508_v23, %v13874_v22  ;;  %v1888_v36 = vpack.c.bf16 %v13876_v26, %v18508_v23  ;;  %v1669_v3 = vpack.c.bf16 %v18508_v23, %v18508_v23  ;;  %v17450_v23 = vld [vmem:[%s22124_s2 + $0x8] sm:$0xff]  }
  0x81   : >> { %15677 = vmatprep.mubr.msk.bf16.mxu0 %vm18105_vm1, %v18104_v2  ;;  %15699 = vmatprep.mubr.msk.bf16.mxu1 %vm18105_vm1, %v18104_v2 }
  0x82   : >> { %15738 = vmatpush3.bf16.msra.mxu1 %v17442_v49  ;;  %15759 = vmatprep.subr.bf16.mxu0 %v18104_v2  ;;  %v18578_v49 = vld [vmem:[%s18277_s30 + $0x138] sm:$0xff] }
  0x83   : >> { %15781 = vmatprep.subr.bf16.mxu1 %v18104_v2 }
  0x87   : >> { %15678 = vmatmul.mubr.msk.bf16.gmra.mrb[44].mxu0 %vm484_vm2, %v860_v50  ;;  %v18581_v50 = vld [vmem:[%s18277_s30 + $0x140] sm:$0xff] }
  0x88   : >> { %15700 = vmatmul.mubr.msk.bf16.gmra.mrb[44].mxu1 %vm484_vm2, %v1082_v51  ;;  %15681 = vmatprep.mubr.msk.bf16.mxu0 %vm18105_vm1, %v18104_v2  ;;  %v1890_v57 = vpack.c.bf16 %v18581_v50, %v18578_v49 }
  0x89   : >> { %15703 = vmatprep.mubr.msk.bf16.mxu1 %vm18105_vm1, %v18104_v2 }
  0x8f   : >> { %15682 = vmatmul.mubr.msk.bf16.gmra.mrb[48].mxu0 %vm484_vm2, %v861_v52 }
  0x90   : >> { %15704 = vmatmul.mubr.msk.bf16.gmra.mrb[48].mxu1 %vm484_vm2, %v1083_v53  ;;  %15685 = vmatprep.mubr.msk.bf16.mxu0 %vm18105_vm1, %v18104_v2 }
  0x91   : >> { %15707 = vmatprep.mubr.msk.bf16.mxu1 %vm18105_vm1, %v18104_v2 }
  0x97   : >> { %15686 = vmatmul.mubr.msk.bf16.gmra.mrb[52].mxu0 %vm484_vm2, %v1081_v48 }
  0x98   : >> { %15708 = vmatmul.mubr.msk.bf16.gmra.mrb[52].mxu1 %vm484_vm2, %v1084_v56  ;;  %15689 = vmatprep.mubr.msk.bf16.mxu0 %vm18105_vm1, %v18104_v2 }
  0x99   : >> { %15711 = vmatprep.mubr.msk.bf16.mxu1 %vm18105_vm1, %v18104_v2 }
  0x9f   : >> { %15690 = vmatmul.mubr.msk.bf16.gmra.mrb[56].mxu0 %vm484_vm2, %v863_v58 }
  0xa0   : >> { %15712 = vmatmul.mubr.msk.bf16.gmra.mrb[56].mxu1 %vm484_vm2, %v1085_v59  ;;  %15717 = vmatprep.mubr.msk.bf16.mxu0 %vm18105_vm1, %v18104_v2 }
  0xa1   : >> { %15739 = vmatprep.mubr.msk.bf16.mxu1 %vm18105_vm1, %v18104_v2 }
  0xa7   : >> { %15718 = vmatmul.mubr.msk.bf16.vlgmr.msra.gmra.mrb[60].mxu0 %vm484_vm2, %v1084_v56 }
  0xa8   : >> { %15740 = vmatmul.mubr.msk.bf16.vlgmr.msra.gmra.mrb[60].mxu1 %vm484_vm2, %v880_v43  ;;  %15760 = vmatpush3.bf16.msra.mxu0 %v17443_v60 }
  0xa9   : >> { %15721 = vmatprep.mubr.msk.bf16.mxu0 %vm18105_vm1, %v18104_v2  ;;  %15743 = vmatprep.mubr.msk.bf16.mxu1 %vm18105_vm1, %v18104_v2 }
  0xaa   : >> { %15782 = vmatpush3.bf16.msra.mxu1 %v17444_v61  ;;  %15803 = vmatprep.subr.bf16.mxu0 %v18104_v2 }
  0xab   : >> { %15825 = vmatprep.subr.bf16.mxu1 %v18104_v2 }
  0xaf   : >> { %15722 = vmatmul.mubr.msk.bf16.gmra.mrb[64].mxu0 %vm484_vm2, %v1281_v63 }
  0xb0   : >> { %15744 = vmatmul.mubr.msk.bf16.gmra.mrb[64].mxu1 %vm484_vm2, %v1263_v0  ;;  %15725 = vmatprep.mubr.msk.bf16.mxu0 %vm18105_vm1, %v18104_v2 }
  0xb1   : >> { %15747 = vmatprep.mubr.msk.bf16.mxu1 %vm18105_vm1, %v18104_v2 }
  0xb7   : >> { %15726 = vmatmul.mubr.msk.bf16.gmra.mrb[68].mxu0 %vm484_vm2, %v1282_v4 }
  0xb8   : >> { %15748 = vmatmul.mubr.msk.bf16.gmra.mrb[68].mxu1 %vm484_vm2, %v1264_v5  ;;  %15729 = vmatprep.mubr.msk.bf16.mxu0 %vm18105_vm1, %v18104_v2 }
  0xb9   : >> { %15751 = vmatprep.mubr.msk.bf16.mxu1 %vm18105_vm1, %v18104_v2 }
  0xbf   : >> { %15730 = vmatmul.mubr.msk.bf16.gmra.mrb[72].mxu0 %vm484_vm2, %v1283_v8 }
  0xc0   : >> { %15752 = vmatmul.mubr.msk.bf16.gmra.mrb[72].mxu1 %vm484_vm2, %v1265_v9  ;;  %15733 = vmatprep.mubr.msk.bf16.mxu0 %vm18105_vm1, %v18104_v2 }
  0xc1   : >> { %15755 = vmatprep.mubr.msk.bf16.mxu1 %vm18105_vm1, %v18104_v2 }
  0xc7   : >> { %15734 = vmatmul.mubr.msk.bf16.gmra.mrb[76].mxu0 %vm484_vm2, %v1284_v11 }
  0xc8   : >> { %15756 = vmatmul.mubr.msk.bf16.gmra.mrb[76].mxu1 %vm484_vm2, %v1266_v12  ;;  %15761 = vmatprep.mubr.msk.bf16.mxu0 %vm18105_vm1, %v18104_v2 }
  0xc9   : >> { %15783 = vmatprep.mubr.msk.bf16.mxu1 %vm18105_vm1, %v18104_v2 }
  0xcf   : >> { %15762 = vmatmul.mubr.msk.bf16.vlgmr.msra.gmra.mrb[80].mxu0 %vm484_vm2, %v1265_v9 }
  0xd0   : >> { %15784 = vmatmul.mubr.msk.bf16.vlgmr.msra.gmra.mrb[80].mxu1 %vm484_vm2, %v1683_v15  ;;  %15765 = vmatprep.mubr.msk.bf16.mxu0 %vm18105_vm1, %v18104_v2 }
  0xd1   : >> { %15787 = vmatprep.mubr.msk.bf16.mxu1 %vm18105_vm1, %v18104_v2  ;;  %15804 = vmatpush3.bf16.msra.mxu0 %v17445_v16 }
  0xd2   : >> { %15826 = vmatpush3.bf16.msra.mxu1 %v17446_v17  ;;  %15847 = vmatprep.subr.bf16.mxu0 %v18104_v2 }
  0xd3   : >> { %15869 = vmatprep.subr.bf16.mxu1 %v18104_v2 }
  0xd7   : >> { %15766 = vmatmul.mubr.msk.bf16.gmra.mrb[84].mxu0 %vm484_vm2, %v1485_v20  ;;  %v17449_v20 = vld [vmem:[%s22124_s2 + $0x10] sm:$0xff]  }
  0xd8   : >> { %15788 = vmatmul.mubr.msk.bf16.gmra.mrb[84].mxu1 %vm484_vm2, %v1684_v21  ;;  %15769 = vmatprep.mubr.msk.bf16.mxu0 %vm18105_vm1, %v18104_v2 }
  0xd9   : >> { %15791 = vmatprep.mubr.msk.bf16.mxu1 %vm18105_vm1, %v18104_v2 }
  0xdf   : >> { %15770 = vmatmul.mubr.msk.bf16.gmra.mrb[88].mxu0 %vm484_vm2, %v1486_v24  ;;  %v13923_v24 = vld [vmem:[%s18277_s30 + $0x150] sm:$0xff] }
  0xe0   : >> { %15792 = vmatmul.mubr.msk.bf16.gmra.mrb[88].mxu1 %vm484_vm2, %v1685_v25  ;;  %15773 = vmatprep.mubr.msk.bf16.mxu0 %vm18105_vm1, %v18104_v2 }
  0xe1   : >> { %15795 = vmatprep.mubr.msk.bf16.mxu1 %vm18105_vm1, %v18104_v2 }
  0xe7   : >> { %15774 = vmatmul.mubr.msk.bf16.gmra.mrb[92].mxu0 %vm484_vm2, %v1683_v15 }
  0xe8   : >> { %15796 = vmatmul.mubr.msk.bf16.gmra.mrb[92].mxu1 %vm484_vm2, %v18520_v28  ;;  %15777 = vmatprep.mubr.msk.bf16.mxu0 %vm18105_vm1, %v18104_v2 }
  0xe9   : >> { %15799 = vmatprep.mubr.msk.bf16.mxu1 %vm18105_vm1, %v18104_v2 }
  0xef   : >> { %15778 = vmatmul.mubr.msk.bf16.gmra.mrb[96].mxu0 %vm484_vm2, %v1488_v30  ;;  %v2087_v30 = vpack.c.bf16 %v13923_v24, %v18596_v62 }
  0xf0   : >> { %15800 = vmatmul.mubr.msk.bf16.gmra.mrb[96].mxu1 %vm484_vm2, %v1687_v31  ;;  %15805 = vmatprep.mubr.msk.bf16.mxu0 %vm18105_vm1, %v18104_v2 }
  0xf1   : >> { %15827 = vmatprep.mubr.msk.bf16.mxu1 %vm18105_vm1, %v18104_v2 }
  0xf7   : >> { %15806 = vmatmul.mubr.msk.bf16.vlgmr.msra.gmra.mrb[100].mxu0 %vm484_vm2, %v1283_v8 }
  0xf8   : >> { %15828 = vmatmul.mubr.msk.bf16.vlgmr.msra.gmra.mrb[100].mxu1 %vm484_vm2, %v1887_v32  ;;  %15809 = vmatprep.mubr.msk.bf16.mxu0 %vm18105_vm1, %v18104_v2 }
  0xf9   : >> { %15831 = vmatprep.mubr.msk.bf16.mxu1 %vm18105_vm1, %v18104_v2  ;;  %15848 = vmatpush3.bf16.msra.mxu0 %v17447_v33 }
  0xfa   : >> { %15870 = vmatpush3.bf16.msra.mxu1 %v17448_v34  ;;  %15891 = vmatprep.subr.bf16.mxu0 %v18104_v2 }
  0xfb   : >> { %15913 = vmatprep.subr.bf16.mxu1 %v18104_v2 }
  0xff   : >> { %15810 = vmatmul.mubr.msk.bf16.gmra.mrb[104].mxu0 %vm484_vm2, %v1666_v35 }
 0x100   : >> { %15832 = vmatmul.mubr.msk.bf16.gmra.mrb[104].mxu1 %vm484_vm2, %v1888_v36  ;;  %15813 = vmatprep.mubr.msk.bf16.mxu0 %vm18105_vm1, %v18104_v2 }
 0x101   : >> { %15835 = vmatprep.mubr.msk.bf16.mxu1 %vm18105_vm1, %v18104_v2 }
 0x102   : >> { %v534_v37 = vpop.f32.mrb[0].mxu0 }
 0x103   : >> { %v627_v38 = vpop.f32.mrb[0].mxu1  ;;  %v15587_v39 = vpop.f32.mrb[1].mxu0 }
 0x104   : >> { %v18566_v41 = vadd.f32 %v627_v38, %v534_v37  ;;  %v15609_v42 = vpop.f32.mrb[1].mxu1  ;;  %v537_v43 = vpop.f32.mrb[2].mxu0  ;;  %v13924_v37 = vld [vmem:[%s18277_s30 + $0x158] sm:$0xff]  ;;  %v18643_v38 = vld [vmem:[%s18277_s30 + $0x160] sm:$0xff] }
 0x105   : >> { %v630_v45 = vpop.f32.mrb[2].mxu1  ;;  %v15588_v46 = vpop.f32.mrb[3].mxu0  ;;  %v811_v42 = vld [vmem:[%s22201_s1] sm:$0xff] }
 0x106   : >> { %v18569_v47 = vadd.f32 %v630_v45, %v537_v43  ;;  %v15610_v48 = vpop.f32.mrb[3].mxu1  ;;  %vm820_vm3 = vcmp.gt.f32.partialorder %v811_v42, 0.5 }
 0x107   : >> { %15814 = vmatmul.mubr.msk.bf16.gmra.mrb[108].mxu0 %vm484_vm2, %v1667_v40  ;;  %v2070_v48 = vpack.c.bf16 %v18596_v62, %v18581_v50 }
 0x108   : >> { %15836 = vmatmul.mubr.msk.bf16.gmra.mrb[108].mxu1 %vm484_vm2, %v1889_v44  ;;  %15817 = vmatprep.mubr.msk.bf16.mxu0 %vm18105_vm1, %v18104_v2  ;;  %v2088_v44 = vpack.c.bf16 %v18643_v38, %v13924_v37 }
 0x109   : >> { %15839 = vmatprep.mubr.msk.bf16.mxu1 %vm18105_vm1, %v18104_v2 }
 0x10a   : >> { %v542_v51 = vpop.f32.mrb[4].mxu0 }
 0x10b   : >> { %v635_v52 = vpop.f32.mrb[4].mxu1  ;;  %v15591_v53 = vpop.f32.mrb[5].mxu0 }
 0x10c   : >> { %v18583_v54 = vadd.f32 %v635_v52, %v542_v51  ;;  %v15613_v55 = vpop.f32.mrb[5].mxu1  ;;  %v545_v56 = vpop.f32.mrb[6].mxu0  ;;  %v812_v52 = vld [vmem:[%s22201_s1 + $0x8] sm:$0xff] }
 0x10d   : >> { %v638_v58 = vpop.f32.mrb[6].mxu1  ;;  %v15592_v59 = vpop.f32.mrb[7].mxu0  ;;  %vm821_vm5 = vcmp.gt.f32.partialorder %v812_v52, 0.5 }
 0x10e   : >> { %v18587_v60 = vadd.f32 %v638_v58, %v545_v56  ;;  %v15614_v61 = vpop.f32.mrb[7].mxu1  ;;  %v18677_v58 = vld [vmem:[%s18277_s30 + $0x170] sm:$0xff] }
 0x10f   : >> { %15818 = vmatmul.mubr.msk.bf16.gmra.mrb[112].mxu0 %vm484_vm2, %v1887_v32  ;;  %v2069_v32 = vpack.c.bf16 %v18578_v49, %v18530_v29  ;;  %v18650_v29 = vld [vmem:[%s22125_s3] ss:$0 sm:$0xff] }
 0x110   : >> { %15840 = vmatmul.mubr.msk.bf16.gmra.mrb[112].mxu1 %vm484_vm2, %v1890_v57  ;;  %15821 = vmatprep.mubr.msk.bf16.mxu0 %vm18105_vm1, %v18104_v2 }
 0x111   : >> { %15843 = vmatprep.mubr.msk.bf16.mxu1 %vm18105_vm1, %v18104_v2 }
 0x112   : >> { %v550_v63 = vpop.f32.mrb[8].mxu0 }
 0x113   : >> { %v643_v0 = vpop.f32.mrb[8].mxu1  ;;  %v15595_v1 = vpop.f32.mrb[9].mxu0 }
 0x114   : >> { %v18600_v4 = vadd.f32 %v643_v0, %v550_v63  ;;  %v15617_v5 = vpop.f32.mrb[9].mxu1  ;;  %v553_v6 = vpop.f32.mrb[10].mxu0  ;;  %v813_v1 = vld [vmem:[%s22201_s1 + $0x10] sm:$0xff] }
 0x115   : >> { %v646_v8 = vpop.f32.mrb[10].mxu1  ;;  %v15596_v9 = vpop.f32.mrb[11].mxu0  ;;  %vm822_vm6 = vcmp.gt.f32.partialorder %v813_v1, 0.5 }
 0x116   : >> { %v18604_v10 = vadd.f32 %v646_v8, %v553_v6  ;;  %v15618_v11 = vpop.f32.mrb[11].mxu1  ;;  %v18693_v8 = vpack.c.bf16 %v13924_v37, %v13923_v24 }
 0x117   : >> { %15822 = vmatmul.mubr.msk.bf16.gmra.mrb[116].mxu0 %vm484_vm2, %v1669_v3 }
 0x118   : >> { %15844 = vmatmul.mubr.msk.bf16.gmra.mrb[116].mxu1 %vm484_vm2, %v1891_v7  ;;  %15849 = vmatprep.mubr.msk.bf16.mxu0 %vm18105_vm1, %v18104_v2 }
 0x119   : >> { %15871 = vmatprep.mubr.msk.bf16.mxu1 %vm18105_vm1, %v18104_v2 }
 0x11a   : >> { %v558_v12 = vpop.f32.mrb[12].mxu0 }
 0x11b   : >> { %v651_v13 = vpop.f32.mrb[12].mxu1  ;;  %v15599_v14 = vpop.f32.mrb[13].mxu0 }
 0x11c   : >> { %v18612_v15 = vadd.f32 %v651_v13, %v558_v12  ;;  %v15621_v16 = vpop.f32.mrb[13].mxu1  ;;  %v561_v17 = vpop.f32.mrb[14].mxu0  ;;  %v814_v12 = vld [vmem:[%s22201_s1 + $0x18] sm:$0xff] }
 0x11d   : >> { %v654_v18 = vpop.f32.mrb[14].mxu1  ;;  %v15600_v19 = vpop.f32.mrb[15].mxu0  ;;  %vm823_vm7 = vcmp.gt.f32.partialorder %v814_v12, 0.5 }
 0x11e   : >> { %v18617_v21 = vadd.f32 %v654_v18, %v561_v17  ;;  %v15622_v22 = vpop.f32.mrb[15].mxu1 }
 0x11f   : >> { %15850 = vmatmul.mubr.msk.bf16.vlgmr.msra.gmra.mrb[120].mxu0 %vm484_vm2, %v1890_v57 }
 0x120   : >> { %15872 = vmatmul.mubr.msk.bf16.vlgmr.msra.gmra.mrb[120].mxu1 %vm484_vm2, %v18520_v28  ;;  %15853 = vmatprep.mubr.msk.bf16.mxu0 %vm18105_vm1, %v18104_v2 }
 0x121   : >> { %15875 = vmatprep.mubr.msk.bf16.mxu1 %vm18105_vm1, %v18104_v2  ;;  %15892 = vmatpush3.bf16.msra.mxu0 %v17449_v20 }
 0x122   : >> { %v566_v25 = vpop.f32.mrb[16].mxu0  ;;  %15914 = vmatpush3.bf16.msra.mxu1 %v17450_v23  ;;  %15935 = vmatprep.subr.bf16.mxu0 %v18104_v2 }
 0x123   : >> { %v659_v26 = vpop.f32.mrb[16].mxu1  ;;  %v15603_v27 = vpop.f32.mrb[17].mxu0  ;;  %15957 = vmatprep.subr.bf16.mxu1 %v18104_v2 }
 0x124   : >> { %v18633_v28 = vadd.f32 %v659_v26, %v566_v25  ;;  %v569_v31 = vpop.f32.mrb[18].mxu0  ;;  %v15625_v33 = vpop.f32.mrb[17].mxu1  ;;  %v815_v25 = vld [vmem:[%s22201_s1 + $0x20] sm:$0xff] }
 0x125   : >> { %v15604_v34 = vpop.f32.mrb[19].mxu0  ;;  %v662_v35 = vpop.f32.mrb[18].mxu1  ;;  %vm824_vm8 = vcmp.gt.f32.partialorder %v815_v25, 0.5 }
 0x126   : >> { %v15626_v36 = vpop.f32.mrb[19].mxu1  ;;  %v816_v35 = vld [vmem:[%s22201_s1 + $0x28] sm:$0xff] }
 0x127   : >> { %15854 = vmatmul.mubr.msk.bf16.gmra.mrb[124].mxu0 %vm484_vm2, %v2087_v30  ;;  %vm825_vm9 = vcmp.gt.f32.partialorder %v816_v35, 0.5 }
 0x128   : >> { %15876 = vmatmul.mubr.msk.bf16.gmra.mrb[124].mxu1 %vm484_vm2, %v2069_v32  ;;  %15857 = vmatprep.mubr.msk.bf16.mxu0 %vm18105_vm1, %v18104_v2  ;;  %v2072_v32 = vpack.c.bf16 %v18643_v38, %v18643_v38 }
 0x129   : >> { %15879 = vmatprep.mubr.msk.bf16.mxu1 %vm18105_vm1, %v18104_v2 }
 0x12a   : >> { %v739_v39 = vpop.f32.mrb[20].mxu0 }
 0x12b   : >> { %v777_v40 = vadd.f32 %v739_v39, %v18566_v41  ;;  %v15631_v43 = vpop.f32.mrb[21].mxu0  ;;  %v18657_v45 = vpop.f32.mrb[20].mxu1 }
 0x12c   : >> { %v742_v46 = vpop.f32.mrb[22].mxu0  ;;  %v15653_v49 = vpop.f32.mrb[21].mxu1 }
 0x12d   : >> { %v793_v51 = vadd.f32 %v18650_v29, %v777_v40  ;;  %v778_v41 = vadd.f32 %v742_v46, %v18569_v47  ;;  %v15632_v53 = vpop.f32.mrb[23].mxu0  ;;  %v18666_v55 = vpop.f32.mrb[22].mxu1  ;;  %v18674_v47 = vld [vmem:[%s18277_s30 + $0x168] sm:$0xff] }
 0x12e   : >> { %v15654_v56 = vpop.f32.mrb[23].mxu1  ;;  %v18688_v5 = vpack.c.bf16 %v18677_v58, %v18674_v47  ;;  %v18744_v46 = vld [vmem:[%s18277_s30 + $0x188] sm:$0xff] }
 0x12f   : >> { %v802_v57 = vmax.f32 %v793_v51, 0.0  ;;  %v794_v50 = vadd.f32 %v18650_v29, %v778_v41  ;;  %15858 = vmatmul.mubr.msk.bf16.gmra.mrb[128].mxu0 %vm484_vm2, %v2088_v44  ;;  %v18741_v44 = vld [vmem:[%s18277_s30 + $0x180] sm:$0xff]  ;;  %v817_v41 = vld [vmem:[%s22201_s1 + $0x30] sm:$0xff] }
 0x130   : >> { %15880 = vmatmul.mubr.msk.bf16.gmra.mrb[128].mxu1 %vm484_vm2, %v2070_v48  ;;  %15861 = vmatprep.mubr.msk.bf16.mxu0 %vm18105_vm1, %v18104_v2  ;;  %vm826_vm10 = vcmp.gt.f32.partialorder %v817_v41, 0.5 }
 0x131   : >> { %v829_v59 = vsel %vm820_vm3, %v802_v57, 0.0  ;;  %v803_v61 = vmax.f32 %v794_v50, 0.0  ;;  %15883 = vmatprep.mubr.msk.bf16.mxu1 %vm18105_vm1, %v18104_v2  ;;  %v18756_v57 = vpack.c.bf16 %v18744_v46, %v18741_v44 }
 0x132   : >> { %839 = vst.msk [vmem:[#allocation2] sm:$0xff] %vm838_vm4, %v829_v59  ;;  %v747_v62 = vpop.f32.mrb[24].mxu0 }
 0x133   : >> { %v830_v63 = vsel %vm821_vm5, %v803_v61, 0.0  ;;  %v779_v0 = vadd.f32 %v747_v62, %v18583_v54  ;;  %v15635_v3 = vpop.f32.mrb[25].mxu0  ;;  %v18690_v6 = vpop.f32.mrb[24].mxu1 }
 0x134   : >> { %840 = vst.msk [vmem:[#allocation2 + $0x8] sm:$0xff] %vm838_vm4, %v830_v63  ;;  %v750_v7 = vpop.f32.mrb[26].mxu0  ;;  %v15657_v9 = vpop.f32.mrb[25].mxu1  ;;  %v17452_v3 = vld [vmem:[%s22124_s2 + $0x10] sm:$0xff]  }
 0x135   : >> { %v795_v54 = vadd.f32 %v18650_v29, %v779_v0  ;;  %v780_v11 = vadd.f32 %v750_v7, %v18587_v60  ;;  %v15636_v13 = vpop.f32.mrb[27].mxu0  ;;  %v18700_v14 = vpop.f32.mrb[26].mxu1  ;;  %v18710_v60 = vld [vmem:[%s18277_s30 + $0x178] sm:$0xff]  ;;  %v17451_v0 = vld [vmem:[%s22124_s2] sm:$0xff]  }
 0x136   : >> { %v15658_v16 = vpop.f32.mrb[27].mxu1  ;;  %v2090_v27 = vpack.c.bf16 %v18710_v60, %v18710_v60  ;;  %v18791_v13 = vld [vmem:[%s18277_s30 + $0x190] sm:$0xff]  ;;  %v2292_v41 = vpack.c.bf16 %v18710_v60, %v18677_v58 }
 0x137   : >> { %v804_v17 = vmax.f32 %v795_v54, 0.0  ;;  %v796_v18 = vadd.f32 %v18650_v29, %v780_v11  ;;  %15862 = vmatmul.mubr.msk.bf16.gmra.mrb[132].mxu0 %vm484_vm2, %v18688_v5  ;;  %v18782_v54 = vld [vmem:[%s22126_s4 + $0x10] sm:$0xff]  }
 0x138   : >> { %15884 = vmatmul.mubr.msk.bf16.gmra.mrb[132].mxu1 %vm484_vm2, %v18693_v8  ;;  %15865 = vmatprep.mubr.msk.bf16.mxu0 %vm18105_vm1, %v18104_v2 }
 0x139   : >> { %v831_v19 = vsel %vm822_vm6, %v804_v17, 0.0  ;;  %v805_v20 = vmax.f32 %v796_v18, 0.0  ;;  %15887 = vmatprep.mubr.msk.bf16.mxu1 %vm18105_vm1, %v18104_v2  ;;  %v819_v17 = vld [vmem:[%s22201_s1 + $0x40] sm:$0xff] }
 0x13a   : >> { %841 = vst.msk [vmem:[#allocation2 + $0x10] sm:$0xff] %vm838_vm4, %v831_v19  ;;  %v755_v22 = vpop.f32.mrb[28].mxu0  ;;  %vm828_vm12 = vcmp.gt.f32.partialorder %v819_v17, 0.5 }
 0x13b   : >> { %v832_v23 = vsel %vm823_vm7, %v805_v20, 0.0  ;;  %v781_v24 = vadd.f32 %v755_v22, %v18600_v4  ;;  %v15639_v26 = vpop.f32.mrb[29].mxu0  ;;  %v18721_v30 = vpop.f32.mrb[28].mxu1 }
 0x13c   : >> { %842 = vst.msk [vmem:[#allocation2 + $0x18] sm:$0xff] %vm838_vm4, %v832_v23  ;;  %v758_v31 = vpop.f32.mrb[30].mxu0  ;;  %v15661_v33 = vpop.f32.mrb[29].mxu1  ;;  %v2291_v23 = vpack.c.bf16 %v18674_v47, %v18643_v38 }
 0x13d   : >> { %v797_v34 = vadd.f32 %v18650_v29, %v781_v24  ;;  %v782_v4 = vadd.f32 %v758_v31, %v18604_v10  ;;  %v15640_v36 = vpop.f32.mrb[31].mxu0  ;;  %v18731_v37 = vpop.f32.mrb[30].mxu1 }
 0x13e   : >> { %v15662_v39 = vpop.f32.mrb[31].mxu1 }
 0x13f   : >> { %v806_v40 = vmax.f32 %v797_v34, 0.0  ;;  %v798_v42 = vadd.f32 %v18650_v29, %v782_v4  ;;  %15866 = vmatmul.mubr.msk.bf16.gmra.mrb[136].mxu0 %vm484_vm2, %v2090_v27 }
 0x140   : >> { %15888 = vmatmul.mubr.msk.bf16.gmra.mrb[136].mxu1 %vm484_vm2, %v2072_v32  ;;  %15893 = vmatprep.mubr.msk.bf16.mxu0 %vm18105_vm1, %v18104_v2 }
 0x141   : >> { %v833_v10 = vsel %vm824_vm8, %v806_v40, 0.0  ;;  %v807_v43 = vmax.f32 %v798_v42, 0.0  ;;  %15915 = vmatprep.mubr.msk.bf16.mxu1 %vm18105_vm1, %v18104_v2  ;;  %v18830_v40 = vld [vmem:[%s18277_s30 + $0x1a0] sm:$0xff]  ;;  %v18833_v42 = vld [vmem:[%s18277_s30 + $0x1a8] sm:$0xff] }
 0x142   : >> { %843 = vst.msk [vmem:[#allocation2 + $0x20] sm:$0xff] %vm838_vm4, %v833_v10  ;;  %v763_v48 = vpop.f32.mrb[32].mxu0 }
 0x143   : >> { %v834_v49 = vsel %vm825_vm9, %v807_v43, 0.0  ;;  %v783_v51 = vadd.f32 %v763_v48, %v18612_v15  ;;  %v15643_v52 = vpop.f32.mrb[33].mxu0  ;;  %v18751_v53 = vpop.f32.mrb[32].mxu1  ;;  %v818_v15 = vld [vmem:[%s22201_s1 + $0x38] sm:$0xff] }
 0x144   : >> { %844 = vst.msk [vmem:[#allocation2 + $0x28] sm:$0xff] %vm838_vm4, %v834_v49  ;;  %v766_v56 = vpop.f32.mrb[34].mxu0  ;;  %v15665_v50 = vpop.f32.mrb[33].mxu1  ;;  %vm827_vm11 = vcmp.gt.f32.partialorder %v818_v15, 0.5  ;;  %v2491_v15 = vpack.c.bf16 %v18833_v42, %v18830_v40 }
 0x145   : >> { %v799_v59 = vadd.f32 %v18650_v29, %v783_v51  ;;  %v784_v61 = vadd.f32 %v766_v56, %v18617_v21  ;;  %v15644_v62 = vpop.f32.mrb[35].mxu0  ;;  %v18763_v63 = vpop.f32.mrb[34].mxu1  ;;  %v18774_v21 = vld [vmem:[%s22126_s4 + $0x10] sm:$0xff]  }
 0x146   : >> { %v15666_v1 = vpop.f32.mrb[35].mxu1 }
 0x147   : >> { %v808_v7 = vmax.f32 %v799_v59, 0.0  ;;  %v800_v9 = vadd.f32 %v18650_v29, %v784_v61  ;;  %15894 = vmatmul.mubr.msk.bf16.vlgmr.msra.gmra.mrb[140].mxu0 %vm484_vm2, %v18693_v8  ;;  %v18794_v8 = vld [vmem:[%s18277_s30 + $0x198] sm:$0xff]  ;;  %v1215_v1 = vld [vmem:[%s22201_s1 + $0x48] sm:$0xff] }
 0x148   : >> { %15916 = vmatmul.mubr.msk.bf16.vlgmr.msra.gmra.mrb[140].mxu1 %vm484_vm2, %v18756_v57  ;;  %15897 = vmatprep.mubr.msk.bf16.mxu0 %vm18105_vm1, %v18104_v2  ;;  %vm1224_vm13 = vcmp.gt.f32.partialorder %v1215_v1, 0.5 }
 0x149   : >> { %v835_v11 = vsel %vm826_vm10, %v808_v7, 0.0  ;;  %v809_v12 = vmax.f32 %v800_v9, 0.0  ;;  %15919 = vmatprep.mubr.msk.bf16.mxu1 %vm18105_vm1, %v18104_v2  ;;  %15936 = vmatpush3.bf16.msra.mxu0 %v17451_v0  ;;  %v18801_v18 = vld [vmem:[#allocation2 + $0x19] sm:$0xff] }
 0x14a   : >> { %845 = vst.msk [vmem:[#allocation2 + $0x30] sm:$0xff] %vm838_vm4, %v835_v11  ;;  %v771_v16 = vpop.f32.mrb[36].mxu0  ;;  %15958 = vmatpush3.bf16.msra.mxu1 %v17452_v3  ;;  %15979 = vmatprep.subr.bf16.mxu0 %v18774_v21  ;;  %v18811_v26 = vld [vmem:[#allocation2 + $0x1a] sm:$0xff] }
 0x14b   : >> { %v836_v19 = vsel %vm827_vm11, %v809_v12, 0.0  ;;  %v785_v20 = vadd.f32 %v771_v16, %v18633_v28  ;;  %v15647_v22 = vpop.f32.mrb[37].mxu0  ;;  %v18806_v24 = vpop.f32.mrb[36].mxu1  ;;  %16123 = vmatprep.subr.bf16.mxu1 %v18782_v54  ;;  %v18809_v25 = vld [vmem:[#allocation2 + $0x21] sm:$0xff]  ;;  %22202 = vst [vmem:[#allocation14_spill] sm:$0xff] %v18811_v26  ;;  %v2490_v28 = vpack.c.bf16 %v18794_v8, %v18791_v13  ;;  %v1216_v16 = vld [vmem:[%s22201_s1 + $0x50] sm:$0xff] }
 0x14c   : >> { %v18813_v27 = vld [vmem:[#allocation2 + $0x22] sm:$0xff]  ;;  %846 = vst.msk [vmem:[#allocation2 + $0x38] sm:$0xff] %vm838_vm4, %v836_v19  ;;  %v774_v31 = vpop.f32.mrb[38].mxu0  ;;  %v15669_v32 = vpop.f32.mrb[37].mxu1  ;;  %v18869_v19 = vld [vmem:[%s18277_s30 + $0x1b0] sm:$0xff]  ;;  %vm1225_vm14 = vcmp.gt.f32.partialorder %v1216_v16, 0.5 }
 0x14d   : >> { %v801_v33 = vadd.f32 %v18650_v29, %v785_v20  ;;  %v15648_v34 = vpop.f32.mrb[39].mxu0  ;;  %v974_v4 = vpop.f32.mrb[38].mxu1  ;;  %v18872_v20 = vld [vmem:[%s18277_s30 + $0x1b8] sm:$0xff] }
 0x14e   : >> { %v15670_v35 = vpop.f32.mrb[39].mxu1 }
 0x14f   : >> { %v810_v36 = vmax.f32 %v801_v33, 0.0  ;;  %15898 = vmatmul.mubr.msk.bf16.gmra.mrb[144].mxu0 %vm484_vm2, %v2291_v23  ;;  %v2492_v35 = vpack.c.bf16 %v18872_v20, %v18869_v19 }
 0x150   : >> { %15920 = vmatmul.mubr.msk.bf16.gmra.mrb[144].mxu1 %vm484_vm2, %v2490_v28  ;;  %15901 = vmatprep.mubr.msk.bf16.mxu0 %vm18105_vm1, %v18104_v2 }
 0x151   : >> { %v837_v39 = vsel %vm828_vm12, %v810_v36, 0.0  ;;  %15923 = vmatprep.mubr.msk.bf16.mxu1 %vm18105_vm1, %v18104_v2  ;;  %v18836_v43 = vld [vmem:[#allocation2 + $0x29] sm:$0xff] }
 0x152   : >> { %847 = vst.msk [vmem:[#allocation2 + $0x40] sm:$0xff] %vm838_vm4, %v837_v39  ;;  %v1032_v10 = vpop.f32.mrb[40].mxu0  ;;  %v18843_v56 = vld [vmem:[#allocation2 + $0x2a] sm:$0xff] }
 0x153   : >> { %v1033_v48 = vadd.f32 %v1032_v10, %v18657_v45  ;;  %v15675_v49 = vpop.f32.mrb[41].mxu0  ;;  %v1143_v51 = vpop.f32.mrb[40].mxu1  ;;  %v18841_v52 = vld [vmem:[#allocation2 + $0x31] sm:$0xff]  ;;  %22203 = vst [vmem:[#allocation15_spill] sm:$0xff] %v18843_v56 }
 0x154   : >> { %v18845_v50 = vld [vmem:[#allocation2 + $0x32] sm:$0xff]  ;;  %v1035_v59 = vpop.f32.mrb[42].mxu0  ;;  %v15697_v61 = vpop.f32.mrb[41].mxu1  ;;  %v3131_v45 = vld [vmem:[#allocation2 + $0xa] sm:$0xff] }
 0x155   : >> { %22204 = vst [vmem:[#allocation16_spill] sm:$0xff] %v18845_v50  ;;  %v1036_v0 = vadd.f32 %v1035_v59, %v18666_v55  ;;  %v1181_v58 = vadd.f32 %v1143_v51, %v1033_v48  ;;  %v15676_v3 = vpop.f32.mrb[43].mxu0  ;;  %v1146_v7 = vpop.f32.mrb[42].mxu1  ;;  %v1217_v48 = vld [vmem:[%s22201_s1 + $0x58] sm:$0xff]  ;;  %v1218_v61 = vld [vmem:[%s22201_s1 + $0x60] sm:$0xff] }
 0x156   : >> { %v15698_v9 = vpop.f32.mrb[43].mxu1  ;;  %vm1226_vm15 = vcmp.gt.f32.partialorder %v1217_v48, 0.5  ;;  %vm1227_vm3 = vcmp.gt.f32.partialorder %v1218_v61, 0.5 }
 0x157   : >> { %v1197_v11 = vadd.f32 %v18650_v29, %v1181_v58  ;;  %v1182_v12 = vadd.f32 %v1146_v7, %v1036_v0  ;;  %15902 = vmatmul.mubr.msk.bf16.gmra.mrb[148].mxu0 %vm484_vm2, %v2292_v41  ;;  %v18896_v0 = vld [vmem:[%s18277_s30 + $0x1c0] sm:$0xff] }
 0x158   : >> { %15924 = vmatmul.mubr.msk.bf16.gmra.mrb[148].mxu1 %vm484_vm2, %v2491_v15  ;;  %15905 = vmatprep.mubr.msk.bf16.mxu0 %vm18105_vm1, %v18104_v2 }
 0x159   : >> { %v1206_v55 = vmax.f32 %v1197_v11, 0.0  ;;  %v1198_v17 = vadd.f32 %v18650_v29, %v1182_v12  ;;  %15927 = vmatprep.mubr.msk.bf16.mxu1 %vm18105_vm1, %v18104_v2  ;;  %v2294_v11 = vpack.c.bf16 %v18791_v13, %v18791_v13  ;;  %v18901_v12 = vld [vmem:[#allocation2 + $0x39] sm:$0xff] }
 0x15a   : >> { %v1040_v22 = vpop.f32.mrb[44].mxu0 }
 0x15b   : >> { %v1233_v23 = vsel %vm1224_vm13, %v1206_v55, 0.0  ;;  %v1207_v31 = vmax.f32 %v1198_v17, 0.0  ;;  %v1041_v28 = vadd.f32 %v1040_v22, %v18690_v6  ;;  %v15679_v32 = vpop.f32.mrb[45].mxu0  ;;  %v1151_v33 = vpop.f32.mrb[44].mxu1  ;;  %v2493_v22 = vpack.c.bf16 %v18896_v0, %v18896_v0 }
 0x15c   : >> { %1242 = vst.msk [vmem:[#allocation2 + $0x48] sm:$0xff] %vm838_vm4, %v1233_v23  ;;  %v1043_v34 = vpop.f32.mrb[46].mxu0  ;;  %v15701_v4 = vpop.f32.mrb[45].mxu1  ;;  %v18908_v23 = vld [vmem:[#allocation2 + $0x3a] sm:$0xff] }
 0x15d   : >> { %v1234_v36 = vsel %vm1225_vm14, %v1207_v31, 0.0  ;;  %v1044_v39 = vadd.f32 %v1043_v34, %v18700_v14  ;;  %v1183_v10 = vadd.f32 %v1151_v33, %v1041_v28  ;;  %v15680_v49 = vpop.f32.mrb[47].mxu0  ;;  %v1154_v6 = vpop.f32.mrb[46].mxu1  ;;  %22205 = vst [vmem:[#allocation17_spill] sm:$0xff] %v18908_v23  ;;  %v1219_v34 = vld [vmem:[%s22201_s1 + $0x68] sm:$0xff] }
 0x15e   : >> { %1243 = vst.msk [vmem:[#allocation2 + $0x50] sm:$0xff] %vm838_vm4, %v1234_v36  ;;  %v15702_v51 = vpop.f32.mrb[47].mxu1  ;;  %vm1228_vm5 = vcmp.gt.f32.partialorder %v1219_v34, 0.5  ;;  %v17455_v34 = vld [vmem:[%s22126_s4 + $0x18] sm:$0xff]  }
 0x15f   : >> { %v1199_v41 = vadd.f32 %v18650_v29, %v1183_v10  ;;  %v1184_v59 = vadd.f32 %v1154_v6, %v1044_v39  ;;  %15906 = vmatmul.mubr.msk.bf16.gmra.mrb[152].mxu0 %vm484_vm2, %v18756_v57 }
 0x160   : >> { %15928 = vmatmul.mubr.msk.bf16.gmra.mrb[152].mxu1 %vm484_vm2, %v2492_v35  ;;  %15909 = vmatprep.mubr.msk.bf16.mxu0 %vm18105_vm1, %v18104_v2 }
 0x161   : >> { %v1208_v14 = vmax.f32 %v1199_v41, 0.0  ;;  %v1200_v15 = vadd.f32 %v18650_v29, %v1184_v59  ;;  %15931 = vmatprep.mubr.msk.bf16.mxu1 %vm18105_vm1, %v18104_v2 }
 0x162   : >> { %v1048_v58 = vpop.f32.mrb[48].mxu0 }
 0x163   : >> { %v1235_v1 = vsel %vm1226_vm15, %v1208_v14, 0.0  ;;  %v1209_v3 = vmax.f32 %v1200_v15, 0.0  ;;  %v1049_v57 = vadd.f32 %v1048_v58, %v18721_v30  ;;  %v15683_v7 = vpop.f32.mrb[49].mxu0  ;;  %v1159_v9 = vpop.f32.mrb[48].mxu1  ;;  %v18903_v16 = vld [vmem:[#allocation2 + $0x41] sm:$0xff] }
 0x164   : >> { %1244 = vst.msk [vmem:[#allocation2 + $0x58] sm:$0xff] %vm838_vm4, %v1235_v1  ;;  %v1051_v55 = vpop.f32.mrb[50].mxu0  ;;  %v15705_v17 = vpop.f32.mrb[49].mxu1  ;;  %v18910_v31 = vld [vmem:[#allocation2 + $0x42] sm:$0xff]  ;;  %v18941_v7 = vpack.c.bf16 %v18830_v40, %v18794_v8 }
 0x165   : >> { %22206 = vst [vmem:[#allocation18_spill] sm:$0xff] %v18910_v31  ;;  %v1236_v28 = vsel %vm1227_vm3, %v1209_v3, 0.0  ;;  %v1052_v32 = vadd.f32 %v1051_v55, %v18731_v37  ;;  %v1185_v33 = vadd.f32 %v1159_v9, %v1049_v57  ;;  %v15684_v4 = vpop.f32.mrb[51].mxu0  ;;  %v1162_v35 = vpop.f32.mrb[50].mxu1  ;;  %v1220_v37 = vld [vmem:[%s22201_s1 + $0x70] sm:$0xff] }
 0x166   : >> { %1245 = vst.msk [vmem:[#allocation2 + $0x60] sm:$0xff] %vm838_vm4, %v1236_v28  ;;  %v15706_v39 = vpop.f32.mrb[51].mxu1  ;;  %vm1229_vm6 = vcmp.gt.f32.partialorder %v1220_v37, 0.5  ;;  %v18934_v58 = vld [vmem:[#allocation2 + $0x49] sm:$0xff]  ;;  %v1221_v28 = vld [vmem:[%s22201_s1 + $0x78] sm:$0xff]  ;;  %v18981_v37 = vld [vmem:[%s22126_s4] sm:$0xff]  }
 0x167   : >> { %v1201_v10 = vadd.f32 %v18650_v29, %v1185_v33  ;;  %v1186_v48 = vadd.f32 %v1162_v35, %v1052_v32  ;;  %15910 = vmatmul.mubr.msk.bf16.gmra.mrb[156].mxu0 %vm484_vm2, %v2294_v11  ;;  %v18943_v9 = vld [vmem:[#allocation2 + $0x4a] sm:$0xff]  ;;  %v1222_v35 = vld [vmem:[%s22201_s1 + $0x80] sm:$0xff]  ;;  %v17456_v39 = vld [vmem:[%s22126_s4 + $0x18] sm:$0xff]   ;;  %vm1230_vm7 = vcmp.gt.f32.partialorder %v1221_v28, 0.5 }
 0x168   : >> { %15932 = vmatmul.mubr.msk.bf16.gmra.mrb[156].mxu1 %vm484_vm2, %v2493_v22  ;;  %15937 = vmatprep.mubr.msk.bf16.mxu0 %vm18105_vm1, %v18104_v2  ;;  %22207 = vst [vmem:[#allocation19_spill] sm:$0xff] %v18943_v9  ;;  %vm1231_vm8 = vcmp.gt.f32.partialorder %v1222_v35, 0.5  ;;  %v19232_v30 = vld [vmem:[#allocation2 + $0x50] sm:$0xff] }
 0x169   : >> { %v1210_v49 = vmax.f32 %v1201_v10, 0.0  ;;  %v1202_v6 = vadd.f32 %v18650_v29, %v1186_v48  ;;  %15959 = vmatprep.mubr.msk.bf16.mxu1 %vm18105_vm1, %v18104_v2 }
 0x16a   : >> { %v1056_v51 = vpop.f32.mrb[52].mxu0 }
 0x16b   : >> { %v1237_v41 = vsel %vm1228_vm5, %v1210_v49, 0.0  ;;  %v1211_v59 = vmax.f32 %v1202_v6, 0.0  ;;  %v1057_v61 = vadd.f32 %v1056_v51, %v18751_v53  ;;  %v15687_v14 = vpop.f32.mrb[53].mxu0  ;;  %v1167_v15 = vpop.f32.mrb[52].mxu1  ;;  %v18936_v1 = vld [vmem:[#allocation2 + $0x51] sm:$0xff]  ;;  %v18986_v49 = vld [vmem:[%s22126_s4] sm:$0xff]  }
 0x16c   : >> { %1246 = vst.msk [vmem:[#allocation2 + $0x68] sm:$0xff] %vm838_vm4, %v1237_v41  ;;  %v1059_v3 = vpop.f32.mrb[54].mxu0  ;;  %v15709_v57 = vpop.f32.mrb[53].mxu1  ;;  %v18945_v11 = vld [vmem:[#allocation2 + $0x52] sm:$0xff] }
 0x16d   : >> { %v1238_v55 = vsel %vm1229_vm6, %v1211_v59, 0.0  ;;  %v1060_v17 = vadd.f32 %v1059_v3, %v18763_v63  ;;  %v1187_v22 = vadd.f32 %v1167_v15, %v1057_v61  ;;  %v15688_v32 = vpop.f32.mrb[55].mxu0  ;;  %v1170_v33 = vpop.f32.mrb[54].mxu1  ;;  %v18993_v14 = vld [vmem:[#allocation2 + $0x59] sm:$0xff]  ;;  %v2694_v57 = vpack.c.bf16 %v18869_v19, %v18833_v42 }
 0x16e   : >> { %1247 = vst.msk [vmem:[#allocation2 + $0x70] sm:$0xff] %vm838_vm4, %v1238_v55  ;;  %v15710_v40 = vpop.f32.mrb[55].mxu1 }
 0x16f   : >> { %v1203_v4 = vadd.f32 %v18650_v29, %v1187_v22  ;;  %v1188_v63 = vadd.f32 %v1170_v33, %v1060_v17  ;;  %15938 = vmatmul.mubr.msk.bf16.vlgmr.msra.gmra.mrb[160].mxu0 %vm484_vm2, %v18688_v5 }
 0x170   : >> { %15960 = vmatmul.mubr.msk.bf16.vlgmr.msra.gmra.mrb[160].mxu1 %vm484_vm2, %v18941_v7  ;;  %15941 = vmatprep.mubr.msk.bf16.mxu0 %vm18105_vm1, %v18104_v2 }
 0x171   : >> { %v1212_v10 = vmax.f32 %v1203_v4, 0.0  ;;  %v1204_v48 = vadd.f32 %v18650_v29, %v1188_v63  ;;  %15963 = vmatprep.mubr.msk.bf16.mxu1 %vm18105_vm1, %v18104_v2  ;;  %15980 = vmatpush3.bf16.msra.mxu0 %v18774_v21  ;;  %v2473_v63 = vpack.c.bf16 %v18791_v13, %v18744_v46  ;;  %v13999_v46 = vld [vmem:[%s18277_s30 + $0x1c8] sm:$0xff]  ;;  %v14000_v13 = vld [vmem:[%s18277_s30 + $0x1d0] sm:$0xff] }
 0x172   : >> { %v1064_v5 = vpop.f32.mrb[56].mxu0  ;;  %16124 = vmatpush3.bf16.msra.mxu1 %v18782_v54  ;;  %15981 = vmatprep.subr.bf16.mxu0 %v17455_v34  ;;  %v2472_v54 = vpack.c.bf16 %v18741_v44, %v18710_v60  ;;  %v1223_v60 = vld [vmem:[%s22201_s1 + $0x88] sm:$0xff] }
 0x173   : >> { %v1239_v6 = vsel %vm1230_vm7, %v1212_v10, 0.0  ;;  %v1213_v51 = vmax.f32 %v1204_v48, 0.0  ;;  %v1065_v41 = vadd.f32 %v1064_v5, %v18806_v24  ;;  %v15691_v21 = vpop.f32.mrb[57].mxu0  ;;  %v1175_v59 = vpop.f32.mrb[56].mxu1  ;;  %v18991_v61 = vld [vmem:[#allocation2 + $0x61] sm:$0xff]  ;;  %16125 = vmatprep.subr.bf16.mxu1 %v17456_v39  ;;  %vm1232_vm9 = vcmp.gt.f32.partialorder %v1223_v60, 0.5 }
 0x174   : >> { %1248 = vst.msk [vmem:[#allocation2 + $0x78] sm:$0xff] %vm838_vm4, %v1239_v6  ;;  %v1067_v15 = vpop.f32.mrb[58].mxu0  ;;  %v15713_v3 = vpop.f32.mrb[57].mxu1  ;;  %v2695_v48 = vpack.c.bf16 %v18896_v0, %v18872_v20 }
 0x175   : >> { %v1240_v55 = vsel %vm1231_vm8, %v1213_v51, 0.0  ;;  %v1189_v17 = vadd.f32 %v1175_v59, %v1065_v41  ;;  %v15692_v44 = vpop.f32.mrb[59].mxu0  ;;  %v1178_v22 = vpop.f32.mrb[58].mxu1  ;;  %15982 = vmatpush3.bf16.msra.mxu0 %v17455_v34 }
 0x176   : >> { %1249 = vst.msk [vmem:[#allocation2 + $0x80] sm:$0xff] %vm838_vm4, %v1240_v55  ;;  %v15714_v28 = vpop.f32.mrb[59].mxu1  ;;  %16126 = vmatpush3.bf16.msra.mxu1 %v17456_v39  ;;  %15995 = vmatprep.subr.bf16.mxu0 %v18981_v37  ;;  %v2696_v55 = vpack.c.bf16 %v14000_v13, %v13999_v46 }
 0x177   : >> { %v1205_v19 = vadd.f32 %v18650_v29, %v1189_v17  ;;  %15942 = vmatmul.mubr.msk.bf16.gmra.mrb[164].mxu0 %vm484_vm2, %v2472_v54  ;;  %16139 = vmatprep.subr.bf16.mxu1 %v18986_v49  ;;  %v19200_v17 = vld [vmem:[#allocation2 + $0x40] sm:$0xff] }
 0x178   : >> { %15964 = vmatmul.mubr.msk.bf16.gmra.mrb[164].mxu1 %vm484_vm2, %v2694_v57  ;;  %15945 = vmatprep.mubr.msk.bf16.mxu0 %vm18105_vm1, %v18104_v2 }
 0x179   : >> { %v1214_v32 = vmax.f32 %v1205_v19, 0.0  ;;  %15967 = vmatprep.mubr.msk.bf16.mxu1 %vm18105_vm1, %v18104_v2  ;;  %v14001_v19 = vld [vmem:[%s18277_s30 + $0x1d8] sm:$0xff]  ;;  %s14705_s30 = sshll.u32 %s18101_s29, 6  ;;  %s440_s29 = sadd.s32 1, %s18101_s29  }
 0x17a   : >> { %v1342_v33 = vpop.f32.mrb[60].mxu0  ;;  %s21139_s17 = scalar_lea.vmem [#allocation7], %s14705_s30  ;;  %p437_p11 = scmp.ge.s32.totalorder %s440_s29, 8  }
 0x17b   : >> { %v1241_v40 = vsel %vm1232_vm9, %v1214_v32, 0.0  ;;  %v1435_v34 = vpop.f32.mrb[60].mxu1  ;;  %v15719_v4 = vpop.f32.mrb[61].mxu0  ;;  %s22191_s0 = smov (%p437_p11), 64   ;;  %s22339_s20 = smov (%p437_p11), 64  }
 0x17c   : >> { %1250 = vst.msk [vmem:[#allocation2 + $0x88] sm:$0xff] %vm838_vm4, %v1241_v40  ;;  %v19017_v35 = vadd.f32 %v1435_v34, %v1342_v33  ;;  %v15741_v39 = vpop.f32.mrb[61].mxu1  ;;  %v1345_v10 = vpop.f32.mrb[62].mxu0  ;;  %v2475_v34 = vpack.c.bf16 %v18833_v42, %v18833_v42  ;;  %v2886_v4 = vld [vmem:[#allocation2 + $0x9] sm:$0xff]  ;;  %s14996_s18 = sshll.u32 (%p437_p11), %s18194_s25, 7  ;;  %s22340_s19 = scalar_lea.vmem (%p437_p11), [#allocation9], %s18225_s16 }
 0x17d   : >> { %v1438_v5 = vpop.f32.mrb[62].mxu1  ;;  %v15720_v6 = vpop.f32.mrb[63].mxu0  ;;  %v19031_v0 = vld [vmem:[#allocation2 + $0x7a] sm:$0xff]  ;;  %s13595_s15 = sshll.u32 (%p437_p11), %s22340_s19, 4  ;;  %s22076_s28 = scalar_lea.hbm (%p437_p11), %s22134_s12, %s14996_s18  ;;  %s22078_s15 = int_to_ptr.vmem [resolvable:$true] %s13595_s15 }
 0x17e   : >> { %v19021_v51 = vadd.f32 %v1438_v5, %v1345_v10  ;;  %v15742_v41 = vpop.f32.mrb[63].mxu1  ;;  %v2697_v10 = vpack.c.bf16 %v14001_v19, %v14001_v19  ;;  %s22341_s30 = smov (%p437_p11), %s22340_s19  ;;  %s18031_s29 = scalar_lea.vmem (%p437_p11), %s22078_s15, 128 }
 0x17f   : >> { %15946 = vmatmul.mubr.msk.bf16.gmra.mrb[168].mxu0 %vm484_vm2, %v2473_v63  ;;  %v2885_v41 = vld [vmem:[#allocation2 + $0x1] sm:$0xff]  ;;  %p18032_p12 = scmp.ne.s32.totalorder (%p437_p11), %s22078_s15, %s18031_s29  ;;  %s18107_s25 = smov (%p437_p11), [#allocation9]  }
 0x180   : >> { %15968 = vmatmul.mubr.msk.bf16.gmra.mrb[168].mxu1 %vm484_vm2, %v2695_v48  ;;  %15949 = vmatprep.mubr.msk.bf16.mxu0 %vm18105_vm1, %v18104_v2  ;;  %v4218_v48 = vld [vmem:[#allocation2 + $0x69] sm:$0xff] }
 0x181   : >> { %15971 = vmatprep.mubr.msk.bf16.mxu1 %vm18105_vm1, %v18104_v2  ;;  %p18033_p13 = pnand (%p437_p11), %p18032_p12, %p18211_p5 }
 0x182   : >> { %v1350_v21 = vpop.f32.mrb[64].mxu0 }
 0x183   : >> { %v1443_v59 = vpop.f32.mrb[64].mxu1  ;;  %v15723_v20 = vpop.f32.mrb[65].mxu0  ;;  %v19033_v54 = vld [vmem:[#allocation2 + $0x82] sm:$0xff]  ;;  %p18034_p0 = pneg (%p437_p11), %p18033_p13 }
 0x184   : >> { %v19035_v15 = vadd.f32 %v1443_v59, %v1350_v21  ;;  %v15745_v3 = vpop.f32.mrb[65].mxu1  ;;  %v1353_v57 = vpop.f32.mrb[66].mxu0  ;;  %v4229_v21 = vpack.c.bf16 %v4218_v48, %v18991_v61 }
 0x185   : >> { %v1446_v60 = vpop.f32.mrb[66].mxu1  ;;  %v15724_v44 = vpop.f32.mrb[67].mxu0  ;;  %v4220_v3 = vld [vmem:[#allocation2 + $0x79] sm:$0xff] }
 0x186   : >> { %v19039_v22 = vadd.f32 %v1446_v60, %v1353_v57  ;;  %v15746_v28 = vpop.f32.mrb[67].mxu1  ;;  %v2887_v44 = vld [vmem:[#allocation2 + $0x11] sm:$0xff] }
 0x187   : >> { %15950 = vmatmul.mubr.msk.bf16.gmra.mrb[172].mxu0 %vm484_vm2, %v18941_v7 }
 0x188   : >> { %15972 = vmatmul.mubr.msk.bf16.gmra.mrb[172].mxu1 %vm484_vm2, %v2696_v55  ;;  %15953 = vmatprep.mubr.msk.bf16.mxu0 %vm18105_vm1, %v18104_v2 }
 0x189   : >> { %15975 = vmatprep.mubr.msk.bf16.mxu1 %vm18105_vm1, %v18104_v2  ;;  %v2897_v2 = vpack.c.bf16 %v2886_v4, %v2885_v41  ;;  %v2899_v4 = vpack.c.bf16 %v18836_v43, %v18809_v25 }
 0x18a   : >> { %v1358_v32 = vpop.f32.mrb[68].mxu0 }
 0x18b   : >> { %v1451_v33 = vpop.f32.mrb[68].mxu1  ;;  %v15727_v40 = vpop.f32.mrb[69].mxu0 }
 0x18c   : >> { %v19051_v63 = vadd.f32 %v1451_v33, %v1358_v32  ;;  %v15749_v39 = vpop.f32.mrb[69].mxu1  ;;  %v1361_v7 = vpop.f32.mrb[70].mxu0  ;;  %v2898_v32 = vpack.c.bf16 %v18801_v18, %v2887_v44  ;;  %v19063_v33 = vld [vmem:[#allocation2 + $0x71] sm:$0xff] }
 0x18d   : >> { %v1454_v5 = vpop.f32.mrb[70].mxu1  ;;  %v15728_v6 = vpop.f32.mrb[71].mxu0  ;;  %v1618_v44 = vld [vmem:[%s22201_s1 + $0x90] sm:$0xff] }
 0x18e   : >> { %v19053_v46 = vadd.f32 %v1454_v5, %v1361_v7  ;;  %v15750_v13 = vpop.f32.mrb[71].mxu1  ;;  %v17458_v7 = vld [vmem:[%s22126_s4 + $0x8] sm:$0xff]   ;;  %v19084_v5 = vld [vmem:[%s22126_s4 + $0x20] sm:$0xff]   ;;  %vm1627_vm1 = vcmp.gt.f32.partialorder %v1618_v44, 0.5 }
 0x18f   : >> { %15954 = vmatmul.mubr.msk.bf16.gmra.mrb[176].mxu0 %vm484_vm2, %v2475_v34  ;;  %v4230_v34 = vpack.c.bf16 %v4220_v3, %v19063_v33  ;;  %v19089_v6 = vld [vmem:[%s22126_s4 + $0x20] sm:$0xff]  }
 0x190   : >> { %15976 = vmatmul.mubr.msk.bf16.gmra.mrb[176].mxu1 %vm484_vm2, %v2697_v10  ;;  %15983 = vmatprep.mubr.msk.bf16.mxu0 %vm838_vm4, %v2897_v2  ;;  %v17462_v10 = vld [vmem:[%s22126_s4 + $0x8] sm:$0xff]   ;;  %v1620_v44 = vld [vmem:[%s22201_s1 + $0xa0] sm:$0xff] }
 0x191   : >> { %16127 = vmatprep.mubr.msk.bf16.mxu1 %vm838_vm4, %v4229_v21  ;;  %vm1629_vm10 = vcmp.gt.f32.partialorder %v1620_v44, 0.5  ;;  %v19157_v44 = vld [vmem:[%s22126_s4 + $0x30] sm:$0xff]  }
 0x192   : >> { %v1366_v42 = vpop.f32.mrb[72].mxu0 }
 0x193   : >> { %v1459_v59 = vpop.f32.mrb[72].mxu1  ;;  %v15731_v20 = vpop.f32.mrb[73].mxu0 }
 0x194   : >> { %v19060_v57 = vadd.f32 %v1459_v59, %v1366_v42  ;;  %v15753_v55 = vpop.f32.mrb[73].mxu1  ;;  %v1369_v60 = vpop.f32.mrb[74].mxu0  ;;  %v2900_v42 = vpack.c.bf16 %v18901_v12, %v18841_v52  ;;  %v2901_v20 = vpack.c.bf16 %v18934_v58, %v18903_v16 }
 0x195   : >> { %v1462_v28 = vpop.f32.mrb[74].mxu1  ;;  %v15732_v19 = vpop.f32.mrb[75].mxu0 }
 0x196   : >> { %v19065_v40 = vadd.f32 %v1462_v28, %v1369_v60  ;;  %v15754_v39 = vpop.f32.mrb[75].mxu1  ;;  %v2864_v19 = vld [vmem:[#allocation2 + $0x8] sm:$0xff] }
 0x197   : >> { %15984 = vmatmul.mubr.msk.bf16.vlgmr.msra.gmra.mrb[180].mxu0 %vm838_vm4, %v2898_v32 }
 0x198   : >> { %16128 = vmatmul.mubr.msk.bf16.vlgmr.msra.gmra.mrb[180].mxu1 %vm838_vm4, %v4230_v34  ;;  %15987 = vmatprep.mubr.msk.bf16.mxu0 %vm838_vm4, %v2899_v4 }
 0x199   : >> { %15996 = vmatpush3.bf16.msra.mxu0 %v18981_v37  ;;  %16140 = vmatpush3.bf16.msra.mxu1 %v18986_v49 }
 0x19a   : >> { %v1374_v48 = vpop.f32.mrb[76].mxu0  ;;  %15997 = vmatprep.subr.bf16.mxu0 %v17458_v7  ;;  %16141 = vmatprep.subr.bf16.mxu1 %v17462_v10 }
 0x19b   : >> { %v1467_v41 = vpop.f32.mrb[76].mxu1  ;;  %v15735_v2 = vpop.f32.mrb[77].mxu0 }
 0x19c   : >> { %v19091_v13 = vadd.f32 %v1467_v41, %v1374_v48  ;;  %v1377_v37 = vpop.f32.mrb[78].mxu0  ;;  %v15757_v21 = vpop.f32.mrb[77].mxu1  ;;  %v2863_v41 = vld [vmem:[#allocation2] sm:$0xff] }
 0x19d   : >> { %v15736_v49 = vpop.f32.mrb[79].mxu0  ;;  %15998 = vmatpush3.bf16.msra.mxu0 %v17458_v7  ;;  %v1470_v59 = vpop.f32.mrb[78].mxu1  ;;  %16142 = vmatpush3.bf16.msra.mxu1 %v17462_v10  ;;  %v1619_v10 = vld [vmem:[%s22201_s1 + $0x98] sm:$0xff]  ;;  %v2875_v37 = vpack.c.bf16 %v2864_v19, %v2863_v41  ;;  %v19126_v19 = vld [vmem:[#allocation2 + $0x28] sm:$0xff] }
 0x19e   : >> { %v15758_v3 = vpop.f32.mrb[79].mxu1  ;;  %16011 = vmatprep.subr.bf16.mxu0 %v19084_v5  ;;  %16155 = vmatprep.subr.bf16.mxu1 %v19089_v6  ;;  %vm1628_vm2 = vcmp.gt.f32.partialorder %v1619_v10, 0.5 }
 0x19f   : >> { %15988 = vmatmul.mubr.msk.bf16.gmra.mrb[184].mxu0 %vm838_vm4, %v2900_v42  ;;  %v19120_v3 = vld [vmem:[#allocation2 + $0x18] sm:$0xff] }
 0x1a0   : >> { %15991 = vmatprep.mubr.msk.bf16.mxu0 %vm838_vm4, %v2901_v20 }
 0x1a2   : >> { %v1546_v55 = vpop.f32.mrb[80].mxu0 }
 0x1a3   : >> { %v1584_v60 = vadd.f32 %v1546_v55, %v19017_v35  ;;  %v15763_v28 = vpop.f32.mrb[81].mxu0  ;;  %v19105_v32 = vpop.f32.mrb[80].mxu1  ;;  %v2902_v35 = vpack.c.bf16 %v18993_v14, %v18936_v1 }
 0x1a4   : >> { %v1549_v34 = vpop.f32.mrb[82].mxu0  ;;  %v15785_v4 = vpop.f32.mrb[81].mxu1 }
 0x1a5   : >> { %v1600_v39 = vadd.f32 %v18650_v29, %v1584_v60  ;;  %v1585_v7 = vadd.f32 %v1549_v34, %v19021_v51  ;;  %v15764_v48 = vpop.f32.mrb[83].mxu0  ;;  %v19114_v2 = vpop.f32.mrb[82].mxu1 }
 0x1a6   : >> { %v15786_v21 = vpop.f32.mrb[83].mxu1 }
 0x1a7   : >> { %v1609_v49 = vmax.f32 %v1600_v39, 0.0  ;;  %v1601_v42 = vadd.f32 %v18650_v29, %v1585_v7  ;;  %15992 = vmatmul.mubr.msk.bf16.gmra.mrb[188].mxu0 %vm838_vm4, %v2902_v35  ;;  %v2865_v39 = vld [vmem:[#allocation2 + $0x10] sm:$0xff] }
 0x1a8   : >> { %15999 = vmatprep.mubr.msk.bf16.mxu0 %vm838_vm4, %v2875_v37  ;;  %v2876_v41 = vpack.c.bf16 %v19120_v3, %v2865_v39  ;;  %v19137_v37 = vld [vmem:[#allocation2 + $0x20] sm:$0xff]  ;;  %v19165_v39 = vld [vmem:[#allocation2 + $0x38] sm:$0xff] }
 0x1a9   : >> { %v1636_v51 = vsel %vm1627_vm1, %v1609_v49, 0.0  ;;  %v1610_v59 = vmax.f32 %v1601_v42, 0.0  ;;  %v17461_v49 = vld [vmem:[%s22126_s4 + $0x28] sm:$0xff]   ;;  %v2877_v42 = vpack.c.bf16 %v19126_v19, %v19137_v37 }
 0x1aa   : >> { %1645 = vst.msk [vmem:[#allocation2 + $0x90] sm:$0xff] %vm838_vm4, %v1636_v51  ;;  %v1554_v20 = vpop.f32.mrb[84].mxu0 }
 0x1ab   : >> { %v1637_v55 = vsel %vm1628_vm2, %v1610_v59, 0.0  ;;  %v1586_v60 = vadd.f32 %v1554_v20, %v19035_v15  ;;  %v15767_v28 = vpop.f32.mrb[85].mxu0  ;;  %v19128_v34 = vpop.f32.mrb[84].mxu1  ;;  %v1621_v15 = vld [vmem:[%s22201_s1 + $0xa8] sm:$0xff] }
 0x1ac   : >> { %1646 = vst.msk [vmem:[#allocation2 + $0x98] sm:$0xff] %vm838_vm4, %v1637_v55  ;;  %v1557_v4 = vpop.f32.mrb[86].mxu0  ;;  %v15789_v7 = vpop.f32.mrb[85].mxu1  ;;  %vm1630_vm11 = vcmp.gt.f32.partialorder %v1621_v15, 0.5 }
 0x1ad   : >> { %v1602_v10 = vadd.f32 %v18650_v29, %v1586_v60  ;;  %v1587_v48 = vadd.f32 %v1557_v4, %v19039_v22  ;;  %v15768_v35 = vpop.f32.mrb[87].mxu0  ;;  %v19139_v21 = vpop.f32.mrb[86].mxu1  ;;  %v19150_v60 = vld [vmem:[#allocation2 + $0x81] sm:$0xff]  ;;  %v1622_v4 = vld [vmem:[%s22201_s1 + $0xb0] sm:$0xff] }
 0x1ae   : >> { %v15790_v22 = vpop.f32.mrb[87].mxu1  ;;  %22208 = vst [vmem:[#allocation20_spill] sm:$0xff] %v19150_v60  ;;  %v19167_v7 = vld [vmem:[#allocation2 + $0x48] sm:$0xff]  ;;  %vm1631_vm12 = vcmp.gt.f32.partialorder %v1622_v4, 0.5 }
 0x1af   : >> { %v1611_v51 = vmax.f32 %v1602_v10, 0.0  ;;  %v1603_v59 = vadd.f32 %v18650_v29, %v1587_v48  ;;  %16000 = vmatmul.mubr.msk.bf16.vlgmr.msra.gmra.mrb[180].mxu0 %vm838_vm4, %v2876_v41 }
 0x1b0   : >> { %16003 = vmatprep.mubr.msk.bf16.mxu0 %vm838_vm4, %v2877_v42  ;;  %16012 = vmatpush3.bf16.msra.mxu0 %v19084_v5 }
 0x1b1   : >> { %v1638_v20 = vsel %vm1629_vm10, %v1611_v51, 0.0  ;;  %v1612_v55 = vmax.f32 %v1603_v59, 0.0  ;;  %v19152_v28 = vld [vmem:[#allocation2 + $0x89] sm:$0xff]  ;;  %16013 = vmatprep.subr.bf16.mxu0 %v17461_v49 }
 0x1b2   : >> { %22209 = vst [vmem:[#allocation21_spill] sm:$0xff] %v19152_v28  ;;  %1647 = vst.msk [vmem:[#allocation2 + $0xa0] sm:$0xff] %vm838_vm4, %v1638_v20  ;;  %v1562_v29 = vpop.f32.mrb[88].mxu0  ;;  %v4231_v5 = vpack.c.bf16 %v19152_v28, %v19150_v60  ;;  %v19174_v42 = vld [vmem:[#allocation2 + $0x8a] sm:$0xff]  ;;  %v3145_v60 = vpack.c.bf16 %v18908_v23, %v18845_v50 }
 0x1b3   : >> { %v1639_v10 = vsel %vm1630_vm11, %v1612_v55, 0.0  ;;  %v1588_v48 = vadd.f32 %v1562_v29, %v19051_v63  ;;  %v15771_v15 = vpop.f32.mrb[89].mxu0  ;;  %v19170_v35 = vld [vmem:[#allocation2 + $0x91] sm:$0xff]  ;;  %v19172_v41 = vpop.f32.mrb[88].mxu1  ;;  %v19189_v29 = vld [vmem:[%s22125_s3] ss:$0 sm:$0xff] }
 0x1b4   : >> { %22210 = vst [vmem:[#allocation22_spill] sm:$0xff] %v19170_v35  ;;  %v19176_v22 = vld [vmem:[#allocation2 + $0x92] sm:$0xff]  ;;  %1648 = vst.msk [vmem:[#allocation2 + $0xa8] sm:$0xff] %vm838_vm4, %v1639_v10  ;;  %v1565_v51 = vpop.f32.mrb[90].mxu0  ;;  %16131 = vmatprep.mubr.msk.bf16.mxu1 %vm838_vm4, %v4231_v5  ;;  %v15793_v20 = vpop.f32.mrb[89].mxu1  ;;  %16014 = vmatpush3.bf16.msra.mxu0 %v17461_v49 }
 0x1b5   : >> { %v19180_v59 = vld [vmem:[#allocation2 + $0x30] sm:$0xff]  ;;  %v1604_v10 = vadd.f32 %v19189_v29, %v1588_v48  ;;  %v1589_v15 = vadd.f32 %v1565_v51, %v19053_v46  ;;  %v1623_v5 = vld [vmem:[%s22201_s1 + $0xb8] sm:$0xff]  ;;  %v15772_v49 = vpop.f32.mrb[91].mxu0  ;;  %v19202_v55 = vpop.f32.mrb[90].mxu1  ;;  %16027 = vmatprep.subr.bf16.mxu0 %v19157_v44  ;;  %v2879_v48 = vpack.c.bf16 %v19167_v7, %v19200_v17 }
 0x1b6   : >> { %v19198_v20 = vpack.c.bf16 %v19165_v39, %v19180_v59  ;;  %v15794_v46 = vpop.f32.mrb[91].mxu1  ;;  %vm1632_vm13 = vcmp.gt.f32.partialorder %v1623_v5, 0.5 }
 0x1b7   : >> { %v1613_v51 = vmax.f32 %v1604_v10, 0.0  ;;  %v1605_v63 = vadd.f32 %v19189_v29, %v1589_v15  ;;  %v1624_v46 = vld [vmem:[%s22201_s1 + $0xc0] sm:$0xff]  ;;  %v19219_v15 = vld [vmem:[#allocation2 + $0x58] sm:$0xff] }
 0x1b8   : >> { %22211 = vst [vmem:[#allocation23_spill] sm:$0xff] %v19198_v20  ;;  %16004 = vmatmul.mubr.msk.bf16.gmra.mrb[184].mxu0 %vm838_vm4, %v19198_v20  ;;  %v3130_v20 = vld [vmem:[#allocation2 + $0x2] sm:$0xff]  ;;  %vm1633_vm14 = vcmp.gt.f32.partialorder %v1624_v46, 0.5 }
 0x1b9   : >> { %16007 = vmatprep.mubr.msk.bf16.mxu0 %vm838_vm4, %v2879_v48  ;;  %v1640_v49 = vsel %vm1631_vm12, %v1613_v51, 0.0  ;;  %v1614_v8 = vmax.f32 %v1605_v63, 0.0  ;;  %v19211_v36 = vld [vmem:[#allocation2 + $0x99] sm:$0xff] }
 0x1ba   : >> { %22212 = vst [vmem:[#allocation24_spill] sm:$0xff] %v19211_v36  ;;  %1649 = vst.msk [vmem:[#allocation2 + $0xb0] sm:$0xff] %vm838_vm4, %v1640_v49  ;;  %v1570_v4 = vpop.f32.mrb[92].mxu0  ;;  %v4232_v10 = vpack.c.bf16 %v19211_v36, %v19170_v35  ;;  %v19226_v49 = vld [vmem:[#allocation2 + $0x9a] sm:$0xff] }
 0x1bb   : >> { %v1641_v5 = vsel %vm1632_vm13, %v1614_v8, 0.0  ;;  %v1590_v48 = vadd.f32 %v1570_v4, %v19060_v57  ;;  %v15775_v51 = vpop.f32.mrb[93].mxu0  ;;  %v19222_v63 = vpop.f32.mrb[92].mxu1  ;;  %v19224_v47 = vld [vmem:[#allocation2 + $0xa1] sm:$0xff]  ;;  %v3142_v8 = vpack.c.bf16 %v3131_v45, %v3130_v20  ;;  %v1626_v45 = vld [vmem:[%s22201_s1 + $0xd0] sm:$0xff] }
 0x1bc   : >> { %22213 = vst [vmem:[#allocation25_spill] sm:$0xff] %v19224_v47  ;;  %v19228_v24 = vld [vmem:[#allocation2 + $0xa2] sm:$0xff]  ;;  %1650 = vst.msk [vmem:[#allocation2 + $0xb8] sm:$0xff] %vm838_vm4, %v1641_v5  ;;  %v1573_v53 = vpop.f32.mrb[94].mxu0  ;;  %16132 = vmatmul.mubr.msk.bf16.gmra.mrb[184].mxu1 %vm838_vm4, %v4232_v10  ;;  %v15797_v62 = vpop.f32.mrb[93].mxu1  ;;  %v2880_v10 = vpack.c.bf16 %v19219_v15, %v19232_v30  ;;  %vm1635_vm3 = vcmp.gt.f32.partialorder %v1626_v45, 0.5 }
 0x1bd   : >> { %v1606_v4 = vadd.f32 %v19189_v29, %v1590_v48  ;;  %v1591_v51 = vadd.f32 %v1573_v53, %v19065_v40  ;;  %v1625_v5 = vld [vmem:[%s22201_s1 + $0xc8] sm:$0xff]  ;;  %v15776_v38 = vpop.f32.mrb[95].mxu0  ;;  %v19245_v62 = vpop.f32.mrb[94].mxu1 }
 0x1be   : >> { %v15798_v36 = vpop.f32.mrb[95].mxu1  ;;  %vm1634_vm15 = vcmp.gt.f32.partialorder %v1625_v5, 0.5  ;;  %v3132_v5 = vld [vmem:[#allocation2 + $0x12] sm:$0xff] }
 0x1bf   : >> { %v1615_v28 = vmax.f32 %v1606_v4, 0.0  ;;  %v1607_v57 = vadd.f32 %v19189_v29, %v1591_v51 }
 0x1c0   : >> { %16008 = vmatmul.mubr.msk.bf16.gmra.mrb[188].mxu0 %vm838_vm4, %v2880_v10 }
 0x1c1   : >> { %16015 = vmatprep.mubr.msk.bf16.mxu0 %vm838_vm4, %v3142_v8  ;;  %v1642_v53 = vsel %vm1633_vm14, %v1615_v28, 0.0  ;;  %v1616_v40 = vmax.f32 %v1607_v57, 0.0  ;;  %v19250_v38 = vld [vmem:[#allocation2 + $0xa9] sm:$0xff] }
 0x1c2   : >> { %22214 = vst [vmem:[#allocation26_spill] sm:$0xff] %v19250_v38  ;;  %1651 = vst.msk [vmem:[#allocation2 + $0xc0] sm:$0xff] %vm838_vm4, %v1642_v53  ;;  %v1578_v48 = vpop.f32.mrb[96].mxu0  ;;  %v4233_v36 = vpack.c.bf16 %v19250_v38, %v19224_v47  ;;  %v19263_v8 = vld [vmem:[#allocation2 + $0xaa] sm:$0xff] }
 0x1c3   : >> { %v1643_v20 = vsel %vm1634_vm15, %v1616_v40, 0.0  ;;  %v1592_v46 = vadd.f32 %v1578_v48, %v19091_v13  ;;  %v15779_v4 = vpop.f32.mrb[97].mxu0  ;;  %v19259_v51 = vpop.f32.mrb[96].mxu1  ;;  %v19261_v28 = vld [vmem:[#allocation2 + $0xb1] sm:$0xff]  ;;  %v19282_v13 = vld [vmem:[#allocation2 + $0x68] sm:$0xff] }
 0x1c4   : >> { %22215 = vst [vmem:[#allocation27_spill] sm:$0xff] %v19261_v28  ;;  %v19265_v57 = vld [vmem:[#allocation2 + $0xb2] sm:$0xff]  ;;  %1652 = vst.msk [vmem:[#allocation2 + $0xc8] sm:$0xff] %vm838_vm4, %v1643_v20  ;;  %16135 = vmatprep.mubr.msk.bf16.mxu1 %vm838_vm4, %v4233_v36  ;;  %v1581_v10 = vpop.f32.mrb[98].mxu0  ;;  %v15801_v53 = vpop.f32.mrb[97].mxu1  ;;  %v3143_v4 = vpack.c.bf16 %v18811_v26, %v3132_v5  ;;  %v3144_v36 = vpack.c.bf16 %v18843_v56, %v18813_v27  ;;  %v19295_v5 = vld [vmem:[#allocation2 + $0x60] sm:$0xff] }
 0x1c5   : >> { %v1608_v48 = vadd.f32 %v19189_v29, %v1592_v46  ;;  %v15780_v47 = vpop.f32.mrb[99].mxu0  ;;  %v1780_v35 = vpop.f32.mrb[98].mxu1  ;;  %v17465_v20 = vld [vmem:[%s22126_s4 + $0x38] sm:$0xff]   ;;  %v19290_v29 = vld [vmem:[%s22126_s4 + $0x40] sm:$0xff]  }
 0x1c6   : >> { %v15802_v10 = vpop.f32.mrb[99].mxu1 }
 0x1c7   : >> { %v1617_v53 = vmax.f32 %v1608_v48, 0.0 }
 0x1c8   : >> { %16016 = vmatmul.mubr.msk.bf16.vlgmr.msra.gmra.mrb[180].mxu0 %vm838_vm4, %v3143_v4 }
 0x1c9   : >> { %16019 = vmatprep.mubr.msk.bf16.mxu0 %vm838_vm4, %v3144_v36  ;;  %16028 = vmatpush3.bf16.msra.mxu0 %v19157_v44  ;;  %v1644_v47 = vsel %vm1635_vm3, %v1617_v53, 0.0  ;;  %v19285_v35 = vld [vmem:[#allocation2 + $0xb9] sm:$0xff]  ;;  %v19300_v36 = vpack.c.bf16 %v19282_v13, %v19295_v5 }
 0x1ca   : >> { %22216 = vst [vmem:[#allocation28_spill] sm:$0xff] %v19285_v35  ;;  %16029 = vmatprep.subr.bf16.mxu0 %v17465_v20  ;;  %1653 = vst.msk [vmem:[#allocation2 + $0xd0] sm:$0xff] %vm838_vm4, %v1644_v47  ;;  %v1838_v45 = vpop.f32.mrb[100].mxu0  ;;  %v4234_v46 = vpack.c.bf16 %v19285_v35, %v19261_v28  ;;  %v19302_v10 = vld [vmem:[#allocation2 + $0xc0] sm:$0xff]  ;;  %v2021_v28 = vld [vmem:[%s22201_s1 + $0xd8] sm:$0xff] }
 0x1cb   : >> { %v1839_v48 = vadd.f32 %v1838_v45, %v19105_v32  ;;  %v15807_v44 = vpop.f32.mrb[101].mxu0  ;;  %v1949_v4 = vpop.f32.mrb[100].mxu1  ;;  %22217 = vst [vmem:[#allocation29_spill] sm:$0xff] %v19300_v36  ;;  %22218 = vst [vmem:[#allocation30_spill] sm:$0xff] %v19302_v10  ;;  %v19304_v53 = vld [vmem:[#allocation2 + $0xc8] sm:$0xff]  ;;  %vm2030_vm5 = vcmp.gt.f32.partialorder %v2021_v28, 0.5 }
 0x1cc   : >> { %22219 = vst [vmem:[#allocation31_spill] sm:$0xff] %v19304_v53  ;;  %v1841_v40 = vpop.f32.mrb[102].mxu0  ;;  %v19309_v47 = vld [vmem:[%s22125_s3] ss:$0 sm:$0xff]  ;;  %16136 = vmatmul.mubr.msk.bf16.gmra.mrb[188].mxu1 %vm838_vm4, %v4234_v46  ;;  %v15829_v38 = vpop.f32.mrb[101].mxu1 }
 0x1cd   : >> { %16030 = vmatpush3.bf16.msra.mxu0 %v17465_v20  ;;  %v1842_v45 = vadd.f32 %v1841_v40, %v19114_v2  ;;  %v1987_v44 = vadd.f32 %v1949_v4, %v1839_v48  ;;  %16143 = vmatprep.mubr.msk.bf16.mxu1 %vm838_vm4, %v19300_v36  ;;  %v1952_v35 = vpop.f32.mrb[102].mxu1  ;;  %v15808_v46 = vpop.f32.mrb[103].mxu0  ;;  %v3146_v38 = vpack.c.bf16 %v18943_v9, %v18910_v31  ;;  %v2022_v48 = vld [vmem:[%s22201_s1 + $0xe0] sm:$0xff]  ;;  %v19330_v4 = vld [vmem:[#allocation2 + $0x78] sm:$0xff] }
 0x1ce   : >> { %16043 = vmatprep.subr.bf16.mxu0 %v19290_v29  ;;  %v15830_v20 = vpop.f32.mrb[103].mxu1  ;;  %v19333_v46 = vld [vmem:[#allocation2 + $0x88] sm:$0xff]  ;;  %vm2031_vm6 = vcmp.gt.f32.partialorder %v2022_v48, 0.5  ;;  %v19346_v28 = vld [vmem:[#allocation2 + $0x80] sm:$0xff] }
 0x1cf   : >> { %v2003_v2 = vadd.f32 %v19309_v47, %v1987_v44  ;;  %v1988_v40 = vadd.f32 %v1952_v35, %v1842_v45  ;;  %v19336_v20 = vld [vmem:[#allocation2 + $0x70] sm:$0xff]  ;;  %v19338_v44 = vld [vmem:[#allocation2 + $0xc2] sm:$0xff]  ;;  %v19360_v50 = vpack.c.bf16 %v19333_v46, %v19346_v28 }
 0x1d0   : >> { %16020 = vmatmul.mubr.msk.bf16.gmra.mrb[184].mxu0 %vm838_vm4, %v3145_v60  ;;  %22220 = vst [vmem:[#allocation32_spill] sm:$0xff] %v19338_v44  ;;  %v19344_v60 = vpack.c.bf16 %v19330_v4, %v19336_v20 }
 0x1d1   : >> { %16023 = vmatprep.mubr.msk.bf16.mxu0 %vm838_vm4, %v3146_v38  ;;  %v2012_v32 = vmax.f32 %v2003_v2, 0.0  ;;  %v2004_v36 = vadd.f32 %v19309_v47, %v1988_v40  ;;  %v19340_v35 = vld [vmem:[#allocation2 + $0xca] sm:$0xff]  ;;  %v19348_v38 = vld [vmem:[#allocation2 + $0x5a] sm:$0xff] }
 0x1d2   : >> { %22221 = vst [vmem:[#allocation33_spill] sm:$0xff] %v19340_v35  ;;  %v1846_v45 = vpop.f32.mrb[104].mxu0  ;;  %v17466_v2 = vld [vmem:[%s22126_s4 + $0x28] sm:$0xff]   ;;  %v19355_v40 = vpack.c.bf16 %v19340_v35, %v19338_v44 }
 0x1d3   : >> { %v2039_v9 = vsel %vm2030_vm5, %v2012_v32, 0.0  ;;  %v2013_v53 = vmax.f32 %v2004_v36, 0.0  ;;  %v1847_v23 = vadd.f32 %v1846_v45, %v19128_v34  ;;  %v15811_v31 = vpop.f32.mrb[105].mxu0  ;;  %v1957_v56 = vpop.f32.mrb[104].mxu1  ;;  %v3147_v34 = vpack.c.bf16 %v19348_v38, %v18945_v11 }
 0x1d4   : >> { %22222 = vst [vmem:[#allocation34_spill] sm:$0xff] %v19355_v40  ;;  %2048 = vst.msk [vmem:[#allocation2 + $0xd8] sm:$0xff] %vm838_vm4, %v2039_v9  ;;  %v1849_v10 = vpop.f32.mrb[106].mxu0  ;;  %16144 = vmatmul.mubr.msk.bf16.vlgmr.msra.gmra.mrb[180].mxu1 %vm838_vm4, %v19344_v60  ;;  %v15833_v26 = vpop.f32.mrb[105].mxu1  ;;  %v2023_v31 = vld [vmem:[%s22201_s1 + $0xe8] sm:$0xff] }
 0x1d5   : >> { %v2040_v35 = vsel %vm2031_vm6, %v2013_v53, 0.0  ;;  %v1850_v32 = vadd.f32 %v1849_v10, %v19139_v21  ;;  %v1989_v36 = vadd.f32 %v1957_v56, %v1847_v23  ;;  %16156 = vmatpush3.bf16.msra.mxu1 %v19089_v6  ;;  %16147 = vmatprep.mubr.msk.bf16.mxu1 %vm838_vm4, %v19360_v50  ;;  %v1960_v9 = vpop.f32.mrb[106].mxu1  ;;  %v15812_v45 = vpop.f32.mrb[107].mxu0  ;;  %v3288_v26 = vpack.c.bf16 %v19137_v37, %v19120_v3  ;;  %v19381_v23 = vld [vmem:[%s22126_s4 + $0x30] sm:$0xff]   ;;  %v19388_v53 = vld [vmem:[#allocation2 + $0x98] sm:$0xff]  ;;  %v19391_v3 = vld [vmem:[#allocation2 + $0xa8] sm:$0xff] }
 0x1d6   : >> { %2049 = vst.msk [vmem:[#allocation2 + $0xe0] sm:$0xff] %vm838_vm4, %v2040_v35  ;;  %v15834_v56 = vpop.f32.mrb[107].mxu1  ;;  %16157 = vmatprep.subr.bf16.mxu1 %v17466_v2  ;;  %v2024_v10 = vld [vmem:[%s22201_s1 + $0xf0] sm:$0xff]  ;;  %vm2032_vm7 = vcmp.gt.f32.partialorder %v2023_v31, 0.5 }
 0x1d7   : >> { %v2005_v6 = vadd.f32 %v19309_v47, %v1989_v36  ;;  %v1990_v21 = vadd.f32 %v1960_v9, %v1850_v32  ;;  %v19394_v35 = vld [vmem:[#allocation2 + $0x90] sm:$0xff]  ;;  %vm2033_vm8 = vcmp.gt.f32.partialorder %v2024_v10, 0.5  ;;  %v19398_v9 = vld [vmem:[#allocation2 + $0xa0] sm:$0xff] }
 0x1d8   : >> { %16024 = vmatmul.mubr.msk.bf16.gmra.mrb[188].mxu0 %vm838_vm4, %v3147_v34  ;;  %v4210_v36 = vpack.c.bf16 %v19388_v53, %v19394_v35 }
 0x1d9   : >> { %16031 = vmatprep.mubr.msk.bf16.mxu0 %vm838_vm4, %v3288_v26  ;;  %v2014_v37 = vmax.f32 %v2005_v6, 0.0  ;;  %v2006_v48 = vadd.f32 %v19309_v47, %v1990_v21  ;;  %16158 = vmatpush3.bf16.msra.mxu1 %v17466_v2  ;;  %v4211_v6 = vpack.c.bf16 %v19391_v3, %v19398_v9 }
 0x1da   : >> { %v1854_v32 = vpop.f32.mrb[108].mxu0  ;;  %16171 = vmatprep.subr.bf16.mxu1 %v19381_v23 }
 0x1db   : >> { %v2041_v31 = vsel %vm2032_vm7, %v2014_v37, 0.0  ;;  %v2015_v34 = vmax.f32 %v2006_v48, 0.0  ;;  %v1855_v45 = vadd.f32 %v1854_v32, %v19172_v41  ;;  %v15815_v26 = vpop.f32.mrb[109].mxu0  ;;  %v1965_v56 = vpop.f32.mrb[108].mxu1  ;;  %v2025_v37 = vld [vmem:[%s22201_s1 + $0xf8] sm:$0xff]  ;;  %v3289_v48 = vpack.c.bf16 %v19180_v59, %v19126_v19  ;;  %v2026_v19 = vld [vmem:[%s22201_s1 + $0x100] sm:$0xff] }
 0x1dc   : >> { %2050 = vst.msk [vmem:[#allocation2 + $0xe8] sm:$0xff] %vm838_vm4, %v2041_v31  ;;  %v1857_v2 = vpop.f32.mrb[110].mxu0  ;;  %16148 = vmatmul.mubr.msk.bf16.gmra.mrb[184].mxu1 %vm838_vm4, %v4210_v36  ;;  %v15837_v21 = vpop.f32.mrb[109].mxu1  ;;  %v17469_v36 = vld [vmem:[%s22126_s4 + $0x48] sm:$0xff]   ;;  %v19428_v59 = vld [vmem:[#allocation2 + $0xb8] sm:$0xff]  ;;  %vm2034_vm9 = vcmp.gt.f32.partialorder %v2025_v37, 0.5 }
 0x1dd   : >> { %v2042_v10 = vsel %vm2033_vm8, %v2015_v34, 0.0  ;;  %v1858_v40 = vadd.f32 %v1857_v2, %v19202_v55  ;;  %v1991_v44 = vadd.f32 %v1965_v56, %v1855_v45  ;;  %16151 = vmatprep.mubr.msk.bf16.mxu1 %vm838_vm4, %v4211_v6  ;;  %v1968_v41 = vpop.f32.mrb[110].mxu1  ;;  %v15816_v32 = vpop.f32.mrb[111].mxu0  ;;  %v19416_v31 = vld [vmem:[#allocation2 + $0xe0] sm:$0xff]  ;;  %v3290_v55 = vpack.c.bf16 %v19200_v17, %v19165_v39  ;;  %v19421_v45 = vld [vmem:[#allocation2 + $0xd8] sm:$0xff]  ;;  %v19433_v17 = vld [vmem:[#allocation2 + $0x6a] sm:$0xff] }
 0x1de   : >> { %22223 = vst [vmem:[#allocation35_spill] sm:$0xff] %v19416_v31  ;;  %2051 = vst.msk [vmem:[#allocation2 + $0xf0] sm:$0xff] %vm838_vm4, %v2042_v10  ;;  %v15838_v34 = vpop.f32.mrb[111].mxu1  ;;  %v19442_v2 = vld [vmem:[%s22126_s4 + $0x50] sm:$0xff]   ;;  %vm2035_vm1 = vcmp.gt.f32.partialorder %v2026_v19, 0.5  ;;  %v19446_v37 = vld [vmem:[#allocation2 + $0x62] sm:$0xff] }
 0x1df   : >> { %22224 = vst [vmem:[#allocation36_spill] sm:$0xff] %v19421_v45  ;;  %v2007_v26 = vadd.f32 %v19309_v47, %v1991_v44  ;;  %v1992_v56 = vadd.f32 %v1968_v41, %v1858_v40  ;;  %v19437_v40 = vld [vmem:[#allocation2 + $0xb0] sm:$0xff]  ;;  %v4473_v34 = vpack.c.bf16 %v19433_v17, %v19446_v37  ;;  %v2027_v45 = vld [vmem:[%s22201_s1 + $0x108] sm:$0xff] }
 0x1e0   : >> { %16032 = vmatmul.mubr.msk.bf16.vlgmr.msra.gmra.mrb[180].mxu0 %vm838_vm4, %v3289_v48  ;;  %v4212_v10 = vpack.c.bf16 %v19428_v59, %v19437_v40  ;;  %vm2036_vm2 = vcmp.gt.f32.partialorder %v2027_v45, 0.5 }
 0x1e1   : >> { %16035 = vmatprep.mubr.msk.bf16.mxu0 %vm838_vm4, %v3290_v55  ;;  %16044 = vmatpush3.bf16.msra.mxu0 %v19290_v29  ;;  %v2016_v39 = vmax.f32 %v2007_v26, 0.0  ;;  %v2008_v44 = vadd.f32 %v19309_v47, %v1992_v56  ;;  %v19451_v26 = vld [vmem:[#allocation2 + $0xd9] sm:$0xff] }
 0x1e2   : >> { %16045 = vmatprep.subr.bf16.mxu0 %v17469_v36  ;;  %v1862_v21 = vpop.f32.mrb[112].mxu0 }
 0x1e3   : >> { %v2043_v41 = vsel %vm2034_vm9, %v2016_v39, 0.0  ;;  %v2017_v29 = vmax.f32 %v2008_v44, 0.0  ;;  %v1863_v48 = vadd.f32 %v1862_v21, %v19222_v63  ;;  %v15819_v32 = vpop.f32.mrb[113].mxu0  ;;  %v1973_v55 = vpop.f32.mrb[112].mxu1  ;;  %v19453_v56 = vld [vmem:[#allocation2 + $0xe1] sm:$0xff] }
 0x1e4   : >> { %2052 = vst.msk [vmem:[#allocation2 + $0xf8] sm:$0xff] %vm838_vm4, %v2043_v41  ;;  %v1865_v6 = vpop.f32.mrb[114].mxu0  ;;  %16152 = vmatmul.mubr.msk.bf16.gmra.mrb[188].mxu1 %vm838_vm4, %v4212_v10  ;;  %v15841_v31 = vpop.f32.mrb[113].mxu1  ;;  %v19457_v39 = vld [vmem:[#allocation2 + $0xe2] sm:$0xff]  ;;  %v19470_v10 = vld [vmem:[#allocation2 + $0xda] sm:$0xff] }
 0x1e5   : >> { %16046 = vmatpush3.bf16.msra.mxu0 %v17469_v36  ;;  %v2044_v44 = vsel %vm2035_vm1, %v2017_v29, 0.0  ;;  %v1866_v21 = vadd.f32 %v1865_v6, %v19245_v62  ;;  %v1993_v32 = vadd.f32 %v1973_v55, %v1863_v48  ;;  %16159 = vmatprep.mubr.msk.bf16.mxu1 %vm838_vm4, %v4473_v34  ;;  %v1976_v41 = vpop.f32.mrb[114].mxu1  ;;  %v3291_v36 = vpack.c.bf16 %v19232_v30, %v19167_v7  ;;  %v15820_v31 = vpop.f32.mrb[115].mxu0  ;;  %v2028_v30 = vld [vmem:[%s22201_s1 + $0x110] sm:$0xff] }
 0x1e6   : >> { %16059 = vmatprep.subr.bf16.mxu0 %v19442_v2  ;;  %2053 = vst.msk [vmem:[#allocation2 + $0x100] sm:$0xff] %vm838_vm4, %v2044_v44  ;;  %v3292_v62 = vpack.c.bf16 %v19295_v5, %v19219_v15  ;;  %v15842_v19 = vpop.f32.mrb[115].mxu1  ;;  %v19484_v15 = vld [vmem:[#allocation2 + $0x72] sm:$0xff]  ;;  %vm2037_vm10 = vcmp.gt.f32.partialorder %v2028_v30, 0.5  ;;  %v19500_v6 = vld [vmem:[#allocation2 + $0xea] sm:$0xff]  ;;  %v19520_v30 = vld [vmem:[%s22126_s4 + $0x40] sm:$0xff]  }
 0x1e7   : >> { %v2009_v29 = vadd.f32 %v19309_v47, %v1993_v32  ;;  %v1994_v48 = vadd.f32 %v1976_v41, %v1866_v21  ;;  %v4474_v34 = vpack.c.bf16 %v19031_v0, %v19484_v15  ;;  %v17470_v44 = vld [vmem:[%s22126_s4 + $0x38] sm:$0xff]  }
 0x1e8   : >> { %16036 = vmatmul.mubr.msk.bf16.gmra.mrb[184].mxu0 %vm838_vm4, %v3291_v36  ;;  %v4475_v36 = vpack.c.bf16 %v19174_v42, %v19033_v54 }
 0x1e9   : >> { %16039 = vmatprep.mubr.msk.bf16.mxu0 %vm838_vm4, %v3292_v62  ;;  %v2018_v7 = vmax.f32 %v2009_v29, 0.0  ;;  %v2010_v55 = vadd.f32 %v19309_v47, %v1994_v48  ;;  %v19494_v62 = vld [vmem:[#allocation2 + $0xe9] sm:$0xff] }
 0x1ea   : >> { %v1870_v5 = vpop.f32.mrb[116].mxu0 }
 0x1eb   : >> { %v2045_v21 = vsel %vm2036_vm2, %v2018_v7, 0.0  ;;  %v2019_v32 = vmax.f32 %v2010_v55, 0.0  ;;  %v1871_v45 = vadd.f32 %v1870_v5, %v19259_v51  ;;  %v1981_v41 = vpop.f32.mrb[116].mxu1  ;;  %v15823_v31 = vpop.f32.mrb[117].mxu0  ;;  %v19496_v19 = vld [vmem:[#allocation2 + $0xf1] sm:$0xff] }
 0x1ec   : >> { %2054 = vst.msk [vmem:[#allocation2 + $0x108] sm:$0xff] %vm838_vm4, %v2045_v21  ;;  %16160 = vmatmul.mubr.msk.bf16.vlgmr.msra.gmra.mrb[180].mxu1 %vm838_vm4, %v4474_v34  ;;  %v1873_v29 = vpop.f32.mrb[118].mxu0  ;;  %v15845_v48 = vpop.f32.mrb[117].mxu1  ;;  %v19502_v7 = vld [vmem:[#allocation2 + $0xf2] sm:$0xff]  ;;  %v3293_v34 = vpack.c.bf16 %v19336_v20, %v19282_v13  ;;  %v22225_v13 = vpack.c.bf16 %v18809_v25, %v18801_v18 }
 0x1ed   : >> { %v2046_v55 = vsel %vm2037_vm10, %v2019_v32, 0.0  ;;  %v1995_v5 = vadd.f32 %v1981_v41, %v1871_v45  ;;  %v2029_v31 = vld [vmem:[%s22201_s1 + $0x118] sm:$0xff]  ;;  %16172 = vmatpush3.bf16.msra.mxu1 %v19381_v23  ;;  %16163 = vmatprep.mubr.msk.bf16.mxu1 %vm838_vm4, %v4475_v36  ;;  %v15824_v21 = vpop.f32.mrb[119].mxu0  ;;  %v1984_v29 = vpop.f32.mrb[118].mxu1  ;;  %v4476_v45 = vpack.c.bf16 %v19226_v49, %v19176_v22 }
 0x1ee   : >> { %2055 = vst.msk [vmem:[#allocation2 + $0x110] sm:$0xff] %vm838_vm4, %v2046_v55  ;;  %16173 = vmatprep.subr.bf16.mxu1 %v17470_v44  ;;  %v15846_v32 = vpop.f32.mrb[119].mxu1  ;;  %vm2038_vm11 = vcmp.gt.f32.partialorder %v2029_v31, 0.5  ;;  %v19531_v36 = vld [vmem:[#allocation2 + $0xf9] sm:$0xff] }
 0x1ef   : >> { %v2011_v23 = vadd.f32 %v19309_v47, %v1995_v5  ;;  %v4477_v5 = vpack.c.bf16 %v19263_v8, %v19228_v24  ;;  %v19537_v18 = vld [vmem:[#allocation2 + $0xfa] sm:$0xff] }
 0x1f0   : >> { %16040 = vmatmul.mubr.msk.bf16.gmra.mrb[188].mxu0 %vm838_vm4, %v3293_v34  ;;  %22226 = vst [vmem:[#allocation37_spill] sm:$0xff] %v19537_v18 }
 0x1f1   : >> { %16047 = vmatprep.mubr.msk.bf16.mxu0 %vm838_vm4, %v22225_v13  ;;  %v2020_v20 = vmax.f32 %v2011_v23, 0.0  ;;  %16174 = vmatpush3.bf16.msra.mxu1 %v17470_v44  ;;  %v3584_v23 = vpack.c.bf16 %v19446_v37, %v19348_v38 }
 0x1f2   : >> { %16187 = vmatprep.subr.bf16.mxu1 %v19520_v30  ;;  %v2148_v41 = vpop.f32.mrb[120].mxu0 }
 0x1f3   : >> { %v2047_v55 = vsel %vm2038_vm11, %v2020_v20, 0.0  ;;  %v15851_v31 = vpop.f32.mrb[121].mxu0  ;;  %v2241_v34 = vpop.f32.mrb[120].mxu1  ;;  %v19535_v21 = vld [vmem:[#allocation2 + $0x101] sm:$0xff] }
 0x1f4   : >> { %v19539_v25 = vld [vmem:[#allocation2 + $0x102] sm:$0xff]  ;;  %2056 = vst.msk [vmem:[#allocation2 + $0x118] sm:$0xff] %vm838_vm4, %v2047_v55  ;;  %16164 = vmatmul.mubr.msk.bf16.gmra.mrb[184].mxu1 %vm838_vm4, %v4476_v45  ;;  %v2151_v44 = vpop.f32.mrb[122].mxu0  ;;  %v19543_v29 = vadd.f32 %v2241_v34, %v2148_v41  ;;  %v15873_v32 = vpop.f32.mrb[121].mxu1  ;;  %v17473_v31 = vld [vmem:[%s22126_s4 + $0x58] sm:$0xff]   ;;  %v22228_v41 = vpack.c.bf16 %v18841_v52, %v18836_v43 }
 0x1f5   : >> { %22227 = vst [vmem:[#allocation38_spill] sm:$0xff] %v19539_v25  ;;  %16167 = vmatprep.mubr.msk.bf16.mxu1 %vm838_vm4, %v4477_v5  ;;  %v15852_v20 = vpop.f32.mrb[123].mxu0  ;;  %v2244_v55 = vpop.f32.mrb[122].mxu1  ;;  %v19559_v34 = vld [vmem:[#allocation2 + $0xba] sm:$0xff]  ;;  %v22229_v32 = vpack.c.bf16 %v18903_v16, %v18901_v12  ;;  %v19575_v12 = vld [vmem:[#allocation2 + $0x109] sm:$0xff] }
 0x1f6   : >> { %v19553_v48 = vadd.f32 %v2244_v55, %v2151_v44  ;;  %v15874_v45 = vpop.f32.mrb[123].mxu1  ;;  %v19569_v5 = vld [vmem:[%s22126_s4 + $0x60] sm:$0xff]   ;;  %v4478_v43 = vpack.c.bf16 %v19559_v34, %v19265_v57  ;;  %v4618_v44 = vpack.c.bf16 %v19346_v28, %v19330_v4  ;;  %v19584_v13 = vld [vmem:[#allocation2 + $0x10a] sm:$0xff] }
 0x1f7   : >> { %22231 = vst [vmem:[#allocation40_spill] sm:$0xff] %v19584_v13 }
 0x1f8   : >> { %16048 = vmatmul.mubr.msk.bf16.vlgmr.msra.gmra.mrb[180].mxu0 %vm838_vm4, %v22228_v41 }
 0x1f9   : >> { %16051 = vmatprep.mubr.msk.bf16.mxu0 %vm838_vm4, %v22229_v32  ;;  %16060 = vmatpush3.bf16.msra.mxu0 %v19442_v2 }
 0x1fa   : >> { %16061 = vmatprep.subr.bf16.mxu0 %v17473_v31  ;;  %v2156_v52 = vpop.f32.mrb[124].mxu0 }
 0x1fb   : >> { %v15855_v20 = vpop.f32.mrb[125].mxu0  ;;  %v2249_v55 = vpop.f32.mrb[124].mxu1  ;;  %v19577_v16 = vld [vmem:[#allocation2 + $0x111] sm:$0xff] }
 0x1fc   : >> { %v19579_v2 = vld [vmem:[#allocation2 + $0x112] sm:$0xff]  ;;  %16168 = vmatmul.mubr.msk.bf16.gmra.mrb[188].mxu1 %vm838_vm4, %v4478_v43  ;;  %v2159_v45 = vpop.f32.mrb[126].mxu0  ;;  %v19582_v41 = vadd.f32 %v2249_v55, %v2156_v52  ;;  %v15877_v32 = vpop.f32.mrb[125].mxu1  ;;  %v22232_v52 = vpack.c.bf16 %v18936_v1, %v18934_v58  ;;  %v22233_v55 = vpack.c.bf16 %v18991_v61, %v18993_v14  ;;  %v19610_v1 = vld [vmem:[#allocation2 + $0x69] sm:$0xff] }
 0x1fd   : >> { %22230 = vst [vmem:[#allocation39_spill] sm:$0xff] %v19579_v2  ;;  %16062 = vmatpush3.bf16.msra.mxu0 %v17473_v31  ;;  %16175 = vmatprep.mubr.msk.bf16.mxu1 %vm838_vm4, %v4618_v44  ;;  %v15856_v28 = vpop.f32.mrb[127].mxu0  ;;  %v2252_v20 = vpop.f32.mrb[126].mxu1  ;;  %v4619_v44 = vpack.c.bf16 %v19394_v35, %v19333_v46  ;;  %v3439_v46 = vpack.c.bf16 %v19063_v33, %v19610_v1 }
 0x1fe   : >> { %16075 = vmatprep.subr.bf16.mxu0 %v19569_v5  ;;  %v19592_v43 = vadd.f32 %v2252_v20, %v2159_v45  ;;  %v15878_v31 = vpop.f32.mrb[127].mxu1  ;;  %v17474_v45 = vld [vmem:[%s22126_s4 + $0x48] sm:$0xff]   ;;  %v4620_v28 = vpack.c.bf16 %v19398_v9, %v19388_v53  ;;  %v17475_v53 = vld [vmem:[%s22126_s4 + $0x50] sm:$0xff]   ;;  %v4621_v33 = vpack.c.bf16 %v19437_v40, %v19391_v3 }
 0x1ff   : >> { %v17477_v3 = vld [vmem:[%s22126_s4 + $0x68] sm:$0xff]  }
 0x200   : >> { %16052 = vmatmul.mubr.msk.bf16.gmra.mrb[184].mxu0 %vm838_vm4, %v22232_v52 }
 0x201   : >> { %16055 = vmatprep.mubr.msk.bf16.mxu0 %vm838_vm4, %v22233_v55 }
 0x202   : >> { %v2164_v32 = vpop.f32.mrb[128].mxu0 }
 0x203   : >> { %v15859_v20 = vpop.f32.mrb[129].mxu0  ;;  %v2257_v58 = vpop.f32.mrb[128].mxu1 }
 0x204   : >> { %16176 = vmatmul.mubr.msk.bf16.vlgmr.msra.gmra.mrb[180].mxu1 %vm838_vm4, %v4619_v44  ;;  %v2167_v61 = vpop.f32.mrb[130].mxu0  ;;  %v19612_v14 = vadd.f32 %v2257_v58, %v2164_v32  ;;  %v15881_v31 = vpop.f32.mrb[129].mxu1  ;;  %v22234_v44 = vld [vmem:[#allocation14_spill] sm:$0xff] }
 0x205   : >> { %16188 = vmatpush3.bf16.msra.mxu1 %v19520_v30  ;;  %16179 = vmatprep.mubr.msk.bf16.mxu1 %vm838_vm4, %v4620_v28  ;;  %v15860_v35 = vpop.f32.mrb[131].mxu0  ;;  %v2260_v52 = vpop.f32.mrb[130].mxu1  ;;  %v22235_v30 = vpack.c.bf16 %v18813_v27, %v22234_v44  ;;  %v22236_v28 = vld [vmem:[#allocation30_spill] sm:$0xff] }
 0x206   : >> { %16189 = vmatprep.subr.bf16.mxu1 %v17474_v45  ;;  %v19621_v9 = vadd.f32 %v2260_v52, %v2167_v61  ;;  %v15882_v55 = vpop.f32.mrb[131].mxu1  ;;  %v4622_v20 = vpack.c.bf16 %v22236_v28, %v19428_v59  ;;  %v22237_v59 = vld [vmem:[#allocation16_spill] sm:$0xff] }
 0x207   : >> { %v22238_v55 = vld [vmem:[#allocation15_spill] sm:$0xff] }
 0x208   : >> { %16056 = vmatmul.mubr.msk.bf16.gmra.mrb[188].mxu0 %vm838_vm4, %v3439_v46  ;;  %v22239_v44 = vpack.c.bf16 %v22237_v59, %v22238_v55 }
 0x209   : >> { %16063 = vmatprep.mubr.msk.bf16.mxu0 %vm838_vm4, %v22235_v30  ;;  %16190 = vmatpush3.bf16.msra.mxu1 %v17474_v45  ;;  %v19645_v30 = vld [vmem:[#allocation2 + $0xd0] sm:$0xff] }
 0x20a   : >> { %v2172_v32 = vpop.f32.mrb[132].mxu0  ;;  %16203 = vmatprep.subr.bf16.mxu1 %v17475_v53 }
 0x20b   : >> { %v15863_v58 = vpop.f32.mrb[133].mxu0  ;;  %v2265_v61 = vpop.f32.mrb[132].mxu1 }
 0x20c   : >> { %16180 = vmatmul.mubr.msk.bf16.gmra.mrb[184].mxu1 %vm838_vm4, %v4621_v33  ;;  %v2175_v31 = vpop.f32.mrb[134].mxu0  ;;  %v19633_v46 = vadd.f32 %v2265_v61, %v2172_v32  ;;  %v15885_v35 = vpop.f32.mrb[133].mxu1  ;;  %v22240_v33 = vld [vmem:[#allocation18_spill] sm:$0xff]  ;;  %v22241_v32 = vld [vmem:[#allocation17_spill] sm:$0xff]  ;;  %v22243_v61 = vld [vmem:[#allocation31_spill] sm:$0xff] }
 0x20d   : >> { %16183 = vmatprep.mubr.msk.bf16.mxu1 %vm838_vm4, %v4622_v20  ;;  %v15864_v27 = vpop.f32.mrb[135].mxu0  ;;  %v2268_v40 = vpop.f32.mrb[134].mxu1  ;;  %v22242_v58 = vpack.c.bf16 %v22240_v33, %v22241_v32  ;;  %v19655_v20 = vld [vmem:[%s22126_s4 + $0x70] sm:$0xff]   ;;  %v19659_v35 = vld [vmem:[#allocation2 + $0x79] sm:$0xff] }
 0x20e   : >> { %v19639_v45 = vadd.f32 %v2268_v40, %v2175_v31  ;;  %v15886_v52 = vpop.f32.mrb[135].mxu1  ;;  %v4623_v31 = vpack.c.bf16 %v19645_v30, %v22243_v61  ;;  %v22244_v40 = vld [vmem:[#allocation20_spill] sm:$0xff] }
 0x20f   : >> { %v4763_v52 = vpack.c.bf16 %v22244_v40, %v19659_v35  ;;  %v22245_v40 = vld [vmem:[#allocation19_spill] sm:$0xff] }
 0x210   : >> { %16064 = vmatmul.mubr.msk.bf16.vlgmr.msra.gmra.mrb[180].mxu0 %vm838_vm4, %v22239_v44 }
 0x211   : >> { %16067 = vmatprep.mubr.msk.bf16.mxu0 %vm838_vm4, %v22242_v58  ;;  %16076 = vmatpush3.bf16.msra.mxu0 %v19569_v5 }
 0x212   : >> { %16077 = vmatprep.subr.bf16.mxu0 %v17477_v3  ;;  %v2180_v27 = vpop.f32.mrb[136].mxu0 }
 0x213   : >> { %v15867_v59 = vpop.f32.mrb[137].mxu0  ;;  %v2273_v55 = vpop.f32.mrb[136].mxu1 }
 0x214   : >> { %16184 = vmatmul.mubr.msk.bf16.gmra.mrb[188].mxu1 %vm838_vm4, %v4623_v31  ;;  %v2183_v5 = vpop.f32.mrb[138].mxu0  ;;  %v19664_v44 = vadd.f32 %v2273_v55, %v2180_v27  ;;  %v15889_v33 = vpop.f32.mrb[137].mxu1  ;;  %v22246_v59 = vpack.c.bf16 %v18945_v11, %v22245_v40  ;;  %v17478_v31 = vld [vmem:[%s22126_s4 + $0x58] sm:$0xff]   ;;  %v22247_v11 = vld [vmem:[#allocation22_spill] sm:$0xff]  ;;  %v22248_v55 = vld [vmem:[#allocation21_spill] sm:$0xff] }
 0x215   : >> { %16078 = vmatpush3.bf16.msra.mxu0 %v17477_v3  ;;  %16191 = vmatprep.mubr.msk.bf16.mxu1 %vm838_vm4, %v4763_v52  ;;  %v15868_v32 = vpop.f32.mrb[139].mxu0  ;;  %v2276_v58 = vpop.f32.mrb[138].mxu1  ;;  %v2424_v52 = vld [vmem:[%s22201_s1 + $0x120] sm:$0xff]  ;;  %v22249_v5 = vpack.c.bf16 %v22247_v11, %v22248_v55  ;;  %v22253_v55 = vld [vmem:[#allocation23_spill] sm:$0xff] }
 0x216   : >> { %16091 = vmatprep.subr.bf16.mxu0 %v19655_v20  ;;  %v15890_v4 = vpop.f32.mrb[139].mxu1  ;;  %v22250_v58 = vld [vmem:[#allocation25_spill] sm:$0xff]  ;;  %v22251_v40 = vld [vmem:[#allocation24_spill] sm:$0xff]  ;;  %vm2433_vm12 = vcmp.gt.f32.partialorder %v2424_v52, 0.5 }
 0x218   : >> { %16068 = vmatmul.mubr.msk.bf16.gmra.mrb[184].mxu0 %vm838_vm4, %v22246_v59  ;;  %v22252_v59 = vpack.c.bf16 %v22250_v58, %v22251_v40  ;;  %v22254_v40 = vld [vmem:[#allocation28_spill] sm:$0xff] }
 0x219   : >> { %16071 = vmatprep.mubr.msk.bf16.mxu0 %vm838_vm4, %v3584_v23 }
 0x21a   : >> { %v2352_v3 = vpop.f32.mrb[140].mxu0 }
 0x21b   : >> { %v2390_v27 = vadd.f32 %v2352_v3, %v19543_v29  ;;  %v15895_v38 = vpop.f32.mrb[141].mxu0  ;;  %v19682_v37 = vpop.f32.mrb[140].mxu1  ;;  %v2425_v29 = vld [vmem:[%s22201_s1 + $0x128] sm:$0xff]  ;;  %v3585_v3 = vpack.c.bf16 %v19484_v15, %v19433_v17 }
 0x21c   : >> { %v2355_v4 = vpop.f32.mrb[142].mxu0  ;;  %16192 = vmatmul.mubr.msk.bf16.vlgmr.msra.gmra.mrb[180].mxu1 %vm838_vm4, %v22249_v5  ;;  %v15917_v23 = vpop.f32.mrb[141].mxu1  ;;  %vm2434_vm13 = vcmp.gt.f32.partialorder %v2425_v29, 0.5  ;;  %v19710_v17 = vld [vmem:[#allocation2 + $0xc1] sm:$0xff]  ;;  %v2426_v29 = vld [vmem:[%s22201_s1 + $0x130] sm:$0xff] }
 0x21d   : >> { %v2406_v33 = vadd.f32 %v19309_v47, %v2390_v27  ;;  %v2391_v32 = vadd.f32 %v2355_v4, %v19553_v48  ;;  %16204 = vmatpush3.bf16.msra.mxu1 %v17475_v53  ;;  %16195 = vmatprep.mubr.msk.bf16.mxu1 %vm838_vm4, %v22252_v59  ;;  %v15896_v38 = vpop.f32.mrb[143].mxu0  ;;  %v19699_v11 = vpop.f32.mrb[142].mxu1  ;;  %v19704_v48 = vld [vmem:[%s22126_s4 + $0x60] sm:$0xff]   ;;  %v3717_v23 = vld [vmem:[#allocation2 + $0x48] sm:$0xff]  ;;  %v4767_v59 = vpack.c.bf16 %v19710_v17, %v22254_v40  ;;  %vm2435_vm14 = vcmp.gt.f32.partialorder %v2426_v29, 0.5 }
 0x21e   : >> { %16205 = vmatprep.subr.bf16.mxu1 %v17478_v31  ;;  %v15918_v27 = vpop.f32.mrb[143].mxu1  ;;  %v19749_v29 = vld [vmem:[%s22126_s4 + $0x80] sm:$0xff]  }
 0x21f   : >> { %v2415_v53 = vmax.f32 %v2406_v33, 0.0  ;;  %v2407_v4 = vadd.f32 %v19309_v47, %v2391_v32  ;;  %v22255_v27 = vld [vmem:[#allocation27_spill] sm:$0xff] }
 0x220   : >> { %16072 = vmatmul.mubr.msk.bf16.gmra.mrb[188].mxu0 %vm838_vm4, %v3585_v3  ;;  %v3719_v3 = vld [vmem:[#allocation2 + $0x58] sm:$0xff] }
 0x221   : >> { %16079 = vmatprep.mubr.msk.bf16.mxu0 %vm838_vm4, %v22253_v55  ;;  %v2442_v15 = vsel %vm2433_vm12, %v2415_v53, 0.0  ;;  %v2416_v52 = vmax.f32 %v2407_v4, 0.0  ;;  %16206 = vmatpush3.bf16.msra.mxu1 %v17478_v31  ;;  %v22256_v53 = vld [vmem:[#allocation26_spill] sm:$0xff] }
 0x222   : >> { %2451 = vst.msk [vmem:[#allocation2 + $0x120] sm:$0xff] %vm838_vm4, %v2442_v15  ;;  %v2360_v5 = vpop.f32.mrb[144].mxu0  ;;  %16219 = vmatprep.subr.bf16.mxu1 %v19704_v48  ;;  %v22257_v4 = vpack.c.bf16 %v22255_v27, %v22256_v53  ;;  %v17481_v27 = vld [vmem:[%s22126_s4 + $0x78] sm:$0xff]  }
 0x223   : >> { %v2443_v33 = vsel %vm2434_vm13, %v2416_v52, 0.0  ;;  %v2392_v32 = vadd.f32 %v2360_v5, %v19582_v41  ;;  %v15899_v58 = vpop.f32.mrb[145].mxu0  ;;  %v19720_v38 = vpop.f32.mrb[144].mxu1  ;;  %v3716_v41 = vld [vmem:[#allocation2 + $0x40] sm:$0xff]  ;;  %v2427_v5 = vld [vmem:[%s22201_s1 + $0x138] sm:$0xff] }
 0x224   : >> { %2452 = vst.msk [vmem:[#allocation2 + $0x128] sm:$0xff] %vm838_vm4, %v2443_v33  ;;  %v2363_v31 = vpop.f32.mrb[146].mxu0  ;;  %16196 = vmatmul.mubr.msk.bf16.gmra.mrb[184].mxu1 %vm838_vm4, %v22257_v4  ;;  %v15921_v55 = vpop.f32.mrb[145].mxu1  ;;  %v3727_v58 = vpack.c.bf16 %v3717_v23, %v3716_v41  ;;  %v3718_v33 = vld [vmem:[#allocation2 + $0x50] sm:$0xff]  ;;  %vm2436_vm15 = vcmp.gt.f32.partialorder %v2427_v5, 0.5 }
 0x225   : >> { %v2408_v15 = vadd.f32 %v19309_v47, %v2392_v32  ;;  %v2393_v52 = vadd.f32 %v2363_v31, %v19592_v43  ;;  %16199 = vmatprep.mubr.msk.bf16.mxu1 %vm838_vm4, %v4767_v59  ;;  %v15900_v40 = vpop.f32.mrb[147].mxu0  ;;  %v19733_v51 = vpop.f32.mrb[146].mxu1  ;;  %v3728_v53 = vpack.c.bf16 %v3719_v3, %v3718_v33  ;;  %v19740_v31 = vld [vmem:[#allocation2 + $0xd1] sm:$0xff]  ;;  %v19744_v41 = vld [vmem:[#allocation2 + $0xc9] sm:$0xff] }
 0x226   : >> { %v15922_v32 = vpop.f32.mrb[147].mxu1  ;;  %v4768_v55 = vpack.c.bf16 %v19740_v31, %v19744_v41 }
 0x227   : >> { %v2417_v4 = vmax.f32 %v2408_v15, 0.0  ;;  %v2409_v43 = vadd.f32 %v19309_v47, %v2393_v52 }
 0x228   : >> { %16080 = vmatmul.mubr.msk.bf16.vlgmr.msra.gmra.mrb[180].mxu0 %vm838_vm4, %v3727_v58 }
 0x229   : >> { %16083 = vmatprep.mubr.msk.bf16.mxu0 %vm838_vm4, %v3728_v53  ;;  %16092 = vmatpush3.bf16.msra.mxu0 %v19655_v20  ;;  %v2444_v23 = vsel %vm2435_vm14, %v2417_v4, 0.0  ;;  %v2418_v59 = vmax.f32 %v2409_v43, 0.0  ;;  %v2428_v20 = vld [vmem:[%s22201_s1 + $0x140] sm:$0xff] }
 0x22a   : >> { %16093 = vmatprep.subr.bf16.mxu0 %v17481_v27  ;;  %2453 = vst.msk [vmem:[#allocation2 + $0x130] sm:$0xff] %vm838_vm4, %v2444_v23  ;;  %v2368_v3 = vpop.f32.mrb[148].mxu0  ;;  %v19760_v33 = vld [vmem:[#allocation2 + $0x119] sm:$0xff]  ;;  %v2429_v23 = vld [vmem:[%s22201_s1 + $0x148] sm:$0xff]  ;;  %vm2437_vm3 = vcmp.gt.f32.partialorder %v2428_v20, 0.5 }
 0x22b   : >> { %v2445_v15 = vsel %vm2436_vm15, %v2418_v59, 0.0  ;;  %v2394_v52 = vadd.f32 %v2368_v3, %v19612_v14  ;;  %v15903_v5 = vpop.f32.mrb[149].mxu0  ;;  %v19758_v58 = vpop.f32.mrb[148].mxu1  ;;  %v19762_v40 = vld [vmem:[#allocation2 + $0x121] sm:$0xff]  ;;  %v22258_v59 = vpack.c.bf16 %v19033_v54, %v19031_v0  ;;  %vm2438_vm5 = vcmp.gt.f32.partialorder %v2429_v23, 0.5 }
 0x22c   : >> { %2454 = vst.msk [vmem:[#allocation2 + $0x138] sm:$0xff] %vm838_vm4, %v2445_v15  ;;  %v2371_v53 = vpop.f32.mrb[150].mxu0  ;;  %16200 = vmatmul.mubr.msk.bf16.gmra.mrb[188].mxu1 %vm838_vm4, %v4768_v55  ;;  %v15925_v32 = vpop.f32.mrb[149].mxu1  ;;  %v17482_v20 = vld [vmem:[%s22126_s4 + $0x68] sm:$0xff]  }
 0x22d   : >> { %16094 = vmatpush3.bf16.msra.mxu0 %v17481_v27  ;;  %v2410_v4 = vadd.f32 %v19309_v47, %v2394_v52  ;;  %v2395_v43 = vadd.f32 %v2371_v53, %v19621_v9  ;;  %16207 = vmatprep.mubr.msk.bf16.mxu1 %vm838_vm4, %v22258_v59  ;;  %v15904_v3 = vpop.f32.mrb[151].mxu0  ;;  %v19777_v55 = vpop.f32.mrb[150].mxu1  ;;  %v22259_v9 = vld [vmem:[#allocation29_spill] sm:$0xff]  ;;  %v3861_v53 = vld [vmem:[#allocation2 + $0x39] sm:$0xff] }
 0x22e   : >> { %16107 = vmatprep.subr.bf16.mxu0 %v19749_v29  ;;  %v15926_v27 = vpop.f32.mrb[151].mxu1 }
 0x22f   : >> { %v2419_v15 = vmax.f32 %v2410_v4, 0.0  ;;  %v2411_v52 = vadd.f32 %v19309_v47, %v2395_v43  ;;  %v2430_v43 = vld [vmem:[%s22201_s1 + $0x150] sm:$0xff] }
 0x230   : >> { %16084 = vmatmul.mubr.msk.bf16.gmra.mrb[184].mxu0 %vm838_vm4, %v22259_v9  ;;  %vm2439_vm6 = vcmp.gt.f32.partialorder %v2430_v43, 0.5  ;;  %v3863_v43 = vld [vmem:[#allocation2 + $0x49] sm:$0xff] }
 0x231   : >> { %16087 = vmatprep.mubr.msk.bf16.mxu0 %vm838_vm4, %v19344_v60  ;;  %v2446_v0 = vsel %vm2437_vm3, %v2419_v15, 0.0  ;;  %v2420_v54 = vmax.f32 %v2411_v52, 0.0  ;;  %v19795_v60 = vld [vmem:[#allocation2 + $0x129] sm:$0xff]  ;;  %v22260_v15 = vpack.c.bf16 %v19176_v22, %v19174_v42  ;;  %v3860_v42 = vld [vmem:[#allocation2 + $0x31] sm:$0xff] }
 0x232   : >> { %2455 = vst.msk [vmem:[#allocation2 + $0x140] sm:$0xff] %vm838_vm4, %v2446_v0  ;;  %v2376_v5 = vpop.f32.mrb[152].mxu0 }
 0x233   : >> { %v2447_v32 = vsel %vm2438_vm5, %v2420_v54, 0.0  ;;  %v2396_v4 = vadd.f32 %v2376_v5, %v19633_v46  ;;  %v15907_v23 = vpop.f32.mrb[153].mxu0  ;;  %v19793_v59 = vpop.f32.mrb[152].mxu1  ;;  %v19797_v3 = vld [vmem:[#allocation2 + $0x131] sm:$0xff]  ;;  %v22261_v5 = vpack.c.bf16 %v19228_v24, %v19226_v49 }
 0x234   : >> { %2456 = vst.msk [vmem:[#allocation2 + $0x148] sm:$0xff] %vm838_vm4, %v2447_v32  ;;  %v2379_v27 = vpop.f32.mrb[154].mxu0  ;;  %16208 = vmatmul.mubr.msk.bf16.vlgmr.msra.gmra.mrb[180].mxu1 %vm838_vm4, %v22260_v15  ;;  %v15929_v46 = vpop.f32.mrb[153].mxu1  ;;  %v2431_v54 = vld [vmem:[%s22201_s1 + $0x158] sm:$0xff]  ;;  %v3872_v23 = vpack.c.bf16 %v3861_v53, %v3860_v42  ;;  %v2432_v15 = vld [vmem:[%s22201_s1 + $0x160] sm:$0xff] }
 0x235   : >> { %v2412_v9 = vadd.f32 %v19309_v47, %v2396_v4  ;;  %v2397_v0 = vadd.f32 %v2379_v27, %v19639_v45  ;;  %16220 = vmatpush3.bf16.msra.mxu1 %v19704_v48  ;;  %16211 = vmatprep.mubr.msk.bf16.mxu1 %vm838_vm4, %v22261_v5  ;;  %v15908_v22 = vpop.f32.mrb[155].mxu0  ;;  %v19816_v32 = vpop.f32.mrb[154].mxu1  ;;  %v19821_v45 = vld [vmem:[%s22126_s4 + $0x70] sm:$0xff]   ;;  %vm2440_vm7 = vcmp.gt.f32.partialorder %v2431_v54, 0.5  ;;  %v3865_v46 = vld [vmem:[#allocation2 + $0x59] sm:$0xff]  ;;  %vm2441_vm8 = vcmp.gt.f32.partialorder %v2432_v15, 0.5 }
 0x236   : >> { %v15930_v4 = vpop.f32.mrb[155].mxu1  ;;  %16221 = vmatprep.subr.bf16.mxu1 %v17482_v20  ;;  %v22262_v54 = vld [vmem:[#allocation32_spill] sm:$0xff] }
 0x237   : >> { %v2421_v27 = vmax.f32 %v2412_v9, 0.0  ;;  %v2413_v48 = vadd.f32 %v19309_v47, %v2397_v0  ;;  %v4912_v5 = vpack.c.bf16 %v22262_v54, %v19559_v34 }
 0x238   : >> { %16088 = vmatmul.mubr.msk.bf16.gmra.mrb[188].mxu0 %vm838_vm4, %v19360_v50 }
 0x239   : >> { %16095 = vmatprep.mubr.msk.bf16.mxu0 %vm838_vm4, %v3872_v23  ;;  %v2448_v24 = vsel %vm2439_vm6, %v2421_v27, 0.0  ;;  %v2422_v49 = vmax.f32 %v2413_v48, 0.0  ;;  %16222 = vmatpush3.bf16.msra.mxu1 %v17482_v20  ;;  %v19832_v9 = vld [vmem:[#allocation2 + $0x139] sm:$0xff]  ;;  %v22263_v27 = vpack.c.bf16 %v19265_v57, %v19263_v8  ;;  %v17485_v8 = vld [vmem:[%s22126_s4 + $0x88] sm:$0xff]  }
 0x23a   : >> { %2457 = vst.msk [vmem:[#allocation2 + $0x150] sm:$0xff] %vm838_vm4, %v2448_v24  ;;  %v2384_v53 = vpop.f32.mrb[156].mxu0  ;;  %16235 = vmatprep.subr.bf16.mxu1 %v19821_v45  ;;  %v19841_v23 = vld [vmem:[#allocation2 + $0x13a] sm:$0xff] }
 0x23b   : >> { %v2449_v50 = vsel %vm2440_vm7, %v2422_v49, 0.0  ;;  %v2398_v0 = vadd.f32 %v2384_v53, %v19664_v44  ;;  %v15911_v42 = vpop.f32.mrb[157].mxu0  ;;  %v19837_v20 = vpop.f32.mrb[156].mxu1  ;;  %v19839_v22 = vld [vmem:[#allocation2 + $0x141] sm:$0xff] }
 0x23c   : >> { %v19843_v4 = vld [vmem:[#allocation2 + $0x142] sm:$0xff]  ;;  %2458 = vst.msk [vmem:[#allocation2 + $0x158] sm:$0xff] %vm838_vm4, %v2449_v50  ;;  %16212 = vmatmul.mubr.msk.bf16.gmra.mrb[184].mxu1 %vm838_vm4, %v22263_v27  ;;  %v2387_v48 = vpop.f32.mrb[158].mxu0  ;;  %v15933_v24 = vpop.f32.mrb[157].mxu1  ;;  %v3864_v50 = vld [vmem:[#allocation2 + $0x51] sm:$0xff] }
 0x23d   : >> { %v3862_v44 = vld [vmem:[#allocation2 + $0x41] sm:$0xff]  ;;  %v2414_v53 = vadd.f32 %v19309_v47, %v2398_v0  ;;  %16215 = vmatprep.mubr.msk.bf16.mxu1 %vm838_vm4, %v4912_v5  ;;  %v15912_v42 = vpop.f32.mrb[159].mxu0  ;;  %v2586_v52 = vpop.f32.mrb[158].mxu1  ;;  %v3874_v57 = vpack.c.bf16 %v3865_v46, %v3864_v50  ;;  %v19860_v24 = vld [vmem:[#allocation2 + $0xd2] sm:$0xff] }
 0x23e   : >> { %v3873_v54 = vpack.c.bf16 %v3863_v43, %v3862_v44  ;;  %v15934_v27 = vpop.f32.mrb[159].mxu1  ;;  %v5042_v47 = vld [vmem:[#allocation2 + $0x98] sm:$0xff]  ;;  %v19867_v52 = vld [vmem:[%s22126_s4 + $0x10] sm:$0xff]   ;;  %v22264_v46 = vld [vmem:[#allocation33_spill] sm:$0xff] }
 0x23f   : >> { %v2423_v48 = vmax.f32 %v2414_v53, 0.0  ;;  %v4913_v0 = vpack.c.bf16 %v19860_v24, %v22264_v46  ;;  %v5041_v5 = vld [vmem:[#allocation2 + $0x90] sm:$0xff]  ;;  %v3866_v49 = vld [vmem:[#allocation2 + $0x61] sm:$0xff] }
 0x240   : >> { %16096 = vmatmul.mubr.msk.bf16.vlgmr.msra.gmra.mrb[180].mxu0 %vm838_vm4, %v3873_v54  ;;  %v5053_v50 = vpack.c.bf16 %v5042_v47, %v5041_v5 }
 0x241   : >> { %16099 = vmatprep.mubr.msk.bf16.mxu0 %vm838_vm4, %v3874_v57  ;;  %16108 = vmatpush3.bf16.msra.mxu0 %v19749_v29  ;;  %v2450_v43 = vsel %vm2441_vm8, %v2423_v48, 0.0  ;;  %v19872_v44 = vld [vmem:[#allocation2 + $0x149] sm:$0xff] }
 0x242   : >> { %16109 = vmatprep.subr.bf16.mxu0 %v17485_v8  ;;  %2459 = vst.msk [vmem:[#allocation2 + $0x160] sm:$0xff] %vm838_vm4, %v2450_v43  ;;  %v2644_v15 = vpop.f32.mrb[160].mxu0  ;;  %v19877_v57 = vld [vmem:[#allocation2 + $0x14a] sm:$0xff]  ;;  %v19884_v43 = vld [vmem:[%s22125_s3] ss:$0 sm:$0xff] }
 0x243   : >> { %v2645_v53 = vadd.f32 %v2644_v15, %v19682_v37  ;;  %v15939_v54 = vpop.f32.mrb[161].mxu0  ;;  %v2755_v29 = vpop.f32.mrb[160].mxu1  ;;  %v19875_v42 = vld [vmem:[#allocation2 + $0x151] sm:$0xff] }
 0x244   : >> { %v19879_v27 = vld [vmem:[#allocation2 + $0x152] sm:$0xff]  ;;  %v2647_v48 = vpop.f32.mrb[162].mxu0  ;;  %16216 = vmatmul.mubr.msk.bf16.gmra.mrb[188].mxu1 %vm838_vm4, %v4913_v0  ;;  %v15961_v46 = vpop.f32.mrb[161].mxu1  ;;  %v2827_v54 = vld [vmem:[%s22201_s1 + $0x168] sm:$0xff]  ;;  %v3875_v0 = vpack.c.bf16 %v19610_v1, %v3866_v49 }
 0x245   : >> { %16110 = vmatpush3.bf16.msra.mxu0 %v17485_v8  ;;  %v2648_v15 = vadd.f32 %v2647_v48, %v19699_v11  ;;  %v2793_v5 = vadd.f32 %v2755_v29, %v2645_v53  ;;  %16223 = vmatprep.mubr.msk.bf16.mxu1 %vm838_vm4, %v5053_v50  ;;  %v2758_v34 = vpop.f32.mrb[162].mxu1  ;;  %v3868_v46 = vld [vmem:[#allocation2 + $0x71] sm:$0xff]  ;;  %v15940_v8 = vpop.f32.mrb[163].mxu0  ;;  %v5044_v29 = vld [vmem:[#allocation2 + $0xa8] sm:$0xff]  ;;  %vm2836_vm9 = vcmp.gt.f32.partialorder %v2827_v54, 0.5  ;;  %v5043_v48 = vld [vmem:[#allocation2 + $0xa0] sm:$0xff] }
 0x246   : >> { %16267 = vmatprep.subr.bf16.mxu0 %v19867_v52  ;;  %v3876_v37 = vpack.c.bf16 %v19659_v35, %v3868_v46  ;;  %v15962_v14 = vpop.f32.mrb[163].mxu1  ;;  %v2828_v53 = vld [vmem:[%s22201_s1 + $0x170] sm:$0xff]  ;;  %v5046_v1 = vld [vmem:[#allocation2 + $0xb8] sm:$0xff] }
 0x247   : >> { %v2809_v47 = vadd.f32 %v19884_v43, %v2793_v5  ;;  %v2794_v11 = vadd.f32 %v2758_v34, %v2648_v15  ;;  %vm2837_vm1 = vcmp.gt.f32.partialorder %v2828_v53, 0.5  ;;  %v5054_v14 = vpack.c.bf16 %v5044_v29, %v5043_v48  ;;  %v5045_v5 = vld [vmem:[#allocation2 + $0xb0] sm:$0xff]  ;;  %v17486_v15 = vld [vmem:[%s22126_s4 + $0x78] sm:$0xff]   ;;  %v3870_v48 = vld [vmem:[#allocation2 + $0x81] sm:$0xff] }
 0x248   : >> { %16100 = vmatmul.mubr.msk.bf16.gmra.mrb[184].mxu0 %vm838_vm4, %v3875_v0  ;;  %v3871_v34 = vld [vmem:[#allocation2 + $0x89] sm:$0xff]  ;;  %v5055_v63 = vpack.c.bf16 %v5046_v1, %v5045_v5 }
 0x249   : >> { %16103 = vmatprep.mubr.msk.bf16.mxu0 %vm838_vm4, %v3876_v37  ;;  %v2818_v49 = vmax.f32 %v2809_v47, 0.0  ;;  %v2810_v50 = vadd.f32 %v19884_v43, %v2794_v11  ;;  %v4007_v47 = vld [vmem:[#allocation2 + $0x3a] sm:$0xff] }
 0x24a   : >> { %v2652_v35 = vpop.f32.mrb[164].mxu0 }
 0x24b   : >> { %v2845_v46 = vsel %vm2836_vm9, %v2818_v49, 0.0  ;;  %v2819_v0 = vmax.f32 %v2810_v50, 0.0  ;;  %v2653_v54 = vadd.f32 %v2652_v35, %v19720_v38  ;;  %v15943_v8 = vpop.f32.mrb[165].mxu0  ;;  %v2763_v37 = vpop.f32.mrb[164].mxu1  ;;  %v2829_v38 = vld [vmem:[%s22201_s1 + $0x178] sm:$0xff]  ;;  %v3877_v49 = vpack.c.bf16 %v3871_v34, %v3870_v48  ;;  %v4009_v34 = vld [vmem:[#allocation2 + $0x4a] sm:$0xff] }
 0x24c   : >> { %2854 = vst.msk [vmem:[#allocation2 + $0x168] sm:$0xff] %vm838_vm4, %v2845_v46  ;;  %v2655_v11 = vpop.f32.mrb[166].mxu0  ;;  %16224 = vmatmul.mubr.msk.bf16.vlgmr.msra.gmra.mrb[180].mxu1 %vm838_vm4, %v5054_v14  ;;  %v15965_v29 = vpop.f32.mrb[165].mxu1  ;;  %v4006_v50 = vld [vmem:[#allocation2 + $0x32] sm:$0xff]  ;;  %vm2838_vm2 = vcmp.gt.f32.partialorder %v2829_v38, 0.5  ;;  %v4011_v8 = vld [vmem:[#allocation2 + $0x5a] sm:$0xff] }
 0x24d   : >> { %v2846_v13 = vsel %vm2837_vm1, %v2819_v0, 0.0  ;;  %v2656_v2 = vadd.f32 %v2655_v11, %v19733_v51  ;;  %v2795_v18 = vadd.f32 %v2763_v37, %v2653_v54  ;;  %16236 = vmatpush3.bf16.msra.mxu1 %v19821_v45  ;;  %16227 = vmatprep.mubr.msk.bf16.mxu1 %vm838_vm4, %v5055_v63  ;;  %v2766_v1 = vpop.f32.mrb[166].mxu1  ;;  %v15944_v35 = vpop.f32.mrb[167].mxu0  ;;  %v4018_v14 = vpack.c.bf16 %v4007_v47, %v4006_v50  ;;  %v19923_v51 = vld [vmem:[%s22126_s4 + $0x80] sm:$0xff]  }
 0x24e   : >> { %2855 = vst.msk [vmem:[#allocation2 + $0x170] sm:$0xff] %vm838_vm4, %v2846_v13  ;;  %v15966_v53 = vpop.f32.mrb[167].mxu1  ;;  %16237 = vmatprep.subr.bf16.mxu1 %v17486_v15  ;;  %v2830_v63 = vld [vmem:[%s22201_s1 + $0x180] sm:$0xff] }
 0x24f   : >> { %v2811_v5 = vadd.f32 %v19884_v43, %v2795_v18  ;;  %v2796_v46 = vadd.f32 %v2766_v1, %v2656_v2  ;;  %vm2839_vm10 = vcmp.gt.f32.partialorder %v2830_v63, 0.5  ;;  %v4008_v54 = vld [vmem:[#allocation2 + $0x42] sm:$0xff]  ;;  %v19936_v38 = vld [vmem:[#allocation2 + $0x159] sm:$0xff] }
 0x250   : >> { %16104 = vmatmul.mubr.msk.bf16.gmra.mrb[188].mxu0 %vm838_vm4, %v3877_v49  ;;  %v22265_v29 = vld [vmem:[#allocation36_spill] sm:$0xff]  ;;  %v22266_v49 = vpack.c.bf16 %v22243_v61, %v22236_v28  ;;  %v4019_v35 = vpack.c.bf16 %v4009_v34, %v4008_v54  ;;  %v2831_v28 = vld [vmem:[%s22201_s1 + $0x188] sm:$0xff]  ;;  %v17489_v34 = vld [vmem:[%s22126_s4 + $0x18] sm:$0xff]  }
 0x251   : >> { %16111 = vmatprep.mubr.msk.bf16.mxu0 %vm838_vm4, %v4018_v14  ;;  %v2820_v13 = vmax.f32 %v2811_v5, 0.0  ;;  %v2812_v45 = vadd.f32 %v19884_v43, %v2796_v46  ;;  %16238 = vmatpush3.bf16.msra.mxu1 %v17486_v15  ;;  %v5057_v48 = vpack.c.bf16 %v22265_v29, %v19645_v30  ;;  %vm2840_vm11 = vcmp.gt.f32.partialorder %v2831_v28, 0.5 }
 0x252   : >> { %v2660_v0 = vpop.f32.mrb[168].mxu0  ;;  %16251 = vmatprep.subr.bf16.mxu1 %v19923_v51 }
 0x253   : >> { %v2847_v18 = vsel %vm2838_vm2, %v2820_v13, 0.0  ;;  %v2821_v2 = vmax.f32 %v2812_v45, 0.0  ;;  %v2661_v37 = vadd.f32 %v2660_v0, %v19758_v58  ;;  %v15947_v47 = vpop.f32.mrb[169].mxu0  ;;  %v2771_v11 = vpop.f32.mrb[168].mxu1  ;;  %v19938_v1 = vld [vmem:[#allocation2 + $0x161] sm:$0xff]  ;;  %v4010_v13 = vld [vmem:[#allocation2 + $0x52] sm:$0xff] }
 0x254   : >> { %2856 = vst.msk [vmem:[#allocation2 + $0x178] sm:$0xff] %vm838_vm4, %v2847_v18  ;;  %v2663_v15 = vpop.f32.mrb[170].mxu0  ;;  %16228 = vmatmul.mubr.msk.bf16.gmra.mrb[184].mxu1 %vm838_vm4, %v22266_v49  ;;  %v15969_v50 = vpop.f32.mrb[169].mxu1  ;;  %v19945_v58 = vld [vmem:[#allocation2 + $0x15a] sm:$0xff]  ;;  %v19947_v14 = vld [vmem:[#allocation2 + $0x162] sm:$0xff] }
 0x255   : >> { %v2848_v53 = vsel %vm2839_vm10, %v2821_v2, 0.0  ;;  %v2664_v5 = vadd.f32 %v2663_v15, %v19777_v55  ;;  %v2797_v46 = vadd.f32 %v2771_v11, %v2661_v37  ;;  %16231 = vmatprep.mubr.msk.bf16.mxu1 %vm838_vm4, %v5057_v48  ;;  %v2774_v61 = vpop.f32.mrb[170].mxu1  ;;  %v15948_v45 = vpop.f32.mrb[171].mxu0  ;;  %v4020_v55 = vpack.c.bf16 %v4011_v8, %v4010_v13  ;;  %v2832_v2 = vld [vmem:[%s22201_s1 + $0x190] sm:$0xff]  ;;  %v19968_v37 = vld [vmem:[#allocation2 + $0xe8] sm:$0xff]  ;;  %v5187_v47 = vld [vmem:[#allocation2 + $0x99] sm:$0xff] }
 0x256   : >> { %2857 = vst.msk [vmem:[#allocation2 + $0x180] sm:$0xff] %vm838_vm4, %v2848_v53  ;;  %v15970_v0 = vpop.f32.mrb[171].mxu1  ;;  %v4013_v48 = vld [vmem:[#allocation2 + $0x6a] sm:$0xff]  ;;  %v19976_v15 = vld [vmem:[%s22126_s4] sm:$0xff]   ;;  %vm2841_vm12 = vcmp.gt.f32.partialorder %v2832_v2, 0.5 }
 0x257   : >> { %v2813_v54 = vadd.f32 %v19884_v43, %v2797_v46  ;;  %v2798_v18 = vadd.f32 %v2774_v61, %v2664_v5  ;;  %v17598_v50 = vld [vmem:[#allocation2 + $0xe0] sm:$0xff]  ;;  %v5186_v53 = vld [vmem:[#allocation2 + $0x91] sm:$0xff] }
 0x258   : >> { %16112 = vmatmul.mubr.msk.bf16.vlgmr.msra.gmra.mrb[180].mxu0 %vm838_vm4, %v4019_v35  ;;  %v19979_v35 = vpack.c.bf16 %v19968_v37, %v17598_v50  ;;  %v4012_v5 = vld [vmem:[#allocation2 + $0x62] sm:$0xff]  ;;  %v4015_v46 = vld [vmem:[#allocation2 + $0x7a] sm:$0xff]  ;;  %v5198_v0 = vpack.c.bf16 %v5187_v47, %v5186_v53  ;;  %v19990_v28 = vld [vmem:[#allocation2 + $0x16a] sm:$0xff] }
 0x259   : >> { %16115 = vmatprep.mubr.msk.bf16.mxu0 %vm838_vm4, %v4020_v55  ;;  %16268 = vmatpush3.bf16.msra.mxu0 %v19867_v52  ;;  %v2822_v11 = vmax.f32 %v2813_v54, 0.0  ;;  %v2814_v8 = vadd.f32 %v19884_v43, %v2798_v18  ;;  %v19983_v54 = vld [vmem:[#allocation2 + $0x169] sm:$0xff]  ;;  %v4021_v30 = vpack.c.bf16 %v4013_v48, %v4012_v5  ;;  %v2833_v53 = vld [vmem:[%s22201_s1 + $0x198] sm:$0xff] }
 0x25a   : >> { %16269 = vmatprep.subr.bf16.mxu0 %v17489_v34  ;;  %v2668_v49 = vpop.f32.mrb[172].mxu0  ;;  %vm2842_vm13 = vcmp.gt.f32.partialorder %v2833_v53, 0.5 }
 0x25b   : >> { %v2849_v52 = vsel %vm2840_vm11, %v2822_v11, 0.0  ;;  %v2823_v61 = vmax.f32 %v2814_v8, 0.0  ;;  %v2669_v13 = vadd.f32 %v2668_v49, %v19793_v59  ;;  %v15951_v45 = vpop.f32.mrb[173].mxu0  ;;  %v2779_v55 = vpop.f32.mrb[172].mxu1  ;;  %v19985_v18 = vld [vmem:[#allocation2 + $0x171] sm:$0xff] }
 0x25c   : >> { %2858 = vst.msk [vmem:[#allocation2 + $0x188] sm:$0xff] %vm838_vm4, %v2849_v52  ;;  %v2671_v63 = vpop.f32.mrb[174].mxu0  ;;  %16232 = vmatmul.mubr.msk.bf16.gmra.mrb[188].mxu1 %vm838_vm4, %v19979_v35  ;;  %v15973_v50 = vpop.f32.mrb[173].mxu1  ;;  %v19992_v11 = vld [vmem:[#allocation2 + $0x172] sm:$0xff]  ;;  %v5189_v45 = vld [vmem:[#allocation2 + $0xa9] sm:$0xff] }
 0x25d   : >> { %16270 = vmatpush3.bf16.msra.mxu0 %v17489_v34  ;;  %v2850_v47 = vsel %vm2841_vm12, %v2823_v61, 0.0  ;;  %v2672_v8 = vadd.f32 %v2671_v63, %v19816_v32  ;;  %v2799_v49 = vadd.f32 %v2779_v55, %v2669_v13  ;;  %16239 = vmatprep.mubr.msk.bf16.mxu1 %vm838_vm4, %v5198_v0  ;;  %v2782_v48 = vpop.f32.mrb[174].mxu1  ;;  %v4014_v34 = vld [vmem:[#allocation2 + $0x72] sm:$0xff]  ;;  %v15952_v5 = vpop.f32.mrb[175].mxu0  ;;  %v2834_v13 = vld [vmem:[%s22201_s1 + $0x1a0] sm:$0xff] }
 0x25e   : >> { %16283 = vmatprep.subr.bf16.mxu0 %v19976_v15  ;;  %2859 = vst.msk [vmem:[#allocation2 + $0x190] sm:$0xff] %vm838_vm4, %v2850_v47  ;;  %v4022_v2 = vpack.c.bf16 %v4015_v46, %v4014_v34  ;;  %v15974_v61 = vpop.f32.mrb[175].mxu1  ;;  %v5191_v55 = vld [vmem:[#allocation2 + $0xb9] sm:$0xff]  ;;  %v5188_v47 = vld [vmem:[#allocation2 + $0xa1] sm:$0xff]  ;;  %vm2843_vm14 = vcmp.gt.f32.partialorder %v2834_v13, 0.5  ;;  %v5553_v13 = vpack.c.bf16 %v19744_v41, %v19710_v17 }
 0x25f   : >> { %v2815_v32 = vadd.f32 %v19884_v43, %v2799_v49  ;;  %v2800_v63 = vadd.f32 %v2782_v48, %v2672_v8  ;;  %v5199_v34 = vpack.c.bf16 %v5189_v45, %v5188_v47  ;;  %v5190_v49 = vld [vmem:[#allocation2 + $0xb1] sm:$0xff]  ;;  %v17490_v48 = vld [vmem:[%s22126_s4 + $0x88] sm:$0xff]  }
 0x260   : >> { %16116 = vmatmul.mubr.msk.bf16.gmra.mrb[184].mxu0 %vm838_vm4, %v4021_v30  ;;  %v4017_v8 = vld [vmem:[#allocation2 + $0x8a] sm:$0xff]  ;;  %v4016_v47 = vld [vmem:[#allocation2 + $0x82] sm:$0xff] }
 0x261   : >> { %16119 = vmatprep.mubr.msk.bf16.mxu0 %vm838_vm4, %v4022_v2  ;;  %v2824_v0 = vmax.f32 %v2815_v32, 0.0  ;;  %v2816_v50 = vadd.f32 %v19884_v43, %v2800_v63  ;;  %v5200_v2 = vpack.c.bf16 %v5191_v55, %v5190_v49  ;;  %v20017_v32 = vld [vmem:[#allocation2 + $0x180] sm:$0xff]  ;;  %v2835_v45 = vld [vmem:[%s22201_s1 + $0x1a8] sm:$0xff] }
 0x262   : >> { %v2676_v46 = vpop.f32.mrb[176].mxu0  ;;  %vm2844_vm15 = vcmp.gt.f32.partialorder %v2835_v45, 0.5  ;;  %v17600_v45 = vld [vmem:[#allocation2 + $0xe1] sm:$0xff] }
 0x263   : >> { %v2851_v5 = vsel %vm2842_vm13, %v2824_v0, 0.0  ;;  %v2825_v30 = vmax.f32 %v2816_v50, 0.0  ;;  %v2677_v53 = vadd.f32 %v2676_v46, %v19837_v20  ;;  %v2787_v61 = vpop.f32.mrb[176].mxu1  ;;  %v15955_v52 = vpop.f32.mrb[177].mxu0  ;;  %v20019_v63 = vld [vmem:[#allocation2 + $0x188] sm:$0xff]  ;;  %v4023_v46 = vpack.c.bf16 %v4017_v8, %v4016_v47 }
 0x264   : >> { %2860 = vst.msk [vmem:[#allocation2 + $0x198] sm:$0xff] %vm838_vm4, %v2851_v5  ;;  %16240 = vmatmul.mubr.msk.bf16.vlgmr.msra.gmra.mrb[180].mxu1 %vm838_vm4, %v5199_v34  ;;  %v2679_v0 = vpop.f32.mrb[178].mxu0  ;;  %v15977_v50 = vpop.f32.mrb[177].mxu1  ;;  %v20026_v59 = vld [vmem:[#allocation2 + $0x181] sm:$0xff]  ;;  %v20166_v8 = vpack.c.bf16 %v19983_v54, %v19938_v1 }
 0x265   : >> { %v2852_v52 = vsel %vm2843_vm14, %v2825_v30, 0.0  ;;  %v2801_v55 = vadd.f32 %v2787_v61, %v2677_v53  ;;  %16252 = vmatpush3.bf16.msra.mxu1 %v19923_v51  ;;  %16243 = vmatprep.mubr.msk.bf16.mxu1 %vm838_vm4, %v5200_v2  ;;  %v15956_v49 = vpop.f32.mrb[179].mxu0  ;;  %v2790_v5 = vpop.f32.mrb[178].mxu1  ;;  %v20033_v25 = vld [vmem:[#allocation2 + $0x189] sm:$0xff]  ;;  %v17599_v2 = vld [vmem:[#allocation2 + $0xd9] sm:$0xff] }
 0x266   : >> { %22267 = vst [vmem:[#allocation14_spill] sm:$0xff] %v20033_v25  ;;  %v20035_v34 = vld [vmem:[#allocation2 + $0x182] sm:$0xff]  ;;  %v20037_v0 = vld [vmem:[#allocation2 + $0x18a] sm:$0xff]  ;;  %2861 = vst.msk [vmem:[#allocation2 + $0x1a0] sm:$0xff] %vm838_vm4, %v2852_v52  ;;  %16253 = vmatprep.subr.bf16.mxu1 %v17490_v48  ;;  %v15978_v30 = vpop.f32.mrb[179].mxu1  ;;  %v5202_v47 = vpack.c.bf16 %v17599_v2, %v19740_v31 }
 0x267   : >> { %22268 = vst [vmem:[#allocation30_spill] sm:$0xff] %v20035_v34  ;;  %22269 = vst [vmem:[#allocation16_spill] sm:$0xff] %v20037_v0  ;;  %v17491_v51 = vld [vmem:[%s22126_s4 + $0x10] sm:$0xff]   ;;  %v2817_v61 = vadd.f32 %v19884_v43, %v2801_v55  ;;  %v17493_v43 = vld [vmem:[%s22126_s4 + $0x8] sm:$0xff]  }
 0x268   : >> { %16120 = vmatmul.mubr.msk.bf16.gmra.mrb[188].mxu0 %vm838_vm4, %v4023_v46  ;;  %v17601_v50 = vld [vmem:[#allocation2 + $0xe9] sm:$0xff]  ;;  %v17496_v31 = vld [vmem:[%s22126_s4 + $0x20] sm:$0xff]   ;;  %v5331_v55 = vld [vmem:[#allocation2 + $0x92] sm:$0xff]  ;;  %22280 = vst [vmem:[#allocation24_spill] sm:$0xff] %v20166_v8 }
 0x269   : >> { %16271 = vmatprep.mubr.msk.bf16.mxu0 %vm838_vm4, %v5553_v13  ;;  %v2826_v17 = vmax.f32 %v2817_v61, 0.0  ;;  %16254 = vmatpush3.bf16.msra.mxu1 %v17490_v48  ;;  %v5555_v52 = vpack.c.bf16 %v17601_v50, %v17600_v45  ;;  %v5332_v48 = vld [vmem:[#allocation2 + $0x9a] sm:$0xff]  ;;  %v17602_v49 = vld [vmem:[#allocation2 + $0xf1] sm:$0xff]  ;;  %v5520_v50 = vld [vmem:[#allocation2 + $0xc8] sm:$0xff] }
 0x26a   : >> { %16411 = vmatprep.subr.bf16.mxu1 %v17491_v51  ;;  %v5343_v46 = vpack.c.bf16 %v5332_v48, %v5331_v55  ;;  %v17603_v5 = vld [vmem:[#allocation2 + $0xf9] sm:$0xff]  ;;  %v17604_v30 = vld [vmem:[#allocation2 + $0x101] sm:$0xff]  ;;  %v5334_v61 = vld [vmem:[#allocation2 + $0xaa] sm:$0xff] }
 0x26b   : >> { %v2853_v41 = vsel %vm2844_vm15, %v2826_v17, 0.0  ;;  %v5336_v17 = vld [vmem:[#allocation2 + $0xba] sm:$0xff]  ;;  %v20179_v20 = vld [vmem:[#allocation2 + $0x128] sm:$0xff] }
 0x26c   : >> { %2862 = vst.msk [vmem:[#allocation2 + $0x1a8] sm:$0xff] %vm838_vm4, %v2853_v41  ;;  %16244 = vmatmul.mubr.msk.bf16.gmra.mrb[184].mxu1 %vm838_vm4, %v5553_v13  ;;  %v20067_v13 = vpack.c.bf16 %v17603_v5, %v17602_v49  ;;  %v5333_v41 = vld [vmem:[#allocation2 + $0xa2] sm:$0xff]  ;;  %v17613_v0 = vld [vmem:[#allocation2 + $0x10a] sm:$0xff]  ;;  %v22288_v25 = vld [vmem:[#allocation35_spill] sm:$0xff] }
 0x26d   : >> { %16247 = vmatprep.mubr.msk.bf16.mxu1 %vm838_vm4, %v5202_v47  ;;  %v5344_v2 = vpack.c.bf16 %v5334_v61, %v5333_v41  ;;  %v5519_v55 = vld [vmem:[#allocation2 + $0xc0] sm:$0xff]  ;;  %v5521_v61 = vld [vmem:[#allocation2 + $0xd0] sm:$0xff] }
 0x26e   : >> { %22270 = vst [vmem:[#allocation15_spill] sm:$0xff] %v20067_v13  ;;  %v17495_v49 = vld [vmem:[%s22126_s4] sm:$0xff]  }
 0x26f   : >> { %v17499_v53 = vld [vmem:[%s22126_s4 + $0x20] sm:$0xff]  }
 0x270   : >> { %16272 = vmatmul.mubr.msk.bf16.vlgmr.msra.gmra.mrb[192].mxu0 %vm838_vm4, %v5202_v47  ;;  %v5335_v47 = vld [vmem:[#allocation2 + $0xb2] sm:$0xff] }
 0x271   : >> { %16275 = vmatprep.mubr.msk.bf16.mxu0 %vm838_vm4, %v5555_v52  ;;  %16284 = vmatpush3.bf16.msra.mxu0 %v19976_v15  ;;  %v20070_v15 = vpack.c.bf16 %v19575_v12, %v17604_v30  ;;  %v5345_v45 = vpack.c.bf16 %v5336_v17, %v5335_v47  ;;  %v22273_v30 = vld [vmem:[#allocation34_spill] sm:$0xff]  ;;  %v17607_v17 = vld [vmem:[#allocation2 + $0xd8] sm:$0xff]  ;;  %v17608_v47 = vld [vmem:[#allocation2 + $0xe2] sm:$0xff] }
 0x272   : >> { %16285 = vmatprep.subr.bf16.mxu0 %v17493_v43  ;;  %v5532_v41 = vpack.c.bf16 %v17607_v17, %v5521_v61  ;;  %v20132_v61 = vpack.c.bf16 %v19832_v9, %v19797_v3  ;;  %v20134_v17 = vld [vmem:[#allocation2 + $0x118] sm:$0xff] }
 0x273   : >> { %22271 = vst [vmem:[#allocation18_spill] sm:$0xff] %v20070_v15 }
 0x274   : >> { %16248 = vmatmul.mubr.msk.bf16.gmra.mrb[188].mxu1 %vm838_vm4, %v5555_v52  ;;  %v17605_v52 = vld [vmem:[#allocation2 + $0x111] sm:$0xff]  ;;  %22276 = vst [vmem:[#allocation19_spill] sm:$0xff] %v20132_v61 }
 0x275   : >> { %16286 = vmatpush3.bf16.msra.mxu0 %v17493_v43  ;;  %16255 = vmatprep.mubr.msk.bf16.mxu1 %vm838_vm4, %v5343_v46  ;;  %v17494_v43 = vld [vmem:[%s22126_s4 + $0x18] sm:$0xff]   ;;  %v20082_v48 = vpack.c.bf16 %v19760_v33, %v17605_v52  ;;  %v5531_v46 = vpack.c.bf16 %v5520_v50, %v5519_v55  ;;  %v20107_v52 = vpack.c.bf16 %v19795_v60, %v19762_v40  ;;  %v20109_v55 = vld [vmem:[#allocation2 + $0x108] sm:$0xff] }
 0x276   : >> { %16299 = vmatprep.subr.bf16.mxu0 %v17496_v31  ;;  %v20103_v50 = vld [vmem:[#allocation2 + $0xf8] sm:$0xff] }
 0x277   : >> { %22272 = vst [vmem:[#allocation17_spill] sm:$0xff] %v20082_v48  ;;  %22274 = vst [vmem:[#allocation31_spill] sm:$0xff] %v20107_v52 }
 0x278   : >> { %16276 = vmatmul.mubr.msk.bf16.gmra.mrb[196].mxu0 %vm838_vm4, %v20067_v13  ;;  %v17503_v13 = vld [vmem:[%s22126_s4 + $0x30] sm:$0xff]  }
 0x279   : >> { %16279 = vmatprep.mubr.msk.bf16.mxu0 %vm838_vm4, %v20070_v15  ;;  %v20204_v15 = vld [vmem:[#allocation2 + $0x138] sm:$0xff] }
 0x27c   : >> { %16256 = vmatmul.mubr.msk.bf16.vlgmr.msra.gmra.mrb[180].mxu1 %vm838_vm4, %v5344_v2  ;;  %v17497_v2 = vld [vmem:[%s22126_s4 + $0x28] sm:$0xff]  }
 0x27d   : >> { %16412 = vmatpush3.bf16.msra.mxu1 %v17491_v51  ;;  %16259 = vmatprep.mubr.msk.bf16.mxu1 %vm838_vm4, %v5345_v45  ;;  %v17606_v51 = vld [vmem:[#allocation2 + $0xda] sm:$0xff] }
 0x27e   : >> { %16413 = vmatprep.subr.bf16.mxu1 %v17494_v43  ;;  %v5347_v5 = vpack.c.bf16 %v17606_v51, %v19860_v24  ;;  %v17500_v24 = vld [vmem:[%s22126_s4 + $0x30] sm:$0xff]  }
 0x280   : >> { %16280 = vmatmul.mubr.msk.bf16.gmra.mrb[200].mxu0 %vm838_vm4, %v20082_v48 }
 0x281   : >> { %16287 = vmatprep.mubr.msk.bf16.mxu0 %vm838_vm4, %v5531_v46  ;;  %16414 = vmatpush3.bf16.msra.mxu1 %v17494_v43  ;;  %v17609_v43 = vld [vmem:[#allocation2 + $0xea] sm:$0xff]  ;;  %v20120_v46 = vld [vmem:[#allocation2 + $0x100] sm:$0xff] }
 0x282   : >> { %16427 = vmatprep.subr.bf16.mxu1 %v17495_v49  ;;  %v5348_v45 = vpack.c.bf16 %v17609_v43, %v17608_v47  ;;  %v20124_v51 = vpack.c.bf16 %v20109_v55, %v20120_v46  ;;  %v20145_v47 = vld [vmem:[#allocation2 + $0x110] sm:$0xff] }
 0x283   : >> { %v20151_v43 = vpack.c.bf16 %v20134_v17, %v20145_v47 }
 0x284   : >> { %16260 = vmatmul.mubr.msk.bf16.gmra.mrb[184].mxu1 %vm838_vm4, %v22273_v30  ;;  %22275 = vst [vmem:[#allocation20_spill] sm:$0xff] %v20124_v51 }
 0x285   : >> { %16263 = vmatprep.mubr.msk.bf16.mxu1 %vm838_vm4, %v5347_v5  ;;  %22278 = vst [vmem:[#allocation21_spill] sm:$0xff] %v20151_v43 }
 0x288   : >> { %16288 = vmatmul.mubr.msk.bf16.vlgmr.msra.gmra.mrb[192].mxu0 %vm838_vm4, %v5532_v41  ;;  %v17498_v41 = vld [vmem:[%s22126_s4 + $0x8] sm:$0xff]  }
 0x289   : >> { %16291 = vmatprep.mubr.msk.bf16.mxu0 %vm838_vm4, %v19979_v35  ;;  %16300 = vmatpush3.bf16.msra.mxu0 %v17496_v31  ;;  %v20112_v35 = vld [vmem:[#allocation2 + $0xf0] sm:$0xff] }
 0x28a   : >> { %16301 = vmatprep.subr.bf16.mxu0 %v17497_v2  ;;  %v20118_v31 = vpack.c.bf16 %v20103_v50, %v20112_v35 }
 0x28c   : >> { %16264 = vmatmul.mubr.msk.bf16.gmra.mrb[188].mxu1 %vm838_vm4, %v5348_v45 }
 0x28d   : >> { %16302 = vmatpush3.bf16.msra.mxu0 %v17497_v2  ;;  %16415 = vmatprep.mubr.msk.bf16.mxu1 %vm838_vm4, %v20107_v52  ;;  %v20141_v2 = vpack.c.bf16 %v19872_v44, %v19839_v22  ;;  %v17612_v52 = vld [vmem:[#allocation2 + $0x102] sm:$0xff] }
 0x28e   : >> { %16315 = vmatprep.subr.bf16.mxu0 %v17500_v24  ;;  %v20200_v48 = vpack.c.bf16 %v17613_v0, %v17612_v52  ;;  %v17502_v0 = vld [vmem:[%s22126_s4 + $0x28] sm:$0xff]  }
 0x28f   : >> { %22277 = vst [vmem:[#allocation22_spill] sm:$0xff] %v20141_v2 }
 0x290   : >> { %16292 = vmatmul.mubr.msk.bf16.gmra.mrb[196].mxu0 %vm838_vm4, %v20118_v31  ;;  %22284 = vst [vmem:[#allocation26_spill] sm:$0xff] %v20200_v48 }
 0x291   : >> { %16295 = vmatprep.mubr.msk.bf16.mxu0 %vm838_vm4, %v20124_v51  ;;  %v20279_v51 = vld [vmem:[#allocation2 + $0x122] sm:$0xff] }
 0x294   : >> { %16416 = vmatmul.mubr.msk.bf16.vlgmr.msra.gmra.mrb[192].mxu1 %vm838_vm4, %v20132_v61 }
 0x295   : >> { %16428 = vmatpush3.bf16.msra.mxu1 %v17495_v49  ;;  %16419 = vmatprep.mubr.msk.bf16.mxu1 %vm838_vm4, %v20141_v2  ;;  %v20162_v49 = vpack.c.bf16 %v19936_v38, %v19875_v42  ;;  %v20188_v2 = vld [vmem:[#allocation2 + $0x120] sm:$0xff] }
 0x296   : >> { %16429 = vmatprep.subr.bf16.mxu1 %v17498_v41 }
 0x297   : >> { %22279 = vst [vmem:[#allocation25_spill] sm:$0xff] %v20162_v49 }
 0x298   : >> { %16296 = vmatmul.mubr.msk.bf16.gmra.mrb[200].mxu0 %vm838_vm4, %v20151_v43  ;;  %v20250_v43 = vld [vmem:[#allocation2 + $0x160] sm:$0xff] }
 0x299   : >> { %16303 = vmatprep.mubr.msk.bf16.mxu0 %vm838_vm4, %v22273_v30  ;;  %16430 = vmatpush3.bf16.msra.mxu1 %v17498_v41  ;;  %v17501_v30 = vld [vmem:[%s22126_s4 + $0x38] sm:$0xff]  }
 0x29a   : >> { %16443 = vmatprep.subr.bf16.mxu1 %v17499_v53  ;;  %v20176_v41 = vld [vmem:[#allocation2 + $0x179] sm:$0xff] }
 0x29c   : >> { %16420 = vmatmul.mubr.msk.bf16.gmra.mrb[196].mxu1 %vm838_vm4, %v20162_v49  ;;  %v17504_v49 = vld [vmem:[%s22126_s4 + $0x40] sm:$0xff]  }
 0x29d   : >> { %16423 = vmatprep.mubr.msk.bf16.mxu1 %vm838_vm4, %v20166_v8  ;;  %v20186_v8 = vpack.c.bf16 %v20176_v41, %v19985_v18 }
 0x29f   : >> { %22281 = vst [vmem:[#allocation23_spill] sm:$0xff] %v20186_v8 }
 0x2a0   : >> { %16304 = vmatmul.mubr.msk.bf16.vlgmr.msra.gmra.mrb[192].mxu0 %vm838_vm4, %v5347_v5  ;;  %v20192_v5 = vpack.c.bf16 %v20179_v20, %v20188_v2 }
 0x2a1   : >> { %16307 = vmatprep.mubr.msk.bf16.mxu0 %vm838_vm4, %v5348_v45  ;;  %16316 = vmatpush3.bf16.msra.mxu0 %v17500_v24  ;;  %v17610_v24 = vld [vmem:[#allocation2 + $0xf2] sm:$0xff]  ;;  %v17611_v45 = vld [vmem:[#allocation2 + $0xfa] sm:$0xff] }
 0x2a2   : >> { %16317 = vmatprep.subr.bf16.mxu0 %v17501_v30  ;;  %22282 = vst [vmem:[#allocation28_spill] sm:$0xff] %v20192_v5  ;;  %v20198_v61 = vpack.c.bf16 %v17611_v45, %v17610_v24  ;;  %v20213_v24 = vld [vmem:[#allocation2 + $0x140] sm:$0xff] }
 0x2a3   : >> { %v20215_v45 = vld [vmem:[#allocation2 + $0x11a] sm:$0xff] }
 0x2a4   : >> { %16424 = vmatmul.mubr.msk.bf16.gmra.mrb[200].mxu1 %vm838_vm4, %v20186_v8  ;;  %22283 = vst [vmem:[#allocation27_spill] sm:$0xff] %v20198_v61  ;;  %v6845_v8 = vld [vmem:[#allocation2 + $0x130] sm:$0xff] }
 0x2a5   : >> { %16318 = vmatpush3.bf16.msra.mxu0 %v17501_v30  ;;  %16431 = vmatprep.mubr.msk.bf16.mxu1 %vm838_vm4, %v20192_v5  ;;  %v20208_v30 = vld [vmem:[#allocation2 + $0x148] sm:$0xff]  ;;  %v20211_v34 = vpack.c.bf16 %v20204_v15, %v6845_v8  ;;  %v20236_v5 = vld [vmem:[#allocation2 + $0x158] sm:$0xff] }
 0x2a6   : >> { %16331 = vmatprep.subr.bf16.mxu0 %v17504_v49  ;;  %v20222_v52 = vpack.c.bf16 %v20208_v30, %v20213_v24 }
 0x2a7   : >> { %22285 = vst [vmem:[#allocation29_spill] sm:$0xff] %v20211_v34 }
 0x2a8   : >> { %16308 = vmatmul.mubr.msk.bf16.gmra.mrb[196].mxu0 %vm838_vm4, %v20198_v61  ;;  %22286 = vst [vmem:[#allocation32_spill] sm:$0xff] %v20222_v52 }
 0x2a9   : >> { %16311 = vmatprep.mubr.msk.bf16.mxu0 %vm838_vm4, %v20200_v48  ;;  %v17614_v48 = vld [vmem:[#allocation2 + $0x112] sm:$0xff] }
 0x2aa   : >> { %v20229_v61 = vpack.c.bf16 %v20215_v45, %v17614_v48 }
 0x2ac   : >> { %16432 = vmatmul.mubr.msk.bf16.vlgmr.msra.gmra.mrb[192].mxu1 %vm838_vm4, %v20211_v34  ;;  %22287 = vst [vmem:[#allocation33_spill] sm:$0xff] %v20229_v61  ;;  %v20244_v34 = vld [vmem:[#allocation2 + $0x150] sm:$0xff] }
 0x2ad   : >> { %16444 = vmatpush3.bf16.msra.mxu1 %v17499_v53  ;;  %16435 = vmatprep.mubr.msk.bf16.mxu1 %vm838_vm4, %v20222_v52  ;;  %v22289_v53 = vpack.c.bf16 %v22288_v25, %v22265_v29  ;;  %v20242_v52 = vld [vmem:[#allocation2 + $0x168] sm:$0xff]  ;;  %v20248_v48 = vpack.c.bf16 %v20236_v5, %v20244_v34  ;;  %v5943_v25 = vpack.c.bf16 %v20112_v35, %v19968_v37  ;;  %v17508_v37 = vld [vmem:[%s22126_s4 + $0x50] sm:$0xff]  }
 0x2ae   : >> { %16445 = vmatprep.subr.bf16.mxu1 %v17502_v0  ;;  %v17505_v29 = vld [vmem:[%s22126_s4 + $0x48] sm:$0xff]  }
 0x2af   : >> { %22290 = vst [vmem:[#allocation36_spill] sm:$0xff] %v20248_v48 }
 0x2b0   : >> { %16312 = vmatmul.mubr.msk.bf16.gmra.mrb[200].mxu0 %vm838_vm4, %v20229_v61  ;;  %v20254_v61 = vpack.c.bf16 %v20242_v52, %v20250_v43 }
 0x2b1   : >> { %16319 = vmatprep.mubr.msk.bf16.mxu0 %vm838_vm4, %v22289_v53  ;;  %16446 = vmatpush3.bf16.msra.mxu1 %v17502_v0  ;;  %v5944_v0 = vpack.c.bf16 %v20120_v46, %v20103_v50  ;;  %v20268_v53 = vld [vmem:[#allocation2 + $0x178] sm:$0xff]  ;;  %v5945_v46 = vpack.c.bf16 %v20145_v47, %v20109_v55  ;;  %v20306_v55 = vpack.c.bf16 %v19877_v57, %v19843_v4 }
 0x2b2   : >> { %16459 = vmatprep.subr.bf16.mxu1 %v17503_v13  ;;  %22291 = vst [vmem:[#allocation34_spill] sm:$0xff] %v20254_v61  ;;  %v22292_v47 = vpack.c.bf16 %v19453_v56, %v19451_v26  ;;  %v17509_v26 = vld [vmem:[%s22126_s4 + $0x58] sm:$0xff]   ;;  %v22293_v56 = vpack.c.bf16 %v19496_v19, %v19494_v62  ;;  %v7266_v62 = vpack.c.bf16 %v20213_v24, %v20204_v15  ;;  %v17510_v15 = vld [vmem:[%s22126_s4 + $0x48] sm:$0xff]  }
 0x2b3   : >> { %v22295_v19 = vpack.c.bf16 %v19577_v16, %v19575_v12  ;;  %v7268_v24 = vpack.c.bf16 %v20250_v43, %v20236_v5  ;;  %v17511_v12 = vld [vmem:[%s22126_s4 + $0x50] sm:$0xff]   ;;  %v22297_v16 = vpack.c.bf16 %v19797_v3, %v19795_v60  ;;  %v17513_v60 = vld [vmem:[%s22126_s4 + $0x68] sm:$0xff]  }
 0x2b4   : >> { %16436 = vmatmul.mubr.msk.bf16.gmra.mrb[196].mxu1 %vm838_vm4, %v20248_v48  ;;  %v20271_v48 = vld [vmem:[#allocation2 + $0x12a] sm:$0xff] }
 0x2b5   : >> { %16439 = vmatprep.mubr.msk.bf16.mxu1 %vm838_vm4, %v20254_v61  ;;  %v6853_v61 = vld [vmem:[#allocation2 + $0x170] sm:$0xff]  ;;  %v20283_v50 = vpack.c.bf16 %v20271_v48, %v20279_v51 }
 0x2b6   : >> { %v20277_v35 = vpack.c.bf16 %v20268_v53, %v6853_v61  ;;  %v22300_v3 = vld [vmem:[#allocation38_spill] sm:$0xff] }
 0x2b7   : >> { %v17516_v5 = vld [vmem:[%s22126_s4 + $0x70] sm:$0xff]  }
 0x2b8   : >> { %16320 = vmatmul.mubr.msk.bf16.vlgmr.msra.gmra.mrb[192].mxu0 %vm838_vm4, %v5943_v25  ;;  %v20295_v25 = vld [vmem:[#allocation2 + $0x132] sm:$0xff] }
 0x2b9   : >> { %16323 = vmatprep.mubr.msk.bf16.mxu0 %vm838_vm4, %v5944_v0  ;;  %16332 = vmatpush3.bf16.msra.mxu0 %v17504_v49  ;;  %v5946_v49 = vpack.c.bf16 %v20188_v2, %v20134_v17  ;;  %v20299_v0 = vpack.c.bf16 %v19841_v23, %v20295_v25  ;;  %v5947_v17 = vpack.c.bf16 %v6845_v8, %v20179_v20  ;;  %v17507_v2 = vld [vmem:[%s22126_s4 + $0x40] sm:$0xff]  }
 0x2ba   : >> { %16333 = vmatprep.subr.bf16.mxu0 %v17505_v29  ;;  %v20327_v20 = vpack.c.bf16 %v19990_v28, %v19947_v14  ;;  %v20340_v8 = vld [vmem:[#allocation2 + $0x17a] sm:$0xff] }
 0x2bc   : >> { %16440 = vmatmul.mubr.msk.bf16.gmra.mrb[200].mxu1 %vm838_vm4, %v20277_v35 }
 0x2bd   : >> { %16334 = vmatpush3.bf16.msra.mxu0 %v17505_v29  ;;  %16447 = vmatprep.mubr.msk.bf16.mxu1 %vm838_vm4, %v20283_v50  ;;  %v17506_v29 = vld [vmem:[%s22126_s4 + $0x38] sm:$0xff]  }
 0x2be   : >> { %16347 = vmatprep.subr.bf16.mxu0 %v17508_v37 }
 0x2c0   : >> { %16324 = vmatmul.mubr.msk.bf16.gmra.mrb[196].mxu0 %vm838_vm4, %v5945_v46  ;;  %v22294_v46 = vpack.c.bf16 %v19535_v21, %v19531_v36  ;;  %v22296_v36 = vpack.c.bf16 %v19762_v40, %v19760_v33  ;;  %v7267_v21 = vpack.c.bf16 %v20244_v34, %v20208_v30  ;;  %v22298_v33 = vpack.c.bf16 %v19457_v39, %v19470_v10  ;;  %v20398_v10 = vld [vmem:[#allocation2 + $0x190] sm:$0xff] }
 0x2c1   : >> { %16327 = vmatprep.mubr.msk.bf16.mxu0 %vm838_vm4, %v5946_v49  ;;  %v17512_v49 = vld [vmem:[%s22126_s4 + $0x60] sm:$0xff]   ;;  %v7269_v40 = vpack.c.bf16 %v6853_v61, %v20242_v52  ;;  %v7270_v34 = vpack.c.bf16 %v20017_v32, %v20268_v53  ;;  %v22299_v39 = vpack.c.bf16 %v19502_v7, %v19500_v6  ;;  %v22301_v61 = vld [vmem:[#allocation37_spill] sm:$0xff]  ;;  %v7271_v30 = vpack.c.bf16 %v20398_v10, %v20019_v63  ;;  %v22304_v52 = vld [vmem:[#allocation39_spill] sm:$0xff] }
 0x2c2   : >> { %v22302_v43 = vpack.c.bf16 %v22300_v3, %v22301_v61  ;;  %v22303_v6 = vpack.c.bf16 %v19839_v22, %v19832_v9  ;;  %v6236_v7 = vpack.c.bf16 %v20279_v51, %v20215_v45  ;;  %v22305_v53 = vld [vmem:[#allocation40_spill] sm:$0xff]  ;;  %v22307_v9 = vpack.c.bf16 %v19875_v42, %v19872_v44 }
 0x2c3   : >> { %v22308_v22 = vpack.c.bf16 %v19938_v1, %v19936_v38  ;;  %v6237_v51 = vpack.c.bf16 %v20295_v25, %v20271_v48  ;;  %v17515_v45 = vld [vmem:[%s22126_s4 + $0x60] sm:$0xff]   ;;  %v7415_v44 = vpack.c.bf16 %v20026_v59, %v20176_v41  ;;  %v22309_v42 = vpack.c.bf16 %v19985_v18, %v19983_v54  ;;  %v17517_v38 = vld [vmem:[%s22126_s4 + $0x78] sm:$0xff]   ;;  %v22311_v48 = vld [vmem:[#allocation21_spill] sm:$0xff] }
 0x2c4   : >> { %16448 = vmatmul.mubr.msk.bf16.vlgmr.msra.gmra.mrb[192].mxu1 %vm838_vm4, %v20299_v0  ;;  %v22310_v1 = vld [vmem:[#allocation20_spill] sm:$0xff]  ;;  %v22312_v18 = vld [vmem:[#allocation14_spill] sm:$0xff]  ;;  %v22313_v25 = vpack.c.bf16 %v19843_v4, %v19841_v23  ;;  %v22317_v23 = vpack.c.bf16 %v19947_v14, %v19945_v58  ;;  %v17521_v14 = vld [vmem:[%s22126_s4 + $0x88] sm:$0xff]  }
 0x2c5   : >> { %16460 = vmatpush3.bf16.msra.mxu1 %v17503_v13  ;;  %16451 = vmatprep.mubr.msk.bf16.mxu1 %vm838_vm4, %v20306_v55  ;;  %v20323_v13 = vpack.c.bf16 %v19945_v58, %v19879_v27  ;;  %v17520_v54 = vld [vmem:[%s22126_s4 + $0x80] sm:$0xff]   ;;  %v17519_v4 = vld [vmem:[%s22126_s4 + $0x70] sm:$0xff]   ;;  %v22321_v58 = vpack.c.bf16 %v19992_v11, %v19990_v28 }
 0x2c6   : >> { %16461 = vmatprep.subr.bf16.mxu1 %v17506_v29  ;;  %v17525_v28 = vld [vmem:[%s22128_s6 + $0x20] sm:$0xff]  }
 0x2c8   : >> { %16328 = vmatmul.mubr.msk.bf16.gmra.mrb[200].mxu0 %vm838_vm4, %v5947_v17  ;;  %v17514_v17 = vld [vmem:[%s22126_s4 + $0x58] sm:$0xff]  }
 0x2c9   : >> { %16335 = vmatprep.mubr.msk.bf16.mxu0 %vm838_vm4, %v22292_v47  ;;  %16462 = vmatpush3.bf16.msra.mxu1 %v17506_v29  ;;  %v20351_v29 = vpack.c.bf16 %v20340_v8, %v19992_v11  ;;  %v22315_v47 = vld [vmem:[#allocation29_spill] sm:$0xff]  ;;  %v22324_v11 = vld [vmem:[#allocation16_spill] sm:$0xff] }
 0x2ca   : >> { %16475 = vmatprep.subr.bf16.mxu1 %v17507_v2 }
 0x2cc   : >> { %16452 = vmatmul.mubr.msk.bf16.gmra.mrb[196].mxu1 %vm838_vm4, %v20323_v13 }
 0x2cd   : >> { %16455 = vmatprep.mubr.msk.bf16.mxu1 %vm838_vm4, %v20327_v20 }
 0x2d0   : >> { %16336 = vmatmul.mubr.msk.bf16.vlgmr.msra.gmra.mrb[192].mxu0 %vm838_vm4, %v22293_v56  ;;  %v22316_v56 = vpack.c.bf16 %v19879_v27, %v19877_v57  ;;  %v22320_v57 = vld [vmem:[#allocation30_spill] sm:$0xff] }
 0x2d1   : >> { %16339 = vmatprep.mubr.msk.bf16.mxu0 %vm838_vm4, %v22294_v46  ;;  %16348 = vmatpush3.bf16.msra.mxu0 %v17508_v37  ;;  %v22306_v37 = vpack.c.bf16 %v22304_v52, %v22305_v53  ;;  %v22318_v46 = vld [vmem:[#allocation32_spill] sm:$0xff]  ;;  %v7560_v27 = vpack.c.bf16 %v22320_v57, %v20340_v8 }
 0x2d2   : >> { %16349 = vmatprep.subr.bf16.mxu0 %v17509_v26 }
 0x2d4   : >> { %16456 = vmatmul.mubr.msk.bf16.gmra.mrb[200].mxu1 %vm838_vm4, %v20351_v29 }
 0x2d5   : >> { %16350 = vmatpush3.bf16.msra.mxu0 %v17509_v26  ;;  %16463 = vmatprep.mubr.msk.bf16.mxu1 %vm838_vm4, %v7266_v62  ;;  %v17518_v26 = vld [vmem:[%s22126_s4 + $0x68] sm:$0xff]   ;;  %v22322_v62 = vld [vmem:[#allocation18_spill] sm:$0xff] }
 0x2d6   : >> { %16363 = vmatprep.subr.bf16.mxu0 %v17512_v49 }
 0x2d8   : >> { %16340 = vmatmul.mubr.msk.bf16.gmra.mrb[196].mxu0 %vm838_vm4, %v22295_v19  ;;  %v20500_v19 = vld [vmem:[#allocation2 + $0x192] sm:$0xff] }
 0x2d9   : >> { %16343 = vmatprep.mubr.msk.bf16.mxu0 %vm838_vm4, %v22296_v36  ;;  %v22323_v36 = vld [vmem:[#allocation17_spill] sm:$0xff]  ;;  %v7561_v8 = vpack.c.bf16 %v20500_v19, %v22324_v11 }
 0x2dc   : >> { %16464 = vmatmul.mubr.msk.bf16.vlgmr.msra.gmra.mrb[192].mxu1 %vm838_vm4, %v7267_v21  ;;  %v22325_v21 = vld [vmem:[#allocation36_spill] sm:$0xff] }
 0x2dd   : >> { %16476 = vmatpush3.bf16.msra.mxu1 %v17507_v2  ;;  %16467 = vmatprep.mubr.msk.bf16.mxu1 %vm838_vm4, %v7268_v24  ;;  %v22314_v2 = vld [vmem:[#allocation28_spill] sm:$0xff]  ;;  %v22327_v24 = vld [vmem:[#allocation19_spill] sm:$0xff] }
 0x2de   : >> { %16477 = vmatprep.subr.bf16.mxu1 %v17510_v15 }
 0x2e0   : >> { %16344 = vmatmul.mubr.msk.bf16.gmra.mrb[200].mxu0 %vm838_vm4, %v22297_v16  ;;  %v22328_v16 = vld [vmem:[#allocation34_spill] sm:$0xff] }
 0x2e1   : >> { %16351 = vmatprep.mubr.msk.bf16.mxu0 %vm838_vm4, %v22298_v33  ;;  %16478 = vmatpush3.bf16.msra.mxu1 %v17510_v15  ;;  %v22326_v15 = vld [vmem:[#allocation31_spill] sm:$0xff]  ;;  %v20526_v33 = vld [vmem:[%s22126_s4 + $0x80] sm:$0xff]  }
 0x2e2   : >> { %16491 = vmatprep.subr.bf16.mxu1 %v17511_v12 }
 0x2e4   : >> { %16468 = vmatmul.mubr.msk.bf16.gmra.mrb[196].mxu1 %vm838_vm4, %v7269_v40  ;;  %v22329_v40 = vld [vmem:[#allocation22_spill] sm:$0xff] }
 0x2e5   : >> { %16471 = vmatprep.mubr.msk.bf16.mxu1 %vm838_vm4, %v7270_v34  ;;  %v22330_v34 = vld [vmem:[#allocation27_spill] sm:$0xff] }
 0x2e8   : >> { %16352 = vmatmul.mubr.msk.bf16.vlgmr.msra.gmra.mrb[192].mxu0 %vm838_vm4, %v22299_v39  ;;  %v7698_v39 = vld [vmem:[#allocation2 + $0x198] sm:$0xff] }
 0x2e9   : >> { %16355 = vmatprep.mubr.msk.bf16.mxu0 %vm838_vm4, %v22302_v43  ;;  %16364 = vmatpush3.bf16.msra.mxu0 %v17512_v49  ;;  %v22319_v49 = vld [vmem:[#allocation15_spill] sm:$0xff]  ;;  %v7705_v43 = vpack.c.bf16 %v7698_v39, %v20398_v10 }
 0x2ea   : >> { %16365 = vmatprep.subr.bf16.mxu0 %v17513_v60 }
 0x2ec   : >> { %16472 = vmatmul.mubr.msk.bf16.gmra.mrb[200].mxu1 %vm838_vm4, %v7271_v30 }
 0x2ed   : >> { %16366 = vmatpush3.bf16.msra.mxu0 %v17513_v60  ;;  %16479 = vmatprep.mubr.msk.bf16.mxu1 %vm838_vm4, %v22303_v6  ;;  %v20535_v60 = vld [vmem:[%s22127_s5] ss:$0 sm:$0xff]  ;;  %v22331_v6 = vpack.c.bf16 %v20019_v63, %v20017_v32  ;;  %v7700_v32 = vld [vmem:[#allocation2 + $0x1a8] sm:$0xff] }
 0x2ee   : >> { %16379 = vmatprep.subr.bf16.mxu0 %v17516_v5 }
 0x2f0   : >> { %16356 = vmatmul.mubr.msk.bf16.gmra.mrb[196].mxu0 %vm838_vm4, %v22306_v37  ;;  %v17526_v37 = vld [vmem:[%s22128_s6 + $0x28] sm:$0xff]  }
 0x2f1   : >> { %16359 = vmatprep.mubr.msk.bf16.mxu0 %vm838_vm4, %v6236_v7 }
 0x2f4   : >> { %16480 = vmatmul.mubr.msk.bf16.vlgmr.msra.gmra.mrb[192].mxu1 %vm838_vm4, %v22307_v9 }
 0x2f5   : >> { %16492 = vmatpush3.bf16.msra.mxu1 %v17511_v12  ;;  %16483 = vmatprep.mubr.msk.bf16.mxu1 %vm838_vm4, %v22308_v22  ;;  %v17522_v12 = vld [vmem:[%s22126_s4 + $0x78] sm:$0xff]   ;;  %v22332_v22 = vld [vmem:[#allocation26_spill] sm:$0xff] }
 0x2f6   : >> { %16493 = vmatprep.subr.bf16.mxu1 %v17514_v17 }
 0x2f8   : >> { %16360 = vmatmul.mubr.msk.bf16.gmra.mrb[200].mxu0 %vm838_vm4, %v6237_v51  ;;  %v22333_v51 = vld [vmem:[#allocation33_spill] sm:$0xff] }
 0x2f9   : >> { %16367 = vmatprep.mubr.msk.bf16.mxu0 %vm838_vm4, %v20118_v31  ;;  %16494 = vmatpush3.bf16.msra.mxu1 %v17514_v17  ;;  %v20452_v31 = vld [vmem:[#allocation2 + $0x191] sm:$0xff] }
 0x2fa   : >> { %16507 = vmatprep.subr.bf16.mxu1 %v17515_v45  ;;  %v7416_v41 = vpack.c.bf16 %v20452_v31, %v22312_v18 }
 0x2fc   : >> { %16484 = vmatmul.mubr.msk.bf16.gmra.mrb[196].mxu1 %vm838_vm4, %v22309_v42 }
 0x2fd   : >> { %16487 = vmatprep.mubr.msk.bf16.mxu1 %vm838_vm4, %v7415_v44  ;;  %v17527_v44 = vld [vmem:[%s22128_s6 + $0x30] sm:$0xff]  }
 0x300   : >> { %16368 = vmatmul.mubr.msk.bf16.vlgmr.msra.gmra.mrb[192].mxu0 %vm838_vm4, %v22310_v1 }
 0x301   : >> { %16371 = vmatprep.mubr.msk.bf16.mxu0 %vm838_vm4, %v22311_v48  ;;  %16380 = vmatpush3.bf16.msra.mxu0 %v17516_v5 }
 0x302   : >> { %16381 = vmatprep.subr.bf16.mxu0 %v17517_v38 }
 0x304   : >> { %16488 = vmatmul.mubr.msk.bf16.gmra.mrb[200].mxu1 %vm838_vm4, %v7416_v41 }
 0x305   : >> { %16382 = vmatpush3.bf16.msra.mxu0 %v17517_v38  ;;  %16495 = vmatprep.mubr.msk.bf16.mxu1 %vm838_vm4, %v22313_v25 }
 0x306   : >> { %16395 = vmatprep.subr.bf16.mxu0 %v17520_v54 }
 0x308   : >> { %16372 = vmatmul.mubr.msk.bf16.gmra.mrb[196].mxu0 %vm838_vm4, %v22314_v2 }
 0x309   : >> { %16375 = vmatprep.mubr.msk.bf16.mxu0 %vm838_vm4, %v22315_v47 }
 0x30c   : >> { %16496 = vmatmul.mubr.msk.bf16.vlgmr.msra.gmra.mrb[192].mxu1 %vm838_vm4, %v22316_v56  ;;  %v17528_v56 = vld [vmem:[%s22128_s6 + $0x38] sm:$0xff]  }
 0x30d   : >> { %16508 = vmatpush3.bf16.msra.mxu1 %v17515_v45  ;;  %16499 = vmatprep.mubr.msk.bf16.mxu1 %vm838_vm4, %v22317_v23  ;;  %v7699_v45 = vld [vmem:[#allocation2 + $0x1a0] sm:$0xff] }
 0x30e   : >> { %16509 = vmatprep.subr.bf16.mxu1 %v17518_v26  ;;  %v7706_v38 = vpack.c.bf16 %v7700_v32, %v7699_v45  ;;  %v7844_v32 = vld [vmem:[#allocation2 + $0x1a1] sm:$0xff] }
 0x310   : >> { %16376 = vmatmul.mubr.msk.bf16.gmra.mrb[200].mxu0 %vm838_vm4, %v22318_v46 }
 0x311   : >> { %16383 = vmatprep.mubr.msk.bf16.mxu0 %vm838_vm4, %v22319_v49  ;;  %16510 = vmatpush3.bf16.msra.mxu1 %v17518_v26  ;;  %v22334_v26 = vld [vmem:[#allocation25_spill] sm:$0xff] }
 0x312   : >> { %16523 = vmatprep.subr.bf16.mxu1 %v17519_v4 }
 0x314   : >> { %16500 = vmatmul.mubr.msk.bf16.gmra.mrb[196].mxu1 %vm838_vm4, %v22321_v58 }
 0x315   : >> { %16503 = vmatprep.mubr.msk.bf16.mxu1 %vm838_vm4, %v7560_v27 }
 0x318   : >> { %16384 = vmatmul.mubr.msk.bf16.vlgmr.msra.gmra.mrb[192].mxu0 %vm838_vm4, %v22322_v62 }
 0x319   : >> { %16387 = vmatprep.mubr.msk.bf16.mxu0 %vm838_vm4, %v22323_v36  ;;  %16396 = vmatpush3.bf16.msra.mxu0 %v17520_v54 }
 0x31a   : >> { %16397 = vmatprep.subr.bf16.mxu0 %v17521_v14 }
 0x31c   : >> { %16504 = vmatmul.mubr.msk.bf16.gmra.mrb[200].mxu1 %vm838_vm4, %v7561_v8  ;;  %v8363_v8 = vld [vmem:[#allocation5 + $0x9] sm:$0xff] }
 0x31d   : >> { %16398 = vmatpush3.bf16.msra.mxu0 %v17521_v14  ;;  %16511 = vmatprep.mubr.msk.bf16.mxu1 %vm838_vm4, %v22325_v21  ;;  %v8362_v14 = vld [vmem:[#allocation5 + $0x1] sm:$0xff] }
 0x31e   : >> { %16555 = vmatprep.subr.bf16.mxu0 %v17525_v28  ;;  %v8370_v39 = vpack.c.bf16 %v8363_v8, %v8362_v14  ;;  %v17530_v8 = vld [vmem:[%s22128_s6 + $0x8] sm:$0xff]  }
 0x320   : >> { %16388 = vmatmul.mubr.msk.bf16.gmra.mrb[196].mxu0 %vm838_vm4, %v22326_v15  ;;  %v17524_v15 = vld [vmem:[%s22126_s4 + $0x88] sm:$0xff]  }
 0x321   : >> { %16391 = vmatprep.mubr.msk.bf16.mxu0 %vm838_vm4, %v22327_v24 }
 0x324   : >> { %16512 = vmatmul.mubr.msk.bf16.vlgmr.msra.gmra.mrb[192].mxu1 %vm838_vm4, %v22328_v16 }
 0x325   : >> { %16524 = vmatpush3.bf16.msra.mxu1 %v17519_v4  ;;  %16515 = vmatprep.mubr.msk.bf16.mxu1 %vm838_vm4, %v20277_v35 }
 0x326   : >> { %16525 = vmatprep.subr.bf16.mxu1 %v17522_v12 }
 0x328   : >> { %16392 = vmatmul.mubr.msk.bf16.gmra.mrb[200].mxu0 %vm838_vm4, %v22329_v40 }
 0x329   : >> { %16399 = vmatprep.mubr.msk.bf16.mxu0 %vm838_vm4, %v22330_v34  ;;  %16526 = vmatpush3.bf16.msra.mxu1 %v17522_v12  ;;  %v22335_v34 = vld [vmem:[#allocation24_spill] sm:$0xff] }
 0x32a   : >> { %16539 = vmatprep.subr.bf16.mxu1 %v20526_v33 }
 0x32b   : >> { %v16113_v35 = vpop.f32.mrb[180].mxu0 }
 0x32c   : >> { %v4161_v3 = vadd.f32 %v16113_v35, %v20535_v60  ;;  %v4093_v61 = vpop.f32.mrb[181].mxu0  ;;  %16516 = vmatmul.mubr.msk.bf16.gmra.mrb[196].mxu1 %vm838_vm4, %v22331_v6 }
 0x32d   : >> { %v4159_v5 = vadd.f32 %v20535_v60, %v4093_v61  ;;  %v16114_v30 = vpop.f32.mrb[182].mxu0  ;;  %16519 = vmatprep.mubr.msk.bf16.mxu1 %vm838_vm4, %v7705_v43  ;;  %v22336_v43 = vld [vmem:[#allocation23_spill] sm:$0xff] }
 0x32e   : >> { %v4173_v7 = vmax.f32 %v4161_v3, 0.0  ;;  %v4162_v52 = vadd.f32 %v16114_v30, %v20535_v60  ;;  %v4096_v53 = vpop.f32.mrb[183].mxu0 }
 0x32f   : >> { %v4171_v17 = vmax.f32 %v4159_v5, 0.0  ;;  %v4160_v10 = vadd.f32 %v20535_v60, %v4096_v53  ;;  %v7843_v53 = vld [vmem:[#allocation2 + $0x199] sm:$0xff] }
 0x330   : >> { %4185 = vst.msk [vmem:[#allocation3 + $0x10] sm:$0xff] %vm413_vm0, %v4173_v7  ;;  %v4174_v9 = vmax.f32 %v4162_v52, 0.0  ;;  %16400 = vmatmul.mubr.msk.bf16.vlgmr.msra.gmra.mrb[192].mxu0 %vm838_vm4, %v22332_v22  ;;  %v22337_v22 = vpack.c.bf16 %v22312_v18, %v20026_v59 }
 0x331   : >> { %4183 = vst.msk [vmem:[#allocation3] sm:$0xff] %vm413_vm0, %v4171_v17  ;;  %v4172_v63 = vmax.f32 %v4160_v10, 0.0  ;;  %16403 = vmatprep.mubr.msk.bf16.mxu0 %vm838_vm4, %v22333_v51  ;;  %16556 = vmatpush3.bf16.msra.mxu0 %v17525_v28 }
 0x332   : >> { %4186 = vst.msk [vmem:[#allocation3 + $0x18] sm:$0xff] %vm413_vm0, %v4174_v9  ;;  %16557 = vmatprep.subr.bf16.mxu0 %v17526_v37 }
 0x333   : >> { %4184 = vst.msk [vmem:[#allocation3 + $0x8] sm:$0xff] %vm413_vm0, %v4172_v63  ;;  %v16117_v42 = vpop.f32.mrb[184].mxu0  ;;  %v7845_v63 = vld [vmem:[#allocation2 + $0x1a9] sm:$0xff] }
 0x334   : >> { %v4165_v1 = vadd.f32 %v16117_v42, %v20535_v60  ;;  %v4109_v48 = vpop.f32.mrb[185].mxu0  ;;  %16520 = vmatmul.mubr.msk.bf16.gmra.mrb[200].mxu1 %vm838_vm4, %v7706_v38 }
 0x335   : >> { %v4163_v54 = vadd.f32 %v20535_v60, %v4109_v48  ;;  %v16118_v41 = vpop.f32.mrb[186].mxu0  ;;  %16558 = vmatpush3.bf16.msra.mxu0 %v17526_v37  ;;  %16527 = vmatprep.mubr.msk.bf16.mxu1 %vm838_vm4, %v22334_v26  ;;  %v7851_v48 = vpack.c.bf16 %v7845_v63, %v7844_v32 }
 0x336   : >> { %v4177_v25 = vmax.f32 %v4165_v1, 0.0  ;;  %v4166_v2 = vadd.f32 %v16118_v41, %v20535_v60  ;;  %v4112_v47 = vpop.f32.mrb[187].mxu0  ;;  %16559 = vmatprep.subr.bf16.mxu0 %v17527_v44 }
 0x337   : >> { %v4175_v23 = vmax.f32 %v4163_v54, 0.0  ;;  %v4164_v4 = vadd.f32 %v20535_v60, %v4112_v47 }
 0x338   : >> { %4189 = vst.msk [vmem:[#allocation3 + $0x30] sm:$0xff] %vm413_vm0, %v4177_v25  ;;  %v4178_v46 = vmax.f32 %v4166_v2, 0.0  ;;  %16404 = vmatmul.mubr.msk.bf16.gmra.mrb[196].mxu0 %vm838_vm4, %v20283_v50 }
 0x339   : >> { %v8169_v49 = vld [vmem:[#allocation3 + $0x10] ss:$2 sm:$0xff]  ;;  %v8217_v27 = vld [vmem:[#allocation3 + $0x11] ss:$2 sm:$0xff]  ;;  %4187 = vst.msk [vmem:[#allocation3 + $0x20] sm:$0xff] %vm413_vm0, %v4175_v23  ;;  %v4176_v58 = vmax.f32 %v4164_v4, 0.0  ;;  %16407 = vmatprep.mubr.msk.bf16.mxu0 %vm838_vm4, %v20299_v0  ;;  %16560 = vmatpush3.bf16.msra.mxu0 %v17527_v44 }
 0x33a   : >> { %v8263_v62 = vmax.f32 %v8169_v49, %v8217_v27  ;;  %v8167_v36 = vld [vmem:[#allocation3] ss:$2 sm:$0xff]  ;;  %v8215_v28 = vld [vmem:[#allocation3 + $0x1] ss:$2 sm:$0xff]  ;;  %4190 = vst.msk [vmem:[#allocation3 + $0x38] sm:$0xff] %vm413_vm0, %v4178_v46  ;;  %16561 = vmatprep.subr.bf16.mxu0 %v17528_v56 }
 0x33b   : >> { %v8262_v21 = vmax.f32 %v8167_v36, %v8215_v28  ;;  %4188 = vst.msk [vmem:[#allocation3 + $0x28] sm:$0xff] %vm413_vm0, %v4176_v58  ;;  %v16121_v50 = vpop.f32.mrb[188].mxu0  ;;  %v20586_v0 = vld [vmem:[%s22128_s6] sm:$0xff]   ;;  %v8365_v49 = vld [vmem:[#allocation5 + $0x19] sm:$0xff] }
 0x33c   : >> { %8287 = vst.msk [vmem:[#allocation4 + $0x8] sm:$0xff] %vm413_vm0, %v8263_v62  ;;  %v4169_v24 = vadd.f32 %v16121_v50, %v20535_v60  ;;  %v4125_v12 = vpop.f32.mrb[189].mxu0  ;;  %16528 = vmatmul.mubr.msk.bf16.vlgmr.msra.gmra.mrb[192].mxu1 %vm838_vm4, %v22335_v34  ;;  %v17531_v34 = vld [vmem:[%s22128_s6 + $0x10] sm:$0xff]  }
 0x33d   : >> { %8286 = vst.msk [vmem:[#allocation4] sm:$0xff] %vm413_vm0, %v8262_v21  ;;  %v4167_v16 = vadd.f32 %v20535_v60, %v4125_v12  ;;  %v16122_v40 = vpop.f32.mrb[190].mxu0  ;;  %16562 = vmatpush3.bf16.msra.mxu0 %v17528_v56  ;;  %16540 = vmatpush3.bf16.msra.mxu1 %v20526_v33 }
 0x33e   : >> { %v4181_v35 = vmax.f32 %v4169_v24, 0.0  ;;  %v4170_v3 = vadd.f32 %v16122_v40, %v20535_v60  ;;  %v4128_v61 = vpop.f32.mrb[191].mxu0  ;;  %16531 = vmatprep.mubr.msk.bf16.mxu1 %vm838_vm4, %v22336_v43  ;;  %16541 = vmatprep.subr.bf16.mxu1 %v17524_v15 }
 0x33f   : >> { %v4179_v5 = vmax.f32 %v4167_v16, 0.0  ;;  %v4168_v30 = vadd.f32 %v20535_v60, %v4128_v61  ;;  %16571 = vmatprep.subr.bf16.mxu0 %v20586_v0  ;;  %v8367_v61 = vld [vmem:[#allocation5 + $0x29] sm:$0xff] }
 0x340   : >> { %4193 = vst.msk [vmem:[#allocation3 + $0x50] sm:$0xff] %vm413_vm0, %v4181_v35  ;;  %v4182_v6 = vmax.f32 %v4170_v3, 0.0  ;;  %16408 = vmatmul.mubr.msk.bf16.gmra.mrb[200].mxu0 %vm838_vm4, %v20306_v55  ;;  %v7850_v55 = vpack.c.bf16 %v7843_v53, %v20452_v31 }
 0x341   : >> { %v8173_v7 = vld [vmem:[#allocation3 + $0x30] ss:$2 sm:$0xff]  ;;  %v8221_v52 = vld [vmem:[#allocation3 + $0x31] ss:$2 sm:$0xff]  ;;  %4191 = vst.msk [vmem:[#allocation3 + $0x40] sm:$0xff] %vm413_vm0, %v4179_v5  ;;  %v4180_v33 = vmax.f32 %v4168_v30, 0.0  ;;  %16563 = vmatprep.mubr.msk.bf16.mxu0 %vm413_vm0, %v8370_v39  ;;  %16542 = vmatpush3.bf16.msra.mxu1 %v17524_v15 }
 0x342   : >> { %v8265_v37 = vmax.f32 %v8173_v7, %v8221_v52  ;;  %v8171_v17 = vld [vmem:[#allocation3 + $0x20] ss:$2 sm:$0xff]  ;;  %v8219_v10 = vld [vmem:[#allocation3 + $0x21] ss:$2 sm:$0xff]  ;;  %4194 = vst.msk [vmem:[#allocation3 + $0x58] sm:$0xff] %vm413_vm0, %v4182_v6 }
 0x343   : >> { %v8264_v9 = vmax.f32 %v8171_v17, %v8219_v10  ;;  %4192 = vst.msk [vmem:[#allocation3 + $0x48] sm:$0xff] %vm413_vm0, %v4180_v33  ;;  %v7989_v17 = vld [vmem:[#allocation2 + $0x1a2] sm:$0xff]  ;;  %v7990_v10 = vld [vmem:[#allocation2 + $0x1aa] sm:$0xff] }
 0x344   : >> { %8289 = vst.msk [vmem:[#allocation4 + $0x18] sm:$0xff] %vm413_vm0, %v8265_v37  ;;  %16532 = vmatmul.mubr.msk.bf16.gmra.mrb[196].mxu1 %vm838_vm4, %v22337_v22  ;;  %v8310_v31 = vld [vmem:[#allocation4] sm:$0xff] }
 0x345   : >> { %8288 = vst.msk [vmem:[#allocation4 + $0x10] sm:$0xff] %vm413_vm0, %v8264_v9  ;;  %16535 = vmatprep.mubr.msk.bf16.mxu1 %vm838_vm4, %v7850_v55 }
 0x349   : >> { %v8177_v51 = vld [vmem:[#allocation3 + $0x50] ss:$2 sm:$0xff]  ;;  %v8225_v45 = vld [vmem:[#allocation3 + $0x51] ss:$2 sm:$0xff] }
 0x34a   : >> { %v8267_v44 = vmax.f32 %v8177_v51, %v8225_v45  ;;  %v8175_v42 = vld [vmem:[#allocation3 + $0x40] ss:$2 sm:$0xff]  ;;  %v8223_v38 = vld [vmem:[#allocation3 + $0x41] ss:$2 sm:$0xff] }
 0x34b   : >> { %v8266_v1 = vmax.f32 %v8175_v42, %v8223_v38  ;;  %v8314_v27 = vld [vmem:[#allocation4 + $0x18] sm:$0xff]  ;;  %v17533_v42 = vld [vmem:[%s22128_s6 + $0x40] sm:$0xff]  }
 0x34c   : >> { %8291 = vst.msk [vmem:[#allocation4 + $0x28] sm:$0xff] %vm413_vm0, %v8267_v44  ;;  %v8311_v54 = vld [vmem:[#allocation4 + $0xc] sm:$0xff]  ;;  %16536 = vmatmul.mubr.msk.bf16.gmra.mrb[200].mxu1 %vm838_vm4, %v7851_v48  ;;  %v7996_v44 = vpack.c.bf16 %v7990_v10, %v7989_v17 }
 0x34d   : >> { %8290 = vst.msk [vmem:[#allocation4 + $0x20] sm:$0xff] %vm413_vm0, %v8266_v1  ;;  %v8312_v59 = vmax.f32 %v8310_v31, %v8311_v54  ;;  %16543 = vmatprep.mubr.msk.bf16.mxu1 %vm838_vm4, %v20323_v13 }
 0x34f   : >> { %8313 = vst.msk [vmem:[#allocation5 + $0x11] sm:$0xff] %vm413_vm0, %v8312_v59  ;;  %v16257_v18 = vpop.f32.mrb[180].mxu1 }
 0x350   : >> { %v5485_v41 = vadd.f32 %v16257_v18, %v20535_v60  ;;  %v5417_v25 = vpop.f32.mrb[181].mxu1 }
 0x351   : >> { %v5483_v2 = vadd.f32 %v20535_v60, %v5417_v25  ;;  %v16258_v47 = vpop.f32.mrb[182].mxu1 }
 0x352   : >> { %v5497_v26 = vmax.f32 %v5485_v41, 0.0  ;;  %v5486_v56 = vadd.f32 %v16258_v47, %v20535_v60  ;;  %v5420_v23 = vpop.f32.mrb[183].mxu1 }
 0x353   : >> { %v5495_v4 = vmax.f32 %v5483_v2, 0.0  ;;  %v5484_v46 = vadd.f32 %v20535_v60, %v5420_v23 }
 0x354   : >> { %v8315_v58 = vld [vmem:[#allocation4 + $0x24] sm:$0xff]  ;;  %5509 = vst.msk [vmem:[#allocation3 + $0x70] sm:$0xff] %vm413_vm0, %v5497_v26  ;;  %v5498_v13 = vmax.f32 %v5486_v56, 0.0  ;;  %16544 = vmatmul.mubr.msk.bf16.vlgmr.msra.gmra.mrb[192].mxu1 %vm838_vm4, %v20327_v20 }
 0x355   : >> { %v8316_v14 = vmax.f32 %v8314_v27, %v8315_v58  ;;  %5507 = vst.msk [vmem:[#allocation3 + $0x60] sm:$0xff] %vm413_vm0, %v5495_v4  ;;  %v5496_v62 = vmax.f32 %v5484_v46, 0.0  ;;  %16547 = vmatprep.mubr.msk.bf16.mxu1 %vm838_vm4, %v20351_v29  ;;  %v7988_v29 = vld [vmem:[#allocation2 + $0x19a] sm:$0xff] }
 0x356   : >> { %v8364_v36 = vld [vmem:[#allocation5 + $0x11] sm:$0xff]  ;;  %5510 = vst.msk [vmem:[#allocation3 + $0x78] sm:$0xff] %vm413_vm0, %v5498_v13  ;;  %v7995_v3 = vpack.c.bf16 %v7988_v29, %v20500_v19  ;;  %v8342_v13 = vld [vmem:[#allocation5] sm:$0xff] }
 0x357   : >> { %v20632_v28 = vpack.c.bf16 %v8365_v49, %v8364_v36  ;;  %8317 = vst.msk [vmem:[#allocation5 + $0x21] sm:$0xff] %vm413_vm0, %v8316_v14  ;;  %5508 = vst.msk [vmem:[#allocation3 + $0x68] sm:$0xff] %vm413_vm0, %v5496_v62  ;;  %v16261_v20 = vpop.f32.mrb[184].mxu1  ;;  %v8343_v14 = vld [vmem:[#allocation5 + $0x8] sm:$0xff]  ;;  %v8369_v62 = vld [vmem:[#allocation5 + $0x39] sm:$0xff] }
 0x358   : >> { %v5489_v21 = vadd.f32 %v16261_v20, %v20535_v60  ;;  %v5433_v50 = vpop.f32.mrb[185].mxu1 }
 0x359   : >> { %16564 = vmatmul.mubr.msk.bf16.vlgmr.msra.gmra.mrb[204].mxu0 %vm413_vm0, %v20632_v28  ;;  %v5487_v15 = vadd.f32 %v20535_v60, %v5433_v50  ;;  %v16262_v24 = vpop.f32.mrb[186].mxu1  ;;  %v8350_v50 = vpack.c.bf16 %v8343_v14, %v8342_v13 }
 0x35a   : >> { %16572 = vmatpush3.bf16.msra.mxu0 %v20586_v0  ;;  %v5501_v12 = vmax.f32 %v5489_v21, 0.0  ;;  %v5490_v16 = vadd.f32 %v16262_v24, %v20535_v60  ;;  %v5436_v40 = vpop.f32.mrb[187].mxu1  ;;  %v22338_v0 = vpack.c.bf16 %v22324_v11, %v22320_v57  ;;  %v17532_v57 = vld [vmem:[%s22128_s6 + $0x18] sm:$0xff]   ;;  %v8345_v24 = vld [vmem:[#allocation5 + $0x18] sm:$0xff] }
 0x35b   : >> { %16573 = vmatprep.subr.bf16.mxu0 %v17530_v8  ;;  %v5499_v39 = vmax.f32 %v5487_v15, 0.0  ;;  %v5488_v35 = vadd.f32 %v20535_v60, %v5436_v40  ;;  %v8344_v15 = vld [vmem:[#allocation5 + $0x10] sm:$0xff] }
 0x35c   : >> { %5513 = vst.msk [vmem:[#allocation3 + $0x90] sm:$0xff] %vm413_vm0, %v5501_v12  ;;  %v5502_v43 = vmax.f32 %v5490_v16, 0.0  ;;  %16548 = vmatmul.mubr.msk.bf16.gmra.mrb[196].mxu1 %vm838_vm4, %v22338_v0  ;;  %v9547_v12 = vld [vmem:[#allocation5 + $0x49] sm:$0xff] }
 0x35d   : >> { %v8181_v5 = vld [vmem:[#allocation3 + $0x70] ss:$2 sm:$0xff]  ;;  %v8229_v30 = vld [vmem:[#allocation3 + $0x71] ss:$2 sm:$0xff]  ;;  %5511 = vst.msk [vmem:[#allocation3 + $0x80] sm:$0xff] %vm413_vm0, %v5499_v39  ;;  %v5500_v6 = vmax.f32 %v5488_v35, 0.0  ;;  %16551 = vmatprep.mubr.msk.bf16.mxu1 %vm838_vm4, %v7995_v3  ;;  %v8351_v39 = vpack.c.bf16 %v8345_v24, %v8344_v15 }
 0x35e   : >> { %v8366_v7 = vld [vmem:[#allocation5 + $0x21] sm:$0xff]  ;;  %16574 = vmatpush3.bf16.msra.mxu0 %v17530_v8  ;;  %v8269_v52 = vmax.f32 %v8181_v5, %v8229_v30  ;;  %5514 = vst.msk [vmem:[#allocation3 + $0x98] sm:$0xff] %vm413_vm0, %v5502_v43  ;;  %v17534_v3 = vld [vmem:[%s22128_s6 + $0x48] sm:$0xff]   ;;  %v17535_v43 = vld [vmem:[%s22128_s6 + $0x50] sm:$0xff]  }
 0x35f   : >> { %v8179_v19 = vld [vmem:[#allocation3 + $0x60] ss:$2 sm:$0xff]  ;;  %v8227_v33 = vld [vmem:[#allocation3 + $0x61] ss:$2 sm:$0xff]  ;;  %v20658_v53 = vpack.c.bf16 %v8367_v61, %v8366_v7  ;;  %16575 = vmatprep.subr.bf16.mxu0 %v17531_v34  ;;  %5512 = vst.msk [vmem:[#allocation3 + $0x88] sm:$0xff] %vm413_vm0, %v5500_v6  ;;  %v16265_v37 = vpop.f32.mrb[188].mxu1 }
 0x360   : >> { %v8268_v11 = vmax.f32 %v8179_v19, %v8227_v33  ;;  %8293 = vst.msk [vmem:[#allocation4 + $0x38] sm:$0xff] %vm413_vm0, %v8269_v52  ;;  %v5493_v9 = vadd.f32 %v16265_v37, %v20535_v60  ;;  %v5449_v55 = vpop.f32.mrb[189].mxu1  ;;  %v8346_v16 = vld [vmem:[#allocation5 + $0x20] sm:$0xff]  ;;  %v8347_v40 = vld [vmem:[#allocation5 + $0x28] sm:$0xff]  ;;  %v8587_v37 = vld [vmem:[#allocation5 + $0x12] sm:$0xff] }
 0x361   : >> { %16567 = vmatprep.mubr.msk.bf16.mxu0 %vm413_vm0, %v20658_v53  ;;  %v5491_v22 = vadd.f32 %v20535_v60, %v5449_v55  ;;  %v16266_v32 = vpop.f32.mrb[190].mxu1  ;;  %v20696_v61 = vpack.c.bf16 %v8347_v40, %v8346_v16  ;;  %v8585_v30 = vld [vmem:[#allocation5 + $0x2] sm:$0xff]  ;;  %v8586_v6 = vld [vmem:[#allocation5 + $0xa] sm:$0xff] }
 0x362   : >> { %8292 = vst.msk [vmem:[#allocation4 + $0x30] sm:$0xff] %vm413_vm0, %v8268_v11  ;;  %16576 = vmatpush3.bf16.msra.mxu0 %v17531_v34  ;;  %v5505_v63 = vmax.f32 %v5493_v9, 0.0  ;;  %v5494_v51 = vadd.f32 %v16266_v32, %v20535_v60  ;;  %v5452_v45 = vpop.f32.mrb[191].mxu1  ;;  %v17536_v52 = vld [vmem:[%s22128_s6 + $0x58] sm:$0xff]   ;;  %v8593_v19 = vpack.c.bf16 %v8586_v6, %v8585_v30  ;;  %v17537_v33 = vld [vmem:[%s22128_s6 + $0x60] sm:$0xff]   ;;  %v17538_v9 = vld [vmem:[%s22128_s6 + $0x68] sm:$0xff]  }
 0x363   : >> { %16577 = vmatprep.subr.bf16.mxu0 %v17532_v57  ;;  %v5503_v38 = vmax.f32 %v5491_v22, 0.0  ;;  %v5492_v1 = vadd.f32 %v20535_v60, %v5452_v45  ;;  %v8589_v10 = vld [vmem:[#allocation5 + $0x22] sm:$0xff]  ;;  %v17539_v22 = vld [vmem:[%s22128_s6 + $0x70] sm:$0xff]  }
 0x364   : >> { %5517 = vst.msk [vmem:[#allocation3 + $0xb0] sm:$0xff] %vm413_vm0, %v5505_v63  ;;  %v5506_v48 = vmax.f32 %v5494_v51, 0.0  ;;  %16552 = vmatmul.mubr.msk.bf16.gmra.mrb[200].mxu1 %vm838_vm4, %v7996_v44  ;;  %v17540_v45 = vld [vmem:[%s22128_s6 + $0x78] sm:$0xff]   ;;  %v17541_v44 = vld [vmem:[%s22128_s6 + $0x80] sm:$0xff]   ;;  %vm10821_vm4 = vcmask (%p437_p11), 1048064  }
 0x365   : >> { %v8185_v31 = vld [vmem:[#allocation3 + $0x90] ss:$2 sm:$0xff]  ;;  %v8233_v54 = vld [vmem:[#allocation3 + $0x91] ss:$2 sm:$0xff]  ;;  %5515 = vst.msk [vmem:[#allocation3 + $0xa0] sm:$0xff] %vm413_vm0, %v5503_v38  ;;  %v5504_v59 = vmax.f32 %v5492_v1, 0.0 }
 0x366   : >> { %16578 = vmatpush3.bf16.msra.mxu0 %v17532_v57  ;;  %v8271_v18 = vmax.f32 %v8185_v31, %v8233_v54  ;;  %v8183_v41 = vld [vmem:[#allocation3 + $0x80] ss:$2 sm:$0xff]  ;;  %v8231_v25 = vld [vmem:[#allocation3 + $0x81] ss:$2 sm:$0xff]  ;;  %5518 = vst.msk [vmem:[#allocation3 + $0xb8] sm:$0xff] %vm413_vm0, %v5506_v48  ;;  %v17542_v38 = vld [vmem:[%s22128_s6 + $0x88] sm:$0xff]  }
 0x367   : >> { %16587 = vmatprep.subr.bf16.mxu0 %v17533_v42  ;;  %v8270_v2 = vmax.f32 %v8183_v41, %v8231_v25  ;;  %5516 = vst.msk [vmem:[#allocation3 + $0xa8] sm:$0xff] %vm413_vm0, %v5504_v59  ;;  %v8588_v57 = vld [vmem:[#allocation5 + $0x1a] sm:$0xff]  ;;  %v17550_v1 = vld [vmem:[%s22128_s6 + $0x28] sm:$0xff]  }
 0x368   : >> { %8295 = vst.msk [vmem:[#allocation4 + $0x48] sm:$0xff] %vm413_vm0, %v8271_v18  ;;  %v20717_v17 = vpack.c.bf16 %v8588_v57, %v8587_v37  ;;  %v17543_v48 = vld [vmem:[%s22128_s6 + $0x90] sm:$0xff]   ;;  %v17544_v41 = vld [vmem:[%s22128_s6 + $0x98] sm:$0xff]  }
 0x369   : >> { %8294 = vst.msk [vmem:[#allocation4 + $0x40] sm:$0xff] %vm413_vm0, %v8270_v2  ;;  %v8318_v49 = vld [vmem:[#allocation4 + $0x30] sm:$0xff]  ;;  %v17552_v59 = vld [vmem:[%s22128_s6 + $0x30] sm:$0xff]   ;;  %v17554_v25 = vld [vmem:[%s22128_s6 + $0x38] sm:$0xff]  }
 0x36a   : >> { %v17545_v2 = vld [vmem:[%s22128_s6 + $0xa0] sm:$0xff]  }
 0x36d   : >> { %v8189_v47 = vld [vmem:[#allocation3 + $0xb0] ss:$2 sm:$0xff]  ;;  %v8237_v26 = vld [vmem:[#allocation3 + $0xb1] ss:$2 sm:$0xff] }
 0x36e   : >> { %v8273_v56 = vmax.f32 %v8189_v47, %v8237_v26  ;;  %v8187_v23 = vld [vmem:[#allocation3 + $0xa0] ss:$2 sm:$0xff]  ;;  %v8235_v4 = vld [vmem:[#allocation3 + $0xa1] ss:$2 sm:$0xff]  ;;  %v17546_v47 = vld [vmem:[%s22128_s6 + $0xa8] sm:$0xff]  }
 0x36f   : >> { %v8272_v46 = vmax.f32 %v8187_v23, %v8235_v4  ;;  %v8322_v36 = vld [vmem:[#allocation4 + $0x48] sm:$0xff]  ;;  %v17548_v26 = vld [vmem:[%s22128_s6 + $0xb8] sm:$0xff]   ;;  %v17553_v23 = vld [vmem:[%s22128_s6 + $0xc8] sm:$0xff]  }
 0x370   : >> { %8297 = vst.msk [vmem:[#allocation4 + $0x58] sm:$0xff] %vm413_vm0, %v8273_v56  ;;  %v8319_v27 = vld [vmem:[#allocation4 + $0x3c] sm:$0xff]  ;;  %v17551_v56 = vld [vmem:[%s22128_s6 + $0xc0] sm:$0xff]  }
 0x371   : >> { %8296 = vst.msk [vmem:[#allocation4 + $0x50] sm:$0xff] %vm413_vm0, %v8272_v46  ;;  %v8320_v58 = vmax.f32 %v8318_v49, %v8319_v27  ;;  %v17555_v4 = vld [vmem:[%s22128_s6 + $0xd0] sm:$0xff]   ;;  %v20809_v46 = vld [vmem:[%s22128_s6] sm:$0xff]   ;;  %v17556_v49 = vld [vmem:[%s22128_s6 + $0xd8] sm:$0xff]  }
 0x372   : >> { %v20818_v27 = vld [vmem:[%s22128_s6 + $0xe0] sm:$0xff]  }
 0x373   : >> { %8321 = vst.msk [vmem:[#allocation5 + $0x31] sm:$0xff] %vm413_vm0, %v8320_v58 }
 0x378   : >> { %v8323_v8 = vld [vmem:[#allocation4 + $0x54] sm:$0xff] }
 0x379   : >> { %v8324_v20 = vmax.f32 %v8322_v36, %v8323_v8 }
 0x37a   : >> { %v8368_v21 = vld [vmem:[#allocation5 + $0x31] sm:$0xff] }
 0x37b   : >> { %v20685_v29 = vpack.c.bf16 %v8369_v62, %v8368_v21  ;;  %8325 = vst.msk [vmem:[#allocation5 + $0x41] sm:$0xff] %vm413_vm0, %v8324_v20  ;;  %v8348_v0 = vld [vmem:[#allocation5 + $0x30] sm:$0xff]  ;;  %v8349_v5 = vld [vmem:[#allocation5 + $0x38] sm:$0xff] }
 0x37c   : >> { %v20706_v7 = vpack.c.bf16 %v8349_v5, %v8348_v0  ;;  %v8590_v11 = vld [vmem:[#allocation5 + $0x2a] sm:$0xff]  ;;  %v8591_v63 = vld [vmem:[#allocation5 + $0x32] sm:$0xff] }
 0x37d   : >> { %16568 = vmatmul.mubr.msk.bf16.gmra.mrb[208].mxu0 %vm413_vm0, %v20685_v29  ;;  %v20722_v55 = vpack.c.bf16 %v8590_v11, %v8589_v10 }
 0x37e   : >> { %16579 = vmatprep.mubr.msk.bf16.mxu0 %vm413_vm0, %v8350_v50 }
 0x382   : >> { %v9546_v34 = vld [vmem:[#allocation5 + $0x41] sm:$0xff] }
 0x383   : >> { %v20691_v35 = vpack.c.bf16 %v9547_v12, %v9546_v34  ;;  %v8592_v32 = vld [vmem:[#allocation5 + $0x3a] sm:$0xff]  ;;  %v8722_v54 = vld [vmem:[#allocation5 + $0x48] sm:$0xff] }
 0x384   : >> { %v20731_v51 = vpack.c.bf16 %v8592_v32, %v8591_v63  ;;  %v8721_v31 = vld [vmem:[#allocation5 + $0x40] sm:$0xff] }
 0x385   : >> { %16580 = vmatmul.mubr.msk.bf16.vlgmr.msra.gmra.mrb[204].mxu0 %vm413_vm0, %v8351_v39  ;;  %16707 = vmatprep.mubr.msk.bf16.mxu1 %vm413_vm0, %v20691_v35  ;;  %v20761_v18 = vpack.c.bf16 %v8722_v54, %v8721_v31 }
 0x386   : >> { %16583 = vmatprep.mubr.msk.bf16.mxu0 %vm413_vm0, %v20696_v61  ;;  %16588 = vmatpush3.bf16.msra.mxu0 %v17533_v42  ;;  %v17549_v42 = vld [vmem:[%s22128_s6 + $0x20] sm:$0xff]  }
 0x387   : >> { %16589 = vmatprep.subr.bf16.mxu0 %v17534_v3  ;;  %16699 = vmatprep.subr.bf16.mxu1 %v17549_v42 }
 0x388   : >> { %16700 = vmatpush3.bf16.msra.mxu1 %v17549_v42 }
 0x389   : >> { %16701 = vmatprep.subr.bf16.mxu1 %v17550_v1 }
 0x38a   : >> { %16590 = vmatpush3.bf16.msra.mxu0 %v17534_v3 }
 0x38b   : >> { %16591 = vmatprep.subr.bf16.mxu0 %v17535_v43 }
 0x38c   : >> { %16702 = vmatpush3.bf16.msra.mxu1 %v17550_v1 }
 0x38d   : >> { %16584 = vmatmul.mubr.msk.bf16.gmra.mrb[208].mxu0 %vm413_vm0, %v20706_v7  ;;  %16703 = vmatprep.subr.bf16.mxu1 %v17552_v59 }
 0x38e   : >> { %16592 = vmatpush3.bf16.msra.mxu0 %v17535_v43  ;;  %16595 = vmatprep.mubr.msk.bf16.mxu0 %vm413_vm0, %v8593_v19 }
 0x38f   : >> { %16593 = vmatprep.subr.bf16.mxu0 %v17536_v52 }
 0x390   : >> { %16704 = vmatpush3.bf16.msra.mxu1 %v17552_v59 }
 0x391   : >> { %16705 = vmatprep.subr.bf16.mxu1 %v17554_v25 }
 0x392   : >> { %16594 = vmatpush3.bf16.msra.mxu0 %v17536_v52 }
 0x393   : >> { %16603 = vmatprep.subr.bf16.mxu0 %v17537_v33 }
 0x394   : >> { %16706 = vmatpush3.bf16.msra.mxu1 %v17554_v25 }
 0x395   : >> { %16596 = vmatmul.mubr.msk.bf16.vlgmr.msra.gmra.mrb[204].mxu0 %vm413_vm0, %v20717_v17  ;;  %16715 = vmatprep.subr.bf16.mxu1 %v20809_v46 }
 0x396   : >> { %16599 = vmatprep.mubr.msk.bf16.mxu0 %vm413_vm0, %v20722_v55  ;;  %16604 = vmatpush3.bf16.msra.mxu0 %v17537_v33 }
 0x397   : >> { %16605 = vmatprep.subr.bf16.mxu0 %v17538_v9 }
 0x39a   : >> { %16606 = vmatpush3.bf16.msra.mxu0 %v17538_v9 }
 0x39b   : >> { %16607 = vmatprep.subr.bf16.mxu0 %v17539_v22 }
 0x39d   : >> { %16600 = vmatmul.mubr.msk.bf16.gmra.mrb[208].mxu0 %vm413_vm0, %v20731_v51 }
 0x39e   : >> { %16608 = vmatpush3.bf16.msra.mxu0 %v17539_v22  ;;  %16611 = vmatprep.mubr.msk.bf16.mxu0 %vm413_vm0, %v8351_v39 }
 0x39f   : >> { %16609 = vmatprep.subr.bf16.mxu0 %v17540_v45 }
 0x3a2   : >> { %16610 = vmatpush3.bf16.msra.mxu0 %v17540_v45 }
 0x3a3   : >> { %16619 = vmatprep.subr.bf16.mxu0 %v17541_v44 }
 0x3a5   : >> { %16612 = vmatmul.mubr.msk.bf16.vlgmr.msra.gmra.mrb[204].mxu0 %vm413_vm0, %v20696_v61 }
 0x3a6   : >> { %16615 = vmatprep.mubr.msk.bf16.mxu0 %vm413_vm0, %v20706_v7  ;;  %16620 = vmatpush3.bf16.msra.mxu0 %v17541_v44 }
 0x3a7   : >> { %16621 = vmatprep.subr.bf16.mxu0 %v17542_v38 }
 0x3aa   : >> { %16622 = vmatpush3.bf16.msra.mxu0 %v17542_v38 }
 0x3ab   : >> { %16623 = vmatprep.subr.bf16.mxu0 %v17543_v48 }
 0x3ad   : >> { %16616 = vmatmul.mubr.msk.bf16.gmra.mrb[208].mxu0 %vm413_vm0, %v20761_v18 }
 0x3ae   : >> { %16624 = vmatpush3.bf16.msra.mxu0 %v17543_v48  ;;  %16627 = vmatprep.mubr.msk.bf16.mxu0 %vm413_vm0, %v20632_v28  ;;  %v17547_v28 = vld [vmem:[%s22128_s6 + $0xb0] sm:$0xff]  }
 0x3af   : >> { %16625 = vmatprep.subr.bf16.mxu0 %v17544_v41 }
 0x3b2   : >> { %16626 = vmatpush3.bf16.msra.mxu0 %v17544_v41 }
 0x3b3   : >> { %16635 = vmatprep.subr.bf16.mxu0 %v17545_v2 }
 0x3b5   : >> { %16628 = vmatmul.mubr.msk.bf16.vlgmr.msra.gmra.mrb[204].mxu0 %vm413_vm0, %v20658_v53 }
 0x3b6   : >> { %16631 = vmatprep.mubr.msk.bf16.mxu0 %vm413_vm0, %v20685_v29  ;;  %16636 = vmatpush3.bf16.msra.mxu0 %v17545_v2 }
 0x3b7   : >> { %16637 = vmatprep.subr.bf16.mxu0 %v17546_v47 }
 0x3ba   : >> { %16638 = vmatpush3.bf16.msra.mxu0 %v17546_v47 }
 0x3bb   : >> { %16639 = vmatprep.subr.bf16.mxu0 %v17547_v28 }
 0x3bd   : >> { %16632 = vmatmul.mubr.msk.bf16.gmra.mrb[208].mxu0 %vm413_vm0, %v20691_v35 }
 0x3be   : >> { %16640 = vmatpush3.bf16.msra.mxu0 %v17547_v28  ;;  %16643 = vmatprep.mubr.msk.bf16.mxu0 %vm413_vm0, %v20717_v17 }
 0x3bf   : >> { %16641 = vmatprep.subr.bf16.mxu0 %v17548_v26 }
 0x3c2   : >> { %16642 = vmatpush3.bf16.msra.mxu0 %v17548_v26 }
 0x3c3   : >> { %16651 = vmatprep.subr.bf16.mxu0 %v17551_v56 }
 0x3c5   : >> { %16644 = vmatmul.mubr.msk.bf16.vlgmr.msra.gmra.mrb[204].mxu0 %vm413_vm0, %v20722_v55 }
 0x3c6   : >> { %16647 = vmatprep.mubr.msk.bf16.mxu0 %vm413_vm0, %v20731_v51  ;;  %16652 = vmatpush3.bf16.msra.mxu0 %v17551_v56 }
 0x3c7   : >> { %16653 = vmatprep.subr.bf16.mxu0 %v17553_v23 }
 0x3ca   : >> { %16654 = vmatpush3.bf16.msra.mxu0 %v17553_v23 }
 0x3cb   : >> { %16655 = vmatprep.subr.bf16.mxu0 %v17555_v4 }
 0x3ce   : >> { %16656 = vmatpush3.bf16.msra.mxu0 %v17555_v4 }
 0x3cf   : >> { %16657 = vmatprep.subr.bf16.mxu0 %v17556_v49 }
 0x3d2   : >> { %16658 = vmatpush3.bf16.msra.mxu0 %v17556_v49 }
 0x3d3   : >> { %16667 = vmatprep.subr.bf16.mxu0 %v20818_v27 }
 0x403   : >> { %v16401_v58 = vpop.f32.mrb[192].mxu0 }
 0x404   : >> { %v6809_v13 = vadd.f32 %v16401_v58, %v20535_v60  ;;  %v6741_v14 = vpop.f32.mrb[193].mxu0 }
 0x405   : >> { %v6807_v62 = vadd.f32 %v20535_v60, %v6741_v14  ;;  %v16402_v36 = vpop.f32.mrb[194].mxu0 }
 0x406   : >> { %v6821_v8 = vmax.f32 %v6809_v13, 0.0  ;;  %v6810_v20 = vadd.f32 %v16402_v36, %v20535_v60  ;;  %v6744_v21 = vpop.f32.mrb[195].mxu0 }
 0x407   : >> { %v6819_v50 = vmax.f32 %v6807_v62, 0.0  ;;  %v6808_v15 = vadd.f32 %v20535_v60, %v6744_v21  ;;  %v20854_v62 = vld [vmem:[%s22127_s5] ss:$0 sm:$0xff] }
 0x408   : >> { %6833 = vst.msk [vmem:[#allocation3 + $0xd0] sm:$0xff] %vm413_vm0, %v6821_v8  ;;  %v6822_v24 = vmax.f32 %v6810_v20, 0.0 }
 0x409   : >> { %6831 = vst.msk [vmem:[#allocation3 + $0xc0] sm:$0xff] %vm413_vm0, %v6819_v50  ;;  %v6820_v12 = vmax.f32 %v6808_v15, 0.0 }
 0x40a   : >> { %6834 = vst.msk [vmem:[#allocation3 + $0xd8] sm:$0xff] %vm413_vm0, %v6822_v24 }
 0x40b   : >> { %6832 = vst.msk [vmem:[#allocation3 + $0xc8] sm:$0xff] %vm413_vm0, %v6820_v12  ;;  %v16405_v16 = vpop.f32.mrb[196].mxu0 }
 0x40c   : >> { %v6813_v40 = vadd.f32 %v16405_v16, %v20535_v60  ;;  %v6757_v34 = vpop.f32.mrb[197].mxu0 }
 0x40d   : >> { %v6811_v39 = vadd.f32 %v20535_v60, %v6757_v34  ;;  %v16406_v3 = vpop.f32.mrb[198].mxu0  ;;  %v9549_v34 = vld [vmem:[#allocation5 + $0x59] sm:$0xff] }
 0x40e   : >> { %v6825_v43 = vmax.f32 %v6813_v40, 0.0  ;;  %v6814_v0 = vadd.f32 %v16406_v3, %v20535_v60  ;;  %v6760_v5 = vpop.f32.mrb[199].mxu0 }
 0x40f   : >> { %v6823_v30 = vmax.f32 %v6811_v39, 0.0  ;;  %v6812_v6 = vadd.f32 %v20535_v60, %v6760_v5 }
 0x410   : >> { %6837 = vst.msk [vmem:[#allocation3 + $0xf0] sm:$0xff] %vm413_vm0, %v6825_v43  ;;  %v6826_v52 = vmax.f32 %v6814_v0, 0.0 }
 0x411   : >> { %v8193_v19 = vld [vmem:[#allocation3 + $0xd0] ss:$2 sm:$0xff]  ;;  %v8241_v33 = vld [vmem:[#allocation3 + $0xd1] ss:$2 sm:$0xff]  ;;  %6835 = vst.msk [vmem:[#allocation3 + $0xe0] sm:$0xff] %vm413_vm0, %v6823_v30  ;;  %v6824_v57 = vmax.f32 %v6812_v6, 0.0 }
 0x412   : >> { %v8275_v11 = vmax.f32 %v8193_v19, %v8241_v33  ;;  %v8191_v37 = vld [vmem:[#allocation3 + $0xc0] ss:$2 sm:$0xff]  ;;  %v8239_v17 = vld [vmem:[#allocation3 + $0xc1] ss:$2 sm:$0xff]  ;;  %6838 = vst.msk [vmem:[#allocation3 + $0xf8] sm:$0xff] %vm413_vm0, %v6826_v52 }
 0x413   : >> { %v8274_v10 = vmax.f32 %v8191_v37, %v8239_v17  ;;  %6836 = vst.msk [vmem:[#allocation3 + $0xe8] sm:$0xff] %vm413_vm0, %v6824_v57  ;;  %v16409_v9 = vpop.f32.mrb[200].mxu0  ;;  %v8981_v30 = vld [vmem:[#allocation5 + $0x42] sm:$0xff]  ;;  %v17565_v57 = vld [vmem:[%s22128_s6 + $0x8] sm:$0xff]  }
 0x414   : >> { %8299 = vst.msk [vmem:[#allocation4 + $0x68] sm:$0xff] %vm413_vm0, %v8275_v11  ;;  %v6817_v22 = vadd.f32 %v16409_v9, %v20535_v60  ;;  %v6773_v32 = vpop.f32.mrb[201].mxu0 }
 0x415   : >> { %8298 = vst.msk [vmem:[#allocation4 + $0x60] sm:$0xff] %vm413_vm0, %v8274_v10  ;;  %v6815_v63 = vadd.f32 %v20535_v60, %v6773_v32  ;;  %v16410_v45 = vpop.f32.mrb[202].mxu0 }
 0x416   : >> { %v6829_v44 = vmax.f32 %v6817_v22, 0.0  ;;  %v6818_v42 = vadd.f32 %v16410_v45, %v20535_v60  ;;  %v6776_v38 = vpop.f32.mrb[203].mxu0  ;;  %v17567_v45 = vld [vmem:[%s22128_s6 + $0x10] sm:$0xff]  }
 0x417   : >> { %v6827_v1 = vmax.f32 %v6815_v63, 0.0  ;;  %v6816_v48 = vadd.f32 %v20535_v60, %v6776_v38  ;;  %v9551_v38 = vld [vmem:[#allocation5 + $0x69] sm:$0xff] }
 0x418   : >> { %6841 = vst.msk [vmem:[#allocation3 + $0x110] sm:$0xff] %vm413_vm0, %v6829_v44  ;;  %v6830_v31 = vmax.f32 %v6818_v42, 0.0 }
 0x419   : >> { %v8197_v54 = vld [vmem:[#allocation3 + $0xf0] ss:$2 sm:$0xff]  ;;  %v8245_v59 = vld [vmem:[#allocation3 + $0xf1] ss:$2 sm:$0xff]  ;;  %6839 = vst.msk [vmem:[#allocation3 + $0x100] sm:$0xff] %vm413_vm0, %v6827_v1  ;;  %v6828_v41 = vmax.f32 %v6816_v48, 0.0 }
 0x41a   : >> { %v8277_v25 = vmax.f32 %v8197_v54, %v8245_v59  ;;  %v8195_v2 = vld [vmem:[#allocation3 + $0xe0] ss:$2 sm:$0xff]  ;;  %v8243_v47 = vld [vmem:[#allocation3 + $0xe1] ss:$2 sm:$0xff]  ;;  %6842 = vst.msk [vmem:[#allocation3 + $0x118] sm:$0xff] %vm413_vm0, %v6830_v31 }
 0x41b   : >> { %v8276_v28 = vmax.f32 %v8195_v2, %v8243_v47  ;;  %6840 = vst.msk [vmem:[#allocation3 + $0x108] sm:$0xff] %vm413_vm0, %v6828_v41  ;;  %v17558_v2 = vld [vmem:[%s22128_s6 + $0xe8] sm:$0xff]  }
 0x41c   : >> { %8301 = vst.msk [vmem:[#allocation4 + $0x78] sm:$0xff] %vm413_vm0, %v8277_v25  ;;  %v8326_v58 = vld [vmem:[#allocation4 + $0x60] sm:$0xff] }
 0x41d   : >> { %8300 = vst.msk [vmem:[#allocation4 + $0x70] sm:$0xff] %vm413_vm0, %v8276_v28 }
 0x421   : >> { %v8201_v60 = vld [vmem:[#allocation3 + $0x110] ss:$2 sm:$0xff]  ;;  %v8249_v26 = vld [vmem:[#allocation3 + $0x111] ss:$2 sm:$0xff] }
 0x422   : >> { %v8279_v56 = vmax.f32 %v8201_v60, %v8249_v26  ;;  %v8199_v23 = vld [vmem:[#allocation3 + $0x100] ss:$2 sm:$0xff]  ;;  %v8247_v4 = vld [vmem:[#allocation3 + $0x101] ss:$2 sm:$0xff] }
 0x423   : >> { %v8278_v49 = vmax.f32 %v8199_v23, %v8247_v4  ;;  %v8330_v39 = vld [vmem:[#allocation4 + $0x78] sm:$0xff]  ;;  %v17568_v60 = vld [vmem:[%s22128_s6 + $0x18] sm:$0xff]  }
 0x424   : >> { %8303 = vst.msk [vmem:[#allocation4 + $0x88] sm:$0xff] %vm413_vm0, %v8279_v56  ;;  %v8327_v13 = vld [vmem:[#allocation4 + $0x6c] sm:$0xff] }
 0x425   : >> { %8302 = vst.msk [vmem:[#allocation4 + $0x80] sm:$0xff] %vm413_vm0, %v8278_v49  ;;  %v8328_v14 = vmax.f32 %v8326_v58, %v8327_v13 }
 0x427   : >> { %8329 = vst.msk [vmem:[#allocation5 + $0x51] sm:$0xff] %vm413_vm0, %v8328_v14  ;;  %v16545_v36 = vpop.f32.mrb[192].mxu1 }
 0x428   : >> { %v8133_v8 = vadd.f32 %v16545_v36, %v20854_v62  ;;  %v8065_v20 = vpop.f32.mrb[193].mxu1 }
 0x429   : >> { %v8131_v21 = vadd.f32 %v20854_v62, %v8065_v20  ;;  %v16546_v50 = vpop.f32.mrb[194].mxu1 }
 0x42a   : >> { %v8145_v15 = vmax.f32 %v8133_v8, 0.0  ;;  %v8134_v24 = vadd.f32 %v16546_v50, %v20854_v62  ;;  %v8068_v12 = vpop.f32.mrb[195].mxu1 }
 0x42b   : >> { %v8143_v16 = vmax.f32 %v8131_v21, 0.0  ;;  %v8132_v40 = vadd.f32 %v20854_v62, %v8068_v12 }
 0x42c   : >> { %v8331_v3 = vld [vmem:[#allocation4 + $0x84] sm:$0xff]  ;;  %8157 = vst.msk [vmem:[#allocation3 + $0x130] sm:$0xff] %vm413_vm0, %v8145_v15  ;;  %v8146_v43 = vmax.f32 %v8134_v24, 0.0 }
 0x42d   : >> { %v8332_v0 = vmax.f32 %v8330_v39, %v8331_v3  ;;  %8155 = vst.msk [vmem:[#allocation3 + $0x120] sm:$0xff] %vm413_vm0, %v8143_v16  ;;  %v8144_v5 = vmax.f32 %v8132_v40, 0.0  ;;  %v17561_v3 = vld [vmem:[%s22128_s6 + $0x100] sm:$0xff]  }
 0x42e   : >> { %v8982_v6 = vld [vmem:[#allocation5 + $0x4a] sm:$0xff]  ;;  %8158 = vst.msk [vmem:[#allocation3 + $0x138] sm:$0xff] %vm413_vm0, %v8146_v43  ;;  %v9112_v20 = vld [vmem:[#allocation5 + $0x58] sm:$0xff] }
 0x42f   : >> { %v9548_v52 = vld [vmem:[#allocation5 + $0x51] sm:$0xff]  ;;  %v20864_v19 = vpack.c.bf16 %v8982_v6, %v8981_v30  ;;  %8333 = vst.msk [vmem:[#allocation5 + $0x61] sm:$0xff] %vm413_vm0, %v8332_v0  ;;  %8156 = vst.msk [vmem:[#allocation3 + $0x128] sm:$0xff] %vm413_vm0, %v8144_v5  ;;  %v16549_v11 = vpop.f32.mrb[196].mxu1 }
 0x430   : >> { %v20866_v33 = vpack.c.bf16 %v9549_v34, %v9548_v52  ;;  %v8137_v37 = vadd.f32 %v16549_v11, %v20854_v62  ;;  %v8081_v17 = vpop.f32.mrb[197].mxu1  ;;  %v9111_v8 = vld [vmem:[#allocation5 + $0x50] sm:$0xff]  ;;  %v17560_v34 = vld [vmem:[%s22128_s6 + $0xf8] sm:$0xff]  }
 0x431   : >> { %16648 = vmatmul.mubr.msk.bf16.gmra.mrb[208].mxu0 %vm413_vm0, %v20864_v19  ;;  %v8135_v10 = vadd.f32 %v20854_v62, %v8081_v17  ;;  %v16550_v9 = vpop.f32.mrb[198].mxu1  ;;  %v20923_v40 = vpack.c.bf16 %v9112_v20, %v9111_v8  ;;  %v17562_v52 = vld [vmem:[%s22128_s6 + $0x108] sm:$0xff]   ;;  %v17564_v17 = vld [vmem:[%s22128_s6 + $0x110] sm:$0xff]  }
 0x432   : >> { %16708 = vmatmul.mubr.msk.bf16.vlgmr.msra.gmra.mrb[204].mxu1 %vm413_vm0, %v20866_v33  ;;  %16659 = vmatprep.mubr.msk.bf16.mxu0 %vm413_vm0, %v20696_v61  ;;  %v8149_v22 = vmax.f32 %v8137_v37, 0.0  ;;  %v8138_v32 = vadd.f32 %v16550_v9, %v20854_v62  ;;  %v8084_v63 = vpop.f32.mrb[199].mxu1  ;;  %v17582_v8 = vld [vmem:[%s22128_s6 + $0xa8] sm:$0xff]  }
 0x433   : >> { %16716 = vmatpush3.bf16.msra.mxu1 %v20809_v46  ;;  %v8147_v44 = vmax.f32 %v8135_v10, 0.0  ;;  %v8136_v42 = vadd.f32 %v20854_v62, %v8084_v63  ;;  %v9553_v10 = vld [vmem:[#allocation5 + $0x79] sm:$0xff] }
 0x434   : >> { %16717 = vmatprep.subr.bf16.mxu1 %v17565_v57  ;;  %8161 = vst.msk [vmem:[#allocation3 + $0x150] sm:$0xff] %vm413_vm0, %v8149_v22  ;;  %v8150_v1 = vmax.f32 %v8138_v32, 0.0 }
 0x435   : >> { %v8205_v48 = vld [vmem:[#allocation3 + $0x130] ss:$2 sm:$0xff]  ;;  %v8253_v61 = vld [vmem:[#allocation3 + $0x131] ss:$2 sm:$0xff]  ;;  %8159 = vst.msk [vmem:[#allocation3 + $0x140] sm:$0xff] %vm413_vm0, %v8147_v44  ;;  %v8148_v46 = vmax.f32 %v8136_v42, 0.0 }
 0x436   : >> { %v9550_v31 = vld [vmem:[#allocation5 + $0x61] sm:$0xff]  ;;  %v8281_v54 = vmax.f32 %v8205_v48, %v8253_v61  ;;  %8162 = vst.msk [vmem:[#allocation3 + $0x158] sm:$0xff] %vm413_vm0, %v8150_v1  ;;  %v17570_v42 = vld [vmem:[%s22128_s6 + $0x48] sm:$0xff]  }
 0x437   : >> { %16718 = vmatpush3.bf16.msra.mxu1 %v17565_v57  ;;  %v8203_v59 = vld [vmem:[#allocation3 + $0x120] ss:$2 sm:$0xff]  ;;  %v8251_v41 = vld [vmem:[#allocation3 + $0x121] ss:$2 sm:$0xff]  ;;  %v20890_v25 = vpack.c.bf16 %v9551_v38, %v9550_v31  ;;  %8160 = vst.msk [vmem:[#allocation3 + $0x148] sm:$0xff] %vm413_vm0, %v8148_v46  ;;  %v16553_v28 = vpop.f32.mrb[200].mxu1 }
 0x438   : >> { %16719 = vmatprep.subr.bf16.mxu1 %v17567_v45  ;;  %v8280_v47 = vmax.f32 %v8203_v59, %v8251_v41  ;;  %8305 = vst.msk [vmem:[#allocation4 + $0x98] sm:$0xff] %vm413_vm0, %v8281_v54  ;;  %v8141_v26 = vadd.f32 %v16553_v28, %v20854_v62  ;;  %v8097_v56 = vpop.f32.mrb[201].mxu1  ;;  %v9372_v44 = vld [vmem:[#allocation5 + $0x5a] sm:$0xff]  ;;  %v9371_v1 = vld [vmem:[#allocation5 + $0x52] sm:$0xff]  ;;  %v17573_v54 = vld [vmem:[%s22128_s6 + $0x60] sm:$0xff]  }
 0x439   : >> { %16660 = vmatmul.mubr.msk.bf16.vlgmr.msra.gmra.mrb[204].mxu0 %vm413_vm0, %v20706_v7  ;;  %16711 = vmatprep.mubr.msk.bf16.mxu1 %vm413_vm0, %v20890_v25  ;;  %v8139_v23 = vadd.f32 %v20854_v62, %v8097_v56  ;;  %v16554_v4 = vpop.f32.mrb[202].mxu1  ;;  %v17559_v7 = vld [vmem:[%s22128_s6 + $0xf0] sm:$0xff]   ;;  %v17572_v31 = vld [vmem:[%s22128_s6 + $0x58] sm:$0xff]  }
 0x43a   : >> { %8304 = vst.msk [vmem:[#allocation4 + $0x90] sm:$0xff] %vm413_vm0, %v8280_v47  ;;  %16663 = vmatprep.mubr.msk.bf16.mxu0 %vm413_vm0, %v20761_v18  ;;  %16668 = vmatpush3.bf16.msra.mxu0 %v20818_v27  ;;  %v8153_v49 = vmax.f32 %v8141_v26, 0.0  ;;  %v8142_v58 = vadd.f32 %v16554_v4, %v20854_v62  ;;  %v8100_v13 = vpop.f32.mrb[203].mxu1  ;;  %v20918_v27 = vld [vmem:[%s22128_s6 + $0x40] sm:$0xff]   ;;  %v17576_v56 = vld [vmem:[%s22128_s6 + $0x78] sm:$0xff]   ;;  %v17578_v4 = vld [vmem:[%s22128_s6 + $0x88] sm:$0xff]  }
 0x43b   : >> { %16669 = vmatprep.subr.bf16.mxu0 %v17558_v2  ;;  %16720 = vmatpush3.bf16.msra.mxu1 %v17567_v45  ;;  %v8151_v14 = vmax.f32 %v8139_v23, 0.0  ;;  %v8140_v36 = vadd.f32 %v20854_v62, %v8100_v13  ;;  %v9531_v45 = vld [vmem:[#allocation5 + $0x68] sm:$0xff] }
 0x43c   : >> { %16721 = vmatprep.subr.bf16.mxu1 %v17568_v60  ;;  %8165 = vst.msk [vmem:[#allocation3 + $0x170] sm:$0xff] %vm413_vm0, %v8153_v49  ;;  %v8154_v21 = vmax.f32 %v8142_v58, 0.0  ;;  %v9772_v41 = vld [vmem:[#allocation5 + $0x62] sm:$0xff]  ;;  %v17579_v49 = vld [vmem:[%s22128_s6 + $0x90] sm:$0xff]  }
 0x43d   : >> { %v8209_v50 = vld [vmem:[#allocation3 + $0x150] ss:$2 sm:$0xff]  ;;  %v8257_v15 = vld [vmem:[#allocation3 + $0x151] ss:$2 sm:$0xff]  ;;  %8163 = vst.msk [vmem:[#allocation3 + $0x160] sm:$0xff] %vm413_vm0, %v8151_v14  ;;  %v8152_v24 = vmax.f32 %v8140_v36, 0.0 }
 0x43e   : >> { %16670 = vmatpush3.bf16.msra.mxu0 %v17558_v2  ;;  %v8283_v12 = vmax.f32 %v8209_v50, %v8257_v15  ;;  %v8207_v16 = vld [vmem:[#allocation3 + $0x140] ss:$2 sm:$0xff]  ;;  %v8255_v62 = vld [vmem:[#allocation3 + $0x141] ss:$2 sm:$0xff]  ;;  %8166 = vst.msk [vmem:[#allocation3 + $0x178] sm:$0xff] %vm413_vm0, %v8154_v21  ;;  %v17574_v2 = vld [vmem:[%s22128_s6 + $0x68] sm:$0xff]  }
 0x43f   : >> { %16671 = vmatprep.subr.bf16.mxu0 %v17559_v7  ;;  %16722 = vmatpush3.bf16.msra.mxu1 %v17568_v60  ;;  %v8282_v39 = vmax.f32 %v8207_v16, %v8255_v62  ;;  %8164 = vst.msk [vmem:[#allocation3 + $0x168] sm:$0xff] %vm413_vm0, %v8152_v24  ;;  %v17577_v23 = vld [vmem:[%s22128_s6 + $0x80] sm:$0xff]   ;;  %v17580_v14 = vld [vmem:[%s22128_s6 + $0x98] sm:$0xff]   ;;  %v17586_v24 = vld [vmem:[%s22128_s6 + $0xc8] sm:$0xff]  }
 0x440   : >> { %16731 = vmatprep.subr.bf16.mxu1 %v20918_v27  ;;  %8307 = vst.msk [vmem:[#allocation4 + $0xa8] sm:$0xff] %vm413_vm0, %v8283_v12  ;;  %v17581_v36 = vld [vmem:[%s22128_s6 + $0xa0] sm:$0xff]   ;;  %v17584_v50 = vld [vmem:[%s22128_s6 + $0xb8] sm:$0xff]   ;;  %v17587_v12 = vld [vmem:[%s22128_s6 + $0xd0] sm:$0xff]  }
 0x441   : >> { %16664 = vmatmul.mubr.msk.bf16.gmra.mrb[208].mxu0 %vm413_vm0, %v20923_v40  ;;  %8306 = vst.msk [vmem:[#allocation4 + $0xa0] sm:$0xff] %vm413_vm0, %v8282_v39  ;;  %v17585_v15 = vld [vmem:[%s22128_s6 + $0xc0] sm:$0xff]  }
 0x442   : >> { %16672 = vmatpush3.bf16.msra.mxu0 %v17559_v7  ;;  %16675 = vmatprep.mubr.msk.bf16.mxu0 %vm413_vm0, %v20658_v53  ;;  %v8334_v53 = vld [vmem:[#allocation4 + $0x90] sm:$0xff]  ;;  %v17589_v39 = vld [vmem:[%s22128_s6 + $0xe0] sm:$0xff]  }
 0x443   : >> { %16673 = vmatprep.subr.bf16.mxu0 %v17560_v34  ;;  %v10162_v62 = vld [vmem:[#allocation5 + $0x8a] sm:$0xff] }
 0x445   : >> { %v8213_v43 = vld [vmem:[#allocation3 + $0x170] ss:$2 sm:$0xff]  ;;  %v8261_v0 = vld [vmem:[#allocation3 + $0x171] ss:$2 sm:$0xff] }
 0x446   : >> { %16674 = vmatpush3.bf16.msra.mxu0 %v17560_v34  ;;  %v8285_v5 = vmax.f32 %v8213_v43, %v8261_v0  ;;  %v8211_v30 = vld [vmem:[#allocation3 + $0x160] ss:$2 sm:$0xff]  ;;  %v8259_v6 = vld [vmem:[#allocation3 + $0x161] ss:$2 sm:$0xff]  ;;  %v10290_v43 = vld [vmem:[#allocation5 + $0x90] sm:$0xff] }
 0x447   : >> { %16683 = vmatprep.subr.bf16.mxu0 %v17561_v3  ;;  %v8284_v57 = vmax.f32 %v8211_v30, %v8259_v6  ;;  %v17588_v34 = vld [vmem:[%s22128_s6 + $0xd8] sm:$0xff]   ;;  %v10291_v0 = vld [vmem:[#allocation5 + $0x98] sm:$0xff] }
 0x448   : >> { %8309 = vst.msk [vmem:[#allocation4 + $0xb8] sm:$0xff] %vm413_vm0, %v8285_v5  ;;  %v8335_v11 = vld [vmem:[#allocation4 + $0x9c] sm:$0xff]  ;;  %v10295_v30 = vpack.c.bf16 %v10291_v0, %v10290_v43 }
 0x449   : >> { %16676 = vmatmul.mubr.msk.bf16.vlgmr.msra.gmra.mrb[204].mxu0 %vm413_vm0, %v20685_v29  ;;  %8308 = vst.msk [vmem:[#allocation4 + $0xb0] sm:$0xff] %vm413_vm0, %v8284_v57  ;;  %v8336_v37 = vmax.f32 %v8334_v53, %v8335_v11  ;;  %v17566_v29 = vld [vmem:[%s22128_s6 + $0x118] sm:$0xff]   ;;  %v17591_v5 = vld [vmem:[%s22128_s6 + $0xf0] sm:$0xff]   ;;  %v17594_v57 = vld [vmem:[%s22128_s6 + $0x108] sm:$0xff]  }
 0x44a   : >> { %16679 = vmatprep.mubr.msk.bf16.mxu0 %vm413_vm0, %v20691_v35  ;;  %16684 = vmatpush3.bf16.msra.mxu0 %v17561_v3  ;;  %v8338_v35 = vld [vmem:[#allocation4 + $0xa8] sm:$0xff]  ;;  %v17590_v3 = vld [vmem:[%s22128_s6 + $0xe8] sm:$0xff]   ;;  %v17592_v6 = vld [vmem:[%s22128_s6 + $0xf8] sm:$0xff]  }
 0x44b   : >> { %16685 = vmatprep.subr.bf16.mxu0 %v17562_v52  ;;  %8337 = vst.msk [vmem:[#allocation5 + $0x71] sm:$0xff] %vm413_vm0, %v8336_v37  ;;  %v10419_v53 = vld [vmem:[#allocation5 + $0x91] sm:$0xff]  ;;  %v10420_v11 = vld [vmem:[#allocation5 + $0x99] sm:$0xff] }
 0x44c   : >> { %v10424_v37 = vpack.c.bf16 %v10420_v11, %v10419_v53 }
 0x44e   : >> { %16686 = vmatpush3.bf16.msra.mxu0 %v17562_v52  ;;  %v17593_v52 = vld [vmem:[%s22128_s6 + $0x100] sm:$0xff]  }
 0x44f   : >> { %16687 = vmatprep.subr.bf16.mxu0 %v17564_v17 }
 0x450   : >> { %v8339_v9 = vld [vmem:[#allocation4 + $0xb4] sm:$0xff] }
 0x451   : >> { %16680 = vmatmul.mubr.msk.bf16.gmra.mrb[208].mxu0 %vm413_vm0, %v20866_v33  ;;  %v8340_v22 = vmax.f32 %v8338_v35, %v8339_v9  ;;  %v21120_v9 = vld [vmem:[%s22129_s7] ss:$0 sm:$0xff] }
 0x452   : >> { %16688 = vmatpush3.bf16.msra.mxu0 %v17564_v17  ;;  %16691 = vmatprep.mubr.msk.bf16.mxu0 %vm413_vm0, %v20722_v55  ;;  %v9552_v32 = vld [vmem:[#allocation5 + $0x71] sm:$0xff]  ;;  %v9530_v55 = vld [vmem:[#allocation5 + $0x60] sm:$0xff] }
 0x453   : >> { %16689 = vmatprep.subr.bf16.mxu0 %v17566_v29  ;;  %v20959_v63 = vpack.c.bf16 %v9553_v10, %v9552_v32  ;;  %8341 = vst.msk [vmem:[#allocation5 + $0x81] sm:$0xff] %vm413_vm0, %v8340_v22  ;;  %v20973_v38 = vpack.c.bf16 %v9531_v45, %v9530_v55  ;;  %v9532_v48 = vld [vmem:[#allocation5 + $0x70] sm:$0xff]  ;;  %v9533_v61 = vld [vmem:[#allocation5 + $0x78] sm:$0xff]  ;;  %v17596_v17 = vld [vmem:[%s22128_s6 + $0x118] sm:$0xff]  }
 0x454   : >> { %v20987_v46 = vpack.c.bf16 %v9533_v61, %v9532_v48  ;;  %v9773_v59 = vld [vmem:[#allocation5 + $0x6a] sm:$0xff]  ;;  %v9774_v60 = vld [vmem:[#allocation5 + $0x72] sm:$0xff]  ;;  %v10549_v10 = vld [vmem:[#allocation5 + $0x9a] sm:$0xff] }
 0x455   : >> { %16712 = vmatmul.mubr.msk.bf16.gmra.mrb[208].mxu1 %vm413_vm0, %v20959_v63  ;;  %v21002_v47 = vpack.c.bf16 %v9773_v59, %v9772_v41 }
 0x456   : >> { %16690 = vmatpush3.bf16.msra.mxu0 %v17566_v29  ;;  %16723 = vmatprep.mubr.msk.bf16.mxu1 %vm413_vm0, %v20761_v18  ;;  %v17571_v18 = vld [vmem:[%s22128_s6 + $0x50] sm:$0xff]  }
 0x457   : >> { %v10548_v29 = vld [vmem:[#allocation5 + $0x92] sm:$0xff] }
 0x458   : >> { %v10553_v35 = vpack.c.bf16 %v10549_v10, %v10548_v29 }
 0x459   : >> { %16692 = vmatmul.mubr.msk.bf16.vlgmr.msra.gmra.mrb[204].mxu0 %vm413_vm0, %v20731_v51  ;;  %v20980_v51 = vpack.c.bf16 %v9372_v44, %v9371_v1 }
 0x45a   : >> { %16695 = vmatprep.mubr.msk.bf16.mxu0 %vm413_vm0, %v20864_v19  ;;  %v9775_v28 = vld [vmem:[#allocation5 + $0x7a] sm:$0xff]  ;;  %v9904_v13 = vld [vmem:[#allocation5 + $0x88] sm:$0xff] }
 0x45b   : >> { %v21011_v26 = vpack.c.bf16 %v9775_v28, %v9774_v60  ;;  %v9903_v58 = vld [vmem:[#allocation5 + $0x80] sm:$0xff] }
 0x45c   : >> { %v9908_v7 = vpack.c.bf16 %v9904_v13, %v9903_v58  ;;  %v10032_v20 = vld [vmem:[#allocation5 + $0x81] sm:$0xff] }
 0x45d   : >> { %16724 = vmatmul.mubr.msk.bf16.vlgmr.msra.gmra.mrb[204].mxu1 %vm413_vm0, %v20923_v40  ;;  %v10161_v16 = vld [vmem:[#allocation5 + $0x82] sm:$0xff] }
 0x45e   : >> { %16732 = vmatpush3.bf16.msra.mxu1 %v20918_v27  ;;  %16727 = vmatprep.mubr.msk.bf16.mxu1 %vm413_vm0, %v20973_v38  ;;  %v10033_v27 = vld [vmem:[#allocation5 + $0x89] sm:$0xff] }
 0x45f   : >> { %16733 = vmatprep.subr.bf16.mxu1 %v17570_v42  ;;  %v10037_v21 = vpack.c.bf16 %v10033_v27, %v10032_v20 }
 0x461   : >> { %16696 = vmatmul.mubr.msk.bf16.gmra.mrb[208].mxu0 %vm413_vm0, %v20980_v51 }
 0x462   : >> { %16734 = vmatpush3.bf16.msra.mxu1 %v17570_v42 }
 0x463   : >> { %16735 = vmatprep.subr.bf16.mxu1 %v17571_v18 }
 0x465   : >> { %16728 = vmatmul.mubr.msk.bf16.gmra.mrb[208].mxu1 %vm413_vm0, %v20987_v46 }
 0x466   : >> { %16736 = vmatpush3.bf16.msra.mxu1 %v17571_v18  ;;  %16739 = vmatprep.mubr.msk.bf16.mxu1 %vm413_vm0, %v20864_v19  ;;  %v17575_v19 = vld [vmem:[%s22128_s6 + $0x70] sm:$0xff]  }
 0x467   : >> { %16737 = vmatprep.subr.bf16.mxu1 %v17572_v31 }
 0x46a   : >> { %16738 = vmatpush3.bf16.msra.mxu1 %v17572_v31 }
 0x46b   : >> { %16747 = vmatprep.subr.bf16.mxu1 %v17573_v54 }
 0x46d   : >> { %16740 = vmatmul.mubr.msk.bf16.vlgmr.msra.gmra.mrb[204].mxu1 %vm413_vm0, %v20980_v51 }
 0x46e   : >> { %16748 = vmatpush3.bf16.msra.mxu1 %v17573_v54  ;;  %16743 = vmatprep.mubr.msk.bf16.mxu1 %vm413_vm0, %v21002_v47 }
 0x46f   : >> { %16749 = vmatprep.subr.bf16.mxu1 %v17574_v2 }
 0x472   : >> { %16750 = vmatpush3.bf16.msra.mxu1 %v17574_v2 }
 0x473   : >> { %16751 = vmatprep.subr.bf16.mxu1 %v17575_v19 }
 0x475   : >> { %16744 = vmatmul.mubr.msk.bf16.gmra.mrb[208].mxu1 %vm413_vm0, %v21011_v26 }
 0x476   : >> { %16752 = vmatpush3.bf16.msra.mxu1 %v17575_v19  ;;  %16755 = vmatprep.mubr.msk.bf16.mxu1 %vm413_vm0, %v20923_v40  ;;  %v10166_v40 = vpack.c.bf16 %v10162_v62, %v10161_v16 }
 0x477   : >> { %16753 = vmatprep.subr.bf16.mxu1 %v17576_v56 }
 0x47a   : >> { %16754 = vmatpush3.bf16.msra.mxu1 %v17576_v56 }
 0x47b   : >> { %16763 = vmatprep.subr.bf16.mxu1 %v17577_v23 }
 0x47d   : >> { %16756 = vmatmul.mubr.msk.bf16.vlgmr.msra.gmra.mrb[204].mxu1 %vm413_vm0, %v20973_v38 }
 0x47e   : >> { %16764 = vmatpush3.bf16.msra.mxu1 %v17577_v23  ;;  %16759 = vmatprep.mubr.msk.bf16.mxu1 %vm413_vm0, %v20987_v46 }
 0x47f   : >> { %16765 = vmatprep.subr.bf16.mxu1 %v17578_v4 }
 0x482   : >> { %16766 = vmatpush3.bf16.msra.mxu1 %v17578_v4 }
 0x483   : >> { %16767 = vmatprep.subr.bf16.mxu1 %v17579_v49 }
 0x485   : >> { %16760 = vmatmul.mubr.msk.bf16.gmra.mrb[208].mxu1 %vm413_vm0, %v9908_v7 }
 0x486   : >> { %16768 = vmatpush3.bf16.msra.mxu1 %v17579_v49  ;;  %16771 = vmatprep.mubr.msk.bf16.mxu1 %vm413_vm0, %v20866_v33  ;;  %v17583_v33 = vld [vmem:[%s22128_s6 + $0xb0] sm:$0xff]  }
 0x487   : >> { %16769 = vmatprep.subr.bf16.mxu1 %v17580_v14 }
 0x48a   : >> { %16770 = vmatpush3.bf16.msra.mxu1 %v17580_v14 }
 0x48b   : >> { %16779 = vmatprep.subr.bf16.mxu1 %v17581_v36 }
 0x48d   : >> { %16772 = vmatmul.mubr.msk.bf16.vlgmr.msra.gmra.mrb[204].mxu1 %vm413_vm0, %v20890_v25 }
 0x48e   : >> { %16780 = vmatpush3.bf16.msra.mxu1 %v17581_v36  ;;  %16775 = vmatprep.mubr.msk.bf16.mxu1 %vm413_vm0, %v20959_v63 }
 0x48f   : >> { %16781 = vmatprep.subr.bf16.mxu1 %v17582_v8 }
 0x492   : >> { %16782 = vmatpush3.bf16.msra.mxu1 %v17582_v8 }
 0x493   : >> { %16783 = vmatprep.subr.bf16.mxu1 %v17583_v33 }
 0x495   : >> { %16776 = vmatmul.mubr.msk.bf16.gmra.mrb[208].mxu1 %vm413_vm0, %v10037_v21 }
 0x496   : >> { %16784 = vmatpush3.bf16.msra.mxu1 %v17583_v33  ;;  %16787 = vmatprep.mubr.msk.bf16.mxu1 %vm413_vm0, %v20980_v51 }
 0x497   : >> { %16785 = vmatprep.subr.bf16.mxu1 %v17584_v50 }
 0x49a   : >> { %16786 = vmatpush3.bf16.msra.mxu1 %v17584_v50 }
 0x49b   : >> { %16795 = vmatprep.subr.bf16.mxu1 %v17585_v15 }
 0x49d   : >> { %16788 = vmatmul.mubr.msk.bf16.vlgmr.msra.gmra.mrb[204].mxu1 %vm413_vm0, %v21002_v47 }
 0x49e   : >> { %16796 = vmatpush3.bf16.msra.mxu1 %v17585_v15  ;;  %16791 = vmatprep.mubr.msk.bf16.mxu1 %vm413_vm0, %v21011_v26 }
 0x49f   : >> { %16797 = vmatprep.subr.bf16.mxu1 %v17586_v24 }
 0x4a2   : >> { %16798 = vmatpush3.bf16.msra.mxu1 %v17586_v24 }
 0x4a3   : >> { %16799 = vmatprep.subr.bf16.mxu1 %v17587_v12 }
 0x4a5   : >> { %16792 = vmatmul.mubr.msk.bf16.gmra.mrb[208].mxu1 %vm413_vm0, %v10166_v40 }
 0x4a6   : >> { %16800 = vmatpush3.bf16.msra.mxu1 %v17587_v12  ;;  %16803 = vmatprep.mubr.msk.bf16.mxu1 %vm413_vm0, %v20973_v38 }
 0x4a7   : >> { %16801 = vmatprep.subr.bf16.mxu1 %v17588_v34 }
 0x4aa   : >> { %16802 = vmatpush3.bf16.msra.mxu1 %v17588_v34 }
 0x4ab   : >> { %16811 = vmatprep.subr.bf16.mxu1 %v17589_v39 }
 0x4ad   : >> { %16804 = vmatmul.mubr.msk.bf16.vlgmr.msra.gmra.mrb[204].mxu1 %vm413_vm0, %v20987_v46 }
 0x4ae   : >> { %16812 = vmatpush3.bf16.msra.mxu1 %v17589_v39  ;;  %16807 = vmatprep.mubr.msk.bf16.mxu1 %vm413_vm0, %v9908_v7 }
 0x4af   : >> { %16813 = vmatprep.subr.bf16.mxu1 %v17590_v3 }
 0x4b2   : >> { %16814 = vmatpush3.bf16.msra.mxu1 %v17590_v3 }
 0x4b3   : >> { %16815 = vmatprep.subr.bf16.mxu1 %v17591_v5 }
 0x4b5   : >> { %16808 = vmatmul.mubr.msk.bf16.gmra.mrb[208].mxu1 %vm413_vm0, %v10295_v30 }
 0x4b6   : >> { %16816 = vmatpush3.bf16.msra.mxu1 %v17591_v5  ;;  %16819 = vmatprep.mubr.msk.bf16.mxu1 %vm413_vm0, %v20890_v25  ;;  %v17595_v25 = vld [vmem:[%s22128_s6 + $0x110] sm:$0xff]  }
 0x4b7   : >> { %16817 = vmatprep.subr.bf16.mxu1 %v17592_v6 }
 0x4ba   : >> { %16818 = vmatpush3.bf16.msra.mxu1 %v17592_v6 }
 0x4bb   : >> { %16827 = vmatprep.subr.bf16.mxu1 %v17593_v52 }
 0x4bd   : >> { %16820 = vmatmul.mubr.msk.bf16.vlgmr.msra.gmra.mrb[204].mxu1 %vm413_vm0, %v20959_v63 }
 0x4be   : >> { %16828 = vmatpush3.bf16.msra.mxu1 %v17593_v52  ;;  %16823 = vmatprep.mubr.msk.bf16.mxu1 %vm413_vm0, %v10037_v21 }
 0x4bf   : >> { %16829 = vmatprep.subr.bf16.mxu1 %v17594_v57 }
 0x4c2   : >> { %16830 = vmatpush3.bf16.msra.mxu1 %v17594_v57 }
 0x4c3   : >> { %16831 = vmatprep.subr.bf16.mxu1 %v17595_v25 }
 0x4c5   : >> { %16824 = vmatmul.mubr.msk.bf16.gmra.mrb[208].mxu1 %vm413_vm0, %v10424_v37 }
 0x4c6   : >> { %16832 = vmatpush3.bf16.msra.mxu1 %v17595_v25  ;;  %16835 = vmatprep.mubr.msk.bf16.mxu1 %vm413_vm0, %v21002_v47 }
 0x4c7   : >> { %16833 = vmatprep.subr.bf16.mxu1 %v17596_v17 }
 0x4ca   : >> { %16834 = vmatpush3.bf16.msra.mxu1 %v17596_v17 }
 0x4cd   : >> { %16836 = vmatmul.mubr.msk.bf16.vlgmr.msra.gmra.mrb[204].mxu1 %vm413_vm0, %v21011_v26 }
 0x4ce   : >> { %16839 = vmatprep.mubr.msk.bf16.mxu1 %vm413_vm0, %v10166_v40 }
 0x4d5   : >> { %16840 = vmatmul.mubr.msk.bf16.gmra.mrb[208].mxu1 %vm413_vm0, %v10553_v35 }
 0x52c   : >> { %v16693_v22 = vpop.f32.mrb[204].mxu0 }
 0x52d   : >> { %v9504_v32 = vadd.f32 %v16693_v22, %v21120_v9  ;;  %v9456_v63 = vpop.f32.mrb[205].mxu0 }
 0x52e   : >> { %v9502_v55 = vadd.f32 %v21120_v9, %v9456_v63  ;;  %v16694_v45 = vpop.f32.mrb[206].mxu0 }
 0x52f   : >> { %v9512_v44 = vmax.f32 %v9504_v32, 0.0  ;;  %v9505_v42 = vadd.f32 %v16694_v45, %v21120_v9  ;;  %v9459_v38 = vpop.f32.mrb[207].mxu0 }
 0x530   : >> { %v9510_v1 = vmax.f32 %v9502_v55, 0.0  ;;  %v9503_v51 = vadd.f32 %v21120_v9, %v9459_v38 }
 0x531   : >> { %9520 = vst.msk [vmem:[#allocation6 + $0x10] sm:$0xff] %vm413_vm0, %v9512_v44  ;;  %v9513_v18 = vmax.f32 %v9505_v42, 0.0 }
 0x532   : >> { %9518 = vst.msk [vmem:[#allocation6] sm:$0xff] %vm413_vm0, %v9510_v1  ;;  %v9511_v48 = vmax.f32 %v9503_v51, 0.0 }
 0x533   : >> { %9521 = vst.msk [vmem:[#allocation6 + $0x18] sm:$0xff] %vm413_vm0, %v9513_v18 }
 0x534   : >> { %9519 = vst.msk [vmem:[#allocation6 + $0x8] sm:$0xff] %vm413_vm0, %v9511_v48  ;;  %v16697_v61 = vpop.f32.mrb[208].mxu0 }
 0x535   : >> { %v9508_v46 = vadd.f32 %v16697_v61, %v21120_v9  ;;  %v9472_v31 = vpop.f32.mrb[209].mxu0 }
 0x536   : >> { %v9506_v54 = vadd.f32 %v21120_v9, %v9472_v31  ;;  %v16698_v59 = vpop.f32.mrb[210].mxu0 }
 0x537   : >> { %v9516_v41 = vmax.f32 %v9508_v46, 0.0  ;;  %v9509_v2 = vadd.f32 %v16698_v59, %v21120_v9  ;;  %v9475_v47 = vpop.f32.mrb[211].mxu0 }
 0x538   : >> { %v9514_v19 = vmax.f32 %v9506_v54, 0.0  ;;  %v9507_v28 = vadd.f32 %v21120_v9, %v9475_v47 }
 0x539   : >> { %9524 = vst.msk [vmem:[#allocation6 + $0x30] sm:$0xff] %vm413_vm0, %v9516_v41  ;;  %v9517_v60 = vmax.f32 %v9509_v2, 0.0 }
 0x53a   : >> { %v10705_v26 = vld [vmem:[#allocation6 + $0x10] ss:$2 sm:$0xff]  ;;  %v10721_v56 = vld [vmem:[#allocation6 + $0x11] ss:$2 sm:$0xff]  ;;  %9522 = vst.msk [vmem:[#allocation6 + $0x20] sm:$0xff] %vm413_vm0, %v9514_v19  ;;  %v9515_v23 = vmax.f32 %v9507_v28, 0.0 }
 0x53b   : >> { %v10735_v4 = vmax.f32 %v10705_v26, %v10721_v56  ;;  %v10703_v49 = vld [vmem:[#allocation6] ss:$2 sm:$0xff]  ;;  %v10719_v58 = vld [vmem:[#allocation6 + $0x1] ss:$2 sm:$0xff]  ;;  %9525 = vst.msk [vmem:[#allocation6 + $0x38] sm:$0xff] %vm413_vm0, %v9517_v60 }
 0x53c   : >> { %v10734_v13 = vmax.f32 %v10703_v49, %v10719_v58  ;;  %9523 = vst.msk [vmem:[#allocation6 + $0x28] sm:$0xff] %vm413_vm0, %v9515_v23 }
 0x53d   : >> { %10744 = vst.msk [vmem:[%s21139_s17 + $0x8] sm:$0xff] %vm413_vm0, %v10735_v4 }
 0x53e   : >> { %10743 = vst.msk [vmem:[%s21139_s17] sm:$0xff] %vm413_vm0, %v10734_v13 }
 0x542   : >> { %v10709_v7 = vld [vmem:[#allocation6 + $0x30] ss:$2 sm:$0xff]  ;;  %v10725_v14 = vld [vmem:[#allocation6 + $0x31] ss:$2 sm:$0xff] }
 0x543   : >> { %v10737_v36 = vmax.f32 %v10709_v7, %v10725_v14  ;;  %v10707_v8 = vld [vmem:[#allocation6 + $0x20] ss:$2 sm:$0xff]  ;;  %v10723_v33 = vld [vmem:[#allocation6 + $0x21] ss:$2 sm:$0xff] }
 0x544   : >> { %v10736_v20 = vmax.f32 %v10707_v8, %v10723_v33 }
 0x545   : >> { %10746 = vst.msk [vmem:[%s21139_s17 + $0x18] sm:$0xff] %vm413_vm0, %v10737_v36 }
 0x546   : >> { %10745 = vst.msk [vmem:[%s21139_s17 + $0x10] sm:$0xff] %vm413_vm0, %v10736_v20 }
 0x5a0   : >> { %v16837_v27 = vpop.f32.mrb[204].mxu1 }
 0x5a1   : >> { %v10680_v21 = vadd.f32 %v16837_v27, %v21120_v9  ;;  %v10632_v50 = vpop.f32.mrb[205].mxu1 }
 0x5a2   : >> { %v10678_v15 = vadd.f32 %v21120_v9, %v10632_v50  ;;  %v16838_v24 = vpop.f32.mrb[206].mxu1 }
 0x5a3   : >> { %v10688_v12 = vmax.f32 %v10680_v21, 0.0  ;;  %v10681_v16 = vadd.f32 %v16838_v24, %v21120_v9  ;;  %v10635_v62 = vpop.f32.mrb[207].mxu1 }
 0x5a4   : >> { %v10686_v40 = vmax.f32 %v10678_v15, 0.0  ;;  %v10679_v34 = vadd.f32 %v21120_v9, %v10635_v62 }
 0x5a5   : >> { %10696 = vst.msk [vmem:[#allocation6 + $0x50] sm:$0xff] %vm413_vm0, %v10688_v12  ;;  %v10689_v39 = vmax.f32 %v10681_v16, 0.0 }
 0x5a6   : >> { %10694 = vst.msk [vmem:[#allocation6 + $0x40] sm:$0xff] %vm413_vm0, %v10686_v40  ;;  %v10687_v3 = vmax.f32 %v10679_v34, 0.0 }
 0x5a7   : >> { %10697 = vst.msk [vmem:[#allocation6 + $0x58] sm:$0xff] %vm413_vm0, %v10689_v39 }
 0x5a8   : >> { %10695 = vst.msk [vmem:[#allocation6 + $0x48] sm:$0xff] %vm413_vm0, %v10687_v3  ;;  %v16841_v43 = vpop.f32.mrb[208].mxu1 }
 0x5a9   : >> { %v10684_v0 = vadd.f32 %v16841_v43, %v21120_v9  ;;  %v10648_v5 = vpop.f32.mrb[209].mxu1 }
 0x5aa   : >> { %v10682_v30 = vadd.f32 %v21120_v9, %v10648_v5  ;;  %v16842_v6 = vpop.f32.mrb[210].mxu1 }
 0x5ab   : >> { %v10692_v52 = vmax.f32 %v10684_v0, 0.0  ;;  %v10685_v57 = vadd.f32 %v16842_v6, %v21120_v9  ;;  %v10651_v53 = vpop.f32.mrb[211].mxu1 }
 0x5ac   : >> { %v10690_v11 = vmax.f32 %v10682_v30, 0.0  ;;  %v10683_v25 = vadd.f32 %v21120_v9, %v10651_v53  ;;  %v17615_v53 = vld [vmem:[%s22130_s8 + $0x4] ss:$16 sps:$4 sm:$0xff] (%p437_p11)  }
 0x5ad   : >> { %10700 = vst.msk [vmem:[#allocation6 + $0x70] sm:$0xff] %vm413_vm0, %v10692_v52  ;;  %v10693_v37 = vmax.f32 %v10685_v57, 0.0  ;;  %12901 = vmatprep.subr.bf16.mxu0 (%p437_p11), %v17615_v53 }
 0x5ae   : >> { %v10713_v17 = vld [vmem:[#allocation6 + $0x50] ss:$2 sm:$0xff]  ;;  %v10729_v29 = vld [vmem:[#allocation6 + $0x51] ss:$2 sm:$0xff]  ;;  %10698 = vst.msk [vmem:[#allocation6 + $0x60] sm:$0xff] %vm413_vm0, %v10690_v11  ;;  %v10691_v10 = vmax.f32 %v10683_v25, 0.0 }
 0x5af   : >> { %v10739_v35 = vmax.f32 %v10713_v17, %v10729_v29  ;;  %v10711_v22 = vld [vmem:[#allocation6 + $0x40] ss:$2 sm:$0xff]  ;;  %v10727_v32 = vld [vmem:[#allocation6 + $0x41] ss:$2 sm:$0xff]  ;;  %10701 = vst.msk [vmem:[#allocation6 + $0x78] sm:$0xff] %vm413_vm0, %v10693_v37 }
 0x5b0   : >> { %v10738_v63 = vmax.f32 %v10711_v22, %v10727_v32  ;;  %10699 = vst.msk [vmem:[#allocation6 + $0x68] sm:$0xff] %vm413_vm0, %v10691_v10  ;;  %v17617_v11 = vld [vmem:[%s22130_s8 + $0xc] ss:$16 sps:$4 sm:$0xff] (%p437_p11)  }
 0x5b1   : >> { %10748 = vst.msk [vmem:[%s21139_s17 + $0x28] sm:$0xff] %vm413_vm0, %v10739_v35  ;;  %13065 = vmatprep.subr.bf16.mxu1 (%p437_p11), %v17617_v11 }
 0x5b2   : >> { %10747 = vst.msk [vmem:[%s21139_s17 + $0x20] sm:$0xff] %vm413_vm0, %v10738_v63 }
 0x5b4   : > { %439 = sbr.rel (!%p437_p11) target bundleno = 37 (0x25), region = 240 }
 0x5b6   : >> { %v10717_v9 = vld [vmem:[#allocation6 + $0x70] ss:$2 sm:$0xff]  ;;  %v10733_v55 = vld [vmem:[#allocation6 + $0x71] ss:$2 sm:$0xff] }
 0x5b7   : >> { %v10741_v45 = vmax.f32 %v10717_v9, %v10733_v55  ;;  %v10715_v44 = vld [vmem:[#allocation6 + $0x60] ss:$2 sm:$0xff]  ;;  %v10731_v42 = vld [vmem:[#allocation6 + $0x61] ss:$2 sm:$0xff] }
 0x5b8   : >> { %v10740_v38 = vmax.f32 %v10715_v44, %v10731_v42 }
 0x5b9   : >> { %10750 = vst.msk [vmem:[%s21139_s17 + $0x38] sm:$0xff] %vm413_vm0, %v10741_v45 }
 0x5ba   : >> { %10749 = vst.msk [vmem:[%s21139_s17 + $0x30] sm:$0xff] %vm413_vm0, %v10740_v38  ;;  %s22342_s17 = sand.u32 (%p437_p11), 1, %s18089_s22  }
 0x5c1   : > { %v10858_v1 = vld [vmem:[#allocation7 + $0x3] ss:$64 sm:$0x1]  ;;  %v10874_v54 = vld [vmem:[#allocation7 + $0xb] ss:$64 sm:$0x1] }
 0x5c2   : > { %v10859_v51 = vld [vmem:[#allocation7 + $0x3] ss:$64 sm:$0x2]  ;;  %v10875_v59 = vld [vmem:[#allocation7 + $0xb] ss:$64 sm:$0x2] }
 0x5c3   : > { %v10861_v18 = vld [vmem:[#allocation7 + $0x3] ss:$64 sm:$0x4]  ;;  %v10860_v48 = vor.u32 %v10859_v51, %v10858_v1  ;;  %v10877_v41 = vld [vmem:[#allocation7 + $0xb] ss:$64 sm:$0x4]  ;;  %v10876_v19 = vor.u32 %v10875_v59, %v10874_v54 }
 0x5c4   : > { %v10863_v61 = vld [vmem:[#allocation7 + $0x3] ss:$64 sm:$0x8]  ;;  %v10879_v60 = vld [vmem:[#allocation7 + $0xb] ss:$64 sm:$0x8] }
 0x5c5   : > { %v10862_v46 = vor.u32 %v10861_v18, %v10860_v48  ;;  %v10865_v31 = vld [vmem:[#allocation7 + $0x3] ss:$64 sm:$0x10]  ;;  %v10878_v56 = vor.u32 %v10877_v41, %v10876_v19  ;;  %v10881_v23 = vld [vmem:[#allocation7 + $0xb] ss:$64 sm:$0x10] }
 0x5c6   : > { %v10867_v47 = vld [vmem:[#allocation7 + $0x3] ss:$64 sm:$0x20]  ;;  %v10785_v4 = vld [vmem:[#allocation7 + $0x1] ss:$64 sm:$0x1] }
 0x5c7   : > { %v10864_v2 = vor.u32 %v10863_v61, %v10862_v46  ;;  %v10869_v28 = vld [vmem:[#allocation7 + $0x3] ss:$64 sm:$0x40]  ;;  %v10786_v49 = vld [vmem:[#allocation7 + $0x1] ss:$64 sm:$0x2]  ;;  %v10880_v7 = vor.u32 %v10879_v60, %v10878_v56 }
 0x5c8   : > { %v10788_v58 = vld [vmem:[#allocation7 + $0x1] ss:$64 sm:$0x4]  ;;  %v10883_v14 = vld [vmem:[#allocation7 + $0xb] ss:$64 sm:$0x20]  ;;  %v10787_v36 = vor.u32 %v10786_v49, %v10785_v4 }
 0x5c9   : > { %v10866_v26 = vor.u32 %v10865_v31, %v10864_v2  ;;  %v10871_v8 = vld [vmem:[#allocation7 + $0x3] ss:$64 sm:$0x80]  ;;  %v10885_v33 = vld [vmem:[#allocation7 + $0xb] ss:$64 sm:$0x40]  ;;  %v10882_v21 = vor.u32 %v10881_v23, %v10880_v7 }
 0x5ca   : > { %v10790_v20 = vld [vmem:[#allocation7 + $0x1] ss:$64 sm:$0x8]  ;;  %v10789_v50 = vor.u32 %v10788_v58, %v10787_v36  ;;  %v10801_v24 = vld [vmem:[#allocation7 + $0x9] ss:$64 sm:$0x1] }
 0x5cb   : > { %v10868_v13 = vor.u32 %v10867_v47, %v10866_v26  ;;  %v10792_v15 = vld [vmem:[#allocation7 + $0x1] ss:$64 sm:$0x10]  ;;  %v10802_v12 = vld [vmem:[#allocation7 + $0x9] ss:$64 sm:$0x2]  ;;  %v10884_v62 = vor.u32 %v10883_v14, %v10882_v21 }
 0x5cc   : > { %v10804_v16 = vld [vmem:[#allocation7 + $0x9] ss:$64 sm:$0x4]  ;;  %v10887_v40 = vld [vmem:[#allocation7 + $0xb] ss:$64 sm:$0x80]  ;;  %v10791_v34 = vor.u32 %v10790_v20, %v10789_v50  ;;  %v10803_v3 = vor.u32 %v10802_v12, %v10801_v24 }
 0x5cd   : > { %v10870_v27 = vor.u32 %v10869_v28, %v10868_v13  ;;  %v10794_v39 = vld [vmem:[#allocation7 + $0x1] ss:$64 sm:$0x20]  ;;  %v10806_v0 = vld [vmem:[#allocation7 + $0x9] ss:$64 sm:$0x8]  ;;  %v10886_v30 = vor.u32 %v10885_v33, %v10884_v62 }
 0x5ce   : > { %v10796_v43 = vld [vmem:[#allocation7 + $0x1] ss:$64 sm:$0x40]  ;;  %v10793_v6 = vor.u32 %v10792_v15, %v10791_v34  ;;  %v10805_v52 = vor.u32 %v10804_v16, %v10803_v3  ;;  %v10808_v57 = vld [vmem:[#allocation7 + $0x9] ss:$64 sm:$0x10] }
 0x5cf   : > { %v10872_v5 = vor.u32 %v10871_v8, %v10870_v27  ;;  %v11002_v25 = vld [vmem:[#allocation7 + $0x13] ss:$64 sm:$0x1]  ;;  %v10888_v37 = vor.u32 %v10887_v40, %v10886_v30  ;;  %v10798_v22 = vld [vmem:[#allocation7 + $0x1] ss:$64 sm:$0x80] }
 0x5d0   : > { %v10795_v17 = vor.u32 %v10794_v39, %v10793_v6  ;;  %v10807_v29 = vor.u32 %v10806_v0, %v10805_v52  ;;  %v11003_v10 = vld [vmem:[#allocation7 + $0x13] ss:$64 sm:$0x2]  ;;  %v10810_v32 = vld [vmem:[#allocation7 + $0x9] ss:$64 sm:$0x20] }
 0x5d1   : > { %v11005_v35 = vld [vmem:[#allocation7 + $0x13] ss:$64 sm:$0x4]  ;;  %v11004_v63 = vor.u32 %v11003_v10, %v11002_v25  ;;  %v10889_v9 = vmax.f32 %v10872_v5, %v10888_v37  ;;  %v10812_v44 = vld [vmem:[#allocation7 + $0x9] ss:$64 sm:$0x40] }
 0x5d2   : > { %v10797_v55 = vor.u32 %v10796_v43, %v10795_v17  ;;  %v10809_v45 = vor.u32 %v10808_v57, %v10807_v29  ;;  %v11007_v42 = vld [vmem:[#allocation7 + $0x13] ss:$64 sm:$0x8]  ;;  %v11018_v51 = vld [vmem:[#allocation7 + $0x1b] ss:$64 sm:$0x1] }
 0x5d3   : > { %v11006_v38 = vor.u32 %v11005_v35, %v11004_v63  ;;  %v11009_v1 = vld [vmem:[#allocation7 + $0x13] ss:$64 sm:$0x10]  ;;  %10891 = vrot.lane.b32.xlu0 %v10889_v9, %s22191_s0  ;;  %v11019_v48 = vld [vmem:[#allocation7 + $0x1b] ss:$64 sm:$0x2] }
 0x5d4   : > { %v10811_v18 = vor.u32 %v10810_v32, %v10809_v45  ;;  %v11021_v61 = vld [vmem:[#allocation7 + $0x1b] ss:$64 sm:$0x4]  ;;  %v10814_v46 = vld [vmem:[#allocation7 + $0x9] ss:$64 sm:$0x80]  ;;  %v11020_v59 = vor.u32 %v11019_v48, %v11018_v51  ;;  %v10799_v41 = vor.u32 %v10798_v22, %v10797_v55 }
 0x5d5   : > { %v11008_v31 = vor.u32 %v11007_v42, %v11006_v38  ;;  %v11011_v54 = vld [vmem:[#allocation7 + $0x13] ss:$64 sm:$0x20]  ;;  %v11023_v19 = vld [vmem:[#allocation7 + $0x1b] ss:$64 sm:$0x8] }
 0x5d6   : > { %v10813_v2 = vor.u32 %v10812_v44, %v10811_v18  ;;  %v11013_v47 = vld [vmem:[#allocation7 + $0x13] ss:$64 sm:$0x40]  ;;  %v11022_v60 = vor.u32 %v11021_v61, %v11020_v59  ;;  %v11025_v26 = vld [vmem:[#allocation7 + $0x1b] ss:$64 sm:$0x10] }
 0x5d7   : > { %v11010_v28 = vor.u32 %v11009_v1, %v11008_v31  ;;  %v17619_v56 = vld [vmem:[%s22130_s8] ss:$16 sps:$4 sm:$0xff]   ;;  %v11027_v4 = vld [vmem:[#allocation7 + $0x1b] ss:$64 sm:$0x20] }
 0x5d8   : > { %v10815_v23 = vor.u32 %v10814_v46, %v10813_v2  ;;  %v17620_v49 = vld [vmem:[%s22130_s8 + $0x8] ss:$16 sps:$4 sm:$0xff]   ;;  %v17621_v58 = vld [vmem:[%s22130_s8 + $0x24] ss:$16 sps:$4 sm:$0xff]   ;;  %v11024_v7 = vor.u32 %v11023_v19, %v11022_v60  ;;  %12902 = vmatpush1.bf16.msra.mxu0 %v17619_v56  ;;  %v17623_v14 = vld [vmem:[%s22130_s8 + $0x2c] ss:$16 sps:$4 sm:$0xff]  }
 0x5d9   : > { %v11012_v13 = vor.u32 %v11011_v54, %v11010_v28  ;;  %13066 = vmatpush1.bf16.msra.mxu1 %v17620_v49  ;;  %12903 = vmatprep.subr.bf16.mxu0 %v17621_v58  ;;  %v10930_v8 = vld [vmem:[#allocation7 + $0x11] ss:$64 sm:$0x1]  ;;  %v11015_v27 = vld [vmem:[#allocation7 + $0x13] ss:$64 sm:$0x80] }
 0x5da   : > { %v10816_v36 = vmax.f32 %v10799_v41, %v10815_v23  ;;  %v10931_v33 = vld [vmem:[#allocation7 + $0x11] ss:$64 sm:$0x2]  ;;  %v11026_v21 = vor.u32 %v11025_v26, %v11024_v7  ;;  %13067 = vmatprep.subr.bf16.mxu1 %v17623_v14  ;;  %v11029_v24 = vld [vmem:[#allocation7 + $0x1b] ss:$64 sm:$0x40] }
 0x5db   : > { %v11014_v20 = vor.u32 %v11013_v47, %v11012_v13  ;;  %v10932_v50 = vor.u32 %v10931_v33, %v10930_v8  ;;  %v10933_v15 = vld [vmem:[#allocation7 + $0x11] ss:$64 sm:$0x4]  ;;  %v11031_v62 = vld [vmem:[#allocation7 + $0x1b] ss:$64 sm:$0x80] }
 0x5dc   : > { %10818 = vrot.lane.b32.xlu0 %v10816_v36, %s22191_s0  ;;  %v10935_v12 = vld [vmem:[#allocation7 + $0x11] ss:$64 sm:$0x8]  ;;  %v11028_v16 = vor.u32 %v11027_v4, %v11026_v21  ;;  %v10946_v39 = vld [vmem:[#allocation7 + $0x19] ss:$64 sm:$0x1] }
 0x5dd   : > { %v10934_v40 = vor.u32 %v10933_v15, %v10932_v50  ;;  %v10937_v34 = vld [vmem:[#allocation7 + $0x11] ss:$64 sm:$0x10]  ;;  %v10947_v3 = vld [vmem:[#allocation7 + $0x19] ss:$64 sm:$0x2]  ;;  %v11016_v43 = vor.u32 %v11015_v27, %v11014_v20 }
 0x5de   : > { %v11030_v0 = vor.u32 %v11029_v24, %v11028_v16  ;;  %v10948_v30 = vor.u32 %v10947_v3, %v10946_v39  ;;  %v10949_v6 = vld [vmem:[#allocation7 + $0x19] ss:$64 sm:$0x4]  ;;  %v10939_v52 = vld [vmem:[#allocation7 + $0x11] ss:$64 sm:$0x20] }
 0x5df   : > { %v10936_v5 = vor.u32 %v10935_v12, %v10934_v40  ;;  %v10951_v57 = vld [vmem:[#allocation7 + $0x19] ss:$64 sm:$0x8]  ;;  %v10941_v25 = vld [vmem:[#allocation7 + $0x11] ss:$64 sm:$0x40] }
 0x5e0   : > { %v11032_v53 = vor.u32 %v11031_v62, %v11030_v0  ;;  %v10950_v37 = vor.u32 %v10949_v6, %v10948_v30  ;;  %v10953_v17 = vld [vmem:[#allocation7 + $0x19] ss:$64 sm:$0x10]  ;;  %v17625_v10 = vld [vmem:[%s22130_s8 + $0x20] ss:$16 sps:$4 sm:$0xff]  }
 0x5e1   : > { %v10938_v11 = vor.u32 %v10937_v34, %v10936_v5  ;;  %v10955_v29 = vld [vmem:[#allocation7 + $0x19] ss:$64 sm:$0x20]  ;;  %v17627_v9 = vld [vmem:[%s22130_s8 + $0x44] ss:$16 sps:$4 sm:$0xff]   ;;  %12904 = vmatpush1.bf16.msra.mxu0 %v17625_v10 }
 0x5e2   : > { %v17626_v35 = vld [vmem:[%s22130_s8 + $0x28] ss:$16 sps:$4 sm:$0xff]   ;;  %v11033_v22 = vmax.f32 %v11016_v43, %v11032_v53  ;;  %v10952_v63 = vor.u32 %v10951_v57, %v10950_v37  ;;  %v10943_v55 = vld [vmem:[#allocation7 + $0x11] ss:$64 sm:$0x80]  ;;  %12905 = vmatprep.subr.bf16.mxu0 %v17627_v9 }
 0x5e3   : > { %v10940_v32 = vor.u32 %v10939_v52, %v10938_v11  ;;  %v10957_v45 = vld [vmem:[#allocation7 + $0x19] ss:$64 sm:$0x40]  ;;  %13068 = vmatpush1.bf16.msra.mxu1 %v17626_v35  ;;  %v17629_v44 = vld [vmem:[%s22130_s8 + $0x4c] ss:$16 sps:$4 sm:$0xff]  }
 0x5e4   : > { %v17631_v42 = vld [vmem:[%s22130_s8 + $0x40] ss:$16 sps:$4 sm:$0xff]   ;;  %11035 = vrot.lane.b32.xlu1 %v11033_v22, %s22191_s0  ;;  %v10954_v1 = vor.u32 %v10953_v17, %v10952_v63  ;;  %v17632_v51 = vld [vmem:[%s22130_s8 + $0x48] ss:$16 sps:$4 sm:$0xff]   ;;  %13069 = vmatprep.subr.bf16.mxu1 %v17629_v44  ;;  %v17633_v48 = vld [vmem:[%s22130_s8 + $0x64] ss:$16 sps:$4 sm:$0xff]  }
 0x5e5   : > { %v10942_v38 = vor.u32 %v10941_v25, %v10940_v32  ;;  %v10959_v18 = vld [vmem:[#allocation7 + $0x19] ss:$64 sm:$0x80]  ;;  %v17635_v46 = vld [vmem:[%s22130_s8 + $0x6c] ss:$16 sps:$4 sm:$0xff]   ;;  %12906 = vmatpush1.bf16.msra.mxu0 %v17631_v42  ;;  %s18035_s0 = sshll.u32 %s18107_s25, 4  ;;  %s18036_s0 = int_to_ptr.vmem [resolvable:$false] %s18035_s0 }
 0x5e6   : > { %v10956_v61 = vor.u32 %v10955_v29, %v10954_v1  ;;  %v17637_v31 = vld [vmem:[%s22130_s8 + $0x60] ss:$16 sps:$4 sm:$0xff]   ;;  %v17638_v54 = vld [vmem:[%s22130_s8 + $0x68] ss:$16 sps:$4 sm:$0xff]   ;;  %v17639_v59 = vld [vmem:[%s22130_s8 + $0x84] ss:$16 sps:$4 sm:$0xff]   ;;  %12907 = vmatprep.subr.bf16.mxu0 %v17633_v48  ;;  %p18038_p1 = scmp.lt.s32.totalorder %s22078_s15, %s18036_s0 }
 0x5e7   : > { %13070 = vmatpush1.bf16.msra.mxu1 %v17632_v51  ;;  %v10944_v41 = vor.u32 %v10943_v55, %v10942_v38  ;;  %v17641_v47 = vld [vmem:[%s22130_s8 + $0x8c] ss:$16 sps:$4 sm:$0xff]   ;;  %v17643_v28 = vld [vmem:[%s22130_s8 + $0x80] ss:$16 sps:$4 sm:$0xff]   ;;  %v17644_v60 = vld [vmem:[%s22130_s8 + $0x88] ss:$16 sps:$4 sm:$0xff]  }
 0x5e8   : > { %v10958_v2 = vor.u32 %v10957_v45, %v10956_v61  ;;  %13071 = vmatprep.subr.bf16.mxu1 %v17635_v46  ;;  %v17645_v26 = vld [vmem:[%s22130_s8 + $0xa4] ss:$16 sps:$4 sm:$0xff]   ;;  %v17647_v23 = vld [vmem:[%s22130_s8 + $0xac] ss:$16 sps:$4 sm:$0xff]   ;;  %v17649_v4 = vld [vmem:[%s22130_s8 + $0xa0] ss:$16 sps:$4 sm:$0xff]  }
 0x5e9   : > { %12908 = vmatpush1.bf16.msra.mxu0 %v17637_v31  ;;  %v17650_v49 = vld [vmem:[%s22130_s8 + $0xa8] ss:$16 sps:$4 sm:$0xff]   ;;  %v17651_v58 = vld [vmem:[%s22130_s8 + $0xc4] ss:$16 sps:$4 sm:$0xff]   ;;  %v17653_v13 = vld [vmem:[%s22130_s8 + $0xcc] ss:$16 sps:$4 sm:$0xff]  }
 0x5ea   : > { %v10960_v19 = vor.u32 %v10959_v18, %v10958_v2  ;;  %12909 = vmatprep.subr.bf16.mxu0 %v17639_v59  ;;  %v17655_v7 = vld [vmem:[%s22130_s8 + $0xc0] ss:$16 sps:$4 sm:$0xff]   ;;  %v17656_v14 = vld [vmem:[%s22130_s8 + $0xc8] ss:$16 sps:$4 sm:$0xff]   ;;  %v17657_v36 = vld [vmem:[%s22130_s8 + $0xe4] ss:$16 sps:$4 sm:$0xff]  }
 0x5eb   : > { %13072 = vmatpush1.bf16.msra.mxu1 %v17638_v54  ;;  %v17659_v8 = vld [vmem:[%s22130_s8 + $0xec] ss:$16 sps:$4 sm:$0xff]   ;;  %v17661_v33 = vld [vmem:[%s22130_s8 + $0xe0] ss:$16 sps:$4 sm:$0xff]   ;;  %v17662_v20 = vld [vmem:[%s22130_s8 + $0xe8] ss:$16 sps:$4 sm:$0xff]  }
 0x5ec   : > { %v10961_v56 = vmax.f32 %v10944_v41, %v10960_v19  ;;  %13073 = vmatprep.subr.bf16.mxu1 %v17641_v47  ;;  %v17663_v27 = vld [vmem:[%s22130_s8 + $0x104] ss:$16 sps:$4 sm:$0xff]   ;;  %v17665_v21 = vld [vmem:[%s22130_s8 + $0x10c] ss:$16 sps:$4 sm:$0xff]   ;;  %v17667_v50 = vld [vmem:[%s22130_s8 + $0x100] ss:$16 sps:$4 sm:$0xff]  }
 0x5ed   : > { %12910 = vmatpush1.bf16.msra.mxu0 %v17643_v28  ;;  %v17668_v15 = vld [vmem:[%s22130_s8 + $0x108] ss:$16 sps:$4 sm:$0xff]   ;;  %v17669_v24 = vld [vmem:[%s22130_s8 + $0x124] ss:$16 sps:$4 sm:$0xff]   ;;  %v17671_v12 = vld [vmem:[%s22130_s8 + $0x12c] ss:$16 sps:$4 sm:$0xff]  }
 0x5ee   : > { %10963 = vrot.lane.b32.xlu1 %v10961_v56, %s22339_s20  ;;  %12911 = vmatprep.subr.bf16.mxu0 %v17645_v26  ;;  %v17673_v16 = vld [vmem:[%s22130_s8 + $0x120] ss:$16 sps:$4 sm:$0xff]   ;;  %v17674_v62 = vld [vmem:[%s22130_s8 + $0x128] ss:$16 sps:$4 sm:$0xff]   ;;  %v17675_v40 = vld [vmem:[%s22130_s8 + $0x144] ss:$16 sps:$4 sm:$0xff]  }
 0x5ef   : > { %13074 = vmatpush1.bf16.msra.mxu1 %v17644_v60  ;;  %v10824_v34 = vld [vmem:[#allocation7 + $0x2] ss:$64 sm:$0x1]  ;;  %v17677_v3 = vld [vmem:[%s22130_s8 + $0x14c] ss:$16 sps:$4 sm:$0xff]   ;;  %s18037_s19 = scalar_lea.vmem %s18036_s0, 256 }
 0x5f0   : > { %13075 = vmatprep.subr.bf16.mxu1 %v17647_v23  ;;  %v10825_v39 = vld [vmem:[#allocation7 + $0x2] ss:$64 sm:$0x2]  ;;  %v17680_v30 = vld [vmem:[%s22130_s8 + $0x148] ss:$16 sps:$4 sm:$0xff]   ;;  %p18039_p2 = scmp.lt.s32.totalorder %s18037_s19, %s18031_s29 }
 0x5f1   : > { %12912 = vmatpush1.bf16.msra.mxu0 %v17649_v4  ;;  %v10826_v43 = vor.u32 %v10825_v39, %v10824_v34  ;;  %v10827_v0 = vld [vmem:[#allocation7 + $0x2] ss:$64 sm:$0x4]  ;;  %v17681_v52 = vld [vmem:[%s22130_s8 + $0x164] ss:$16 sps:$4 sm:$0xff]  }
 0x5f2   : > { %12913 = vmatprep.subr.bf16.mxu0 %v17651_v58  ;;  %v17679_v5 = vld [vmem:[%s22130_s8 + $0x140] ss:$16 sps:$4 sm:$0xff]   ;;  %v10840_v11 = vld [vmem:[#allocation7 + $0xa] ss:$64 sm:$0x1]  ;;  %p18040_p3 = por %p18039_p2, %p18038_p1 }
 0x5f3   : > { %13076 = vmatpush1.bf16.msra.mxu1 %v17650_v49  ;;  %v10829_v6 = vld [vmem:[#allocation7 + $0x2] ss:$64 sm:$0x8]  ;;  %v10828_v57 = vor.u32 %v10827_v0, %v10826_v43  ;;  %v10841_v25 = vld [vmem:[#allocation7 + $0xa] ss:$64 sm:$0x2] }
 0x5f4   : > { %13077 = vmatprep.subr.bf16.mxu1 %v17653_v13  ;;  %v10831_v53 = vld [vmem:[#allocation7 + $0x2] ss:$64 sm:$0x10]  ;;  %v17683_v37 = vld [vmem:[%s22130_s8 + $0x16c] ss:$16 sps:$4 sm:$0xff]   ;;  %v10842_v29 = vor.u32 %v10841_v25, %v10840_v11  ;;  %p18041_p4 = pnand %p18040_p3, %p18034_p0 }
 0x5f5   : > { %12914 = vmatpush1.bf16.msra.mxu0 %v17655_v7  ;;  %v10830_v17 = vor.u32 %v10829_v6, %v10828_v57  ;;  %v10843_v10 = vld [vmem:[#allocation7 + $0xa] ss:$64 sm:$0x4]  ;;  %v17685_v35 = vld [vmem:[%s22130_s8 + $0x160] ss:$16 sps:$4 sm:$0xff]  }
 0x5f6   : > { %12915 = vmatprep.subr.bf16.mxu0 %v17657_v36  ;;  %v17686_v22 = vld [vmem:[%s22130_s8 + $0x168] ss:$16 sps:$4 sm:$0xff]   ;;  %v10833_v32 = vld [vmem:[#allocation7 + $0x2] ss:$64 sm:$0x20]  ;;  %v10844_v42 = vor.u32 %v10843_v10, %v10842_v29 }
 0x5f7   : > { %13078 = vmatpush1.bf16.msra.mxu1 %v17656_v14  ;;  %v10845_v63 = vld [vmem:[#allocation7 + $0xa] ss:$64 sm:$0x8]  ;;  %v17687_v9 = vld [vmem:[%s22130_s8 + $0x184] ss:$16 sps:$4 sm:$0xff]   ;;  %v10832_v45 = vor.u32 %v10831_v53, %v10830_v17 }
 0x5f8   : > { %13079 = vmatprep.subr.bf16.mxu1 %v17659_v8  ;;  %v17689_v55 = vld [vmem:[%s22130_s8 + $0x18c] ss:$16 sps:$4 sm:$0xff]   ;;  %v10835_v44 = vld [vmem:[#allocation7 + $0x2] ss:$64 sm:$0x40]  ;;  %v10846_v51 = vor.u32 %v10845_v63, %v10844_v42 }
 0x5f9   : > { %12916 = vmatpush1.bf16.msra.mxu0 %v17661_v33  ;;  %v10847_v38 = vld [vmem:[#allocation7 + $0xa] ss:$64 sm:$0x10]  ;;  %v10834_v1 = vor.u32 %v10833_v32, %v10832_v45  ;;  %v17691_v48 = vld [vmem:[%s22130_s8 + $0x180] ss:$16 sps:$4 sm:$0xff]  }
 0x5fa   : > { %12917 = vmatprep.subr.bf16.mxu0 %v17663_v27  ;;  %v10849_v18 = vld [vmem:[#allocation7 + $0xa] ss:$64 sm:$0x20]  ;;  %v10837_v46 = vld [vmem:[#allocation7 + $0x2] ss:$64 sm:$0x80]  ;;  %v10848_v59 = vor.u32 %v10847_v38, %v10846_v51 }
 0x5fb   : > { %13080 = vmatpush1.bf16.msra.mxu1 %v17662_v20  ;;  %v17692_v61 = vld [vmem:[%s22130_s8 + $0x188] ss:$16 sps:$4 sm:$0xff]   ;;  %v10836_v54 = vor.u32 %v10835_v44, %v10834_v1  ;;  %v10751_v41 = vld [vmem:[#allocation7] ss:$64 sm:$0x1] }
 0x5fc   : > { %13081 = vmatprep.subr.bf16.mxu1 %v17665_v21  ;;  %v10851_v31 = vld [vmem:[#allocation7 + $0xa] ss:$64 sm:$0x40]  ;;  %v10752_v2 = vld [vmem:[#allocation7] ss:$64 sm:$0x2]  ;;  %v10850_v26 = vor.u32 %v10849_v18, %v10848_v59 }
 0x5fd   : > { %12918 = vmatpush1.bf16.msra.mxu0 %v17667_v50  ;;  %v10853_v47 = vld [vmem:[#allocation7 + $0xa] ss:$64 sm:$0x80]  ;;  %v17693_v19 = vld [vmem:[%s22130_s8 + $0x1a4] ss:$16 sps:$4 sm:$0xff]   ;;  %v10753_v28 = vor.u32 %v10752_v2, %v10751_v41  ;;  %v10838_v13 = vor.u32 %v10837_v46, %v10836_v54 }
 0x5fe   : > { %12919 = vmatprep.subr.bf16.mxu0 %v17669_v24  ;;  %v10754_v60 = vld [vmem:[#allocation7] ss:$64 sm:$0x4]  ;;  %v17695_v56 = vld [vmem:[%s22130_s8 + $0x1ac] ss:$16 sps:$4 sm:$0xff]   ;;  %v10852_v7 = vor.u32 %v10851_v31, %v10850_v26 }
 0x5ff   : > { %13082 = vmatpush1.bf16.msra.mxu1 %v17668_v15  ;;  %v10756_v23 = vld [vmem:[#allocation7] ss:$64 sm:$0x8]  ;;  %v10755_v49 = vor.u32 %v10754_v60, %v10753_v28  ;;  %v10767_v14 = vld [vmem:[#allocation7 + $0x8] ss:$64 sm:$0x1] }
 0x600   : > { %13083 = vmatprep.subr.bf16.mxu1 %v17671_v12  ;;  %v17697_v4 = vld [vmem:[%s22130_s8 + $0x1a0] ss:$16 sps:$4 sm:$0xff]   ;;  %v10768_v36 = vld [vmem:[#allocation7 + $0x8] ss:$64 sm:$0x2]  ;;  %v10854_v21 = vor.u32 %v10853_v47, %v10852_v7 }
 0x601   : > { %12920 = vmatpush1.bf16.msra.mxu0 %v17673_v16  ;;  %v10758_v58 = vld [vmem:[#allocation7] ss:$64 sm:$0x10]  ;;  %v17698_v8 = vld [vmem:[%s22130_s8 + $0x1a8] ss:$16 sps:$4 sm:$0xff]   ;;  %v10757_v33 = vor.u32 %v10756_v23, %v10755_v49  ;;  %v10769_v20 = vor.u32 %v10768_v36, %v10767_v14 }
 0x602   : > { %12921 = vmatprep.subr.bf16.mxu0 %v17675_v40  ;;  %v10770_v27 = vld [vmem:[#allocation7 + $0x8] ss:$64 sm:$0x4]  ;;  %v10760_v50 = vld [vmem:[#allocation7] ss:$64 sm:$0x20]  ;;  %v10855_v40 = vmax.f32 %v10838_v13, %v10854_v21 }
 0x603   : > { %13084 = vmatpush1.bf16.msra.mxu1 %v17674_v62  ;;  %v10772_v15 = vld [vmem:[#allocation7 + $0x8] ss:$64 sm:$0x8]  ;;  %v10759_v24 = vor.u32 %v10758_v58, %v10757_v33  ;;  %v10762_v12 = vld [vmem:[#allocation7] ss:$64 sm:$0x40]  ;;  %v10771_v16 = vor.u32 %v10770_v27, %v10769_v20 }
 0x604   : > { %13085 = vmatprep.subr.bf16.mxu1 %v17677_v3  ;;  %v10774_v62 = vld [vmem:[#allocation7 + $0x8] ss:$64 sm:$0x10]  ;;  %v17699_v39 = vld [vmem:[%s22130_s8 + $0x1c4] ss:$16 sps:$4 sm:$0xff]   ;;  %10856 = vst.msk [vmem:[#allocation8 + $0x8] sm:$0xff] %vm413_vm0, %v10855_v40 }
 0x605   : > { %12922 = vmatpush1.bf16.msra.mxu0 %v17679_v5  ;;  %v10776_v34 = vld [vmem:[#allocation7 + $0x8] ss:$64 sm:$0x20]  ;;  %v10761_v3 = vor.u32 %v10760_v50, %v10759_v24  ;;  %v10773_v43 = vor.u32 %v10772_v15, %v10771_v16  ;;  %v17701_v0 = vld [vmem:[%s22130_s8 + $0x1cc] ss:$16 sps:$4 sm:$0xff]  }
 0x606   : > { %12923 = vmatprep.subr.bf16.mxu0 %v17681_v52  ;;  %v17703_v5 = vld [vmem:[%s22130_s8 + $0x1c0] ss:$16 sps:$4 sm:$0xff]   ;;  %v10778_v6 = vld [vmem:[#allocation7 + $0x8] ss:$64 sm:$0x40] }
 0x607   : > { %13086 = vmatpush1.bf16.msra.mxu1 %v17680_v30  ;;  %v10764_v30 = vld [vmem:[#allocation7] ss:$64 sm:$0x80]  ;;  %v17704_v52 = vld [vmem:[%s22130_s8 + $0x1c8] ss:$16 sps:$4 sm:$0xff]   ;;  %v10763_v57 = vor.u32 %v10762_v12, %v10761_v3  ;;  %v10775_v53 = vor.u32 %v10774_v62, %v10773_v43 }
 0x608   : > { %13087 = vmatprep.subr.bf16.mxu1 %v17683_v37  ;;  %v17705_v11 = vld [vmem:[%s22130_s8 + $0x1e4] ss:$16 sps:$4 sm:$0xff]   ;;  %v10780_v25 = vld [vmem:[#allocation7 + $0x8] ss:$64 sm:$0x80] }
 0x609   : > { %12924 = vmatpush1.bf16.msra.mxu0 %v17685_v35  ;;  %v17707_v37 = vld [vmem:[%s22130_s8 + $0x1ec] ss:$16 sps:$4 sm:$0xff]   ;;  %v17709_v17 = vld [vmem:[%s22130_s8 + $0x1e0] ss:$16 sps:$4 sm:$0xff]   ;;  %v10777_v29 = vor.u32 %v10776_v34, %v10775_v53  ;;  %v17710_v10 = vld [vmem:[%s22130_s8 + $0x1e8] ss:$16 sps:$4 sm:$0xff]  }
 0x60a   : > { %12925 = vmatprep.subr.bf16.mxu0 %v17687_v9  ;;  %v17713_v35 = vld [vmem:[%s22130_s8 + $0x204] ss:$16 sps:$4 sm:$0xff]   ;;  %v17716_v63 = vld [vmem:[%s22130_s8 + $0x20c] ss:$16 sps:$4 sm:$0xff]  }
 0x60b   : > { %13088 = vmatpush1.bf16.msra.mxu1 %v17686_v22  ;;  %v10765_v22 = vor.u32 %v10764_v30, %v10763_v57  ;;  %v10779_v32 = vor.u32 %v10778_v6, %v10777_v29  ;;  %v11146_v9 = vld [vmem:[#allocation7 + $0x23] ss:$64 sm:$0x1]  ;;  %v11165_v54 = vld [vmem:[#allocation7 + $0x2b] ss:$64 sm:$0x4] }
 0x60c   : > { %13089 = vmatprep.subr.bf16.mxu1 %v17689_v55  ;;  %v11147_v55 = vld [vmem:[#allocation7 + $0x23] ss:$64 sm:$0x2]  ;;  %v11167_v41 = vld [vmem:[#allocation7 + $0x2b] ss:$64 sm:$0x8] }
 0x60d   : > { %12926 = vmatpush1.bf16.msra.mxu0 %v17691_v48  ;;  %v10781_v45 = vor.u32 %v10780_v25, %v10779_v32  ;;  %v11148_v44 = vor.u32 %v11147_v55, %v11146_v9  ;;  %v11149_v42 = vld [vmem:[#allocation7 + $0x23] ss:$64 sm:$0x4]  ;;  %v11162_v48 = vld [vmem:[#allocation7 + $0x2b] ss:$64 sm:$0x1] }
 0x60e   : > { %12927 = vmatprep.subr.bf16.mxu0 %v17693_v19  ;;  %v11151_v38 = vld [vmem:[#allocation7 + $0x23] ss:$64 sm:$0x8]  ;;  %v11169_v28 = vld [vmem:[#allocation7 + $0x2b] ss:$64 sm:$0x10] }
 0x60f   : > { %13090 = vmatpush1.bf16.msra.mxu1 %v17692_v61  ;;  %v10782_v1 = vmax.f32 %v10765_v22, %v10781_v45  ;;  %v11150_v51 = vor.u32 %v11149_v42, %v11148_v44  ;;  %v11153_v18 = vld [vmem:[#allocation7 + $0x23] ss:$64 sm:$0x10]  ;;  %v11163_v61 = vld [vmem:[#allocation7 + $0x2b] ss:$64 sm:$0x2] }
 0x610   : > { %13091 = vmatprep.subr.bf16.mxu1 %v17695_v56  ;;  %v11164_v31 = vor.u32 %v11163_v61, %v11162_v48  ;;  %v11155_v59 = vld [vmem:[#allocation7 + $0x23] ss:$64 sm:$0x20]  ;;  %v11074_v60 = vld [vmem:[#allocation7 + $0x21] ss:$64 sm:$0x1] }
 0x611   : > { %12928 = vmatpush1.bf16.msra.mxu0 %v17697_v4  ;;  %10783 = vst.msk [vmem:[#allocation8] sm:$0xff] %vm413_vm0, %v10782_v1  ;;  %v11152_v46 = vor.u32 %v11151_v38, %v11150_v51  ;;  %v11157_v47 = vld [vmem:[#allocation7 + $0x23] ss:$64 sm:$0x40] }
 0x612   : > { %12929 = vmatprep.subr.bf16.mxu0 %v17699_v39  ;;  %v11166_v19 = vor.u32 %v11165_v54, %v11164_v31  ;;  %v11075_v26 = vld [vmem:[#allocation7 + $0x21] ss:$64 sm:$0x2]  ;;  %v11159_v58 = vld [vmem:[#allocation7 + $0x23] ss:$64 sm:$0x80] }
 0x613   : > { %13092 = vmatpush1.bf16.msra.mxu1 %v17698_v8  ;;  %v11154_v2 = vor.u32 %v11153_v18, %v11152_v46  ;;  %v11076_v4 = vor.u32 %v11075_v26, %v11074_v60  ;;  %v11077_v49 = vld [vmem:[#allocation7 + $0x21] ss:$64 sm:$0x4]  ;;  %v11171_v13 = vld [vmem:[#allocation7 + $0x2b] ss:$64 sm:$0x20] }
 0x614   : > { %13093 = vmatprep.subr.bf16.mxu1 %v17701_v0  ;;  %v11168_v23 = vor.u32 %v11167_v41, %v11166_v19  ;;  %v11079_v7 = vld [vmem:[#allocation7 + $0x21] ss:$64 sm:$0x8]  ;;  %v11173_v8 = vld [vmem:[#allocation7 + $0x2b] ss:$64 sm:$0x40] }
 0x615   : > { %12930 = vmatpush1.bf16.msra.mxu0 %v17703_v5  ;;  %v11156_v56 = vor.u32 %v11155_v59, %v11154_v2  ;;  %v11078_v33 = vor.u32 %v11077_v49, %v11076_v4  ;;  %v11081_v20 = vld [vmem:[#allocation7 + $0x21] ss:$64 sm:$0x10]  ;;  %v11090_v27 = vld [vmem:[#allocation7 + $0x29] ss:$64 sm:$0x1] }
 0x616   : > { %12931 = vmatprep.subr.bf16.mxu0 %v17705_v11  ;;  %v11170_v36 = vor.u32 %v11169_v28, %v11168_v23  ;;  %v11091_v21 = vld [vmem:[#allocation7 + $0x29] ss:$64 sm:$0x2]  ;;  %v11175_v15 = vld [vmem:[#allocation7 + $0x2b] ss:$64 sm:$0x80] }
 0x617   : > { %13094 = vmatpush1.bf16.msra.mxu1 %v17704_v52  ;;  %v11158_v14 = vor.u32 %v11157_v47, %v11156_v56  ;;  %v11080_v24 = vor.u32 %v11079_v7, %v11078_v33  ;;  %v11092_v12 = vor.u32 %v11091_v21, %v11090_v27  ;;  %v11093_v16 = vld [vmem:[#allocation7 + $0x29] ss:$64 sm:$0x4]  ;;  %v11083_v62 = vld [vmem:[#allocation7 + $0x21] ss:$64 sm:$0x20] }
 0x618   : > { %13095 = vmatprep.subr.bf16.mxu1 %v17707_v37  ;;  %v11172_v50 = vor.u32 %v11171_v13, %v11170_v36  ;;  %v11095_v40 = vld [vmem:[#allocation7 + $0x29] ss:$64 sm:$0x8]  ;;  %v11085_v43 = vld [vmem:[#allocation7 + $0x21] ss:$64 sm:$0x40] }
 0x619   : > { %12932 = vmatpush1.bf16.msra.mxu0 %v17709_v17  ;;  %v11160_v34 = vor.u32 %v11159_v58, %v11158_v14  ;;  %v11082_v3 = vor.u32 %v11081_v20, %v11080_v24  ;;  %v11094_v0 = vor.u32 %v11093_v16, %v11092_v12  ;;  %v11097_v5 = vld [vmem:[#allocation7 + $0x29] ss:$64 sm:$0x10]  ;;  %v11087_v25 = vld [vmem:[#allocation7 + $0x21] ss:$64 sm:$0x80] }
 0x61a   : > { %12942 = vmatprep.subr.bf16.mxu0 %v17713_v35  ;;  %v11174_v39 = vor.u32 %v11173_v8, %v11172_v50  ;;  %v11099_v57 = vld [vmem:[#allocation7 + $0x29] ss:$64 sm:$0x20]  ;;  %v10968_v55 = vld [vmem:[#allocation7 + $0x12] ss:$64 sm:$0x1] }
 0x61b   : > { %13096 = vmatpush1.bf16.msra.mxu1 %v17710_v10  ;;  %v11084_v6 = vor.u32 %v11083_v62, %v11082_v3  ;;  %v11096_v52 = vor.u32 %v11095_v40, %v11094_v0  ;;  %v11101_v17 = vld [vmem:[#allocation7 + $0x29] ss:$64 sm:$0x40]  ;;  %v10969_v45 = vld [vmem:[#allocation7 + $0x12] ss:$64 sm:$0x2] }
 0x61c   : > { %13106 = vmatprep.subr.bf16.mxu1 %v17716_v63  ;;  %v11176_v30 = vor.u32 %v11175_v15, %v11174_v39  ;;  %v11103_v10 = vld [vmem:[#allocation7 + $0x29] ss:$64 sm:$0x80]  ;;  %v10970_v44 = vor.u32 %v10969_v45, %v10968_v55  ;;  %v10971_v42 = vld [vmem:[#allocation7 + $0x12] ss:$64 sm:$0x4] }
 0x61d   : > { %v11086_v11 = vor.u32 %v11085_v43, %v11084_v6  ;;  %v11098_v37 = vor.u32 %v11097_v5, %v11096_v52  ;;  %v10973_v38 = vld [vmem:[#allocation7 + $0x12] ss:$64 sm:$0x8]  ;;  %v10984_v46 = vld [vmem:[#allocation7 + $0x1a] ss:$64 sm:$0x1] }
 0x61e   : > { %v11177_v53 = vmax.f32 %v11160_v34, %v11176_v30  ;;  %v10972_v18 = vor.u32 %v10971_v42, %v10970_v44  ;;  %v10975_v61 = vld [vmem:[#allocation7 + $0x12] ss:$64 sm:$0x10]  ;;  %v10985_v54 = vld [vmem:[#allocation7 + $0x1a] ss:$64 sm:$0x2] }
 0x61f   : > { %v11100_v29 = vor.u32 %v11099_v57, %v11098_v37  ;;  %v11088_v35 = vor.u32 %v11087_v25, %v11086_v11  ;;  %v10987_v59 = vld [vmem:[#allocation7 + $0x1a] ss:$64 sm:$0x4]  ;;  %v10977_v41 = vld [vmem:[#allocation7 + $0x12] ss:$64 sm:$0x20]  ;;  %v10986_v2 = vor.u32 %v10985_v54, %v10984_v46 }
 0x620   : > { %11179 = vrot.lane.b32.xlu0 %v11177_v53, %s22339_s20  ;;  %v10974_v31 = vor.u32 %v10973_v38, %v10972_v18  ;;  %v10979_v19 = vld [vmem:[#allocation7 + $0x12] ss:$64 sm:$0x40]  ;;  %v10989_v28 = vld [vmem:[#allocation7 + $0x1a] ss:$64 sm:$0x8] }
 0x621   : > { %v11102_v22 = vor.u32 %v11101_v17, %v11100_v29  ;;  %v10988_v60 = vor.u32 %v10987_v59, %v10986_v2  ;;  %v10991_v26 = vld [vmem:[#allocation7 + $0x1a] ss:$64 sm:$0x10]  ;;  %v17711_v56 = vld [vmem:[%s22130_s8 + $0x200] ss:$16 sps:$4 sm:$0xff]  }
 0x622   : > { %v10976_v47 = vor.u32 %v10975_v61, %v10974_v31  ;;  %v17714_v23 = vld [vmem:[%s22130_s8 + $0x208] ss:$16 sps:$4 sm:$0xff]   ;;  %v17719_v58 = vld [vmem:[%s22130_s8 + $0x224] ss:$16 sps:$4 sm:$0xff]   ;;  %v17722_v13 = vld [vmem:[%s22130_s8 + $0x22c] ss:$16 sps:$4 sm:$0xff]  }
 0x623   : > { %v11104_v32 = vor.u32 %v11103_v10, %v11102_v22  ;;  %v10993_v49 = vld [vmem:[#allocation7 + $0x1a] ss:$64 sm:$0x20]  ;;  %v10990_v7 = vor.u32 %v10989_v28, %v10988_v60  ;;  %v10896_v14 = vld [vmem:[#allocation7 + $0x10] ss:$64 sm:$0x1] }
 0x624   : > { %v10978_v4 = vor.u32 %v10977_v41, %v10976_v47  ;;  %v10897_v33 = vld [vmem:[#allocation7 + $0x10] ss:$64 sm:$0x2]  ;;  %v10981_v27 = vld [vmem:[#allocation7 + $0x12] ss:$64 sm:$0x80] }
 0x625   : > { %v11105_v63 = vmax.f32 %v11088_v35, %v11104_v32  ;;  %v10992_v21 = vor.u32 %v10991_v26, %v10990_v7  ;;  %v10898_v50 = vor.u32 %v10897_v33, %v10896_v14  ;;  %v10899_v15 = vld [vmem:[#allocation7 + $0x10] ss:$64 sm:$0x4]  ;;  %v17720_v12 = vld [vmem:[%s22130_s8 + $0x228] ss:$16 sps:$4 sm:$0xff]  }
 0x626   : > { %v10980_v8 = vor.u32 %v10979_v19, %v10978_v4  ;;  %v17717_v24 = vld [vmem:[%s22130_s8 + $0x220] ss:$16 sps:$4 sm:$0xff]   ;;  %v10995_v16 = vld [vmem:[#allocation7 + $0x1a] ss:$64 sm:$0x40] }
 0x627   : > { %11107 = vrot.lane.b32.xlu1 %v11105_v63, %s22339_s20  ;;  %v10901_v62 = vld [vmem:[#allocation7 + $0x10] ss:$64 sm:$0x8]  ;;  %v17725_v40 = vld [vmem:[%s22130_s8 + $0x244] ss:$16 sps:$4 sm:$0xff]   ;;  %v10994_v34 = vor.u32 %v10993_v49, %v10992_v21  ;;  %v10900_v3 = vor.u32 %v10899_v15, %v10898_v50 }
 0x628   : > { %v10997_v39 = vld [vmem:[#allocation7 + $0x1a] ss:$64 sm:$0x80]  ;;  %v10903_v43 = vld [vmem:[#allocation7 + $0x10] ss:$64 sm:$0x10]  ;;  %v10982_v0 = vor.u32 %v10981_v27, %v10980_v8 }
 0x629   : > { %v10912_v5 = vld [vmem:[#allocation7 + $0x18] ss:$64 sm:$0x1]  ;;  %v17728_v6 = vld [vmem:[%s22130_s8 + $0x24c] ss:$16 sps:$4 sm:$0xff]   ;;  %v10996_v52 = vor.u32 %v10995_v16, %v10994_v34  ;;  %v10902_v57 = vor.u32 %v10901_v62, %v10900_v3 }
 0x62a   : > { %v10913_v30 = vld [vmem:[#allocation7 + $0x18] ss:$64 sm:$0x2]  ;;  %v10905_v25 = vld [vmem:[#allocation7 + $0x10] ss:$64 sm:$0x20] }
 0x62b   : > { %v10914_v53 = vor.u32 %v10913_v30, %v10912_v5  ;;  %v10915_v11 = vld [vmem:[#allocation7 + $0x18] ss:$64 sm:$0x4]  ;;  %v17723_v17 = vld [vmem:[%s22130_s8 + $0x240] ss:$16 sps:$4 sm:$0xff]   ;;  %v10998_v29 = vor.u32 %v10997_v39, %v10996_v52  ;;  %v10904_v10 = vor.u32 %v10903_v43, %v10902_v57 }
 0x62c   : > { %v10917_v37 = vld [vmem:[#allocation7 + $0x18] ss:$64 sm:$0x8]  ;;  %v10907_v35 = vld [vmem:[#allocation7 + $0x10] ss:$64 sm:$0x40] }
 0x62d   : > { %v10916_v22 = vor.u32 %v10915_v11, %v10914_v53  ;;  %v17726_v32 = vld [vmem:[%s22130_s8 + $0x248] ss:$16 sps:$4 sm:$0xff]   ;;  %v17734_v55 = vld [vmem:[%s22130_s8 + $0x26c] ss:$16 sps:$4 sm:$0xff]   ;;  %v10999_v45 = vmax.f32 %v10982_v0, %v10998_v29  ;;  %v10906_v42 = vor.u32 %v10905_v25, %v10904_v10  ;;  %v17737_v54 = vld [vmem:[%s22130_s8 + $0x284] ss:$16 sps:$4 sm:$0xff]  }
 0x62e   : > { %v10919_v63 = vld [vmem:[#allocation7 + $0x18] ss:$64 sm:$0x10]  ;;  %v17740_v59 = vld [vmem:[%s22130_s8 + $0x28c] ss:$16 sps:$4 sm:$0xff]  }
 0x62f   : > { %v10918_v38 = vor.u32 %v10917_v37, %v10916_v22  ;;  %11000 = vst.msk [vmem:[#allocation8 + $0x18] sm:$0xff] %vm413_vm0, %v10999_v45  ;;  %v10908_v18 = vor.u32 %v10907_v35, %v10906_v42  ;;  %v17732_v46 = vld [vmem:[%s22130_s8 + $0x268] ss:$16 sps:$4 sm:$0xff]   ;;  %v17735_v2 = vld [vmem:[%s22130_s8 + $0x280] ss:$16 sps:$4 sm:$0xff]  }
 0x630   : > { %v10923_v31 = vld [vmem:[#allocation7 + $0x18] ss:$64 sm:$0x40]  ;;  %v11290_v26 = vld [vmem:[#allocation7 + $0x33] ss:$64 sm:$0x1] }
 0x631   : > { %v10920_v61 = vor.u32 %v10919_v63, %v10918_v38  ;;  %v10925_v47 = vld [vmem:[#allocation7 + $0x18] ss:$64 sm:$0x80]  ;;  %v17743_v4 = vld [vmem:[%s22130_s8 + $0x2a4] ss:$16 sps:$4 sm:$0xff]  }
 0x632   : > { %v17738_v19 = vld [vmem:[%s22130_s8 + $0x288] ss:$16 sps:$4 sm:$0xff]   ;;  %v17746_v49 = vld [vmem:[%s22130_s8 + $0x2ac] ss:$16 sps:$4 sm:$0xff]   ;;  %v17741_v7 = vld [vmem:[%s22130_s8 + $0x2a0] ss:$16 sps:$4 sm:$0xff]  }
 0x633   : > { %v17744_v14 = vld [vmem:[%s22130_s8 + $0x2a8] ss:$16 sps:$4 sm:$0xff]   ;;  %v17749_v8 = vld [vmem:[%s22130_s8 + $0x2c4] ss:$16 sps:$4 sm:$0xff]   ;;  %v17752_v16 = vld [vmem:[%s22130_s8 + $0x2cc] ss:$16 sps:$4 sm:$0xff]  }
 0x634   : > { %v11297_v50 = vld [vmem:[#allocation7 + $0x33] ss:$64 sm:$0x10]  ;;  %v11309_v34 = vld [vmem:[#allocation7 + $0x3b] ss:$64 sm:$0x4] }
 0x635   : > { %v17747_v39 = vld [vmem:[%s22130_s8 + $0x2c0] ss:$16 sps:$4 sm:$0xff]   ;;  %v17750_v3 = vld [vmem:[%s22130_s8 + $0x2c8] ss:$16 sps:$4 sm:$0xff]   ;;  %v17755_v5 = vld [vmem:[%s22130_s8 + $0x2e4] ss:$16 sps:$4 sm:$0xff]  }
 0x636   : > { %v11299_v43 = vld [vmem:[#allocation7 + $0x33] ss:$64 sm:$0x20]  ;;  %v11311_v0 = vld [vmem:[#allocation7 + $0x3b] ss:$64 sm:$0x8] }
 0x637   : > { %v11313_v57 = vld [vmem:[#allocation7 + $0x3b] ss:$64 sm:$0x10]  ;;  %v11218_v53 = vld [vmem:[#allocation7 + $0x31] ss:$64 sm:$0x1] }
 0x638   : > { %v11219_v11 = vld [vmem:[#allocation7 + $0x31] ss:$64 sm:$0x2]  ;;  %v17758_v25 = vld [vmem:[%s22130_s8 + $0x2ec] ss:$16 sps:$4 sm:$0xff]  }
 0x639   : > { %v11220_v29 = vor.u32 %v11219_v11, %v11218_v53  ;;  %v11221_v10 = vld [vmem:[#allocation7 + $0x31] ss:$64 sm:$0x4]  ;;  %v17756_v22 = vld [vmem:[%s22130_s8 + $0x2e8] ss:$16 sps:$4 sm:$0xff]  }
 0x63a   : > { %v17753_v35 = vld [vmem:[%s22130_s8 + $0x2e0] ss:$16 sps:$4 sm:$0xff]   ;;  %v11315_v63 = vld [vmem:[#allocation7 + $0x3b] ss:$64 sm:$0x20] }
 0x63b   : > { %v11317_v42 = vld [vmem:[#allocation7 + $0x3b] ss:$64 sm:$0x40]  ;;  %v11222_v38 = vor.u32 %v11221_v10, %v11220_v29  ;;  %v17788_v53 = vld [vmem:[%s22130_s8 + $0x38c] ss:$16 sps:$4 sm:$0xff]  }
 0x63c   : > { %v17783_v11 = vld [vmem:[%s22130_s8 + $0x380] ss:$16 sps:$4 sm:$0xff]   ;;  %v17792_v10 = vld [vmem:[%s22130_s8 + $0x3a8] ss:$16 sps:$4 sm:$0xff]  }
 0x63d   : > { %v17789_v29 = vld [vmem:[%s22130_s8 + $0x3a0] ss:$16 sps:$4 sm:$0xff]  }
 0x645   : > { %v10892_v9 = vpop.permute.xlu0 %10891 }
 0x646   : > { %10894 = vst.msk [vmem:[#allocation8 + $0x8] sm:$0xff] %vm10821_vm4, %v10892_v9  ;;  %v17731_v9 = vld [vmem:[%s22130_s8 + $0x264] ss:$16 sps:$4 sm:$0xff]  }
 0x64d   : > { %v11328_v51 = vld [vmem:[#allocation8 + $0x8] sm:$0xff] }
 0x64e   : > { %v10819_v1 = vpop.permute.xlu0 %10818  ;;  %v11336_v48 = vpack.c.bf16 %v11328_v51, %v11328_v51  ;;  %v10921_v51 = vld [vmem:[#allocation7 + $0x18] ss:$64 sm:$0x20] }
 0x64f   : > { %10822 = vst.msk [vmem:[#allocation8] sm:$0xff] %vm10821_vm4, %v10819_v1  ;;  %v17729_v1 = vld [vmem:[%s22130_s8 + $0x260] ss:$16 sps:$4 sm:$0xff]   ;;  %v10922_v41 = vor.u32 %v10921_v51, %v10920_v61  ;;  %v11234_v51 = vld [vmem:[#allocation7 + $0x39] ss:$64 sm:$0x1] }
 0x650   : > { %12933 = vmatprep.mubr.bf16.mxu0 %v11336_v48  ;;  %13097 = vmatprep.mubr.bf16.mxu1 %v11336_v48  ;;  %v10909_v48 = vld [vmem:[#allocation7 + $0x10] ss:$64 sm:$0x80] }
 0x651   : > { %v10910_v28 = vor.u32 %v10909_v48, %v10908_v18  ;;  %v10924_v60 = vor.u32 %v10923_v31, %v10922_v41  ;;  %v11235_v18 = vld [vmem:[#allocation7 + $0x39] ss:$64 sm:$0x2]  ;;  %v17764_v48 = vld [vmem:[%s22130_s8 + $0x30c] ss:$16 sps:$4 sm:$0xff]  }
 0x652   : > { %v11237_v31 = vld [vmem:[#allocation7 + $0x39] ss:$64 sm:$0x4]  ;;  %v11227_v41 = vld [vmem:[#allocation7 + $0x31] ss:$64 sm:$0x20] }
 0x656   : > { %v11327_v36 = vld [vmem:[#allocation8] sm:$0xff]  ;;  %v11036_v44 = vpop.permute.xlu1 %11035 }
 0x657   : > { %v11335_v20 = vpack.c.bf16 %v11327_v36, %v11327_v36  ;;  %11038 = vst.msk [vmem:[#allocation8 + $0x18] sm:$0xff] %vm10821_vm4, %v11036_v44  ;;  %v11295_v36 = vld [vmem:[#allocation7 + $0x33] ss:$64 sm:$0x8] }
 0x659   : > { %12934 = vmatmul.mubr.bf16.vlgmr.msra.gmra.mrb[0].mxu0 %v11335_v20  ;;  %13098 = vmatmul.mubr.bf16.vlgmr.msra.gmra.mrb[0].mxu1 %v11335_v20 }
 0x65a   : > { %12943 = vmatpush1.bf16.msra.mxu0 %v17711_v56  ;;  %13107 = vmatpush1.bf16.msra.mxu1 %v17714_v23  ;;  %v11291_v56 = vld [vmem:[#allocation7 + $0x33] ss:$64 sm:$0x2] }
 0x65b   : > { %12944 = vmatprep.subr.bf16.mxu0 %v17719_v58  ;;  %13108 = vmatprep.subr.bf16.mxu1 %v17722_v13  ;;  %v11293_v23 = vld [vmem:[#allocation7 + $0x33] ss:$64 sm:$0x4]  ;;  %v10926_v58 = vor.u32 %v10925_v47, %v10924_v60  ;;  %v11292_v13 = vor.u32 %v11291_v56, %v11290_v26  ;;  %v17762_v47 = vld [vmem:[%s22130_s8 + $0x308] ss:$16 sps:$4 sm:$0xff]  }
 0x65c   : > { %v11239_v26 = vld [vmem:[#allocation7 + $0x39] ss:$64 sm:$0x8]  ;;  %v17767_v56 = vld [vmem:[%s22130_s8 + $0x324] ss:$16 sps:$4 sm:$0xff]  }
 0x65d   : > { %v10927_v33 = vmax.f32 %v10910_v28, %v10926_v58  ;;  %v11294_v21 = vor.u32 %v11293_v23, %v11292_v13  ;;  %v11229_v23 = vld [vmem:[#allocation7 + $0x31] ss:$64 sm:$0x40] }
 0x65e   : > { %12945 = vmatpush1.bf16.msra.mxu0 %v17717_v24  ;;  %13109 = vmatpush1.bf16.msra.mxu1 %v17720_v12  ;;  %v11330_v27 = vld [vmem:[#allocation8 + $0x18] sm:$0xff] }
 0x65f   : > { %12946 = vmatprep.subr.bf16.mxu0 %v17725_v40  ;;  %13110 = vmatprep.subr.bf16.mxu1 %v17728_v6  ;;  %v11338_v15 = vpack.c.bf16 %v11330_v27, %v11330_v27  ;;  %v11306_v24 = vld [vmem:[#allocation7 + $0x3b] ss:$64 sm:$0x1]  ;;  %10928 = vst.msk [vmem:[#allocation8 + $0x10] sm:$0xff] %vm413_vm0, %v10927_v33  ;;  %v11296_v62 = vor.u32 %v11295_v36, %v11294_v21  ;;  %v17773_v27 = vld [vmem:[%s22130_s8 + $0x344] ss:$16 sps:$4 sm:$0xff]  }
 0x660   : > { %v10964_v20 = vpop.permute.xlu1 %10963  ;;  %v11307_v12 = vld [vmem:[#allocation7 + $0x3b] ss:$64 sm:$0x2]  ;;  %v11301_v6 = vld [vmem:[#allocation7 + $0x33] ss:$64 sm:$0x40] }
 0x661   : > { %v11308_v40 = vor.u32 %v11307_v12, %v11306_v24  ;;  %10966 = vst.msk [vmem:[#allocation8 + $0x10] sm:$0xff] %vm10821_vm4, %v10964_v20  ;;  %12974 = vmatprep.mubr.bf16.mxu0 %v11338_v15  ;;  %13138 = vmatprep.mubr.bf16.mxu1 %v11338_v15  ;;  %v11298_v30 = vor.u32 %v11297_v50, %v11296_v62  ;;  %v17768_v36 = vld [vmem:[%s22130_s8 + $0x328] ss:$16 sps:$4 sm:$0xff]   ;;  %v11231_v50 = vld [vmem:[#allocation7 + $0x31] ss:$64 sm:$0x80] }
 0x662   : > { %12947 = vmatpush1.bf16.msra.mxu0 %v17723_v17  ;;  %13111 = vmatpush1.bf16.msra.mxu1 %v17726_v32  ;;  %v11303_v32 = vld [vmem:[#allocation7 + $0x33] ss:$64 sm:$0x80]  ;;  %v11243_v20 = vld [vmem:[#allocation7 + $0x39] ss:$64 sm:$0x20] }
 0x663   : > { %12948 = vmatprep.subr.bf16.mxu0 %v17731_v9  ;;  %13112 = vmatprep.subr.bf16.mxu1 %v17734_v55  ;;  %v11310_v52 = vor.u32 %v11309_v34, %v11308_v40  ;;  %v11300_v37 = vor.u32 %v11299_v43, %v11298_v30  ;;  %v11223_v9 = vld [vmem:[#allocation7 + $0x31] ss:$64 sm:$0x8]  ;;  %v17761_v55 = vld [vmem:[%s22130_s8 + $0x304] ss:$16 sps:$4 sm:$0xff]  }
 0x664   : > { %v17776_v24 = vld [vmem:[%s22130_s8 + $0x34c] ss:$16 sps:$4 sm:$0xff]   ;;  %v11245_v12 = vld [vmem:[#allocation7 + $0x39] ss:$64 sm:$0x40] }
 0x665   : > { %v11312_v17 = vor.u32 %v11311_v0, %v11310_v52  ;;  %v11302_v45 = vor.u32 %v11301_v6, %v11300_v37  ;;  %v11247_v62 = vld [vmem:[#allocation7 + $0x39] ss:$64 sm:$0x80]  ;;  %v17771_v40 = vld [vmem:[%s22130_s8 + $0x340] ss:$16 sps:$4 sm:$0xff]  }
 0x666   : > { %12949 = vmatpush1.bf16.msra.mxu0 %v17729_v1  ;;  %13113 = vmatpush1.bf16.msra.mxu1 %v17732_v46  ;;  %v11225_v1 = vld [vmem:[#allocation7 + $0x31] ss:$64 sm:$0x10]  ;;  %v11224_v46 = vor.u32 %v11223_v9, %v11222_v38  ;;  %v17774_v34 = vld [vmem:[%s22130_s8 + $0x348] ss:$16 sps:$4 sm:$0xff]  }
 0x667   : > { %12950 = vmatprep.subr.bf16.mxu0 %v17737_v54  ;;  %13114 = vmatprep.subr.bf16.mxu1 %v17740_v59  ;;  %v11314_v44 = vor.u32 %v11313_v57, %v11312_v17  ;;  %v17759_v54 = vld [vmem:[%s22130_s8 + $0x300] ss:$16 sps:$4 sm:$0xff]   ;;  %v11319_v59 = vld [vmem:[#allocation7 + $0x3b] ss:$64 sm:$0x80] }
 0x668   : > { %v11226_v60 = vor.u32 %v11225_v1, %v11224_v46  ;;  %v17779_v43 = vld [vmem:[%s22130_s8 + $0x364] ss:$16 sps:$4 sm:$0xff]   ;;  %v17782_v0 = vld [vmem:[%s22130_s8 + $0x36c] ss:$16 sps:$4 sm:$0xff]   ;;  %v17777_v30 = vld [vmem:[%s22130_s8 + $0x360] ss:$16 sps:$4 sm:$0xff]  }
 0x669   : > { %v11316_v61 = vor.u32 %v11315_v63, %v11314_v44  ;;  %v17780_v6 = vld [vmem:[%s22130_s8 + $0x368] ss:$16 sps:$4 sm:$0xff]   ;;  %v17785_v57 = vld [vmem:[%s22130_s8 + $0x384] ss:$16 sps:$4 sm:$0xff]   ;;  %v17794_v17 = vld [vmem:[%s22130_s8 + $0x3ac] ss:$16 sps:$4 sm:$0xff]  }
 0x66a   : > { %12951 = vmatpush1.bf16.msra.mxu0 %v17735_v2  ;;  %13115 = vmatpush1.bf16.msra.mxu1 %v17738_v19  ;;  %v11236_v2 = vor.u32 %v11235_v18, %v11234_v51  ;;  %v11304_v19 = vor.u32 %v11303_v32, %v11302_v45  ;;  %v11228_v13 = vor.u32 %v11227_v41, %v11226_v60  ;;  %v17791_v37 = vld [vmem:[%s22130_s8 + $0x3a4] ss:$16 sps:$4 sm:$0xff]   ;;  %v17795_v32 = vld [vmem:[%s22130_s8 + $0x3c0] ss:$16 sps:$4 sm:$0xff]   ;;  %v17798_v63 = vld [vmem:[%s22130_s8 + $0x3c8] ss:$16 sps:$4 sm:$0xff]  }
 0x66b   : > { %12952 = vmatprep.subr.bf16.mxu0 %v17743_v4  ;;  %13116 = vmatprep.subr.bf16.mxu1 %v17746_v49  ;;  %v11318_v28 = vor.u32 %v11317_v42, %v11316_v61  ;;  %v17770_v49 = vld [vmem:[%s22130_s8 + $0x32c] ss:$16 sps:$4 sm:$0xff]   ;;  %v17803_v9 = vld [vmem:[%s22130_s8 + $0x3e4] ss:$16 sps:$4 sm:$0xff]   ;;  %v17801_v45 = vld [vmem:[%s22130_s8 + $0x3e0] ss:$16 sps:$4 sm:$0xff]  }
 0x66c   : > { %v11238_v4 = vor.u32 %v11237_v31, %v11236_v2  ;;  %v11230_v21 = vor.u32 %v11229_v23, %v11228_v13  ;;  %v17804_v44 = vld [vmem:[%s22130_s8 + $0x3e8] ss:$16 sps:$4 sm:$0xff]   ;;  %v11329_v42 = vld [vmem:[#allocation8 + $0x10] sm:$0xff]  ;;  %v17812_v1 = vld [vmem:[%s22130_s8 + $0x40c] ss:$16 sps:$4 sm:$0xff]  }
 0x66d   : > { %v11320_v58 = vor.u32 %v11319_v59, %v11318_v28  ;;  %v17809_v38 = vld [vmem:[%s22130_s8 + $0x404] ss:$16 sps:$4 sm:$0xff]   ;;  %v11337_v51 = vpack.c.bf16 %v11329_v42, %v11329_v42  ;;  %v17807_v18 = vld [vmem:[%s22130_s8 + $0x400] ss:$16 sps:$4 sm:$0xff]   ;;  %v17818_v46 = vld [vmem:[%s22130_s8 + $0x42c] ss:$16 sps:$4 sm:$0xff]  }
 0x66e   : > { %12953 = vmatpush1.bf16.msra.mxu0 %v17741_v7  ;;  %13117 = vmatpush1.bf16.msra.mxu1 %v17744_v14  ;;  %v11241_v7 = vld [vmem:[#allocation7 + $0x39] ss:$64 sm:$0x10]  ;;  %v17765_v14 = vld [vmem:[%s22130_s8 + $0x320] ss:$16 sps:$4 sm:$0xff]  }
 0x66f   : > { %12954 = vmatprep.subr.bf16.mxu0 %v17749_v8  ;;  %13118 = vmatprep.subr.bf16.mxu1 %v17752_v16  ;;  %v11240_v8 = vor.u32 %v11239_v26, %v11238_v4  ;;  %v11321_v33 = vmax.f32 %v11304_v19, %v11320_v58  ;;  %v17815_v61 = vld [vmem:[%s22130_s8 + $0x424] ss:$16 sps:$4 sm:$0xff]   ;;  %v17813_v31 = vld [vmem:[%s22130_s8 + $0x420] ss:$16 sps:$4 sm:$0xff]   ;;  %v17816_v41 = vld [vmem:[%s22130_s8 + $0x428] ss:$16 sps:$4 sm:$0xff]  }
 0x670   : > { %v11113_v59 = vld [vmem:[#allocation7 + $0x22] ss:$64 sm:$0x2]  ;;  %v17821_v19 = vld [vmem:[%s22130_s8 + $0x444] ss:$16 sps:$4 sm:$0xff]  }
 0x671   : > { %v11242_v15 = vor.u32 %v11241_v7, %v11240_v8  ;;  %11323 = vrot.lane.b32.xlu0 %v11321_v33, %s22339_s20  ;;  %v11117_v28 = vld [vmem:[#allocation7 + $0x22] ss:$64 sm:$0x8]  ;;  %v17824_v60 = vld [vmem:[%s22130_s8 + $0x44c] ss:$16 sps:$4 sm:$0xff]  }
 0x672   : > { %12955 = vmatpush1.bf16.msra.mxu0 %v17747_v39  ;;  %13119 = vmatpush1.bf16.msra.mxu1 %v17750_v3  ;;  %v11232_v39 = vor.u32 %v11231_v50, %v11230_v21  ;;  %v17819_v23 = vld [vmem:[%s22130_s8 + $0x440] ss:$16 sps:$4 sm:$0xff]   ;;  %v17822_v4 = vld [vmem:[%s22130_s8 + $0x448] ss:$16 sps:$4 sm:$0xff]   ;;  %v17827_v13 = vld [vmem:[%s22130_s8 + $0x464] ss:$16 sps:$4 sm:$0xff]  }
 0x673   : > { %12956 = vmatprep.subr.bf16.mxu0 %v17755_v5  ;;  %13120 = vmatprep.subr.bf16.mxu1 %v17758_v25  ;;  %v11244_v16 = vor.u32 %v11243_v20, %v11242_v15  ;;  %v17786_v25 = vld [vmem:[%s22130_s8 + $0x388] ss:$16 sps:$4 sm:$0xff]   ;;  %v17830_v7 = vld [vmem:[%s22130_s8 + $0x46c] ss:$16 sps:$4 sm:$0xff]  }
 0x674   : > { %v11129_v58 = vld [vmem:[#allocation7 + $0x2a] ss:$64 sm:$0x2]  ;;  %v11121_v33 = vld [vmem:[#allocation7 + $0x22] ss:$64 sm:$0x20] }
 0x675   : > { %v11246_v3 = vor.u32 %v11245_v12, %v11244_v16  ;;  %v11131_v8 = vld [vmem:[#allocation7 + $0x2a] ss:$64 sm:$0x4]  ;;  %v11123_v21 = vld [vmem:[#allocation7 + $0x22] ss:$64 sm:$0x40] }
 0x676   : > { %12957 = vmatpush1.bf16.msra.mxu0 %v17753_v35  ;;  %13121 = vmatpush1.bf16.msra.mxu1 %v17756_v22  ;;  %v17797_v35 = vld [vmem:[%s22130_s8 + $0x3c4] ss:$16 sps:$4 sm:$0xff]   ;;  %v17800_v22 = vld [vmem:[%s22130_s8 + $0x3cc] ss:$16 sps:$4 sm:$0xff]   ;;  %v17828_v12 = vld [vmem:[%s22130_s8 + $0x468] ss:$16 sps:$4 sm:$0xff]  }
 0x677   : > { %12958 = vmatprep.subr.bf16.mxu0 %v17761_v55  ;;  %13122 = vmatprep.subr.bf16.mxu1 %v17764_v48  ;;  %v11248_v5 = vor.u32 %v11247_v62, %v11246_v3  ;;  %v17806_v55 = vld [vmem:[%s22130_s8 + $0x3ec] ss:$16 sps:$4 sm:$0xff]   ;;  %v17810_v48 = vld [vmem:[%s22130_s8 + $0x408] ss:$16 sps:$4 sm:$0xff]  }
 0x678   : > { %v11133_v20 = vld [vmem:[#allocation7 + $0x2a] ss:$64 sm:$0x8]  ;;  %v11040_v16 = vld [vmem:[#allocation7 + $0x20] ss:$64 sm:$0x1] }
 0x679   : > { %v11249_v52 = vmax.f32 %v11232_v39, %v11248_v5  ;;  %v11135_v15 = vld [vmem:[#allocation7 + $0x2a] ss:$64 sm:$0x10]  ;;  %v11041_v62 = vld [vmem:[#allocation7 + $0x20] ss:$64 sm:$0x2] }
 0x67a   : > { %12959 = vmatpush1.bf16.msra.mxu0 %v17759_v54  ;;  %13123 = vmatpush1.bf16.msra.mxu1 %v17762_v47  ;;  %v11112_v54 = vld [vmem:[#allocation7 + $0x22] ss:$64 sm:$0x1]  ;;  %v11043_v5 = vld [vmem:[#allocation7 + $0x20] ss:$64 sm:$0x4] }
 0x67b   : > { %12960 = vmatprep.subr.bf16.mxu0 %v17767_v56  ;;  %13124 = vmatprep.subr.bf16.mxu1 %v17770_v49  ;;  %v11114_v2 = vor.u32 %v11113_v59, %v11112_v54  ;;  %v11115_v47 = vld [vmem:[#allocation7 + $0x22] ss:$64 sm:$0x4]  ;;  %v11128_v49 = vld [vmem:[#allocation7 + $0x2a] ss:$64 sm:$0x1] }
 0x67c   : > { %11251 = vrot.lane.b32.xlu1 %v11249_v52, %s22339_s20  ;;  %v11119_v56 = vld [vmem:[#allocation7 + $0x22] ss:$64 sm:$0x10]  ;;  %v11061_v42 = vld [vmem:[#allocation7 + $0x28] ss:$64 sm:$0x8] }
 0x67d   : > { %v11116_v26 = vor.u32 %v11115_v47, %v11114_v2  ;;  %v11125_v3 = vld [vmem:[#allocation7 + $0x22] ss:$64 sm:$0x80]  ;;  %v17845_v2 = vld [vmem:[%s22130_s8 + $0x4c4] ss:$16 sps:$4 sm:$0xff]   ;;  %s13582_s20 = scalar_lea.sflag [#allocation10], %s22342_s17 }
 0x67e   : > { %12961 = vmatpush1.bf16.msra.mxu0 %v17765_v14  ;;  %13125 = vmatpush1.bf16.msra.mxu1 %v17768_v36  ;;  %v11130_v36 = vor.u32 %v11129_v58, %v11128_v49  ;;  %v11065_v47 = vld [vmem:[#allocation7 + $0x28] ss:$64 sm:$0x20]  ;;  %v17843_v49 = vld [vmem:[%s22130_s8 + $0x4c0] ss:$16 sps:$4 sm:$0xff]  }
 0x67f   : > { %12962 = vmatprep.subr.bf16.mxu0 %v17773_v27  ;;  %13126 = vmatprep.subr.bf16.mxu1 %v17776_v24  ;;  %v11118_v14 = vor.u32 %v11117_v28, %v11116_v26  ;;  %v17825_v24 = vld [vmem:[%s22130_s8 + $0x460] ss:$16 sps:$4 sm:$0xff]  }
 0x680   : > { %v11132_v50 = vor.u32 %v11131_v8, %v11130_v36  ;;  %v17854_v36 = vld [vmem:[%s22130_s8 + $0x4ec] ss:$16 sps:$4 sm:$0xff]  }
 0x681   : > { %v11120_v27 = vor.u32 %v11119_v56, %v11118_v14  ;;  %v11053_v56 = vld [vmem:[#allocation7 + $0x20] ss:$64 sm:$0x80]  ;;  %v17851_v14 = vld [vmem:[%s22130_s8 + $0x4e4] ss:$16 sps:$4 sm:$0xff]  }
 0x682   : > { %12963 = vmatpush1.bf16.msra.mxu0 %v17771_v40  ;;  %13127 = vmatpush1.bf16.msra.mxu1 %v17774_v34  ;;  %v17833_v40 = vld [vmem:[%s22130_s8 + $0x484] ss:$16 sps:$4 sm:$0xff]   ;;  %v17836_v34 = vld [vmem:[%s22130_s8 + $0x48c] ss:$16 sps:$4 sm:$0xff]  }
 0x683   : > { %12964 = vmatprep.subr.bf16.mxu0 %v17779_v43  ;;  %13128 = vmatprep.subr.bf16.mxu1 %v17782_v0  ;;  %v11122_v39 = vor.u32 %v11121_v33, %v11120_v27  ;;  %v11134_v43 = vor.u32 %v11133_v20, %v11132_v50  ;;  %v11042_v0 = vor.u32 %v11041_v62, %v11040_v16  ;;  %v17849_v27 = vld [vmem:[%s22130_s8 + $0x4e0] ss:$16 sps:$4 sm:$0xff]   ;;  %v17857_v50 = vld [vmem:[%s22130_s8 + $0x504] ss:$16 sps:$4 sm:$0xff]  }
 0x684   : > { %v17855_v16 = vld [vmem:[%s22130_s8 + $0x500] ss:$16 sps:$4 sm:$0xff]  }
 0x685   : > { %v11124_v52 = vor.u32 %v11123_v21, %v11122_v39  ;;  %v17852_v21 = vld [vmem:[%s22130_s8 + $0x4e8] ss:$16 sps:$4 sm:$0xff]  }
 0x686   : > { %12965 = vmatpush1.bf16.msra.mxu0 %v17777_v30  ;;  %13129 = vmatpush1.bf16.msra.mxu1 %v17780_v6  ;;  %v11137_v30 = vld [vmem:[#allocation7 + $0x2a] ss:$64 sm:$0x20]  ;;  %v11045_v6 = vld [vmem:[#allocation7 + $0x20] ss:$64 sm:$0x8] }
 0x687   : > { %12966 = vmatprep.subr.bf16.mxu0 %v17785_v57  ;;  %13130 = vmatprep.subr.bf16.mxu1 %v17788_v53  ;;  %v11136_v57 = vor.u32 %v11135_v15, %v11134_v43  ;;  %v11139_v53 = vld [vmem:[#allocation7 + $0x2a] ss:$64 sm:$0x40]  ;;  %v17860_v15 = vld [vmem:[%s22130_s8 + $0x50c] ss:$16 sps:$4 sm:$0xff]  }
 0x688   : > { %v17861_v43 = vld [vmem:[%s22130_s8 + $0x520] ss:$16 sps:$4 sm:$0xff]  }
 0x68a   : > { %12967 = vmatpush1.bf16.msra.mxu0 %v17783_v11  ;;  %13131 = vmatpush1.bf16.msra.mxu1 %v17786_v25  ;;  %v11044_v11 = vor.u32 %v11043_v5, %v11042_v0  ;;  %v11047_v25 = vld [vmem:[#allocation7 + $0x20] ss:$64 sm:$0x10]  ;;  %v17864_v0 = vld [vmem:[%s22130_s8 + $0x528] ss:$16 sps:$4 sm:$0xff]  }
 0x68b   : > { %12968 = vmatprep.subr.bf16.mxu0 %v17791_v37  ;;  %13132 = vmatprep.subr.bf16.mxu1 %v17794_v17  ;;  %v17831_v37 = vld [vmem:[%s22130_s8 + $0x480] ss:$16 sps:$4 sm:$0xff]   ;;  %v17834_v17 = vld [vmem:[%s22130_s8 + $0x488] ss:$16 sps:$4 sm:$0xff]   ;;  %v17869_v5 = vld [vmem:[%s22130_s8 + $0x544] ss:$16 sps:$4 sm:$0xff]  }
 0x68e   : > { %12969 = vmatpush1.bf16.msra.mxu0 %v17789_v29  ;;  %13133 = vmatpush1.bf16.msra.mxu1 %v17792_v10  ;;  %v11056_v29 = vld [vmem:[#allocation7 + $0x28] ss:$64 sm:$0x1] }
 0x68f   : > { %12970 = vmatprep.subr.bf16.mxu0 %v17797_v35  ;;  %13134 = vmatprep.subr.bf16.mxu1 %v17800_v22  ;;  %v11057_v10 = vld [vmem:[#allocation7 + $0x28] ss:$64 sm:$0x2]  ;;  %v17839_v35 = vld [vmem:[%s22130_s8 + $0x4a4] ss:$16 sps:$4 sm:$0xff]   ;;  %v11138_v22 = vor.u32 %v11137_v30, %v11136_v57 }
 0x690   : > { %v17872_v30 = vld [vmem:[%s22130_s8 + $0x54c] ss:$16 sps:$4 sm:$0xff]   ;;  %v17875_v57 = vld [vmem:[%s22130_s8 + $0x564] ss:$16 sps:$4 sm:$0xff]  }
 0x692   : > { %12971 = vmatpush1.bf16.msra.mxu0 %v17795_v32  ;;  %13135 = vmatpush1.bf16.msra.mxu1 %v17798_v63  ;;  %v11141_v32 = vld [vmem:[#allocation7 + $0x2a] ss:$64 sm:$0x80]  ;;  %v11046_v63 = vor.u32 %v11045_v6, %v11044_v11  ;;  %v17867_v6 = vld [vmem:[%s22130_s8 + $0x540] ss:$16 sps:$4 sm:$0xff]  }
 0x693   : > { %12972 = vmatprep.subr.bf16.mxu0 %v17803_v9  ;;  %13136 = vmatprep.subr.bf16.mxu1 %v17806_v55  ;;  %v11058_v9 = vor.u32 %v11057_v10, %v11056_v29  ;;  %v11059_v55 = vld [vmem:[#allocation7 + $0x28] ss:$64 sm:$0x4]  ;;  %v17873_v11 = vld [vmem:[%s22130_s8 + $0x560] ss:$16 sps:$4 sm:$0xff]  }
 0x694   : > { %v17879_v29 = vld [vmem:[%s22130_s8 + $0x580] ss:$16 sps:$4 sm:$0xff]   ;;  %v17882_v10 = vld [vmem:[%s22130_s8 + $0x588] ss:$16 sps:$4 sm:$0xff]  }
 0x696   : > { %12973 = vmatpush1.bf16.msra.mxu0 %v17801_v45  ;;  %13137 = vmatpush1.bf16.msra.mxu1 %v17804_v44  ;;  %v11126_v45 = vor.u32 %v11125_v3, %v11124_v52  ;;  %v11049_v44 = vld [vmem:[#allocation7 + $0x20] ss:$64 sm:$0x20]  ;;  %v17866_v3 = vld [vmem:[%s22130_s8 + $0x52c] ss:$16 sps:$4 sm:$0xff]  }
 0x697   : > { %12983 = vmatprep.subr.bf16.mxu0 %v17809_v38  ;;  %13147 = vmatprep.subr.bf16.mxu1 %v17812_v1  ;;  %v17842_v38 = vld [vmem:[%s22130_s8 + $0x4ac] ss:$16 sps:$4 sm:$0xff]   ;;  %v11140_v1 = vor.u32 %v11139_v53, %v11138_v22  ;;  %v17870_v52 = vld [vmem:[%s22130_s8 + $0x548] ss:$16 sps:$4 sm:$0xff]  }
 0x698   : > { %v17878_v53 = vld [vmem:[%s22130_s8 + $0x56c] ss:$16 sps:$4 sm:$0xff]  }
 0x699   : > { %12975 = vmatmul.mubr.bf16.vlgmr.msra.gmra.mrb[0].mxu0 %v11337_v51  ;;  %13139 = vmatmul.mubr.bf16.vlgmr.msra.gmra.mrb[0].mxu1 %v11337_v51  ;;  %v11048_v51 = vor.u32 %v11047_v25, %v11046_v63  ;;  %v11142_v54 = vor.u32 %v11141_v32, %v11140_v1  ;;  %v17876_v25 = vld [vmem:[%s22130_s8 + $0x568] ss:$16 sps:$4 sm:$0xff]   ;;  %v17890_v22 = vld [vmem:[%s22130_s8 + $0x5ac] ss:$16 sps:$4 sm:$0xff]   ;;  %v17885_v32 = vld [vmem:[%s22130_s8 + $0x5a0] ss:$16 sps:$4 sm:$0xff]  }
 0x69a   : > { %12984 = vmatpush1.bf16.msra.mxu0 %v17807_v18  ;;  %13148 = vmatpush1.bf16.msra.mxu1 %v17810_v48  ;;  %v11051_v18 = vld [vmem:[#allocation7 + $0x20] ss:$64 sm:$0x40]  ;;  %v11060_v48 = vor.u32 %v11059_v55, %v11058_v9  ;;  %v17888_v63 = vld [vmem:[%s22130_s8 + $0x5a8] ss:$16 sps:$4 sm:$0xff]  }
 0x69b   : > { %12985 = vmatprep.subr.bf16.mxu0 %v17815_v61  ;;  %13149 = vmatprep.subr.bf16.mxu1 %v17818_v46  ;;  %v17837_v61 = vld [vmem:[%s22130_s8 + $0x4a0] ss:$16 sps:$4 sm:$0xff]   ;;  %v11063_v46 = vld [vmem:[#allocation7 + $0x28] ss:$64 sm:$0x10]  ;;  %v11050_v59 = vor.u32 %v11049_v44, %v11048_v51  ;;  %v11143_v28 = vmax.f32 %v11126_v45, %v11142_v54 }
 0x69c   : > { %v17893_v9 = vld [vmem:[%s22130_s8 + $0x5c4] ss:$16 sps:$4 sm:$0xff]   ;;  %v17896_v55 = vld [vmem:[%s22130_s8 + $0x5cc] ss:$16 sps:$4 sm:$0xff]   ;;  %v17891_v45 = vld [vmem:[%s22130_s8 + $0x5c0] ss:$16 sps:$4 sm:$0xff]  }
 0x69d   : > { %v11052_v26 = vor.u32 %v11051_v18, %v11050_v59  ;;  %11144 = vst.msk [vmem:[#allocation8 + $0x28] sm:$0xff] %vm413_vm0, %v11143_v28  ;;  %v17894_v44 = vld [vmem:[%s22130_s8 + $0x5c8] ss:$16 sps:$4 sm:$0xff]   ;;  %v17897_v1 = vld [vmem:[%s22130_s8 + $0x5e0] ss:$16 sps:$4 sm:$0xff]  }
 0x69e   : > { %12986 = vmatpush1.bf16.msra.mxu0 %v17813_v31  ;;  %13150 = vmatpush1.bf16.msra.mxu1 %v17816_v41  ;;  %v17840_v31 = vld [vmem:[%s22130_s8 + $0x4a8] ss:$16 sps:$4 sm:$0xff]   ;;  %v11062_v41 = vor.u32 %v11061_v42, %v11060_v48  ;;  %v17899_v42 = vld [vmem:[%s22130_s8 + $0x5e4] ss:$16 sps:$4 sm:$0xff]   ;;  %v17908_v59 = vld [vmem:[%s22130_s8 + $0x60c] ss:$16 sps:$4 sm:$0xff]  }
 0x69f   : > { %12987 = vmatprep.subr.bf16.mxu0 %v17821_v19  ;;  %13151 = vmatprep.subr.bf16.mxu1 %v17824_v60  ;;  %v17848_v19 = vld [vmem:[%s22130_s8 + $0x4cc] ss:$16 sps:$4 sm:$0xff]   ;;  %v11180_v60 = vpop.permute.xlu0 %11179  ;;  %v11054_v8 = vor.u32 %v11053_v56, %v11052_v26  ;;  %v17900_v51 = vld [vmem:[%s22130_s8 + $0x5e8] ss:$16 sps:$4 sm:$0xff]   ;;  %v17911_v26 = vld [vmem:[%s22130_s8 + $0x624] ss:$16 sps:$4 sm:$0xff]  }
 0x6a0   : > { %11182 = vst.msk [vmem:[#allocation8 + $0x28] sm:$0xff] %vm10821_vm4, %v11180_v60  ;;  %v11256_v18 = vld [vmem:[#allocation7 + $0x32] ss:$64 sm:$0x1] }
 0x6a1   : > { %v11257_v48 = vld [vmem:[#allocation7 + $0x32] ss:$64 sm:$0x2]  ;;  %v11272_v56 = vld [vmem:[#allocation7 + $0x3a] ss:$64 sm:$0x1] }
 0x6a2   : > { %12988 = vmatpush1.bf16.msra.mxu0 %v17819_v23  ;;  %13152 = vmatpush1.bf16.msra.mxu1 %v17822_v4  ;;  %v11064_v23 = vor.u32 %v11063_v46, %v11062_v41  ;;  %v11067_v4 = vld [vmem:[#allocation7 + $0x28] ss:$64 sm:$0x40]  ;;  %v11259_v54 = vld [vmem:[#allocation7 + $0x32] ss:$64 sm:$0x4] }
 0x6a3   : > { %12989 = vmatprep.subr.bf16.mxu0 %v17827_v13  ;;  %13153 = vmatprep.subr.bf16.mxu1 %v17830_v7  ;;  %v17846_v13 = vld [vmem:[%s22130_s8 + $0x4c8] ss:$16 sps:$4 sm:$0xff]   ;;  %v11261_v41 = vld [vmem:[#allocation7 + $0x32] ss:$64 sm:$0x8] }
 0x6a4   : > { %v11066_v58 = vor.u32 %v11065_v47, %v11064_v23  ;;  %v11069_v7 = vld [vmem:[#allocation7 + $0x28] ss:$64 sm:$0x80]  ;;  %v11263_v28 = vld [vmem:[#allocation7 + $0x32] ss:$64 sm:$0x10] }
 0x6a5   : > { %v17906_v47 = vld [vmem:[%s22130_s8 + $0x608] ss:$16 sps:$4 sm:$0xff]  }
 0x6a6   : > { %12990 = vmatpush1.bf16.msra.mxu0 %v17825_v24  ;;  %13154 = vmatpush1.bf16.msra.mxu1 %v17828_v12  ;;  %v11068_v33 = vor.u32 %v11067_v4, %v11066_v58  ;;  %v11108_v12 = vpop.permute.xlu1 %11107  ;;  %v11273_v23 = vld [vmem:[#allocation7 + $0x3a] ss:$64 sm:$0x2]  ;;  %v17914_v4 = vld [vmem:[%s22130_s8 + $0x62c] ss:$16 sps:$4 sm:$0xff]  }
 0x6a7   : > { %12991 = vmatprep.subr.bf16.mxu0 %v17833_v40  ;;  %13155 = vmatprep.subr.bf16.mxu1 %v17836_v34  ;;  %v11332_v62 = vld [vmem:[#allocation8 + $0x28] sm:$0xff]  ;;  %v17863_v34 = vld [vmem:[%s22130_s8 + $0x524] ss:$16 sps:$4 sm:$0xff]   ;;  %v11274_v58 = vor.u32 %v11273_v23, %v11272_v56  ;;  %v11211_v23 = vld [vmem:[#allocation7 + $0x38] ss:$64 sm:$0x40] }
 0x6a8   : > { %v11070_v20 = vor.u32 %v11069_v7, %v11068_v33  ;;  %v17858_v40 = vld [vmem:[%s22130_s8 + $0x508] ss:$16 sps:$4 sm:$0xff]   ;;  %v11340_v39 = vpack.c.bf16 %v11332_v62, %v11332_v62  ;;  %v11265_v7 = vld [vmem:[#allocation7 + $0x32] ss:$64 sm:$0x20] }
 0x6a9   : > { %v11184_v62 = vld [vmem:[#allocation7 + $0x30] ss:$64 sm:$0x1] }
 0x6aa   : > { %12992 = vmatpush1.bf16.msra.mxu0 %v17831_v37  ;;  %13156 = vmatpush1.bf16.msra.mxu1 %v17834_v17  ;;  %v11071_v24 = vmax.f32 %v11054_v8, %v11070_v20  ;;  %v17881_v37 = vld [vmem:[%s22130_s8 + $0x584] ss:$16 sps:$4 sm:$0xff]   ;;  %v17884_v17 = vld [vmem:[%s22130_s8 + $0x58c] ss:$16 sps:$4 sm:$0xff]   ;;  %v17912_v8 = vld [vmem:[%s22130_s8 + $0x628] ss:$16 sps:$4 sm:$0xff]  }
 0x6ab   : > { %12993 = vmatprep.subr.bf16.mxu0 %v17839_v35  ;;  %13157 = vmatprep.subr.bf16.mxu1 %v17842_v38  ;;  %v17887_v35 = vld [vmem:[%s22130_s8 + $0x5a4] ss:$16 sps:$4 sm:$0xff]   ;;  %v17902_v38 = vld [vmem:[%s22130_s8 + $0x5ec] ss:$16 sps:$4 sm:$0xff]  }
 0x6ac   : > { %11072 = vst.msk [vmem:[#allocation8 + $0x20] sm:$0xff] %vm413_vm0, %v11071_v24  ;;  %13015 = vmatprep.mubr.bf16.mxu0 %v11340_v39  ;;  %13179 = vmatprep.mubr.bf16.mxu1 %v11340_v39  ;;  %v11267_v20 = vld [vmem:[#allocation7 + $0x32] ss:$64 sm:$0x40] }
 0x6ad   : > { %11110 = vst.msk [vmem:[#allocation8 + $0x20] sm:$0xff] %vm10821_vm4, %v11108_v12  ;;  %v11281_v12 = vld [vmem:[#allocation7 + $0x3a] ss:$64 sm:$0x20] }
 0x6ae   : > { %12994 = vmatpush1.bf16.msra.mxu0 %v17837_v61  ;;  %13158 = vmatpush1.bf16.msra.mxu1 %v17840_v31  ;;  %v17905_v61 = vld [vmem:[%s22130_s8 + $0x604] ss:$16 sps:$4 sm:$0xff]   ;;  %v11258_v31 = vor.u32 %v11257_v48, %v11256_v18  ;;  %v11195_v48 = vld [vmem:[#allocation7 + $0x30] ss:$64 sm:$0x40] }
 0x6af   : > { %12995 = vmatprep.subr.bf16.mxu0 %v17845_v2  ;;  %13159 = vmatprep.subr.bf16.mxu1 %v17848_v19  ;;  %v17903_v2 = vld [vmem:[%s22130_s8 + $0x600] ss:$16 sps:$4 sm:$0xff]  }
 0x6b0   : > { %v11260_v19 = vor.u32 %v11259_v54, %v11258_v31  ;;  %v11207_v54 = vld [vmem:[#allocation7 + $0x38] ss:$64 sm:$0x10] }
 0x6b2   : > { %12996 = vmatpush1.bf16.msra.mxu0 %v17843_v49  ;;  %13160 = vmatpush1.bf16.msra.mxu1 %v17846_v13  ;;  %v11262_v49 = vor.u32 %v11261_v41, %v11260_v19  ;;  %v11275_v13 = vld [vmem:[#allocation7 + $0x3a] ss:$64 sm:$0x4]  ;;  %v17935_v41 = vld [vmem:[%s22130_s8 + $0x6a4] ss:$16 sps:$4 sm:$0xff]  }
 0x6b3   : > { %12997 = vmatprep.subr.bf16.mxu0 %v17851_v14  ;;  %13161 = vmatprep.subr.bf16.mxu1 %v17854_v36  ;;  %v11277_v14 = vld [vmem:[#allocation7 + $0x3a] ss:$64 sm:$0x8]  ;;  %v17909_v36 = vld [vmem:[%s22130_s8 + $0x620] ss:$16 sps:$4 sm:$0xff]  }
 0x6b4   : > { %v11331_v46 = vld [vmem:[#allocation8 + $0x20] sm:$0xff]  ;;  %v11264_v33 = vor.u32 %v11263_v28, %v11262_v49  ;;  %v17938_v19 = vld [vmem:[%s22130_s8 + $0x6ac] ss:$16 sps:$4 sm:$0xff]   ;;  %v11197_v28 = vld [vmem:[#allocation7 + $0x30] ss:$64 sm:$0x80] }
 0x6b5   : > { %v11339_v60 = vpack.c.bf16 %v11331_v46, %v11331_v46  ;;  %v17927_v46 = vld [vmem:[%s22130_s8 + $0x680] ss:$16 sps:$4 sm:$0xff]   ;;  %v11213_v49 = vld [vmem:[#allocation7 + $0x38] ss:$64 sm:$0x80] }
 0x6b6   : > { %12998 = vmatpush1.bf16.msra.mxu0 %v17849_v27  ;;  %13162 = vmatpush1.bf16.msra.mxu1 %v17852_v21  ;;  %v11276_v27 = vor.u32 %v11275_v13, %v11274_v58  ;;  %v17917_v21 = vld [vmem:[%s22130_s8 + $0x644] ss:$16 sps:$4 sm:$0xff]   ;;  %v17936_v58 = vld [vmem:[%s22130_s8 + $0x6a8] ss:$16 sps:$4 sm:$0xff]  }
 0x6b7   : > { %12999 = vmatprep.subr.bf16.mxu0 %v17857_v50  ;;  %13163 = vmatprep.subr.bf16.mxu1 %v17860_v15  ;;  %v11279_v50 = vld [vmem:[#allocation7 + $0x3a] ss:$64 sm:$0x10]  ;;  %v11266_v15 = vor.u32 %v11265_v7, %v11264_v33  ;;  %v17941_v7 = vld [vmem:[%s22130_s8 + $0x6c4] ss:$16 sps:$4 sm:$0xff]  }
 0x6b8   : > { %v11278_v24 = vor.u32 %v11277_v14, %v11276_v27  ;;  %v17944_v14 = vld [vmem:[%s22130_s8 + $0x6cc] ss:$16 sps:$4 sm:$0xff]   ;;  %v17939_v33 = vld [vmem:[%s22130_s8 + $0x6c0] ss:$16 sps:$4 sm:$0xff]  }
 0x6b9   : > { %v11268_v39 = vor.u32 %v11267_v20, %v11266_v15  ;;  %v17942_v20 = vld [vmem:[%s22130_s8 + $0x6c8] ss:$16 sps:$4 sm:$0xff]   ;;  %v17950_v15 = vld [vmem:[%s22130_s8 + $0x6ec] ss:$16 sps:$4 sm:$0xff]  }
 0x6ba   : > { %13000 = vmatpush1.bf16.msra.mxu0 %v17855_v16  ;;  %13164 = vmatpush1.bf16.msra.mxu1 %v17858_v40  ;;  %v17920_v16 = vld [vmem:[%s22130_s8 + $0x64c] ss:$16 sps:$4 sm:$0xff]   ;;  %v17915_v40 = vld [vmem:[%s22130_s8 + $0x640] ss:$16 sps:$4 sm:$0xff]  }
 0x6bb   : > { %13001 = vmatprep.subr.bf16.mxu0 %v17863_v34  ;;  %13165 = vmatprep.subr.bf16.mxu1 %v17866_v3  ;;  %v17918_v34 = vld [vmem:[%s22130_s8 + $0x648] ss:$16 sps:$4 sm:$0xff]   ;;  %v11280_v3 = vor.u32 %v11279_v50, %v11278_v24 }
 0x6be   : > { %13002 = vmatpush1.bf16.msra.mxu0 %v17861_v43  ;;  %13166 = vmatpush1.bf16.msra.mxu1 %v17864_v0  ;;  %v11185_v43 = vld [vmem:[#allocation7 + $0x30] ss:$64 sm:$0x2] }
 0x6bf   : > { %13003 = vmatprep.subr.bf16.mxu0 %v17869_v5  ;;  %13167 = vmatprep.subr.bf16.mxu1 %v17872_v30  ;;  %v11187_v0 = vld [vmem:[#allocation7 + $0x30] ss:$64 sm:$0x4]  ;;  %v17923_v5 = vld [vmem:[%s22130_s8 + $0x664] ss:$16 sps:$4 sm:$0xff]  }
 0x6c0   : > { %v17926_v30 = vld [vmem:[%s22130_s8 + $0x66c] ss:$16 sps:$4 sm:$0xff]  }
 0x6c2   : > { %13004 = vmatpush1.bf16.msra.mxu0 %v17867_v6  ;;  %13168 = vmatpush1.bf16.msra.mxu1 %v17870_v52  ;;  %v11269_v6 = vld [vmem:[#allocation7 + $0x32] ss:$64 sm:$0x80]  ;;  %v11283_v52 = vld [vmem:[#allocation7 + $0x3a] ss:$64 sm:$0x40] }
 0x6c3   : > { %13005 = vmatprep.subr.bf16.mxu0 %v17875_v57  ;;  %13169 = vmatprep.subr.bf16.mxu1 %v17878_v53  ;;  %v11186_v57 = vor.u32 %v11185_v43, %v11184_v62  ;;  %v11282_v53 = vor.u32 %v11281_v12, %v11280_v3  ;;  %v17945_v12 = vld [vmem:[%s22130_s8 + $0x6e0] ss:$16 sps:$4 sm:$0xff]   ;;  %v17953_v62 = vld [vmem:[%s22130_s8 + $0x704] ss:$16 sps:$4 sm:$0xff]  }
 0x6c4   : > { %v17959_v3 = vld [vmem:[%s22130_s8 + $0x724] ss:$16 sps:$4 sm:$0xff]  }
 0x6c6   : > { %13006 = vmatpush1.bf16.msra.mxu0 %v17873_v11  ;;  %13170 = vmatpush1.bf16.msra.mxu1 %v17876_v25  ;;  %v11285_v11 = vld [vmem:[#allocation7 + $0x3a] ss:$64 sm:$0x80]  ;;  %v11189_v25 = vld [vmem:[#allocation7 + $0x30] ss:$64 sm:$0x8] }
 0x6c7   : > { %13007 = vmatprep.subr.bf16.mxu0 %v17881_v37  ;;  %13171 = vmatprep.subr.bf16.mxu1 %v17884_v17  ;;  %v11188_v37 = vor.u32 %v11187_v0, %v11186_v57  ;;  %v11191_v17 = vld [vmem:[#allocation7 + $0x30] ss:$64 sm:$0x10]  ;;  %v17965_v57 = vld [vmem:[%s22130_s8 + $0x744] ss:$16 sps:$4 sm:$0xff]  }
 0x6ca   : > { %13008 = vmatpush1.bf16.msra.mxu0 %v17879_v29  ;;  %13172 = vmatpush1.bf16.msra.mxu1 %v17882_v10  ;;  %v11200_v29 = vld [vmem:[#allocation7 + $0x38] ss:$64 sm:$0x1]  ;;  %v11270_v10 = vor.u32 %v11269_v6, %v11268_v39  ;;  %v17957_v6 = vld [vmem:[%s22130_s8 + $0x720] ss:$16 sps:$4 sm:$0xff]  }
 0x6cb   : > { %13009 = vmatprep.subr.bf16.mxu0 %v17887_v35  ;;  %13173 = vmatprep.subr.bf16.mxu1 %v17890_v22  ;;  %v11284_v35 = vor.u32 %v11283_v52, %v11282_v53  ;;  %v11201_v22 = vld [vmem:[#allocation7 + $0x38] ss:$64 sm:$0x2]  ;;  %v17968_v53 = vld [vmem:[%s22130_s8 + $0x74c] ss:$16 sps:$4 sm:$0xff]  }
 0x6cc   : > { %v17954_v39 = vld [vmem:[%s22130_s8 + $0x708] ss:$16 sps:$4 sm:$0xff]  }
 0x6cd   : > { %v17960_v52 = vld [vmem:[%s22130_s8 + $0x728] ss:$16 sps:$4 sm:$0xff]  }
 0x6ce   : > { %13010 = vmatpush1.bf16.msra.mxu0 %v17885_v32  ;;  %13174 = vmatpush1.bf16.msra.mxu1 %v17888_v63  ;;  %v11203_v32 = vld [vmem:[#allocation7 + $0x38] ss:$64 sm:$0x4]  ;;  %v17921_v63 = vld [vmem:[%s22130_s8 + $0x660] ss:$16 sps:$4 sm:$0xff]  }
 0x6cf   : > { %13011 = vmatprep.subr.bf16.mxu0 %v17893_v9  ;;  %13175 = vmatprep.subr.bf16.mxu1 %v17896_v55  ;;  %v17924_v9 = vld [vmem:[%s22130_s8 + $0x668] ss:$16 sps:$4 sm:$0xff]   ;;  %v17929_v55 = vld [vmem:[%s22130_s8 + $0x684] ss:$16 sps:$4 sm:$0xff]  }
 0x6d2   : > { %13012 = vmatpush1.bf16.msra.mxu0 %v17891_v45  ;;  %13176 = vmatpush1.bf16.msra.mxu1 %v17894_v44  ;;  %v11190_v45 = vor.u32 %v11189_v25, %v11188_v37  ;;  %v11202_v44 = vor.u32 %v11201_v22, %v11200_v29  ;;  %v17966_v25 = vld [vmem:[%s22130_s8 + $0x748] ss:$16 sps:$4 sm:$0xff]   ;;  %v17971_v37 = vld [vmem:[%s22130_s8 + $0x764] ss:$16 sps:$4 sm:$0xff]   ;;  %v17969_v29 = vld [vmem:[%s22130_s8 + $0x760] ss:$16 sps:$4 sm:$0xff]  }
 0x6d3   : > { %13013 = vmatprep.subr.bf16.mxu0 %v17899_v42  ;;  %13177 = vmatprep.subr.bf16.mxu1 %v17902_v38  ;;  %v11286_v42 = vor.u32 %v11285_v11, %v11284_v35  ;;  %v11193_v38 = vld [vmem:[#allocation7 + $0x30] ss:$64 sm:$0x20]  ;;  %v17977_v35 = vld [vmem:[%s22130_s8 + $0x784] ss:$16 sps:$4 sm:$0xff]  }
 0x6d4   : > { %v11192_v18 = vor.u32 %v11191_v17, %v11190_v45  ;;  %v17963_v11 = vld [vmem:[%s22130_s8 + $0x740] ss:$16 sps:$4 sm:$0xff]   ;;  %v17974_v17 = vld [vmem:[%s22130_s8 + $0x76c] ss:$16 sps:$4 sm:$0xff]  }
 0x6d5   : > { %v11287_v31 = vmax.f32 %v11270_v10, %v11286_v42  ;;  %v17972_v10 = vld [vmem:[%s22130_s8 + $0x768] ss:$16 sps:$4 sm:$0xff]   ;;  %v17980_v22 = vld [vmem:[%s22130_s8 + $0x78c] ss:$16 sps:$4 sm:$0xff]   ;;  %v17981_v45 = vld [vmem:[%s22130_s8 + $0x7a0] ss:$16 sps:$4 sm:$0xff]  }
 0x6d6   : > { %13014 = vmatpush1.bf16.msra.mxu0 %v17897_v1  ;;  %13178 = vmatpush1.bf16.msra.mxu1 %v17900_v51  ;;  %v11205_v1 = vld [vmem:[#allocation7 + $0x38] ss:$64 sm:$0x8]  ;;  %v17932_v51 = vld [vmem:[%s22130_s8 + $0x68c] ss:$16 sps:$4 sm:$0xff]  }
 0x6d7   : > { %13024 = vmatprep.subr.bf16.mxu0 %v17905_v61  ;;  %13188 = vmatprep.subr.bf16.mxu1 %v17908_v59  ;;  %v11204_v61 = vor.u32 %v11203_v32, %v11202_v44  ;;  %v17930_v59 = vld [vmem:[%s22130_s8 + $0x688] ss:$16 sps:$4 sm:$0xff]   ;;  %11288 = vst.msk [vmem:[#allocation8 + $0x38] sm:$0xff] %vm413_vm0, %v11287_v31  ;;  %v17975_v32 = vld [vmem:[%s22130_s8 + $0x780] ss:$16 sps:$4 sm:$0xff]  }
 0x6d8   : > { %v17984_v44 = vld [vmem:[%s22130_s8 + $0x7a8] ss:$16 sps:$4 sm:$0xff]   ;;  %v17989_v42 = vld [vmem:[%s22130_s8 + $0x7c4] ss:$16 sps:$4 sm:$0xff]  }
 0x6d9   : > { %13016 = vmatmul.mubr.bf16.vlgmr.msra.gmra.mrb[0].mxu0 %v11339_v60  ;;  %13180 = vmatmul.mubr.bf16.vlgmr.msra.gmra.mrb[0].mxu1 %v11339_v60  ;;  %v11209_v60 = vld [vmem:[#allocation7 + $0x38] ss:$64 sm:$0x20] }
 0x6da   : > { %13025 = vmatpush1.bf16.msra.mxu0 %v17903_v2  ;;  %13189 = vmatpush1.bf16.msra.mxu1 %v17906_v47  ;;  %v11194_v2 = vor.u32 %v11193_v38, %v11192_v18  ;;  %v11206_v47 = vor.u32 %v11205_v1, %v11204_v61  ;;  %v17992_v38 = vld [vmem:[%s22130_s8 + $0x7cc] ss:$16 sps:$4 sm:$0xff]   ;;  %v17987_v1 = vld [vmem:[%s22130_s8 + $0x7c0] ss:$16 sps:$4 sm:$0xff]   ;;  %v17995_v18 = vld [vmem:[%s22130_s8 + $0x7e4] ss:$16 sps:$4 sm:$0xff]  }
 0x6db   : > { %13026 = vmatprep.subr.bf16.mxu0 %v17911_v26  ;;  %13190 = vmatprep.subr.bf16.mxu1 %v17914_v4  ;;  %v17933_v4 = vld [vmem:[%s22130_s8 + $0x6a0] ss:$16 sps:$4 sm:$0xff]  }
 0x6dc   : > { %v11196_v26 = vor.u32 %v11195_v48, %v11194_v2  ;;  %v11208_v56 = vor.u32 %v11207_v54, %v11206_v47  ;;  %v17998_v48 = vld [vmem:[%s22130_s8 + $0x7ec] ss:$16 sps:$4 sm:$0xff]   ;;  %v17993_v61 = vld [vmem:[%s22130_s8 + $0x7e0] ss:$16 sps:$4 sm:$0xff]  }
 0x6dd   : > { %v17999_v54 = vld [vmem:[%s22132_s10 + $0x40] sm:$0xff]  }
 0x6de   : > { %13027 = vmatpush1.bf16.msra.mxu0 %v17909_v36  ;;  %13191 = vmatpush1.bf16.msra.mxu1 %v17912_v8  ;;  %v11210_v13 = vor.u32 %v11209_v60, %v11208_v56  ;;  %v11198_v36 = vor.u32 %v11197_v28, %v11196_v26  ;;  %v18001_v2 = vld [vmem:[%s22132_s10] sm:$0xff]   ;;  %v18004_v28 = vld [vmem:[%s22132_s10 + $0xc8] sm:$0xff]   ;;  %v18007_v56 = vld [vmem:[%s22132_s10 + $0x50] sm:$0xff]  }
 0x6df   : > { %13028 = vmatprep.subr.bf16.mxu0 %v17917_v21  ;;  %13192 = vmatprep.subr.bf16.mxu1 %v17920_v16  ;;  %v17947_v21 = vld [vmem:[%s22130_s8 + $0x6e4] ss:$16 sps:$4 sm:$0xff]   ;;  %v17948_v16 = vld [vmem:[%s22130_s8 + $0x6e8] ss:$16 sps:$4 sm:$0xff]  }
 0x6e0   : > { %v11212_v8 = vor.u32 %v11211_v23, %v11210_v13  ;;  %v18002_v47 = vld [vmem:[%s22132_s10 + $0x80] sm:$0xff]   ;;  %v18005_v60 = vld [vmem:[%s22132_s10 + $0x8] sm:$0xff]   ;;  %v18008_v23 = vld [vmem:[%s22132_s10 + $0xd0] sm:$0xff]  }
 0x6e1   : > { %v18006_v26 = vld [vmem:[%s22132_s10 + $0x88] sm:$0xff]   ;;  %v18012_v13 = vld [vmem:[%s22132_s10 + $0xd8] sm:$0xff]  }
 0x6e2   : > { %13029 = vmatpush1.bf16.msra.mxu0 %v17915_v40  ;;  %13193 = vmatpush1.bf16.msra.mxu1 %v17918_v34  ;;  %v11214_v27 = vor.u32 %v11213_v49, %v11212_v8  ;;  %v17956_v40 = vld [vmem:[%s22130_s8 + $0x70c] ss:$16 sps:$4 sm:$0xff]   ;;  %v17951_v34 = vld [vmem:[%s22130_s8 + $0x700] ss:$16 sps:$4 sm:$0xff]  }
 0x6e3   : > { %13030 = vmatprep.subr.bf16.mxu0 %v17923_v5  ;;  %13194 = vmatprep.subr.bf16.mxu1 %v17926_v30  ;;  %v11324_v50 = vpop.permute.xlu0 %11323  ;;  %v17962_v5 = vld [vmem:[%s22130_s8 + $0x72c] ss:$16 sps:$4 sm:$0xff]   ;;  %v18010_v49 = vld [vmem:[%s22132_s10 + $0x90] sm:$0xff]   ;;  %v18016_v8 = vld [vmem:[%s22132_s10 + $0xe0] sm:$0xff]  }
 0x6e4   : > { %11326 = vst.msk [vmem:[#allocation8 + $0x38] sm:$0xff] %vm10821_vm4, %v11324_v50  ;;  %v11215_v24 = vmax.f32 %v11198_v36, %v11214_v27  ;;  %v18015_v36 = vld [vmem:[%s22132_s10 + $0x60] sm:$0xff]   ;;  %v18019_v27 = vld [vmem:[%s22132_s10 + $0x68] sm:$0xff]  }
 0x6e5   : > { %v18021_v50 = vld [vmem:[%s22132_s10 + $0x28] sm:$0xff]  }
 0x6e6   : > { %13031 = vmatpush1.bf16.msra.mxu0 %v17921_v63  ;;  %13195 = vmatpush1.bf16.msra.mxu1 %v17924_v9  ;;  %11216 = vst.msk [vmem:[#allocation8 + $0x30] sm:$0xff] %vm413_vm0, %v11215_v24  ;;  %v17978_v63 = vld [vmem:[%s22130_s8 + $0x788] ss:$16 sps:$4 sm:$0xff]   ;;  %v17983_v9 = vld [vmem:[%s22130_s8 + $0x7a4] ss:$16 sps:$4 sm:$0xff]  }
 0x6e7   : > { %13032 = vmatprep.subr.bf16.mxu0 %v17929_v55  ;;  %13196 = vmatprep.subr.bf16.mxu1 %v17932_v51  ;;  %v17986_v55 = vld [vmem:[%s22130_s8 + $0x7ac] ss:$16 sps:$4 sm:$0xff]   ;;  %v17990_v51 = vld [vmem:[%s22130_s8 + $0x7c8] ss:$16 sps:$4 sm:$0xff]   ;;  %v18023_v24 = vld [vmem:[%s22132_s10 + $0x70] sm:$0xff]  }
 0x6ea   : > { %13033 = vmatpush1.bf16.msra.mxu0 %v17927_v46  ;;  %13197 = vmatpush1.bf16.msra.mxu1 %v17930_v59  ;;  %v17996_v46 = vld [vmem:[%s22130_s8 + $0x7e8] ss:$16 sps:$4 sm:$0xff]   ;;  %v18000_v59 = vld [vmem:[%s22132_s10 + $0xc0] sm:$0xff]  }
 0x6eb   : > { %13034 = vmatprep.subr.bf16.mxu0 %v17935_v41  ;;  %13198 = vmatprep.subr.bf16.mxu1 %v17938_v19  ;;  %v11334_v0 = vld [vmem:[#allocation8 + $0x38] sm:$0xff]  ;;  %v18003_v19 = vld [vmem:[%s22132_s10 + $0x48] sm:$0xff]  }
 0x6ec   : > { %v11342_v30 = vpack.c.bf16 %v11334_v0, %v11334_v0 }
 0x6ee   : > { %13035 = vmatpush1.bf16.msra.mxu0 %v17933_v4  ;;  %13199 = vmatpush1.bf16.msra.mxu1 %v17936_v58  ;;  %v11252_v43 = vpop.permute.xlu1 %11251  ;;  %v18009_v4 = vld [vmem:[%s22132_s10 + $0x10] sm:$0xff]   ;;  %v18011_v58 = vld [vmem:[%s22132_s10 + $0x58] sm:$0xff]  }
 0x6ef   : > { %13036 = vmatprep.subr.bf16.mxu0 %v17941_v7  ;;  %13200 = vmatprep.subr.bf16.mxu1 %v17944_v14  ;;  %11254 = vst.msk [vmem:[#allocation8 + $0x30] sm:$0xff] %vm10821_vm4, %v11252_v43  ;;  %v18013_v7 = vld [vmem:[%s22132_s10 + $0x18] sm:$0xff]   ;;  %v11601_v43 = vlaneseq }
 0x6f0   : > { %13056 = vmatprep.mubr.bf16.mxu0 %v11342_v30  ;;  %13220 = vmatprep.mubr.bf16.mxu1 %v11342_v30  ;;  %v18014_v14 = vld [vmem:[%s22132_s10 + $0x98] sm:$0xff]  }
 0x6f1   : > { %v11602_v0 = vshrl.u32 %v11601_v43, 7 }
 0x6f2   : > { %13037 = vmatpush1.bf16.msra.mxu0 %v17939_v33  ;;  %13201 = vmatpush1.bf16.msra.mxu1 %v17942_v20  ;;  %v18017_v33 = vld [vmem:[%s22132_s10 + $0x20] sm:$0xff]  }
 0x6f3   : > { %13038 = vmatprep.subr.bf16.mxu0 %v17947_v21  ;;  %13202 = vmatprep.subr.bf16.mxu1 %v17950_v15  ;;  %v18018_v20 = vld [vmem:[%s22132_s10 + $0xa0] sm:$0xff]   ;;  %v18020_v21 = vld [vmem:[%s22132_s10 + $0xe8] sm:$0xff]   ;;  %v11611_v30 = vsub.s32 2, %v11602_v0 }
 0x6f4   : > { %v18022_v15 = vld [vmem:[%s22132_s10 + $0xa8] sm:$0xff]  }
 0x6f6   : > { %13039 = vmatpush1.bf16.msra.mxu0 %v17945_v12  ;;  %13203 = vmatpush1.bf16.msra.mxu1 %v17948_v16  ;;  %v11333_v31 = vld [vmem:[#allocation8 + $0x30] sm:$0xff] }
 0x6f7   : > { %13040 = vmatprep.subr.bf16.mxu0 %v17953_v62  ;;  %13204 = vmatprep.subr.bf16.mxu1 %v17956_v40  ;;  %v11341_v41 = vpack.c.bf16 %v11333_v31, %v11333_v31  ;;  %v18024_v12 = vld [vmem:[%s22132_s10 + $0xf0] sm:$0xff]   ;;  %v18027_v40 = vld [vmem:[%s22132_s10 + $0x78] sm:$0xff]  }
 0x6f8   : > { %v18025_v16 = vld [vmem:[%s22132_s10 + $0x30] sm:$0xff]  }
 0x6f9   : > { %v18026_v62 = vld [vmem:[%s22132_s10 + $0xb0] sm:$0xff]  }
 0x6fa   : > { %13041 = vmatpush1.bf16.msra.mxu0 %v17951_v34  ;;  %13205 = vmatpush1.bf16.msra.mxu1 %v17954_v39  ;;  %v18028_v34 = vld [vmem:[%s22132_s10 + $0xf8] sm:$0xff]  }
 0x6fb   : > { %13042 = vmatprep.subr.bf16.mxu0 %v17959_v3  ;;  %13206 = vmatprep.subr.bf16.mxu1 %v17962_v5  ;;  %v18029_v39 = vld [vmem:[%s22132_s10 + $0x38] sm:$0xff]   ;;  %v11603_v5 = vsub.s32 0, %v11602_v0 }
 0x6fc   : > { %v18030_v3 = vld [vmem:[%s22132_s10 + $0xb8] sm:$0xff]  }
 0x6fe   : > { %13043 = vmatpush1.bf16.msra.mxu0 %v17957_v6  ;;  %13207 = vmatpush1.bf16.msra.mxu1 %v17960_v52  ;;  %v11599_v6 = vld [vmem:[%s22131_s9] sm:$0xf]  ;;  %v11607_v52 = vsub.s32 1, %v11602_v0 }
 0x6ff   : > { %13044 = vmatprep.subr.bf16.mxu0 %v17965_v57  ;;  %13208 = vmatprep.subr.bf16.mxu1 %v17968_v53  ;;  %v11615_v57 = vsub.s32 3, %v11602_v0  ;;  %v11604_v53 = vrot.slane %v11599_v6, %v11603_v5 }
 0x702   : > { %13045 = vmatpush1.bf16.msra.mxu0 %v17963_v11  ;;  %13209 = vmatpush1.bf16.msra.mxu1 %v17966_v25  ;;  %v11612_v11 = vrot.slane %v11599_v6, %v11611_v30  ;;  %v11608_v25 = vrot.slane %v11599_v6, %v11607_v52 }
 0x703   : > { %13046 = vmatprep.subr.bf16.mxu0 %v17971_v37  ;;  %13210 = vmatprep.subr.bf16.mxu1 %v17974_v17  ;;  %v11616_v37 = vrot.slane %v11599_v6, %v11615_v57 }
 0x706   : > { %13047 = vmatpush1.bf16.msra.mxu0 %v17969_v29  ;;  %13211 = vmatpush1.bf16.msra.mxu1 %v17972_v10 }
 0x707   : > { %13048 = vmatprep.subr.bf16.mxu0 %v17977_v35  ;;  %13212 = vmatprep.subr.bf16.mxu1 %v17980_v22 }
 0x70a   : > { %13049 = vmatpush1.bf16.msra.mxu0 %v17975_v32  ;;  %13213 = vmatpush1.bf16.msra.mxu1 %v17978_v63 }
 0x70b   : > { %13050 = vmatprep.subr.bf16.mxu0 %v17983_v9  ;;  %13214 = vmatprep.subr.bf16.mxu1 %v17986_v55 }
 0x70e   : > { %13051 = vmatpush1.bf16.msra.mxu0 %v17981_v45  ;;  %13215 = vmatpush1.bf16.msra.mxu1 %v17984_v44 }
 0x70f   : > { %13052 = vmatprep.subr.bf16.mxu0 %v17989_v42  ;;  %13216 = vmatprep.subr.bf16.mxu1 %v17992_v38 }
 0x712   : > { %13053 = vmatpush1.bf16.msra.mxu0 %v17987_v1  ;;  %13217 = vmatpush1.bf16.msra.mxu1 %v17990_v51 }
 0x713   : > { %13054 = vmatprep.subr.bf16.mxu0 %v17995_v18  ;;  %13218 = vmatprep.subr.bf16.mxu1 %v17998_v48 }
 0x716   : > { %13055 = vmatpush1.bf16.msra.mxu0 %v17993_v61  ;;  %13219 = vmatpush1.bf16.msra.mxu1 %v17996_v46 }
 0x717   : > { %15539 = vmatprep.subr.bf16.mxu0 %v17999_v54  ;;  %15561 = vmatprep.subr.bf16.mxu1 %v18000_v59 }
 0x719   : > { %13057 = vmatmul.mubr.bf16.vlgmr.msra.gmra.mrb[0].mxu0 %v11341_v41  ;;  %13221 = vmatmul.mubr.bf16.vlgmr.msra.gmra.mrb[0].mxu1 %v11341_v41  ;;  %v14962_v41 = vld [vmem:[%s22133_s11] ss:$0 sm:$0xff] }
 0x71a   : > { %15540 = vmatpush3.bf16.msra.mxu0 %v18001_v2  ;;  %15562 = vmatpush3.bf16.msra.mxu1 %v18002_v47 }
 0x71b   : > { %15541 = vmatprep.subr.bf16.mxu0 %v18003_v19  ;;  %15563 = vmatprep.subr.bf16.mxu1 %v18004_v28 }
 0x71e   : > { %15542 = vmatpush3.bf16.msra.mxu0 %v18005_v60  ;;  %15564 = vmatpush3.bf16.msra.mxu1 %v18006_v26 }
 0x71f   : > { %15543 = vmatprep.subr.bf16.mxu0 %v18007_v56  ;;  %15565 = vmatprep.subr.bf16.mxu1 %v18008_v23 }
 0x722   : > { %15544 = vmatpush3.bf16.msra.mxu0 %v18009_v4  ;;  %15566 = vmatpush3.bf16.msra.mxu1 %v18010_v49 }
 0x723   : > { %15545 = vmatprep.subr.bf16.mxu0 %v18011_v58  ;;  %15567 = vmatprep.subr.bf16.mxu1 %v18012_v13 }
 0x726   : > { %15546 = vmatpush3.bf16.msra.mxu0 %v18013_v7  ;;  %15568 = vmatpush3.bf16.msra.mxu1 %v18014_v14 }
 0x727   : > { %15547 = vmatprep.subr.bf16.mxu0 %v18015_v36  ;;  %15569 = vmatprep.subr.bf16.mxu1 %v18016_v8 }
 0x72a   : > { %15548 = vmatpush3.bf16.msra.mxu0 %v18017_v33  ;;  %15570 = vmatpush3.bf16.msra.mxu1 %v18018_v20 }
 0x72b   : > { %15549 = vmatprep.subr.bf16.mxu0 %v18019_v27  ;;  %15571 = vmatprep.subr.bf16.mxu1 %v18020_v21 }
 0x72e   : > { %15550 = vmatpush3.bf16.msra.mxu0 %v18021_v50  ;;  %15572 = vmatpush3.bf16.msra.mxu1 %v18022_v15 }
 0x72f   : > { %15551 = vmatprep.subr.bf16.mxu0 %v18023_v24  ;;  %15573 = vmatprep.subr.bf16.mxu1 %v18024_v12 }
 0x732   : > { %15552 = vmatpush3.bf16.msra.mxu0 %v18025_v16  ;;  %15574 = vmatpush3.bf16.msra.mxu1 %v18026_v62 }
 0x733   : > { %15553 = vmatprep.subr.bf16.mxu0 %v18027_v40  ;;  %15575 = vmatprep.subr.bf16.mxu1 %v18028_v34 }
 0x736   : > { %15554 = vmatpush3.bf16.msra.mxu0 %v18029_v39  ;;  %15576 = vmatpush3.bf16.msra.mxu1 %v18030_v3 }
 0x7ec   : > { %v13058_v17 = vpop.f32.mrb[0].mxu0  ;;  %v13222_v29 = vpop.f32.mrb[0].mxu1 }
 0x7ed   : > { %v17355_v10 = vadd.f32 %v13058_v17, %v11604_v53  ;;  %v17357_v35 = vadd.f32 %v13222_v29, %v11612_v11  ;;  %v13060_v22 = vpop.f32.mrb[1].mxu0  ;;  %v13224_v32 = vpop.f32.mrb[1].mxu1 }
 0x7ee   : > { %v17356_v63 = vadd.f32 %v13060_v22, %v11608_v25  ;;  %v17358_v9 = vadd.f32 %v13224_v32, %v11616_v37  ;;  %v13062_v55 = vpop.f32.mrb[2].mxu0  ;;  %v13226_v45 = vpop.f32.mrb[2].mxu1 }
 0x7ef   : > { %v13229_v44 = vmax.f32 %v17355_v10, 0.0  ;;  %v13231_v42 = vmax.f32 %v17357_v35, 0.0  ;;  %v13063_v38 = vpop.f32.mrb[3].mxu0  ;;  %v13227_v1 = vpop.f32.mrb[3].mxu1 }
 0x7f0   : > { %v13230_v51 = vmax.f32 %v17356_v63, 0.0  ;;  %v13232_v18 = vmax.f32 %v17358_v9, 0.0 }
 0x7f1   : > { %v13233_v46 = vpack.c.bf16 %v13229_v44, %v13229_v44  ;;  %v13235_v31 = vpack.c.bf16 %v13231_v42, %v13231_v42 }
 0x7f2   : > { %v13234_v48 = vpack.c.bf16 %v13230_v51, %v13230_v51  ;;  %v13236_v61 = vpack.c.bf16 %v13232_v18, %v13232_v18 }
 0x7f4   : > { %13532 = vmatprep.mubr.bf16.mxu0 %v13234_v48  ;;  %13572 = vmatprep.mubr.bf16.mxu1 %v13236_v61 }
 0x7f5   : > { %13533 = vmatmul.mubr.bf16.vlgmr.msra.gmra.mrb[4].mxu0 %v13233_v46  ;;  %13573 = vmatmul.mubr.bf16.vlgmr.msra.gmra.mrb[4].mxu1 %v13235_v31 }
 0x8c8   : > { %v15555_v54 = vpop.f32.mrb[4].mxu0  ;;  %v15577_v59 = vpop.f32.mrb[4].mxu1 }
 0x8c9   : > { %v15556_v2 = vpop.f32.mrb[5].mxu0  ;;  %v15578_v47 = vpop.f32.mrb[5].mxu1 }
 0x8ca   : > { %v15557_v19 = vadd.f32 %v15556_v2, %v15555_v54  ;;  %v15579_v28 = vadd.f32 %v15578_v47, %v15577_v59  ;;  %v15558_v60 = vpop.f32.mrb[6].mxu0  ;;  %v15580_v26 = vpop.f32.mrb[6].mxu1 }
 0x8cb   : > { %v15559_v56 = vpop.f32.mrb[7].mxu0  ;;  %v15581_v23 = vpop.f32.mrb[7].mxu1 }
 0x8cc   : > { %v13535_v4 = vadd.f32 %v15557_v19, %v14962_v41 }
 0x8ce   : > { %v13575_v49 = vadd.f32 %v15579_v28, %v13535_v4 }
 0x8d0   : > { %13580 = vst [vmem:[%s22341_s30] sm:$0xff] %v13575_v49 }
 0x8d1   : > { %18044 = shalt.err (!%p18041_p4)
}
 0x8d2   : > { %s18045_s16 = scalar_lea.hbm %s22076_s28, 128  ;;  %s18049_s1 = scalar_lea.hbm %s22134_s12, 256 }
 0x8d3   : > { %p18046_p7 = scmp.ne.s32.totalorder %s22076_s28, %s18045_s16  ;;  %p18050_p10 = scmp.lt.u32.totalorder %s22076_s28, %s22134_s12 }
 0x8d4   : > { %p18051_p11 = scmp.lt.u32.totalorder %s18049_s1, %s18045_s16  ;;  %p18053_p13 = scmp.lt.u32.totalorder %s18045_s16, %s22076_s28 }
 0x8d5   : > { %p18047_p8 = pnand %p18046_p7, %p18211_p5 }
 0x8d6   : > { %p18052_p12 = por %p18051_p11, %p18050_p10 }
 0x8d7   : > { %p18048_p9 = pneg %p18047_p8 }
 0x8d8   : > { %p18054_p0 = por %p18053_p13, %p18052_p12 }
 0x8da   : > { %p18055_p1 = pnand %p18054_p0, %p18048_p9 }
 0x8dc   : > { %18058 = shalt.err (!%p18055_p1)
}
 0x8dd   : > { %17384 = dma.vmem_to_hbm [thread:$0]  (%p18211_p5), %s22078_s15, 128, %s22076_s28, %s13582_s20  }
 0x8de PF: > { %p17390_p2 = scmp.ge.s32.totalorder %s18097_s24, 2  ;;  %s13607_s29 = sand.u32 1, %s18085_s21  }
 0x8df   : > { %s13608_s25 = scalar_lea.sflag [#allocation10], %s13607_s29 }
 0x8e0   : > { %p17387_p3 = pnand %p17390_p2, %p18215_p6 }
 0x8e2   : > { %18080 = dma.done.wait (!%p17387_p3), %s13608_s25, 128  }
 0x8e3   : > { %18082 = vsyncadd (!%p17387_p3), %s13608_s25, 4294967168  ;;  %s22343_s0 = sld [smem:[#allocation12_spill]]  ;;  %p22_p4 = scmp.ge.s32.totalorder %s18198_s27, 4  }
 0x8e4   : > { %s22344_s21 = smov %s18089_s22  ;;  %s22345_s22 = smov %s18093_s23 }
 0x8e5   : > { %s22347_s24 = smov %s18198_s27  ;;  %24 = sbr.rel (!%p22_p4) target bundleno = 6 (0x6), region = 251 }
 0x8e9   : > { %s22346_s23 = smov %s22343_s0 }
 0x8ec   :  { %13613 = vsyncpa [#allocation10], 1 }
 0x8ed   :  { %13615 = vsyncpa [#allocation10 + $0x1], 1 }

</bundles_post_ra>
